<compile_context>
chip_gen: v7x
topology: tpu7x:2x2x1
jax: 0.10.0
libtpu: 0.0.40
codegen_flags: <defaults>
</compile_context>

<pallas_src>
import jax
import jax.numpy as jnp
from jax.experimental import pallas as pl
from jax.experimental.pallas import tpu as pltpu


_VMEM = pl.BlockSpec(memory_space=pltpu.MemorySpace.VMEM)
_BF16 = jnp.bfloat16


# ----------------------------- Pallas kernels ------------------------------

def bilstm_kernel(xg_ref, whh_ref, out_ref):
    """Fused bidirectional LSTM recurrence (input projection precomputed).

    xg_ref:  (T, B, 8*Hp) f32  fused gate pre-activations (input part + bias).
             Column layout [i_f, i_b, f_f, f_b, o_f, o_b, g_f, g_b]; the bwd
             columns of row t already hold timestep T-1-t (time-reversed by the
             producer), so each step reads a single row.
    whh_ref: (2*Hp, 8*Hp) bf16 recurrent weights; rows [0:Hp] = h_fwd weights
             (feeding only the *_f columns), rows [Hp:2*Hp] = h_bwd weights.
    out_ref: (T, B, 2*Hp) bf16  hidden states, fwd in cols [:Hp], bwd in [Hp:].
    """
    T, B, G = xg_ref.shape
    Hp = G // 8

    h = jnp.zeros((B, 2 * Hp), jnp.float32)   # [h_fwd | h_bwd]
    c = jnp.zeros((B, 2 * Hp), jnp.float32)   # [c_fwd | c_bwd]

    # Static unroll over the (small, compile-time) sequence length.
    for t in range(T):
        rec = jnp.dot(h.astype(_BF16), whh_ref[...],
                      preferred_element_type=jnp.float32)        # (B, 8*Hp)
        pre = xg_ref[t] + rec

        sig = jax.nn.sigmoid(pre[:, 0:6 * Hp])                   # one wide sigmoid
        g = jnp.tanh(pre[:, 6 * Hp:8 * Hp])                      # one wide tanh

        i_cat = sig[:, 0 * Hp:2 * Hp]
        f_cat = sig[:, 2 * Hp:4 * Hp]
        o_cat = sig[:, 4 * Hp:6 * Hp]

        c = f_cat * c + i_cat * g
        h = o_cat * jnp.tanh(c)

        out_ref[t, :, 0:Hp] = h[:, 0:Hp].astype(out_ref.dtype)               # fwd @ t
        out_ref[T - 1 - t, :, Hp:2 * Hp] = h[:, Hp:2 * Hp].astype(out_ref.dtype)  # bwd @ T-1-t


def attn_pool_proj_kernel(seq_ref, wfc_ref, bfc_ref, hc_ref, wproj_ref, bproj_ref,
                          out_ref):
    """Attention pooling over time fused with a trailing linear projection.

    seq_ref:   (T, N, D) bf16   BiLSTM outputs (time-major).
    wfc_ref:   (D, Hp)   bf16   score fc weight (fc1/fc2).
    bfc_ref:   (1, Hp)   f32    score fc bias.
    hc_ref:    (1, Hp)   f32    score vector.
    wproj_ref: (D, P)    bf16   trailing projection (wih2 of rnn2, or fc3).
    bproj_ref: (1, P)    f32
    out_ref:   (N, P)    f32    pooled @ wproj + bproj.
    """
    T, N, D = seq_ref.shape
    bfc = bfc_ref[...]
    hc = hc_ref[...]

    # Pass 1: per-timestep attention scores (no width-1 concatenates).
    s_list = []
    for t in range(T):
        h_t = jnp.tanh(jnp.dot(seq_ref[t], wfc_ref[...],
                               preferred_element_type=jnp.float32) + bfc)   # (N, Hp)
        s_list.append(jnp.sum(h_t * hc, axis=-1, keepdims=True))            # (N, 1)

    m = s_list[0]
    for s in s_list[1:]:
        m = jnp.maximum(m, s)
    e_list = [jnp.exp(s - m) for s in s_list]
    den = e_list[0]
    for e in e_list[1:]:
        den = den + e
    inv = 1.0 / den                                   # exact (matches torch softmax)

    # Pass 2: weighted sum over time (pure VPU).
    pooled = jnp.zeros((N, D), jnp.float32)
    for t in range(T):
        pooled = pooled + (e_list[t] * inv) * seq_ref[t].astype(jnp.float32)

    out_ref[...] = (jnp.dot(pooled.astype(_BF16), wproj_ref[...],
                            preferred_element_type=jnp.float32) + bproj_ref[...])


# ------------------------------- wrappers ----------------------------------

def _pick_batch_tile(batch, cap=32):
    """Largest batch tile <= cap that divides batch (multiple of 16), else batch."""
    if batch <= cap:
        return batch
    tb = cap - (cap % 16)
    while tb >= 16:
        if batch % tb == 0:
            return tb
        tb -= 16
    return batch


def bilstm(xg, whh, hp):
    """xg: (T, B, 8*Hp) f32, whh: (2*Hp, 8*Hp) bf16 -> (T, B, 2*Hp) bf16."""
    T, B, G = xg.shape
    tb = _pick_batch_tile(B)
    grid = (B // tb,)
    return pl.pallas_call(
        bilstm_kernel,
        out_shape=jax.ShapeDtypeStruct((T, B, 2 * hp), _BF16),
        grid=grid,
        in_specs=[pl.BlockSpec((T, tb, G), lambda i: (0, i, 0)),
                  pl.BlockSpec((2 * hp, G), lambda i: (0, 0))],
        out_specs=pl.BlockSpec((T, tb, 2 * hp), lambda i: (0, i, 0)),
        compiler_params=pltpu.CompilerParams(
            dimension_semantics=("parallel",),
            vmem_limit_bytes=32 * 1024 * 1024),
    )(xg, whh)


def attn_pool_proj(seq, wfc, bfc, hc, wproj, bproj):
    """seq: (T, N, D) bf16 -> (N, P) f32 where P = wproj.shape[1]."""
    T, N, D = seq.shape
    P = wproj.shape[1]
    return pl.pallas_call(
        attn_pool_proj_kernel,
        out_shape=jax.ShapeDtypeStruct((N, P), jnp.float32),
        in_specs=[_VMEM] * 6,
        out_specs=_VMEM,
    )(seq, wfc, bfc, hc, wproj, bproj)


# ------------------------------ model glue ---------------------------------

def init_params(key, num_class, emb_dim, hidden=100, hp=128, cp=128):
    """Random params: fused gates, zero-padded lane-aligned dims, bf16 weights.

    Fused gate column layout (width G = 8*Hp): [i_f, i_b, f_f, f_b, o_f, o_b, g_f, g_b].
    Fused bias assumes b = b_ih + b_hh when porting real PyTorch LSTM weights.
    """
    H, Hp = hidden, hp
    Dp, G, Cp = 2 * hp, 8 * hp, cp

    def nrm(shape, scale=0.1):
        nonlocal key
        key, sub = jax.random.split(key)
        return jax.random.normal(sub, shape, jnp.float32) * scale

    # Real rows of a (Dp,) feature axis laid out as [fwd Hp | bwd Hp].
    row_mask_dp = ((jnp.arange(Dp) % Hp) < H).astype(jnp.float32)

    def fused_input_w(in_dim, row_mask):
        w = jnp.zeros((in_dim, G), jnp.float32)
        for k in range(8):
            w = w.at[:, k * Hp:k * Hp + H].set(nrm((in_dim, H)) * row_mask[:, None])
        return w.astype(_BF16)

    def fused_hidden_w():
        w = jnp.zeros((Dp, G), jnp.float32)
        for k in range(8):
            r0 = 0 if k % 2 == 0 else Hp          # fwd gates fed by h_f, bwd by h_b
            w = w.at[r0:r0 + H, k * Hp:k * Hp + H].set(nrm((H, H)))
        return w.astype(_BF16)

    def fused_bias():
        bvec = jnp.zeros((1, G), jnp.float32)
        for k in range(8):
            bvec = bvec.at[:, k * Hp:k * Hp + H].set(nrm((1, H)))
        return bvec

    def fc_w(out_real, out_pad):
        col_mask = (jnp.arange(out_pad) < out_real).astype(jnp.float32)
        w = nrm((Dp, out_pad)) * row_mask_dp[:, None] * col_mask[None, :]
        return w.astype(_BF16)

    def row_vec(out_real, out_pad, scale=0.1):
        v = jnp.zeros((1, out_pad), jnp.float32)
        return v.at[:, :out_real].set(nrm((1, out_real), scale))

    embed = nrm((257, emb_dim), 1.0)
    embed = embed.at[256].set(0.0)                 # padding_idx=256

    return {
        "embed": embed,
        "wih1": fused_input_w(emb_dim, jnp.ones((emb_dim,), jnp.float32)),
        "whh1": fused_hidden_w(), "b1": fused_bias(),
        "wih2": fused_input_w(Dp, row_mask_dp),
        "whh2": fused_hidden_w(), "b2": fused_bias(),
        "fc1_w": fc_w(H, Hp), "fc1_b": row_vec(H, Hp), "hc1": row_vec(H, Hp, 1.0),
        "fc2_w": fc_w(H, Hp), "fc2_b": row_vec(H, Hp), "hc2": row_vec(H, Hp, 1.0),
        "fc3_w": fc_w(num_class, Cp), "fc3_b": row_vec(num_class, Cp),
    }


def ebsnn_lstm_forward(x, params, num_class):
    """x: (b, l, segment_len) int32 byte ids in [0, 256]. Returns (b, num_class)."""
    b, l, seg = x.shape
    Hp = params["whh1"].shape[0] // 2
    G = 8 * Hp

    # Fwd-gate column mask: blocks [i_f, i_b, f_f, f_b, ...] -> even blocks are fwd.
    col_fwd = (jnp.arange(G) // Hp) % 2 == 0

    # ---- Stage 1: BiLSTM over each segment (batch = l*b, ordered (li, bi)) ----
    # Input projection as a 257-row gate-table gather (removes the K=E matmul).
    # TODO(synk): embedding/table gather + flip/select kept as tiny XLA ops.
    table1 = jnp.dot(params["embed"].astype(_BF16), params["wih1"],
                     preferred_element_type=jnp.float32) + params["b1"]   # (257, G)
    x_t = jnp.transpose(x, (2, 1, 0)).reshape(seg, l * b)                 # time-major ids
    xg1 = jnp.take(table1, x_t, axis=0)                                   # (seg, l*b, G)
    xg1 = jnp.where(col_fwd, xg1, jnp.flip(xg1, axis=0))                  # time-reverse bwd cols

    out1 = bilstm(xg1, params["whh1"], Hp)                                # (seg, l*b, 2*Hp) bf16

    # Attention over seg, fused with rnn2's input projection.
    xg2 = attn_pool_proj(out1, params["fc1_w"], params["fc1_b"], params["hc1"],
                         params["wih2"], params["b2"])                    # (l*b, G) f32
    xg2 = xg2.reshape(l, b, G)                                            # stage-2 time-major
    xg2 = jnp.where(col_fwd, xg2, jnp.flip(xg2, axis=0))

    # ---- Stage 2: BiLSTM over segments-per-flow, attention over l, fc3 ----
    out3 = bilstm(xg2, params["whh2"], Hp)                                # (l, b, 2*Hp) bf16
    logits_p = attn_pool_proj(out3, params["fc2_w"], params["fc2_b"], params["hc2"],
                              params["fc3_w"], params["fc3_b"])           # (b, Cp) f32

    # nn.Dropout is identity at inference time; slice padded class lanes.
    return logits_p[:, :num_class]


if __name__ == "__main__":
    b, l, seg = 2, 4, 8                      # segment_len = 8 (module default)
    emb_dim, hidden, num_class = 16, 100, 5  # rnn_dim = 100 (hard-coded in module)

    key = jax.random.PRNGKey(0)
    pkey, xkey = jax.random.split(key)
    params = init_params(pkey, num_class, emb_dim, hidden)
    x = jax.random.randint(xkey, (b, l, seg), 0, 257, dtype=jnp.int32)

    fwd = jax.jit(lambda xx: ebsnn_lstm_forward(xx, params, num_class))
    out = jax.block_until_ready(fwd(x))

    assert out.shape == (b, num_class)
    assert bool(jnp.all(jnp.isfinite(out)))
    print("KERNEL_OK")
</pallas_src>

<mosaic_0001>
module attributes {stable_mosaic.version = 11 : i64} {
  func.func @attn_pool_proj_kernel(%arg0: memref<8x8x256xbf16, #tpu.memory_space<vmem>>, %arg1: memref<256x128xbf16, #tpu.memory_space<vmem>>, %arg2: memref<1x128xf32, #tpu.memory_space<vmem>>, %arg3: memref<1x128xf32, #tpu.memory_space<vmem>>, %arg4: memref<256x1024xbf16, #tpu.memory_space<vmem>>, %arg5: memref<1x1024xf32, #tpu.memory_space<vmem>>, %arg6: memref<8x1024xf32, #tpu.memory_space<vmem>>) attributes {dimension_semantics = [], scalar_prefetch = 0 : i64, scratch_operands = 0 : i64, tpu.core_type = #tpu.core_type<tc>} {
    %c0 = arith.constant 0 : index
    %c0_0 = arith.constant 0 : index
    %0 = vector.load %arg2[%c0, %c0_0] : memref<1x128xf32, #tpu.memory_space<vmem>>, vector<1x128xf32>
    %c0_1 = arith.constant 0 : index
    %c0_2 = arith.constant 0 : index
    %1 = vector.load %arg3[%c0_1, %c0_2] : memref<1x128xf32, #tpu.memory_space<vmem>>, vector<1x128xf32>
    %c0_3 = arith.constant 0 : index
    %c0_4 = arith.constant 0 : index
    %c0_5 = arith.constant 0 : index
    %2 = vector.load %arg0[%c0_3, %c0_4, %c0_5] : memref<8x8x256xbf16, #tpu.memory_space<vmem>>, vector<1x8x256xbf16>
    %3 = vector.shape_cast %2 : vector<1x8x256xbf16> to vector<8x256xbf16>
    %c0_6 = arith.constant 0 : index
    %c0_7 = arith.constant 0 : index
    %4 = vector.load %arg1[%c0_6, %c0_7] : memref<256x128xbf16, #tpu.memory_space<vmem>>, vector<256x128xbf16>
    %cst = arith.constant dense<0.000000e+00> : vector<8x128xf32>
    %5 = tpu.matmul %3, %4, %cst {dimension_numbers = #tpu.dot_dimension_numbers<[1], [0], [0], [1], [0, 0, 1, 1], [], []>} : vector<8x256xbf16>, vector<256x128xbf16>, vector<8x128xf32> -> vector<8x128xf32>
    %6 = vector.broadcast %0 : vector<1x128xf32> to vector<8x128xf32>
    %7 = arith.addf %5, %6 : vector<8x128xf32>
    %8 = math.tanh %7 : vector<8x128xf32>
    %9 = vector.broadcast %1 : vector<1x128xf32> to vector<8x128xf32>
    %10 = arith.mulf %8, %9 : vector<8x128xf32>
    %cst_8 = arith.constant dense<0.000000e+00> : vector<8xf32>
    %11 = vector.multi_reduction <add>, %10, %cst_8 [1] : vector<8x128xf32> to vector<8xf32>
    %12 = vector.shape_cast %11 : vector<8xf32> to vector<8x1xf32>
    %c1 = arith.constant 1 : index
    %c0_9 = arith.constant 0 : index
    %c0_10 = arith.constant 0 : index
    %13 = vector.load %arg0[%c1, %c0_9, %c0_10] : memref<8x8x256xbf16, #tpu.memory_space<vmem>>, vector<1x8x256xbf16>
    %14 = vector.shape_cast %13 : vector<1x8x256xbf16> to vector<8x256xbf16>
    %c0_11 = arith.constant 0 : index
    %c0_12 = arith.constant 0 : index
    %15 = vector.load %arg1[%c0_11, %c0_12] : memref<256x128xbf16, #tpu.memory_space<vmem>>, vector<256x128xbf16>
    %cst_13 = arith.constant dense<0.000000e+00> : vector<8x128xf32>
    %16 = tpu.matmul %14, %15, %cst_13 {dimension_numbers = #tpu.dot_dimension_numbers<[1], [0], [0], [1], [0, 0, 1, 1], [], []>} : vector<8x256xbf16>, vector<256x128xbf16>, vector<8x128xf32> -> vector<8x128xf32>
    %17 = vector.broadcast %0 : vector<1x128xf32> to vector<8x128xf32>
    %18 = arith.addf %16, %17 : vector<8x128xf32>
    %19 = math.tanh %18 : vector<8x128xf32>
    %20 = vector.broadcast %1 : vector<1x128xf32> to vector<8x128xf32>
    %21 = arith.mulf %19, %20 : vector<8x128xf32>
    %cst_14 = arith.constant dense<0.000000e+00> : vector<8xf32>
    %22 = vector.multi_reduction <add>, %21, %cst_14 [1] : vector<8x128xf32> to vector<8xf32>
    %23 = vector.shape_cast %22 : vector<8xf32> to vector<8x1xf32>
    %c2 = arith.constant 2 : index
    %c0_15 = arith.constant 0 : index
    %c0_16 = arith.constant 0 : index
    %24 = vector.load %arg0[%c2, %c0_15, %c0_16] : memref<8x8x256xbf16, #tpu.memory_space<vmem>>, vector<1x8x256xbf16>
    %25 = vector.shape_cast %24 : vector<1x8x256xbf16> to vector<8x256xbf16>
    %c0_17 = arith.constant 0 : index
    %c0_18 = arith.constant 0 : index
    %26 = vector.load %arg1[%c0_17, %c0_18] : memref<256x128xbf16, #tpu.memory_space<vmem>>, vector<256x128xbf16>
    %cst_19 = arith.constant dense<0.000000e+00> : vector<8x128xf32>
    %27 = tpu.matmul %25, %26, %cst_19 {dimension_numbers = #tpu.dot_dimension_numbers<[1], [0], [0], [1], [0, 0, 1, 1], [], []>} : vector<8x256xbf16>, vector<256x128xbf16>, vector<8x128xf32> -> vector<8x128xf32>
    %28 = vector.broadcast %0 : vector<1x128xf32> to vector<8x128xf32>
    %29 = arith.addf %27, %28 : vector<8x128xf32>
    %30 = math.tanh %29 : vector<8x128xf32>
    %31 = vector.broadcast %1 : vector<1x128xf32> to vector<8x128xf32>
    %32 = arith.mulf %30, %31 : vector<8x128xf32>
    %cst_20 = arith.constant dense<0.000000e+00> : vector<8xf32>
    %33 = vector.multi_reduction <add>, %32, %cst_20 [1] : vector<8x128xf32> to vector<8xf32>
    %34 = vector.shape_cast %33 : vector<8xf32> to vector<8x1xf32>
    %c3 = arith.constant 3 : index
    %c0_21 = arith.constant 0 : index
    %c0_22 = arith.constant 0 : index
    %35 = vector.load %arg0[%c3, %c0_21, %c0_22] : memref<8x8x256xbf16, #tpu.memory_space<vmem>>, vector<1x8x256xbf16>
    %36 = vector.shape_cast %35 : vector<1x8x256xbf16> to vector<8x256xbf16>
    %c0_23 = arith.constant 0 : index
    %c0_24 = arith.constant 0 : index
    %37 = vector.load %arg1[%c0_23, %c0_24] : memref<256x128xbf16, #tpu.memory_space<vmem>>, vector<256x128xbf16>
    %cst_25 = arith.constant dense<0.000000e+00> : vector<8x128xf32>
    %38 = tpu.matmul %36, %37, %cst_25 {dimension_numbers = #tpu.dot_dimension_numbers<[1], [0], [0], [1], [0, 0, 1, 1], [], []>} : vector<8x256xbf16>, vector<256x128xbf16>, vector<8x128xf32> -> vector<8x128xf32>
    %39 = vector.broadcast %0 : vector<1x128xf32> to vector<8x128xf32>
    %40 = arith.addf %38, %39 : vector<8x128xf32>
    %41 = math.tanh %40 : vector<8x128xf32>
    %42 = vector.broadcast %1 : vector<1x128xf32> to vector<8x128xf32>
    %43 = arith.mulf %41, %42 : vector<8x128xf32>
    %cst_26 = arith.constant dense<0.000000e+00> : vector<8xf32>
    %44 = vector.multi_reduction <add>, %43, %cst_26 [1] : vector<8x128xf32> to vector<8xf32>
    %45 = vector.shape_cast %44 : vector<8xf32> to vector<8x1xf32>
    %c4 = arith.constant 4 : index
    %c0_27 = arith.constant 0 : index
    %c0_28 = arith.constant 0 : index
    %46 = vector.load %arg0[%c4, %c0_27, %c0_28] : memref<8x8x256xbf16, #tpu.memory_space<vmem>>, vector<1x8x256xbf16>
    %47 = vector.shape_cast %46 : vector<1x8x256xbf16> to vector<8x256xbf16>
    %c0_29 = arith.constant 0 : index
    %c0_30 = arith.constant 0 : index
    %48 = vector.load %arg1[%c0_29, %c0_30] : memref<256x128xbf16, #tpu.memory_space<vmem>>, vector<256x128xbf16>
    %cst_31 = arith.constant dense<0.000000e+00> : vector<8x128xf32>
    %49 = tpu.matmul %47, %48, %cst_31 {dimension_numbers = #tpu.dot_dimension_numbers<[1], [0], [0], [1], [0, 0, 1, 1], [], []>} : vector<8x256xbf16>, vector<256x128xbf16>, vector<8x128xf32> -> vector<8x128xf32>
    %50 = vector.broadcast %0 : vector<1x128xf32> to vector<8x128xf32>
    %51 = arith.addf %49, %50 : vector<8x128xf32>
    %52 = math.tanh %51 : vector<8x128xf32>
    %53 = vector.broadcast %1 : vector<1x128xf32> to vector<8x128xf32>
    %54 = arith.mulf %52, %53 : vector<8x128xf32>
    %cst_32 = arith.constant dense<0.000000e+00> : vector<8xf32>
    %55 = vector.multi_reduction <add>, %54, %cst_32 [1] : vector<8x128xf32> to vector<8xf32>
    %56 = vector.shape_cast %55 : vector<8xf32> to vector<8x1xf32>
    %c5 = arith.constant 5 : index
    %c0_33 = arith.constant 0 : index
    %c0_34 = arith.constant 0 : index
    %57 = vector.load %arg0[%c5, %c0_33, %c0_34] : memref<8x8x256xbf16, #tpu.memory_space<vmem>>, vector<1x8x256xbf16>
    %58 = vector.shape_cast %57 : vector<1x8x256xbf16> to vector<8x256xbf16>
    %c0_35 = arith.constant 0 : index
    %c0_36 = arith.constant 0 : index
    %59 = vector.load %arg1[%c0_35, %c0_36] : memref<256x128xbf16, #tpu.memory_space<vmem>>, vector<256x128xbf16>
    %cst_37 = arith.constant dense<0.000000e+00> : vector<8x128xf32>
    %60 = tpu.matmul %58, %59, %cst_37 {dimension_numbers = #tpu.dot_dimension_numbers<[1], [0], [0], [1], [0, 0, 1, 1], [], []>} : vector<8x256xbf16>, vector<256x128xbf16>, vector<8x128xf32> -> vector<8x128xf32>
    %61 = vector.broadcast %0 : vector<1x128xf32> to vector<8x128xf32>
    %62 = arith.addf %60, %61 : vector<8x128xf32>
    %63 = math.tanh %62 : vector<8x128xf32>
    %64 = vector.broadcast %1 : vector<1x128xf32> to vector<8x128xf32>
    %65 = arith.mulf %63, %64 : vector<8x128xf32>
    %cst_38 = arith.constant dense<0.000000e+00> : vector<8xf32>
    %66 = vector.multi_reduction <add>, %65, %cst_38 [1] : vector<8x128xf32> to vector<8xf32>
    %67 = vector.shape_cast %66 : vector<8xf32> to vector<8x1xf32>
    %c6 = arith.constant 6 : index
    %c0_39 = arith.constant 0 : index
    %c0_40 = arith.constant 0 : index
    %68 = vector.load %arg0[%c6, %c0_39, %c0_40] : memref<8x8x256xbf16, #tpu.memory_space<vmem>>, vector<1x8x256xbf16>
    %69 = vector.shape_cast %68 : vector<1x8x256xbf16> to vector<8x256xbf16>
    %c0_41 = arith.constant 0 : index
    %c0_42 = arith.constant 0 : index
    %70 = vector.load %arg1[%c0_41, %c0_42] : memref<256x128xbf16, #tpu.memory_space<vmem>>, vector<256x128xbf16>
    %cst_43 = arith.constant dense<0.000000e+00> : vector<8x128xf32>
    %71 = tpu.matmul %69, %70, %cst_43 {dimension_numbers = #tpu.dot_dimension_numbers<[1], [0], [0], [1], [0, 0, 1, 1], [], []>} : vector<8x256xbf16>, vector<256x128xbf16>, vector<8x128xf32> -> vector<8x128xf32>
    %72 = vector.broadcast %0 : vector<1x128xf32> to vector<8x128xf32>
    %73 = arith.addf %71, %72 : vector<8x128xf32>
    %74 = math.tanh %73 : vector<8x128xf32>
    %75 = vector.broadcast %1 : vector<1x128xf32> to vector<8x128xf32>
    %76 = arith.mulf %74, %75 : vector<8x128xf32>
    %cst_44 = arith.constant dense<0.000000e+00> : vector<8xf32>
    %77 = vector.multi_reduction <add>, %76, %cst_44 [1] : vector<8x128xf32> to vector<8xf32>
    %78 = vector.shape_cast %77 : vector<8xf32> to vector<8x1xf32>
    %c7 = arith.constant 7 : index
    %c0_45 = arith.constant 0 : index
    %c0_46 = arith.constant 0 : index
    %79 = vector.load %arg0[%c7, %c0_45, %c0_46] : memref<8x8x256xbf16, #tpu.memory_space<vmem>>, vector<1x8x256xbf16>
    %80 = vector.shape_cast %79 : vector<1x8x256xbf16> to vector<8x256xbf16>
    %c0_47 = arith.constant 0 : index
    %c0_48 = arith.constant 0 : index
    %81 = vector.load %arg1[%c0_47, %c0_48] : memref<256x128xbf16, #tpu.memory_space<vmem>>, vector<256x128xbf16>
    %cst_49 = arith.constant dense<0.000000e+00> : vector<8x128xf32>
    %82 = tpu.matmul %80, %81, %cst_49 {dimension_numbers = #tpu.dot_dimension_numbers<[1], [0], [0], [1], [0, 0, 1, 1], [], []>} : vector<8x256xbf16>, vector<256x128xbf16>, vector<8x128xf32> -> vector<8x128xf32>
    %83 = vector.broadcast %0 : vector<1x128xf32> to vector<8x128xf32>
    %84 = arith.addf %82, %83 : vector<8x128xf32>
    %85 = math.tanh %84 : vector<8x128xf32>
    %86 = vector.broadcast %1 : vector<1x128xf32> to vector<8x128xf32>
    %87 = arith.mulf %85, %86 : vector<8x128xf32>
    %cst_50 = arith.constant dense<0.000000e+00> : vector<8xf32>
    %88 = vector.multi_reduction <add>, %87, %cst_50 [1] : vector<8x128xf32> to vector<8xf32>
    %89 = vector.shape_cast %88 : vector<8xf32> to vector<8x1xf32>
    %90 = arith.maximumf %12, %23 : vector<8x1xf32>
    %91 = arith.maximumf %90, %34 : vector<8x1xf32>
    %92 = arith.maximumf %91, %45 : vector<8x1xf32>
    %93 = arith.maximumf %92, %56 : vector<8x1xf32>
    %94 = arith.maximumf %93, %67 : vector<8x1xf32>
    %95 = arith.maximumf %94, %78 : vector<8x1xf32>
    %96 = arith.maximumf %95, %89 : vector<8x1xf32>
    %97 = arith.subf %12, %96 : vector<8x1xf32>
    %98 = math.exp %97 : vector<8x1xf32>
    %99 = arith.subf %23, %96 : vector<8x1xf32>
    %100 = math.exp %99 : vector<8x1xf32>
    %101 = arith.subf %34, %96 : vector<8x1xf32>
    %102 = math.exp %101 : vector<8x1xf32>
    %103 = arith.subf %45, %96 : vector<8x1xf32>
    %104 = math.exp %103 : vector<8x1xf32>
    %105 = arith.subf %56, %96 : vector<8x1xf32>
    %106 = math.exp %105 : vector<8x1xf32>
    %107 = arith.subf %67, %96 : vector<8x1xf32>
    %108 = math.exp %107 : vector<8x1xf32>
    %109 = arith.subf %78, %96 : vector<8x1xf32>
    %110 = math.exp %109 : vector<8x1xf32>
    %111 = arith.subf %89, %96 : vector<8x1xf32>
    %112 = math.exp %111 : vector<8x1xf32>
    %113 = arith.addf %98, %100 : vector<8x1xf32>
    %114 = arith.addf %113, %102 : vector<8x1xf32>
    %115 = arith.addf %114, %104 : vector<8x1xf32>
    %116 = arith.addf %115, %106 : vector<8x1xf32>
    %117 = arith.addf %116, %108 : vector<8x1xf32>
    %118 = arith.addf %117, %110 : vector<8x1xf32>
    %119 = arith.addf %118, %112 : vector<8x1xf32>
    %cst_51 = arith.constant 1.000000e+00 : f32
    %120 = vector.broadcast %cst_51 : f32 to vector<8x1xf32>
    %121 = arith.divf %120, %119 : vector<8x1xf32>
    %cst_52 = arith.constant 0.000000e+00 : f32
    %122 = vector.broadcast %cst_52 : f32 to vector<8x256xf32>
    %123 = arith.mulf %98, %121 : vector<8x1xf32>
    %c0_53 = arith.constant 0 : index
    %c0_54 = arith.constant 0 : index
    %c0_55 = arith.constant 0 : index
    %124 = vector.load %arg0[%c0_53, %c0_54, %c0_55] : memref<8x8x256xbf16, #tpu.memory_space<vmem>>, vector<1x8x256xbf16>
    %125 = vector.shape_cast %124 : vector<1x8x256xbf16> to vector<8x256xbf16>
    %126 = arith.extf %125 : vector<8x256xbf16> to vector<8x256xf32>
    %127 = vector.broadcast %123 : vector<8x1xf32> to vector<8x256xf32>
    %128 = arith.mulf %127, %126 : vector<8x256xf32>
    %129 = arith.addf %122, %128 : vector<8x256xf32>
    %130 = arith.mulf %100, %121 : vector<8x1xf32>
    %c1_56 = arith.constant 1 : index
    %c0_57 = arith.constant 0 : index
    %c0_58 = arith.constant 0 : index
    %131 = vector.load %arg0[%c1_56, %c0_57, %c0_58] : memref<8x8x256xbf16, #tpu.memory_space<vmem>>, vector<1x8x256xbf16>
    %132 = vector.shape_cast %131 : vector<1x8x256xbf16> to vector<8x256xbf16>
    %133 = arith.extf %132 : vector<8x256xbf16> to vector<8x256xf32>
    %134 = vector.broadcast %130 : vector<8x1xf32> to vector<8x256xf32>
    %135 = arith.mulf %134, %133 : vector<8x256xf32>
    %136 = arith.addf %129, %135 : vector<8x256xf32>
    %137 = arith.mulf %102, %121 : vector<8x1xf32>
    %c2_59 = arith.constant 2 : index
    %c0_60 = arith.constant 0 : index
    %c0_61 = arith.constant 0 : index
    %138 = vector.load %arg0[%c2_59, %c0_60, %c0_61] : memref<8x8x256xbf16, #tpu.memory_space<vmem>>, vector<1x8x256xbf16>
    %139 = vector.shape_cast %138 : vector<1x8x256xbf16> to vector<8x256xbf16>
    %140 = arith.extf %139 : vector<8x256xbf16> to vector<8x256xf32>
    %141 = vector.broadcast %137 : vector<8x1xf32> to vector<8x256xf32>
    %142 = arith.mulf %141, %140 : vector<8x256xf32>
    %143 = arith.addf %136, %142 : vector<8x256xf32>
    %144 = arith.mulf %104, %121 : vector<8x1xf32>
    %c3_62 = arith.constant 3 : index
    %c0_63 = arith.constant 0 : index
    %c0_64 = arith.constant 0 : index
    %145 = vector.load %arg0[%c3_62, %c0_63, %c0_64] : memref<8x8x256xbf16, #tpu.memory_space<vmem>>, vector<1x8x256xbf16>
    %146 = vector.shape_cast %145 : vector<1x8x256xbf16> to vector<8x256xbf16>
    %147 = arith.extf %146 : vector<8x256xbf16> to vector<8x256xf32>
    %148 = vector.broadcast %144 : vector<8x1xf32> to vector<8x256xf32>
    %149 = arith.mulf %148, %147 : vector<8x256xf32>
    %150 = arith.addf %143, %149 : vector<8x256xf32>
    %151 = arith.mulf %106, %121 : vector<8x1xf32>
    %c4_65 = arith.constant 4 : index
    %c0_66 = arith.constant 0 : index
    %c0_67 = arith.constant 0 : index
    %152 = vector.load %arg0[%c4_65, %c0_66, %c0_67] : memref<8x8x256xbf16, #tpu.memory_space<vmem>>, vector<1x8x256xbf16>
    %153 = vector.shape_cast %152 : vector<1x8x256xbf16> to vector<8x256xbf16>
    %154 = arith.extf %153 : vector<8x256xbf16> to vector<8x256xf32>
    %155 = vector.broadcast %151 : vector<8x1xf32> to vector<8x256xf32>
    %156 = arith.mulf %155, %154 : vector<8x256xf32>
    %157 = arith.addf %150, %156 : vector<8x256xf32>
    %158 = arith.mulf %108, %121 : vector<8x1xf32>
    %c5_68 = arith.constant 5 : index
    %c0_69 = arith.constant 0 : index
    %c0_70 = arith.constant 0 : index
    %159 = vector.load %arg0[%c5_68, %c0_69, %c0_70] : memref<8x8x256xbf16, #tpu.memory_space<vmem>>, vector<1x8x256xbf16>
    %160 = vector.shape_cast %159 : vector<1x8x256xbf16> to vector<8x256xbf16>
    %161 = arith.extf %160 : vector<8x256xbf16> to vector<8x256xf32>
    %162 = vector.broadcast %158 : vector<8x1xf32> to vector<8x256xf32>
    %163 = arith.mulf %162, %161 : vector<8x256xf32>
    %164 = arith.addf %157, %163 : vector<8x256xf32>
    %165 = arith.mulf %110, %121 : vector<8x1xf32>
    %c6_71 = arith.constant 6 : index
    %c0_72 = arith.constant 0 : index
    %c0_73 = arith.constant 0 : index
    %166 = vector.load %arg0[%c6_71, %c0_72, %c0_73] : memref<8x8x256xbf16, #tpu.memory_space<vmem>>, vector<1x8x256xbf16>
    %167 = vector.shape_cast %166 : vector<1x8x256xbf16> to vector<8x256xbf16>
    %168 = arith.extf %167 : vector<8x256xbf16> to vector<8x256xf32>
    %169 = vector.broadcast %165 : vector<8x1xf32> to vector<8x256xf32>
    %170 = arith.mulf %169, %168 : vector<8x256xf32>
    %171 = arith.addf %164, %170 : vector<8x256xf32>
    %172 = arith.mulf %112, %121 : vector<8x1xf32>
    %c7_74 = arith.constant 7 : index
    %c0_75 = arith.constant 0 : index
    %c0_76 = arith.constant 0 : index
    %173 = vector.load %arg0[%c7_74, %c0_75, %c0_76] : memref<8x8x256xbf16, #tpu.memory_space<vmem>>, vector<1x8x256xbf16>
    %174 = vector.shape_cast %173 : vector<1x8x256xbf16> to vector<8x256xbf16>
    %175 = arith.extf %174 : vector<8x256xbf16> to vector<8x256xf32>
    %176 = vector.broadcast %172 : vector<8x1xf32> to vector<8x256xf32>
    %177 = arith.mulf %176, %175 : vector<8x256xf32>
    %178 = arith.addf %171, %177 : vector<8x256xf32>
    %179 = arith.truncf %178 : vector<8x256xf32> to vector<8x256xbf16>
    %c0_77 = arith.constant 0 : index
    %c0_78 = arith.constant 0 : index
    %180 = vector.load %arg4[%c0_77, %c0_78] : memref<256x1024xbf16, #tpu.memory_space<vmem>>, vector<256x1024xbf16>
    %cst_79 = arith.constant dense<0.000000e+00> : vector<8x1024xf32>
    %181 = tpu.matmul %179, %180, %cst_79 {dimension_numbers = #tpu.dot_dimension_numbers<[1], [0], [0], [1], [0, 0, 1, 1], [], []>} : vector<8x256xbf16>, vector<256x1024xbf16>, vector<8x1024xf32> -> vector<8x1024xf32>
    %c0_80 = arith.constant 0 : index
    %c0_81 = arith.constant 0 : index
    %182 = vector.load %arg5[%c0_80, %c0_81] : memref<1x1024xf32, #tpu.memory_space<vmem>>, vector<1x1024xf32>
    %183 = vector.broadcast %182 : vector<1x1024xf32> to vector<8x1024xf32>
    %184 = arith.addf %181, %183 : vector<8x1024xf32>
    %c0_82 = arith.constant 0 : index
    %c0_83 = arith.constant 0 : index
    %185 = vector.load %arg6[%c0_82, %c0_83] : memref<8x1024xf32, #tpu.memory_space<vmem>>, vector<8x1024xf32>
    tpu.vector_store %arg6[%c0_82, %c0_83], %184 {strides = array<i32>} : memref<8x1024xf32, #tpu.memory_space<vmem>>, vector<8x1024xf32>,
    return
  }
}

module attributes {stable_mosaic.version = 11 : i64} {
  func.func @bilstm_kernel(%arg0: i32, %arg1: memref<8x8x1024xf32, #tpu.memory_space<vmem>>, %arg2: memref<256x1024xbf16, #tpu.memory_space<vmem>>, %arg3: memref<8x8x256xbf16, #tpu.memory_space<vmem>>) attributes {dimension_semantics = [#tpu.dimension_semantics<parallel>], iteration_bounds = array<i64: 1>, scalar_prefetch = 0 : i64, scratch_operands = 0 : i64, tpu.core_type = #tpu.core_type<tc>, window_params = [{transform_indices = @transform_0, window_bounds = array<i64: 8, 8, 1024>}, {pipeline_mode = #tpu.pipeline_mode<synchronous>, transform_indices = @transform_1, window_bounds = array<i64: 256, 1024>}, {transform_indices = @transform_2, window_bounds = array<i64: 8, 8, 256>}]} {
    %cst = arith.constant 0.000000e+00 : f32
    %0 = vector.broadcast %cst : f32 to vector<8x256xf32>
    %cst_0 = arith.constant 0.000000e+00 : f32
    %1 = vector.broadcast %cst_0 : f32 to vector<8x256xf32>
    %2 = arith.truncf %0 : vector<8x256xf32> to vector<8x256xbf16>
    %c0 = arith.constant 0 : index
    %c0_1 = arith.constant 0 : index
    %3 = vector.load %arg2[%c0, %c0_1] : memref<256x1024xbf16, #tpu.memory_space<vmem>>, vector<256x1024xbf16>
    %cst_2 = arith.constant dense<0.000000e+00> : vector<8x1024xf32>
    %4 = tpu.matmul %2, %3, %cst_2 {dimension_numbers = #tpu.dot_dimension_numbers<[1], [0], [0], [1], [0, 0, 1, 1], [], []>} : vector<8x256xbf16>, vector<256x1024xbf16>, vector<8x1024xf32> -> vector<8x1024xf32>
    %c0_3 = arith.constant 0 : index
    %c0_4 = arith.constant 0 : index
    %c0_5 = arith.constant 0 : index
    %5 = vector.load %arg1[%c0_3, %c0_4, %c0_5] : memref<8x8x1024xf32, #tpu.memory_space<vmem>>, vector<1x8x1024xf32>
    %6 = vector.shape_cast %5 : vector<1x8x1024xf32> to vector<8x1024xf32>
    %7 = arith.addf %6, %4 : vector<8x1024xf32>
    %8 = vector.extract_strided_slice %7 {offsets = [0, 0], sizes = [8, 768], strides = [1, 1]} : vector<8x1024xf32> to vector<8x768xf32>
    %9 = arith.negf %8 : vector<8x768xf32>
    %10 = math.exp %9 : vector<8x768xf32>
    %cst_6 = arith.constant 1.000000e+00 : f32
    %11 = vector.broadcast %cst_6 : f32 to vector<8x768xf32>
    %12 = arith.addf %11, %10 : vector<8x768xf32>
    %13 = arith.divf %11, %12 : vector<8x768xf32>
    %14 = vector.extract_strided_slice %7 {offsets = [0, 768], sizes = [8, 256], strides = [1, 1]} : vector<8x1024xf32> to vector<8x256xf32>
    %15 = math.tanh %14 : vector<8x256xf32>
    %16 = vector.extract_strided_slice %13 {offsets = [0, 0], sizes = [8, 256], strides = [1, 1]} : vector<8x768xf32> to vector<8x256xf32>
    %17 = vector.extract_strided_slice %13 {offsets = [0, 256], sizes = [8, 256], strides = [1, 1]} : vector<8x768xf32> to vector<8x256xf32>
    %18 = vector.extract_strided_slice %13 {offsets = [0, 512], sizes = [8, 256], strides = [1, 1]} : vector<8x768xf32> to vector<8x256xf32>
    %19 = arith.mulf %17, %1 : vector<8x256xf32>
    %20 = arith.mulf %16, %15 : vector<8x256xf32>
    %21 = arith.addf %19, %20 : vector<8x256xf32>
    %22 = math.tanh %21 : vector<8x256xf32>
    %23 = arith.mulf %18, %22 : vector<8x256xf32>
    %24 = vector.extract_strided_slice %23 {offsets = [0, 0], sizes = [8, 128], strides = [1, 1]} : vector<8x256xf32> to vector<8x128xf32>
    %25 = arith.truncf %24 : vector<8x128xf32> to vector<8x128xbf16>
    %c0_7 = arith.constant 0 : index
    %c0_8 = arith.constant 0 : index
    %c0_9 = arith.constant 0 : index
    %26 = vector.load %arg3[%c0_7, %c0_8, %c0_9] : memref<8x8x256xbf16, #tpu.memory_space<vmem>>, vector<1x8x128xbf16>
    %27 = vector.shape_cast %26 : vector<1x8x128xbf16> to vector<8x128xbf16>
    %28 = vector.shape_cast %25 : vector<8x128xbf16> to vector<1x8x128xbf16>
    tpu.vector_store %arg3[%c0_7, %c0_8, %c0_9], %28 {strides = array<i32>} : memref<8x8x256xbf16, #tpu.memory_space<vmem>>, vector<1x8x128xbf16>,
    %29 = vector.extract_strided_slice %23 {offsets = [0, 128], sizes = [8, 128], strides = [1, 1]} : vector<8x256xf32> to vector<8x128xf32>
    %30 = arith.truncf %29 : vector<8x128xf32> to vector<8x128xbf16>
    %c7 = arith.constant 7 : index
    %c0_10 = arith.constant 0 : index
    %c128 = arith.constant 128 : index
    %31 = vector.load %arg3[%c7, %c0_10, %c128] : memref<8x8x256xbf16, #tpu.memory_space<vmem>>, vector<1x8x128xbf16>
    %32 = vector.shape_cast %31 : vector<1x8x128xbf16> to vector<8x128xbf16>
    %33 = vector.shape_cast %30 : vector<8x128xbf16> to vector<1x8x128xbf16>
    tpu.vector_store %arg3[%c7, %c0_10, %c128], %33 {strides = array<i32>} : memref<8x8x256xbf16, #tpu.memory_space<vmem>>, vector<1x8x128xbf16>,
    %34 = arith.truncf %23 : vector<8x256xf32> to vector<8x256xbf16>
    %c0_11 = arith.constant 0 : index
    %c0_12 = arith.constant 0 : index
    %35 = vector.load %arg2[%c0_11, %c0_12] : memref<256x1024xbf16, #tpu.memory_space<vmem>>, vector<256x1024xbf16>
    %cst_13 = arith.constant dense<0.000000e+00> : vector<8x1024xf32>
    %36 = tpu.matmul %34, %35, %cst_13 {dimension_numbers = #tpu.dot_dimension_numbers<[1], [0], [0], [1], [0, 0, 1, 1], [], []>} : vector<8x256xbf16>, vector<256x1024xbf16>, vector<8x1024xf32> -> vector<8x1024xf32>
    %c1 = arith.constant 1 : index
    %c0_14 = arith.constant 0 : index
    %c0_15 = arith.constant 0 : index
    %37 = vector.load %arg1[%c1, %c0_14, %c0_15] : memref<8x8x1024xf32, #tpu.memory_space<vmem>>, vector<1x8x1024xf32>
    %38 = vector.shape_cast %37 : vector<1x8x1024xf32> to vector<8x1024xf32>
    %39 = arith.addf %38, %36 : vector<8x1024xf32>
    %40 = vector.extract_strided_slice %39 {offsets = [0, 0], sizes = [8, 768], strides = [1, 1]} : vector<8x1024xf32> to vector<8x768xf32>
    %41 = arith.negf %40 : vector<8x768xf32>
    %42 = math.exp %41 : vector<8x768xf32>
    %cst_16 = arith.constant 1.000000e+00 : f32
    %43 = vector.broadcast %cst_16 : f32 to vector<8x768xf32>
    %44 = arith.addf %43, %42 : vector<8x768xf32>
    %45 = arith.divf %43, %44 : vector<8x768xf32>
    %46 = vector.extract_strided_slice %39 {offsets = [0, 768], sizes = [8, 256], strides = [1, 1]} : vector<8x1024xf32> to vector<8x256xf32>
    %47 = math.tanh %46 : vector<8x256xf32>
    %48 = vector.extract_strided_slice %45 {offsets = [0, 0], sizes = [8, 256], strides = [1, 1]} : vector<8x768xf32> to vector<8x256xf32>
    %49 = vector.extract_strided_slice %45 {offsets = [0, 256], sizes = [8, 256], strides = [1, 1]} : vector<8x768xf32> to vector<8x256xf32>
    %50 = vector.extract_strided_slice %45 {offsets = [0, 512], sizes = [8, 256], strides = [1, 1]} : vector<8x768xf32> to vector<8x256xf32>
    %51 = arith.mulf %49, %21 : vector<8x256xf32>
    %52 = arith.mulf %48, %47 : vector<8x256xf32>
    %53 = arith.addf %51, %52 : vector<8x256xf32>
    %54 = math.tanh %53 : vector<8x256xf32>
    %55 = arith.mulf %50, %54 : vector<8x256xf32>
    %56 = vector.extract_strided_slice %55 {offsets = [0, 0], sizes = [8, 128], strides = [1, 1]} : vector<8x256xf32> to vector<8x128xf32>
    %57 = arith.truncf %56 : vector<8x128xf32> to vector<8x128xbf16>
    %c1_17 = arith.constant 1 : index
    %c0_18 = arith.constant 0 : index
    %c0_19 = arith.constant 0 : index
    %58 = vector.load %arg3[%c1_17, %c0_18, %c0_19] : memref<8x8x256xbf16, #tpu.memory_space<vmem>>, vector<1x8x128xbf16>
    %59 = vector.shape_cast %58 : vector<1x8x128xbf16> to vector<8x128xbf16>
    %60 = vector.shape_cast %57 : vector<8x128xbf16> to vector<1x8x128xbf16>
    tpu.vector_store %arg3[%c1_17, %c0_18, %c0_19], %60 {strides = array<i32>} : memref<8x8x256xbf16, #tpu.memory_space<vmem>>, vector<1x8x128xbf16>,
    %61 = vector.extract_strided_slice %55 {offsets = [0, 128], sizes = [8, 128], strides = [1, 1]} : vector<8x256xf32> to vector<8x128xf32>
    %62 = arith.truncf %61 : vector<8x128xf32> to vector<8x128xbf16>
    %c6 = arith.constant 6 : index
    %c0_20 = arith.constant 0 : index
    %c128_21 = arith.constant 128 : index
    %63 = vector.load %arg3[%c6, %c0_20, %c128_21] : memref<8x8x256xbf16, #tpu.memory_space<vmem>>, vector<1x8x128xbf16>
    %64 = vector.shape_cast %63 : vector<1x8x128xbf16> to vector<8x128xbf16>
    %65 = vector.shape_cast %62 : vector<8x128xbf16> to vector<1x8x128xbf16>
    tpu.vector_store %arg3[%c6, %c0_20, %c128_21], %65 {strides = array<i32>} : memref<8x8x256xbf16, #tpu.memory_space<vmem>>, vector<1x8x128xbf16>,
    %66 = arith.truncf %55 : vector<8x256xf32> to vector<8x256xbf16>
    %c0_22 = arith.constant 0 : index
    %c0_23 = arith.constant 0 : index
    %67 = vector.load %arg2[%c0_22, %c0_23] : memref<256x1024xbf16, #tpu.memory_space<vmem>>, vector<256x1024xbf16>
    %cst_24 = arith.constant dense<0.000000e+00> : vector<8x1024xf32>
    %68 = tpu.matmul %66, %67, %cst_24 {dimension_numbers = #tpu.dot_dimension_numbers<[1], [0], [0], [1], [0, 0, 1, 1], [], []>} : vector<8x256xbf16>, vector<256x1024xbf16>, vector<8x1024xf32> -> vector<8x1024xf32>
    %c2 = arith.constant 2 : index
    %c0_25 = arith.constant 0 : index
    %c0_26 = arith.constant 0 : index
    %69 = vector.load %arg1[%c2, %c0_25, %c0_26] : memref<8x8x1024xf32, #tpu.memory_space<vmem>>, vector<1x8x1024xf32>
    %70 = vector.shape_cast %69 : vector<1x8x1024xf32> to vector<8x1024xf32>
    %71 = arith.addf %70, %68 : vector<8x1024xf32>
    %72 = vector.extract_strided_slice %71 {offsets = [0, 0], sizes = [8, 768], strides = [1, 1]} : vector<8x1024xf32> to vector<8x768xf32>
    %73 = arith.negf %72 : vector<8x768xf32>
    %74 = math.exp %73 : vector<8x768xf32>
    %cst_27 = arith.constant 1.000000e+00 : f32
    %75 = vector.broadcast %cst_27 : f32 to vector<8x768xf32>
    %76 = arith.addf %75, %74 : vector<8x768xf32>
    %77 = arith.divf %75, %76 : vector<8x768xf32>
    %78 = vector.extract_strided_slice %71 {offsets = [0, 768], sizes = [8, 256], strides = [1, 1]} : vector<8x1024xf32> to vector<8x256xf32>
    %79 = math.tanh %78 : vector<8x256xf32>
    %80 = vector.extract_strided_slice %77 {offsets = [0, 0], sizes = [8, 256], strides = [1, 1]} : vector<8x768xf32> to vector<8x256xf32>
    %81 = vector.extract_strided_slice %77 {offsets = [0, 256], sizes = [8, 256], strides = [1, 1]} : vector<8x768xf32> to vector<8x256xf32>
    %82 = vector.extract_strided_slice %77 {offsets = [0, 512], sizes = [8, 256], strides = [1, 1]} : vector<8x768xf32> to vector<8x256xf32>
    %83 = arith.mulf %81, %53 : vector<8x256xf32>
    %84 = arith.mulf %80, %79 : vector<8x256xf32>
    %85 = arith.addf %83, %84 : vector<8x256xf32>
    %86 = math.tanh %85 : vector<8x256xf32>
    %87 = arith.mulf %82, %86 : vector<8x256xf32>
    %88 = vector.extract_strided_slice %87 {offsets = [0, 0], sizes = [8, 128], strides = [1, 1]} : vector<8x256xf32> to vector<8x128xf32>
    %89 = arith.truncf %88 : vector<8x128xf32> to vector<8x128xbf16>
    %c2_28 = arith.constant 2 : index
    %c0_29 = arith.constant 0 : index
    %c0_30 = arith.constant 0 : index
    %90 = vector.load %arg3[%c2_28, %c0_29, %c0_30] : memref<8x8x256xbf16, #tpu.memory_space<vmem>>, vector<1x8x128xbf16>
    %91 = vector.shape_cast %90 : vector<1x8x128xbf16> to vector<8x128xbf16>
    %92 = vector.shape_cast %89 : vector<8x128xbf16> to vector<1x8x128xbf16>
    tpu.vector_store %arg3[%c2_28, %c0_29, %c0_30], %92 {strides = array<i32>} : memref<8x8x256xbf16, #tpu.memory_space<vmem>>, vector<1x8x128xbf16>,
    %93 = vector.extract_strided_slice %87 {offsets = [0, 128], sizes = [8, 128], strides = [1, 1]} : vector<8x256xf32> to vector<8x128xf32>
    %94 = arith.truncf %93 : vector<8x128xf32> to vector<8x128xbf16>
    %c5 = arith.constant 5 : index
    %c0_31 = arith.constant 0 : index
    %c128_32 = arith.constant 128 : index
    %95 = vector.load %arg3[%c5, %c0_31, %c128_32] : memref<8x8x256xbf16, #tpu.memory_space<vmem>>, vector<1x8x128xbf16>
    %96 = vector.shape_cast %95 : vector<1x8x128xbf16> to vector<8x128xbf16>
    %97 = vector.shape_cast %94 : vector<8x128xbf16> to vector<1x8x128xbf16>
    tpu.vector_store %arg3[%c5, %c0_31, %c128_32], %97 {strides = array<i32>} : memref<8x8x256xbf16, #tpu.memory_space<vmem>>, vector<1x8x128xbf16>,
    %98 = arith.truncf %87 : vector<8x256xf32> to vector<8x256xbf16>
    %c0_33 = arith.constant 0 : index
    %c0_34 = arith.constant 0 : index
    %99 = vector.load %arg2[%c0_33, %c0_34] : memref<256x1024xbf16, #tpu.memory_space<vmem>>, vector<256x1024xbf16>
    %cst_35 = arith.constant dense<0.000000e+00> : vector<8x1024xf32>
    %100 = tpu.matmul %98, %99, %cst_35 {dimension_numbers = #tpu.dot_dimension_numbers<[1], [0], [0], [1], [0, 0, 1, 1], [], []>} : vector<8x256xbf16>, vector<256x1024xbf16>, vector<8x1024xf32> -> vector<8x1024xf32>
    %c3 = arith.constant 3 : index
    %c0_36 = arith.constant 0 : index
    %c0_37 = arith.constant 0 : index
    %101 = vector.load %arg1[%c3, %c0_36, %c0_37] : memref<8x8x1024xf32, #tpu.memory_space<vmem>>, vector<1x8x1024xf32>
    %102 = vector.shape_cast %101 : vector<1x8x1024xf32> to vector<8x1024xf32>
    %103 = arith.addf %102, %100 : vector<8x1024xf32>
    %104 = vector.extract_strided_slice %103 {offsets = [0, 0], sizes = [8, 768], strides = [1, 1]} : vector<8x1024xf32> to vector<8x768xf32>
    %105 = arith.negf %104 : vector<8x768xf32>
    %106 = math.exp %105 : vector<8x768xf32>
    %cst_38 = arith.constant 1.000000e+00 : f32
    %107 = vector.broadcast %cst_38 : f32 to vector<8x768xf32>
    %108 = arith.addf %107, %106 : vector<8x768xf32>
    %109 = arith.divf %107, %108 : vector<8x768xf32>
    %110 = vector.extract_strided_slice %103 {offsets = [0, 768], sizes = [8, 256], strides = [1, 1]} : vector<8x1024xf32> to vector<8x256xf32>
    %111 = math.tanh %110 : vector<8x256xf32>
    %112 = vector.extract_strided_slice %109 {offsets = [0, 0], sizes = [8, 256], strides = [1, 1]} : vector<8x768xf32> to vector<8x256xf32>
    %113 = vector.extract_strided_slice %109 {offsets = [0, 256], sizes = [8, 256], strides = [1, 1]} : vector<8x768xf32> to vector<8x256xf32>
    %114 = vector.extract_strided_slice %109 {offsets = [0, 512], sizes = [8, 256], strides = [1, 1]} : vector<8x768xf32> to vector<8x256xf32>
    %115 = arith.mulf %113, %85 : vector<8x256xf32>
    %116 = arith.mulf %112, %111 : vector<8x256xf32>
    %117 = arith.addf %115, %116 : vector<8x256xf32>
    %118 = math.tanh %117 : vector<8x256xf32>
    %119 = arith.mulf %114, %118 : vector<8x256xf32>
    %120 = vector.extract_strided_slice %119 {offsets = [0, 0], sizes = [8, 128], strides = [1, 1]} : vector<8x256xf32> to vector<8x128xf32>
    %121 = arith.truncf %120 : vector<8x128xf32> to vector<8x128xbf16>
    %c3_39 = arith.constant 3 : index
    %c0_40 = arith.constant 0 : index
    %c0_41 = arith.constant 0 : index
    %122 = vector.load %arg3[%c3_39, %c0_40, %c0_41] : memref<8x8x256xbf16, #tpu.memory_space<vmem>>, vector<1x8x128xbf16>
    %123 = vector.shape_cast %122 : vector<1x8x128xbf16> to vector<8x128xbf16>
    %124 = vector.shape_cast %121 : vector<8x128xbf16> to vector<1x8x128xbf16>
    tpu.vector_store %arg3[%c3_39, %c0_40, %c0_41], %124 {strides = array<i32>} : memref<8x8x256xbf16, #tpu.memory_space<vmem>>, vector<1x8x128xbf16>,
    %125 = vector.extract_strided_slice %119 {offsets = [0, 128], sizes = [8, 128], strides = [1, 1]} : vector<8x256xf32> to vector<8x128xf32>
    %126 = arith.truncf %125 : vector<8x128xf32> to vector<8x128xbf16>
    %c4 = arith.constant 4 : index
    %c0_42 = arith.constant 0 : index
    %c128_43 = arith.constant 128 : index
    %127 = vector.load %arg3[%c4, %c0_42, %c128_43] : memref<8x8x256xbf16, #tpu.memory_space<vmem>>, vector<1x8x128xbf16>
    %128 = vector.shape_cast %127 : vector<1x8x128xbf16> to vector<8x128xbf16>
    %129 = vector.shape_cast %126 : vector<8x128xbf16> to vector<1x8x128xbf16>
    tpu.vector_store %arg3[%c4, %c0_42, %c128_43], %129 {strides = array<i32>} : memref<8x8x256xbf16, #tpu.memory_space<vmem>>, vector<1x8x128xbf16>,
    %130 = arith.truncf %119 : vector<8x256xf32> to vector<8x256xbf16>
    %c0_44 = arith.constant 0 : index
    %c0_45 = arith.constant 0 : index
    %131 = vector.load %arg2[%c0_44, %c0_45] : memref<256x1024xbf16, #tpu.memory_space<vmem>>, vector<256x1024xbf16>
    %cst_46 = arith.constant dense<0.000000e+00> : vector<8x1024xf32>
    %132 = tpu.matmul %130, %131, %cst_46 {dimension_numbers = #tpu.dot_dimension_numbers<[1], [0], [0], [1], [0, 0, 1, 1], [], []>} : vector<8x256xbf16>, vector<256x1024xbf16>, vector<8x1024xf32> -> vector<8x1024xf32>
    %c4_47 = arith.constant 4 : index
    %c0_48 = arith.constant 0 : index
    %c0_49 = arith.constant 0 : index
    %133 = vector.load %arg1[%c4_47, %c0_48, %c0_49] : memref<8x8x1024xf32, #tpu.memory_space<vmem>>, vector<1x8x1024xf32>
    %134 = vector.shape_cast %133 : vector<1x8x1024xf32> to vector<8x1024xf32>
    %135 = arith.addf %134, %132 : vector<8x1024xf32>
    %136 = vector.extract_strided_slice %135 {offsets = [0, 0], sizes = [8, 768], strides = [1, 1]} : vector<8x1024xf32> to vector<8x768xf32>
    %137 = arith.negf %136 : vector<8x768xf32>
    %138 = math.exp %137 : vector<8x768xf32>
    %cst_50 = arith.constant 1.000000e+00 : f32
    %139 = vector.broadcast %cst_50 : f32 to vector<8x768xf32>
    %140 = arith.addf %139, %138 : vector<8x768xf32>
    %141 = arith.divf %139, %140 : vector<8x768xf32>
    %142 = vector.extract_strided_slice %135 {offsets = [0, 768], sizes = [8, 256], strides = [1, 1]} : vector<8x1024xf32> to vector<8x256xf32>
    %143 = math.tanh %142 : vector<8x256xf32>
    %144 = vector.extract_strided_slice %141 {offsets = [0, 0], sizes = [8, 256], strides = [1, 1]} : vector<8x768xf32> to vector<8x256xf32>
    %145 = vector.extract_strided_slice %141 {offsets = [0, 256], sizes = [8, 256], strides = [1, 1]} : vector<8x768xf32> to vector<8x256xf32>
    %146 = vector.extract_strided_slice %141 {offsets = [0, 512], sizes = [8, 256], strides = [1, 1]} : vector<8x768xf32> to vector<8x256xf32>
    %147 = arith.mulf %145, %117 : vector<8x256xf32>
    %148 = arith.mulf %144, %143 : vector<8x256xf32>
    %149 = arith.addf %147, %148 : vector<8x256xf32>
    %150 = math.tanh %149 : vector<8x256xf32>
    %151 = arith.mulf %146, %150 : vector<8x256xf32>
    %152 = vector.extract_strided_slice %151 {offsets = [0, 0], sizes = [8, 128], strides = [1, 1]} : vector<8x256xf32> to vector<8x128xf32>
    %153 = arith.truncf %152 : vector<8x128xf32> to vector<8x128xbf16>
    %c4_51 = arith.constant 4 : index
    %c0_52 = arith.constant 0 : index
    %c0_53 = arith.constant 0 : index
    %154 = vector.load %arg3[%c4_51, %c0_52, %c0_53] : memref<8x8x256xbf16, #tpu.memory_space<vmem>>, vector<1x8x128xbf16>
    %155 = vector.shape_cast %154 : vector<1x8x128xbf16> to vector<8x128xbf16>
    %156 = vector.shape_cast %153 : vector<8x128xbf16> to vector<1x8x128xbf16>
    tpu.vector_store %arg3[%c4_51, %c0_52, %c0_53], %156 {strides = array<i32>} : memref<8x8x256xbf16, #tpu.memory_space<vmem>>, vector<1x8x128xbf16>,
    %157 = vector.extract_strided_slice %151 {offsets = [0, 128], sizes = [8, 128], strides = [1, 1]} : vector<8x256xf32> to vector<8x128xf32>
    %158 = arith.truncf %157 : vector<8x128xf32> to vector<8x128xbf16>
    %c3_54 = arith.constant 3 : index
    %c0_55 = arith.constant 0 : index
    %c128_56 = arith.constant 128 : index
    %159 = vector.load %arg3[%c3_54, %c0_55, %c128_56] : memref<8x8x256xbf16, #tpu.memory_space<vmem>>, vector<1x8x128xbf16>
    %160 = vector.shape_cast %159 : vector<1x8x128xbf16> to vector<8x128xbf16>
    %161 = vector.shape_cast %158 : vector<8x128xbf16> to vector<1x8x128xbf16>
    tpu.vector_store %arg3[%c3_54, %c0_55, %c128_56], %161 {strides = array<i32>} : memref<8x8x256xbf16, #tpu.memory_space<vmem>>, vector<1x8x128xbf16>,
    %162 = arith.truncf %151 : vector<8x256xf32> to vector<8x256xbf16>
    %c0_57 = arith.constant 0 : index
    %c0_58 = arith.constant 0 : index
    %163 = vector.load %arg2[%c0_57, %c0_58] : memref<256x1024xbf16, #tpu.memory_space<vmem>>, vector<256x1024xbf16>
    %cst_59 = arith.constant dense<0.000000e+00> : vector<8x1024xf32>
    %164 = tpu.matmul %162, %163, %cst_59 {dimension_numbers = #tpu.dot_dimension_numbers<[1], [0], [0], [1], [0, 0, 1, 1], [], []>} : vector<8x256xbf16>, vector<256x1024xbf16>, vector<8x1024xf32> -> vector<8x1024xf32>
    %c5_60 = arith.constant 5 : index
    %c0_61 = arith.constant 0 : index
    %c0_62 = arith.constant 0 : index
    %165 = vector.load %arg1[%c5_60, %c0_61, %c0_62] : memref<8x8x1024xf32, #tpu.memory_space<vmem>>, vector<1x8x1024xf32>
    %166 = vector.shape_cast %165 : vector<1x8x1024xf32> to vector<8x1024xf32>
    %167 = arith.addf %166, %164 : vector<8x1024xf32>
    %168 = vector.extract_strided_slice %167 {offsets = [0, 0], sizes = [8, 768], strides = [1, 1]} : vector<8x1024xf32> to vector<8x768xf32>
    %169 = arith.negf %168 : vector<8x768xf32>
    %170 = math.exp %169 : vector<8x768xf32>
    %cst_63 = arith.constant 1.000000e+00 : f32
    %171 = vector.broadcast %cst_63 : f32 to vector<8x768xf32>
    %172 = arith.addf %171, %170 : vector<8x768xf32>
    %173 = arith.divf %171, %172 : vector<8x768xf32>
    %174 = vector.extract_strided_slice %167 {offsets = [0, 768], sizes = [8, 256], strides = [1, 1]} : vector<8x1024xf32> to vector<8x256xf32>
    %175 = math.tanh %174 : vector<8x256xf32>
    %176 = vector.extract_strided_slice %173 {offsets = [0, 0], sizes = [8, 256], strides = [1, 1]} : vector<8x768xf32> to vector<8x256xf32>
    %177 = vector.extract_strided_slice %173 {offsets = [0, 256], sizes = [8, 256], strides = [1, 1]} : vector<8x768xf32> to vector<8x256xf32>
    %178 = vector.extract_strided_slice %173 {offsets = [0, 512], sizes = [8, 256], strides = [1, 1]} : vector<8x768xf32> to vector<8x256xf32>
    %179 = arith.mulf %177, %149 : vector<8x256xf32>
    %180 = arith.mulf %176, %175 : vector<8x256xf32>
    %181 = arith.addf %179, %180 : vector<8x256xf32>
    %182 = math.tanh %181 : vector<8x256xf32>
    %183 = arith.mulf %178, %182 : vector<8x256xf32>
    %184 = vector.extract_strided_slice %183 {offsets = [0, 0], sizes = [8, 128], strides = [1, 1]} : vector<8x256xf32> to vector<8x128xf32>
    %185 = arith.truncf %184 : vector<8x128xf32> to vector<8x128xbf16>
    %c5_64 = arith.constant 5 : index
    %c0_65 = arith.constant 0 : index
    %c0_66 = arith.constant 0 : index
    %186 = vector.load %arg3[%c5_64, %c0_65, %c0_66] : memref<8x8x256xbf16, #tpu.memory_space<vmem>>, vector<1x8x128xbf16>
    %187 = vector.shape_cast %186 : vector<1x8x128xbf16> to vector<8x128xbf16>
    %188 = vector.shape_cast %185 : vector<8x128xbf16> to vector<1x8x128xbf16>
    tpu.vector_store %arg3[%c5_64, %c0_65, %c0_66], %188 {strides = array<i32>} : memref<8x8x256xbf16, #tpu.memory_space<vmem>>, vector<1x8x128xbf16>,
    %189 = vector.extract_strided_slice %183 {offsets = [0, 128], sizes = [8, 128], strides = [1, 1]} : vector<8x256xf32> to vector<8x128xf32>
    %190 = arith.truncf %189 : vector<8x128xf32> to vector<8x128xbf16>
    %c2_67 = arith.constant 2 : index
    %c0_68 = arith.constant 0 : index
    %c128_69 = arith.constant 128 : index
    %191 = vector.load %arg3[%c2_67, %c0_68, %c128_69] : memref<8x8x256xbf16, #tpu.memory_space<vmem>>, vector<1x8x128xbf16>
    %192 = vector.shape_cast %191 : vector<1x8x128xbf16> to vector<8x128xbf16>
    %193 = vector.shape_cast %190 : vector<8x128xbf16> to vector<1x8x128xbf16>
    tpu.vector_store %arg3[%c2_67, %c0_68, %c128_69], %193 {strides = array<i32>} : memref<8x8x256xbf16, #tpu.memory_space<vmem>>, vector<1x8x128xbf16>,
    %194 = arith.truncf %183 : vector<8x256xf32> to vector<8x256xbf16>
    %c0_70 = arith.constant 0 : index
    %c0_71 = arith.constant 0 : index
    %195 = vector.load %arg2[%c0_70, %c0_71] : memref<256x1024xbf16, #tpu.memory_space<vmem>>, vector<256x1024xbf16>
    %cst_72 = arith.constant dense<0.000000e+00> : vector<8x1024xf32>
    %196 = tpu.matmul %194, %195, %cst_72 {dimension_numbers = #tpu.dot_dimension_numbers<[1], [0], [0], [1], [0, 0, 1, 1], [], []>} : vector<8x256xbf16>, vector<256x1024xbf16>, vector<8x1024xf32> -> vector<8x1024xf32>
    %c6_73 = arith.constant 6 : index
    %c0_74 = arith.constant 0 : index
    %c0_75 = arith.constant 0 : index
    %197 = vector.load %arg1[%c6_73, %c0_74, %c0_75] : memref<8x8x1024xf32, #tpu.memory_space<vmem>>, vector<1x8x1024xf32>
    %198 = vector.shape_cast %197 : vector<1x8x1024xf32> to vector<8x1024xf32>
    %199 = arith.addf %198, %196 : vector<8x1024xf32>
    %200 = vector.extract_strided_slice %199 {offsets = [0, 0], sizes = [8, 768], strides = [1, 1]} : vector<8x1024xf32> to vector<8x768xf32>
    %201 = arith.negf %200 : vector<8x768xf32>
    %202 = math.exp %201 : vector<8x768xf32>
    %cst_76 = arith.constant 1.000000e+00 : f32
    %203 = vector.broadcast %cst_76 : f32 to vector<8x768xf32>
    %204 = arith.addf %203, %202 : vector<8x768xf32>
    %205 = arith.divf %203, %204 : vector<8x768xf32>
    %206 = vector.extract_strided_slice %199 {offsets = [0, 768], sizes = [8, 256], strides = [1, 1]} : vector<8x1024xf32> to vector<8x256xf32>
    %207 = math.tanh %206 : vector<8x256xf32>
    %208 = vector.extract_strided_slice %205 {offsets = [0, 0], sizes = [8, 256], strides = [1, 1]} : vector<8x768xf32> to vector<8x256xf32>
    %209 = vector.extract_strided_slice %205 {offsets = [0, 256], sizes = [8, 256], strides = [1, 1]} : vector<8x768xf32> to vector<8x256xf32>
    %210 = vector.extract_strided_slice %205 {offsets = [0, 512], sizes = [8, 256], strides = [1, 1]} : vector<8x768xf32> to vector<8x256xf32>
    %211 = arith.mulf %209, %181 : vector<8x256xf32>
    %212 = arith.mulf %208, %207 : vector<8x256xf32>
    %213 = arith.addf %211, %212 : vector<8x256xf32>
    %214 = math.tanh %213 : vector<8x256xf32>
    %215 = arith.mulf %210, %214 : vector<8x256xf32>
    %216 = vector.extract_strided_slice %215 {offsets = [0, 0], sizes = [8, 128], strides = [1, 1]} : vector<8x256xf32> to vector<8x128xf32>
    %217 = arith.truncf %216 : vector<8x128xf32> to vector<8x128xbf16>
    %c6_77 = arith.constant 6 : index
    %c0_78 = arith.constant 0 : index
    %c0_79 = arith.constant 0 : index
    %218 = vector.load %arg3[%c6_77, %c0_78, %c0_79] : memref<8x8x256xbf16, #tpu.memory_space<vmem>>, vector<1x8x128xbf16>
    %219 = vector.shape_cast %218 : vector<1x8x128xbf16> to vector<8x128xbf16>
    %220 = vector.shape_cast %217 : vector<8x128xbf16> to vector<1x8x128xbf16>
    tpu.vector_store %arg3[%c6_77, %c0_78, %c0_79], %220 {strides = array<i32>} : memref<8x8x256xbf16, #tpu.memory_space<vmem>>, vector<1x8x128xbf16>,
    %221 = vector.extract_strided_slice %215 {offsets = [0, 128], sizes = [8, 128], strides = [1, 1]} : vector<8x256xf32> to vector<8x128xf32>
    %222 = arith.truncf %221 : vector<8x128xf32> to vector<8x128xbf16>
    %c1_80 = arith.constant 1 : index
    %c0_81 = arith.constant 0 : index
    %c128_82 = arith.constant 128 : index
    %223 = vector.load %arg3[%c1_80, %c0_81, %c128_82] : memref<8x8x256xbf16, #tpu.memory_space<vmem>>, vector<1x8x128xbf16>
    %224 = vector.shape_cast %223 : vector<1x8x128xbf16> to vector<8x128xbf16>
    %225 = vector.shape_cast %222 : vector<8x128xbf16> to vector<1x8x128xbf16>
    tpu.vector_store %arg3[%c1_80, %c0_81, %c128_82], %225 {strides = array<i32>} : memref<8x8x256xbf16, #tpu.memory_space<vmem>>, vector<1x8x128xbf16>,
    %226 = arith.truncf %215 : vector<8x256xf32> to vector<8x256xbf16>
    %c0_83 = arith.constant 0 : index
    %c0_84 = arith.constant 0 : index
    %227 = vector.load %arg2[%c0_83, %c0_84] : memref<256x1024xbf16, #tpu.memory_space<vmem>>, vector<256x1024xbf16>
    %cst_85 = arith.constant dense<0.000000e+00> : vector<8x1024xf32>
    %228 = tpu.matmul %226, %227, %cst_85 {dimension_numbers = #tpu.dot_dimension_numbers<[1], [0], [0], [1], [0, 0, 1, 1], [], []>} : vector<8x256xbf16>, vector<256x1024xbf16>, vector<8x1024xf32> -> vector<8x1024xf32>
    %c7_86 = arith.constant 7 : index
    %c0_87 = arith.constant 0 : index
    %c0_88 = arith.constant 0 : index
    %229 = vector.load %arg1[%c7_86, %c0_87, %c0_88] : memref<8x8x1024xf32, #tpu.memory_space<vmem>>, vector<1x8x1024xf32>
    %230 = vector.shape_cast %229 : vector<1x8x1024xf32> to vector<8x1024xf32>
    %231 = arith.addf %230, %228 : vector<8x1024xf32>
    %232 = vector.extract_strided_slice %231 {offsets = [0, 0], sizes = [8, 768], strides = [1, 1]} : vector<8x1024xf32> to vector<8x768xf32>
    %233 = arith.negf %232 : vector<8x768xf32>
    %234 = math.exp %233 : vector<8x768xf32>
    %cst_89 = arith.constant 1.000000e+00 : f32
    %235 = vector.broadcast %cst_89 : f32 to vector<8x768xf32>
    %236 = arith.addf %235, %234 : vector<8x768xf32>
    %237 = arith.divf %235, %236 : vector<8x768xf32>
    %238 = vector.extract_strided_slice %231 {offsets = [0, 768], sizes = [8, 256], strides = [1, 1]} : vector<8x1024xf32> to vector<8x256xf32>
    %239 = math.tanh %238 : vector<8x256xf32>
    %240 = vector.extract_strided_slice %237 {offsets = [0, 0], sizes = [8, 256], strides = [1, 1]} : vector<8x768xf32> to vector<8x256xf32>
    %241 = vector.extract_strided_slice %237 {offsets = [0, 256], sizes = [8, 256], strides = [1, 1]} : vector<8x768xf32> to vector<8x256xf32>
    %242 = vector.extract_strided_slice %237 {offsets = [0, 512], sizes = [8, 256], strides = [1, 1]} : vector<8x768xf32> to vector<8x256xf32>
    %243 = arith.mulf %241, %213 : vector<8x256xf32>
    %244 = arith.mulf %240, %239 : vector<8x256xf32>
    %245 = arith.addf %243, %244 : vector<8x256xf32>
    %246 = math.tanh %245 : vector<8x256xf32>
    %247 = arith.mulf %242, %246 : vector<8x256xf32>
    %248 = vector.extract_strided_slice %247 {offsets = [0, 0], sizes = [8, 128], strides = [1, 1]} : vector<8x256xf32> to vector<8x128xf32>
    %249 = arith.truncf %248 : vector<8x128xf32> to vector<8x128xbf16>
    %c7_90 = arith.constant 7 : index
    %c0_91 = arith.constant 0 : index
    %c0_92 = arith.constant 0 : index
    %250 = vector.load %arg3[%c7_90, %c0_91, %c0_92] : memref<8x8x256xbf16, #tpu.memory_space<vmem>>, vector<1x8x128xbf16>
    %251 = vector.shape_cast %250 : vector<1x8x128xbf16> to vector<8x128xbf16>
    %252 = vector.shape_cast %249 : vector<8x128xbf16> to vector<1x8x128xbf16>
    tpu.vector_store %arg3[%c7_90, %c0_91, %c0_92], %252 {strides = array<i32>} : memref<8x8x256xbf16, #tpu.memory_space<vmem>>, vector<1x8x128xbf16>,
    %253 = vector.extract_strided_slice %247 {offsets = [0, 128], sizes = [8, 128], strides = [1, 1]} : vector<8x256xf32> to vector<8x128xf32>
    %254 = arith.truncf %253 : vector<8x128xf32> to vector<8x128xbf16>
    %c0_93 = arith.constant 0 : index
    %c0_94 = arith.constant 0 : index
    %c128_95 = arith.constant 128 : index
    %255 = vector.load %arg3[%c0_93, %c0_94, %c128_95] : memref<8x8x256xbf16, #tpu.memory_space<vmem>>, vector<1x8x128xbf16>
    %256 = vector.shape_cast %255 : vector<1x8x128xbf16> to vector<8x128xbf16>
    %257 = vector.shape_cast %254 : vector<8x128xbf16> to vector<1x8x128xbf16>
    tpu.vector_store %arg3[%c0_93, %c0_94, %c128_95], %257 {strides = array<i32>} : memref<8x8x256xbf16, #tpu.memory_space<vmem>>, vector<1x8x128xbf16>,
    return
  }
  func.func @transform_0(%arg0: i32) -> (i32, i32, i32) {
    %c0_i32 = arith.constant 0 : i32
    %c0_i32_0 = arith.constant 0 : i32
    %c0_i32_1 = arith.constant 0 : i32
    return %c0_i32, %arg0, %c0_i32_0 : i32, i32, i32
  }
  func.func @transform_1(%arg0: i32) -> (i32, i32) {
    %c0_i32 = arith.constant 0 : i32
    %c0_i32_0 = arith.constant 0 : i32
    %c0_i32_1 = arith.constant 0 : i32
    return %c0_i32, %c0_i32_0 : i32, i32
  }
  func.func @transform_2(%arg0: i32) -> (i32, i32, i32) {
    %c0_i32 = arith.constant 0 : i32
    %c0_i32_0 = arith.constant 0 : i32
    %c0_i32_1 = arith.constant 0 : i32
    return %c0_i32, %arg0, %c0_i32_0 : i32, i32, i32
  }
}

module attributes {stable_mosaic.version = 11 : i64} {
  func.func @attn_pool_proj_kernel(%arg0: memref<4x2x256xbf16, #tpu.memory_space<vmem>>, %arg1: memref<256x128xbf16, #tpu.memory_space<vmem>>, %arg2: memref<1x128xf32, #tpu.memory_space<vmem>>, %arg3: memref<1x128xf32, #tpu.memory_space<vmem>>, %arg4: memref<256x128xbf16, #tpu.memory_space<vmem>>, %arg5: memref<1x128xf32, #tpu.memory_space<vmem>>, %arg6: memref<2x128xf32, #tpu.memory_space<vmem>>) attributes {dimension_semantics = [], scalar_prefetch = 0 : i64, scratch_operands = 0 : i64, tpu.core_type = #tpu.core_type<tc>} {
    %c0 = arith.constant 0 : index
    %c0_0 = arith.constant 0 : index
    %0 = vector.load %arg2[%c0, %c0_0] : memref<1x128xf32, #tpu.memory_space<vmem>>, vector<1x128xf32>
    %c0_1 = arith.constant 0 : index
    %c0_2 = arith.constant 0 : index
    %1 = vector.load %arg3[%c0_1, %c0_2] : memref<1x128xf32, #tpu.memory_space<vmem>>, vector<1x128xf32>
    %c0_3 = arith.constant 0 : index
    %c0_4 = arith.constant 0 : index
    %c0_5 = arith.constant 0 : index
    %2 = vector.load %arg0[%c0_3, %c0_4, %c0_5] : memref<4x2x256xbf16, #tpu.memory_space<vmem>>, vector<1x2x256xbf16>
    %3 = vector.shape_cast %2 : vector<1x2x256xbf16> to vector<2x256xbf16>
    %c0_6 = arith.constant 0 : index
    %c0_7 = arith.constant 0 : index
    %4 = vector.load %arg1[%c0_6, %c0_7] : memref<256x128xbf16, #tpu.memory_space<vmem>>, vector<256x128xbf16>
    %cst = arith.constant dense<0.000000e+00> : vector<2x128xf32>
    %5 = tpu.matmul %3, %4, %cst {dimension_numbers = #tpu.dot_dimension_numbers<[1], [0], [0], [1], [0, 0, 1, 1], [], []>} : vector<2x256xbf16>, vector<256x128xbf16>, vector<2x128xf32> -> vector<2x128xf32>
    %6 = vector.broadcast %0 : vector<1x128xf32> to vector<2x128xf32>
    %7 = arith.addf %5, %6 : vector<2x128xf32>
    %8 = math.tanh %7 : vector<2x128xf32>
    %9 = vector.broadcast %1 : vector<1x128xf32> to vector<2x128xf32>
    %10 = arith.mulf %8, %9 : vector<2x128xf32>
    %cst_8 = arith.constant dense<0.000000e+00> : vector<2xf32>
    %11 = vector.multi_reduction <add>, %10, %cst_8 [1] : vector<2x128xf32> to vector<2xf32>
    %12 = vector.shape_cast %11 : vector<2xf32> to vector<2x1xf32>
    %c1 = arith.constant 1 : index
    %c0_9 = arith.constant 0 : index
    %c0_10 = arith.constant 0 : index
    %13 = vector.load %arg0[%c1, %c0_9, %c0_10] : memref<4x2x256xbf16, #tpu.memory_space<vmem>>, vector<1x2x256xbf16>
    %14 = vector.shape_cast %13 : vector<1x2x256xbf16> to vector<2x256xbf16>
    %c0_11 = arith.constant 0 : index
    %c0_12 = arith.constant 0 : index
    %15 = vector.load %arg1[%c0_11, %c0_12] : memref<256x128xbf16, #tpu.memory_space<vmem>>, vector<256x128xbf16>
    %cst_13 = arith.constant dense<0.000000e+00> : vector<2x128xf32>
    %16 = tpu.matmul %14, %15, %cst_13 {dimension_numbers = #tpu.dot_dimension_numbers<[1], [0], [0], [1], [0, 0, 1, 1], [], []>} : vector<2x256xbf16>, vector<256x128xbf16>, vector<2x128xf32> -> vector<2x128xf32>
    %17 = vector.broadcast %0 : vector<1x128xf32> to vector<2x128xf32>
    %18 = arith.addf %16, %17 : vector<2x128xf32>
    %19 = math.tanh %18 : vector<2x128xf32>
    %20 = vector.broadcast %1 : vector<1x128xf32> to vector<2x128xf32>
    %21 = arith.mulf %19, %20 : vector<2x128xf32>
    %cst_14 = arith.constant dense<0.000000e+00> : vector<2xf32>
    %22 = vector.multi_reduction <add>, %21, %cst_14 [1] : vector<2x128xf32> to vector<2xf32>
    %23 = vector.shape_cast %22 : vector<2xf32> to vector<2x1xf32>
    %c2 = arith.constant 2 : index
    %c0_15 = arith.constant 0 : index
    %c0_16 = arith.constant 0 : index
    %24 = vector.load %arg0[%c2, %c0_15, %c0_16] : memref<4x2x256xbf16, #tpu.memory_space<vmem>>, vector<1x2x256xbf16>
    %25 = vector.shape_cast %24 : vector<1x2x256xbf16> to vector<2x256xbf16>
    %c0_17 = arith.constant 0 : index
    %c0_18 = arith.constant 0 : index
    %26 = vector.load %arg1[%c0_17, %c0_18] : memref<256x128xbf16, #tpu.memory_space<vmem>>, vector<256x128xbf16>
    %cst_19 = arith.constant dense<0.000000e+00> : vector<2x128xf32>
    %27 = tpu.matmul %25, %26, %cst_19 {dimension_numbers = #tpu.dot_dimension_numbers<[1], [0], [0], [1], [0, 0, 1, 1], [], []>} : vector<2x256xbf16>, vector<256x128xbf16>, vector<2x128xf32> -> vector<2x128xf32>
    %28 = vector.broadcast %0 : vector<1x128xf32> to vector<2x128xf32>
    %29 = arith.addf %27, %28 : vector<2x128xf32>
    %30 = math.tanh %29 : vector<2x128xf32>
    %31 = vector.broadcast %1 : vector<1x128xf32> to vector<2x128xf32>
    %32 = arith.mulf %30, %31 : vector<2x128xf32>
    %cst_20 = arith.constant dense<0.000000e+00> : vector<2xf32>
    %33 = vector.multi_reduction <add>, %32, %cst_20 [1] : vector<2x128xf32> to vector<2xf32>
    %34 = vector.shape_cast %33 : vector<2xf32> to vector<2x1xf32>
    %c3 = arith.constant 3 : index
    %c0_21 = arith.constant 0 : index
    %c0_22 = arith.constant 0 : index
    %35 = vector.load %arg0[%c3, %c0_21, %c0_22] : memref<4x2x256xbf16, #tpu.memory_space<vmem>>, vector<1x2x256xbf16>
    %36 = vector.shape_cast %35 : vector<1x2x256xbf16> to vector<2x256xbf16>
    %c0_23 = arith.constant 0 : index
    %c0_24 = arith.constant 0 : index
    %37 = vector.load %arg1[%c0_23, %c0_24] : memref<256x128xbf16, #tpu.memory_space<vmem>>, vector<256x128xbf16>
    %cst_25 = arith.constant dense<0.000000e+00> : vector<2x128xf32>
    %38 = tpu.matmul %36, %37, %cst_25 {dimension_numbers = #tpu.dot_dimension_numbers<[1], [0], [0], [1], [0, 0, 1, 1], [], []>} : vector<2x256xbf16>, vector<256x128xbf16>, vector<2x128xf32> -> vector<2x128xf32>
    %39 = vector.broadcast %0 : vector<1x128xf32> to vector<2x128xf32>
    %40 = arith.addf %38, %39 : vector<2x128xf32>
    %41 = math.tanh %40 : vector<2x128xf32>
    %42 = vector.broadcast %1 : vector<1x128xf32> to vector<2x128xf32>
    %43 = arith.mulf %41, %42 : vector<2x128xf32>
    %cst_26 = arith.constant dense<0.000000e+00> : vector<2xf32>
    %44 = vector.multi_reduction <add>, %43, %cst_26 [1] : vector<2x128xf32> to vector<2xf32>
    %45 = vector.shape_cast %44 : vector<2xf32> to vector<2x1xf32>
    %46 = arith.maximumf %12, %23 : vector<2x1xf32>
    %47 = arith.maximumf %46, %34 : vector<2x1xf32>
    %48 = arith.maximumf %47, %45 : vector<2x1xf32>
    %49 = arith.subf %12, %48 : vector<2x1xf32>
    %50 = math.exp %49 : vector<2x1xf32>
    %51 = arith.subf %23, %48 : vector<2x1xf32>
    %52 = math.exp %51 : vector<2x1xf32>
    %53 = arith.subf %34, %48 : vector<2x1xf32>
    %54 = math.exp %53 : vector<2x1xf32>
    %55 = arith.subf %45, %48 : vector<2x1xf32>
    %56 = math.exp %55 : vector<2x1xf32>
    %57 = arith.addf %50, %52 : vector<2x1xf32>
    %58 = arith.addf %57, %54 : vector<2x1xf32>
    %59 = arith.addf %58, %56 : vector<2x1xf32>
    %cst_27 = arith.constant 1.000000e+00 : f32
    %60 = vector.broadcast %cst_27 : f32 to vector<2x1xf32>
    %61 = arith.divf %60, %59 : vector<2x1xf32>
    %cst_28 = arith.constant 0.000000e+00 : f32
    %62 = vector.broadcast %cst_28 : f32 to vector<2x256xf32>
    %63 = arith.mulf %50, %61 : vector<2x1xf32>
    %c0_29 = arith.constant 0 : index
    %c0_30 = arith.constant 0 : index
    %c0_31 = arith.constant 0 : index
    %64 = vector.load %arg0[%c0_29, %c0_30, %c0_31] : memref<4x2x256xbf16, #tpu.memory_space<vmem>>, vector<1x2x256xbf16>
    %65 = vector.shape_cast %64 : vector<1x2x256xbf16> to vector<2x256xbf16>
    %66 = arith.extf %65 : vector<2x256xbf16> to vector<2x256xf32>
    %67 = vector.broadcast %63 : vector<2x1xf32> to vector<2x256xf32>
    %68 = arith.mulf %67, %66 : vector<2x256xf32>
    %69 = arith.addf %62, %68 : vector<2x256xf32>
    %70 = arith.mulf %52, %61 : vector<2x1xf32>
    %c1_32 = arith.constant 1 : index
    %c0_33 = arith.constant 0 : index
    %c0_34 = arith.constant 0 : index
    %71 = vector.load %arg0[%c1_32, %c0_33, %c0_34] : memref<4x2x256xbf16, #tpu.memory_space<vmem>>, vector<1x2x256xbf16>
    %72 = vector.shape_cast %71 : vector<1x2x256xbf16> to vector<2x256xbf16>
    %73 = arith.extf %72 : vector<2x256xbf16> to vector<2x256xf32>
    %74 = vector.broadcast %70 : vector<2x1xf32> to vector<2x256xf32>
    %75 = arith.mulf %74, %73 : vector<2x256xf32>
    %76 = arith.addf %69, %75 : vector<2x256xf32>
    %77 = arith.mulf %54, %61 : vector<2x1xf32>
    %c2_35 = arith.constant 2 : index
    %c0_36 = arith.constant 0 : index
    %c0_37 = arith.constant 0 : index
    %78 = vector.load %arg0[%c2_35, %c0_36, %c0_37] : memref<4x2x256xbf16, #tpu.memory_space<vmem>>, vector<1x2x256xbf16>
    %79 = vector.shape_cast %78 : vector<1x2x256xbf16> to vector<2x256xbf16>
    %80 = arith.extf %79 : vector<2x256xbf16> to vector<2x256xf32>
    %81 = vector.broadcast %77 : vector<2x1xf32> to vector<2x256xf32>
    %82 = arith.mulf %81, %80 : vector<2x256xf32>
    %83 = arith.addf %76, %82 : vector<2x256xf32>
    %84 = arith.mulf %56, %61 : vector<2x1xf32>
    %c3_38 = arith.constant 3 : index
    %c0_39 = arith.constant 0 : index
    %c0_40 = arith.constant 0 : index
    %85 = vector.load %arg0[%c3_38, %c0_39, %c0_40] : memref<4x2x256xbf16, #tpu.memory_space<vmem>>, vector<1x2x256xbf16>
    %86 = vector.shape_cast %85 : vector<1x2x256xbf16> to vector<2x256xbf16>
    %87 = arith.extf %86 : vector<2x256xbf16> to vector<2x256xf32>
    %88 = vector.broadcast %84 : vector<2x1xf32> to vector<2x256xf32>
    %89 = arith.mulf %88, %87 : vector<2x256xf32>
    %90 = arith.addf %83, %89 : vector<2x256xf32>
    %91 = arith.truncf %90 : vector<2x256xf32> to vector<2x256xbf16>
    %c0_41 = arith.constant 0 : index
    %c0_42 = arith.constant 0 : index
    %92 = vector.load %arg4[%c0_41, %c0_42] : memref<256x128xbf16, #tpu.memory_space<vmem>>, vector<256x128xbf16>
    %cst_43 = arith.constant dense<0.000000e+00> : vector<2x128xf32>
    %93 = tpu.matmul %91, %92, %cst_43 {dimension_numbers = #tpu.dot_dimension_numbers<[1], [0], [0], [1], [0, 0, 1, 1], [], []>} : vector<2x256xbf16>, vector<256x128xbf16>, vector<2x128xf32> -> vector<2x128xf32>
    %c0_44 = arith.constant 0 : index
    %c0_45 = arith.constant 0 : index
    %94 = vector.load %arg5[%c0_44, %c0_45] : memref<1x128xf32, #tpu.memory_space<vmem>>, vector<1x128xf32>
    %95 = vector.broadcast %94 : vector<1x128xf32> to vector<2x128xf32>
    %96 = arith.addf %93, %95 : vector<2x128xf32>
    %c0_46 = arith.constant 0 : index
    %c0_47 = arith.constant 0 : index
    %97 = vector.load %arg6[%c0_46, %c0_47] : memref<2x128xf32, #tpu.memory_space<vmem>>, vector<2x128xf32>
    tpu.vector_store %arg6[%c0_46, %c0_47], %96 {strides = array<i32>} : memref<2x128xf32, #tpu.memory_space<vmem>>, vector<2x128xf32>,
    return
  }
}

module attributes {stable_mosaic.version = 11 : i64} {
  func.func @bilstm_kernel(%arg0: i32, %arg1: memref<4x2x1024xf32, #tpu.memory_space<vmem>>, %arg2: memref<256x1024xbf16, #tpu.memory_space<vmem>>, %arg3: memref<4x2x256xbf16, #tpu.memory_space<vmem>>) attributes {dimension_semantics = [#tpu.dimension_semantics<parallel>], iteration_bounds = array<i64: 1>, scalar_prefetch = 0 : i64, scratch_operands = 0 : i64, tpu.core_type = #tpu.core_type<tc>, window_params = [{transform_indices = @transform_0, window_bounds = array<i64: 4, 2, 1024>}, {pipeline_mode = #tpu.pipeline_mode<synchronous>, transform_indices = @transform_1, window_bounds = array<i64: 256, 1024>}, {transform_indices = @transform_2, window_bounds = array<i64: 4, 2, 256>}]} {
    %cst = arith.constant 0.000000e+00 : f32
    %0 = vector.broadcast %cst : f32 to vector<2x256xf32>
    %cst_0 = arith.constant 0.000000e+00 : f32
    %1 = vector.broadcast %cst_0 : f32 to vector<2x256xf32>
    %2 = arith.truncf %0 : vector<2x256xf32> to vector<2x256xbf16>
    %c0 = arith.constant 0 : index
    %c0_1 = arith.constant 0 : index
    %3 = vector.load %arg2[%c0, %c0_1] : memref<256x1024xbf16, #tpu.memory_space<vmem>>, vector<256x1024xbf16>
    %cst_2 = arith.constant dense<0.000000e+00> : vector<2x1024xf32>
    %4 = tpu.matmul %2, %3, %cst_2 {dimension_numbers = #tpu.dot_dimension_numbers<[1], [0], [0], [1], [0, 0, 1, 1], [], []>} : vector<2x256xbf16>, vector<256x1024xbf16>, vector<2x1024xf32> -> vector<2x1024xf32>
    %c0_3 = arith.constant 0 : index
    %c0_4 = arith.constant 0 : index
    %c0_5 = arith.constant 0 : index
    %5 = vector.load %arg1[%c0_3, %c0_4, %c0_5] : memref<4x2x1024xf32, #tpu.memory_space<vmem>>, vector<1x2x1024xf32>
    %6 = vector.shape_cast %5 : vector<1x2x1024xf32> to vector<2x1024xf32>
    %7 = arith.addf %6, %4 : vector<2x1024xf32>
    %8 = vector.extract_strided_slice %7 {offsets = [0, 0], sizes = [2, 768], strides = [1, 1]} : vector<2x1024xf32> to vector<2x768xf32>
    %9 = arith.negf %8 : vector<2x768xf32>
    %10 = math.exp %9 : vector<2x768xf32>
    %cst_6 = arith.constant 1.000000e+00 : f32
    %11 = vector.broadcast %cst_6 : f32 to vector<2x768xf32>
    %12 = arith.addf %11, %10 : vector<2x768xf32>
    %13 = arith.divf %11, %12 : vector<2x768xf32>
    %14 = vector.extract_strided_slice %7 {offsets = [0, 768], sizes = [2, 256], strides = [1, 1]} : vector<2x1024xf32> to vector<2x256xf32>
    %15 = math.tanh %14 : vector<2x256xf32>
    %16 = vector.extract_strided_slice %13 {offsets = [0, 0], sizes = [2, 256], strides = [1, 1]} : vector<2x768xf32> to vector<2x256xf32>
    %17 = vector.extract_strided_slice %13 {offsets = [0, 256], sizes = [2, 256], strides = [1, 1]} : vector<2x768xf32> to vector<2x256xf32>
    %18 = vector.extract_strided_slice %13 {offsets = [0, 512], sizes = [2, 256], strides = [1, 1]} : vector<2x768xf32> to vector<2x256xf32>
    %19 = arith.mulf %17, %1 : vector<2x256xf32>
    %20 = arith.mulf %16, %15 : vector<2x256xf32>
    %21 = arith.addf %19, %20 : vector<2x256xf32>
    %22 = math.tanh %21 : vector<2x256xf32>
    %23 = arith.mulf %18, %22 : vector<2x256xf32>
    %24 = vector.extract_strided_slice %23 {offsets = [0, 0], sizes = [2, 128], strides = [1, 1]} : vector<2x256xf32> to vector<2x128xf32>
    %25 = arith.truncf %24 : vector<2x128xf32> to vector<2x128xbf16>
    %c0_7 = arith.constant 0 : index
    %c0_8 = arith.constant 0 : index
    %c0_9 = arith.constant 0 : index
    %26 = vector.load %arg3[%c0_7, %c0_8, %c0_9] : memref<4x2x256xbf16, #tpu.memory_space<vmem>>, vector<1x2x128xbf16>
    %27 = vector.shape_cast %26 : vector<1x2x128xbf16> to vector<2x128xbf16>
    %28 = vector.shape_cast %25 : vector<2x128xbf16> to vector<1x2x128xbf16>
    tpu.vector_store %arg3[%c0_7, %c0_8, %c0_9], %28 {strides = array<i32>} : memref<4x2x256xbf16, #tpu.memory_space<vmem>>, vector<1x2x128xbf16>,
    %29 = vector.extract_strided_slice %23 {offsets = [0, 128], sizes = [2, 128], strides = [1, 1]} : vector<2x256xf32> to vector<2x128xf32>
    %30 = arith.truncf %29 : vector<2x128xf32> to vector<2x128xbf16>
    %c3 = arith.constant 3 : index
    %c0_10 = arith.constant 0 : index
    %c128 = arith.constant 128 : index
    %31 = vector.load %arg3[%c3, %c0_10, %c128] : memref<4x2x256xbf16, #tpu.memory_space<vmem>>, vector<1x2x128xbf16>
    %32 = vector.shape_cast %31 : vector<1x2x128xbf16> to vector<2x128xbf16>
    %33 = vector.shape_cast %30 : vector<2x128xbf16> to vector<1x2x128xbf16>
    tpu.vector_store %arg3[%c3, %c0_10, %c128], %33 {strides = array<i32>} : memref<4x2x256xbf16, #tpu.memory_space<vmem>>, vector<1x2x128xbf16>,
    %34 = arith.truncf %23 : vector<2x256xf32> to vector<2x256xbf16>
    %c0_11 = arith.constant 0 : index
    %c0_12 = arith.constant 0 : index
    %35 = vector.load %arg2[%c0_11, %c0_12] : memref<256x1024xbf16, #tpu.memory_space<vmem>>, vector<256x1024xbf16>
    %cst_13 = arith.constant dense<0.000000e+00> : vector<2x1024xf32>
    %36 = tpu.matmul %34, %35, %cst_13 {dimension_numbers = #tpu.dot_dimension_numbers<[1], [0], [0], [1], [0, 0, 1, 1], [], []>} : vector<2x256xbf16>, vector<256x1024xbf16>, vector<2x1024xf32> -> vector<2x1024xf32>
    %c1 = arith.constant 1 : index
    %c0_14 = arith.constant 0 : index
    %c0_15 = arith.constant 0 : index
    %37 = vector.load %arg1[%c1, %c0_14, %c0_15] : memref<4x2x1024xf32, #tpu.memory_space<vmem>>, vector<1x2x1024xf32>
    %38 = vector.shape_cast %37 : vector<1x2x1024xf32> to vector<2x1024xf32>
    %39 = arith.addf %38, %36 : vector<2x1024xf32>
    %40 = vector.extract_strided_slice %39 {offsets = [0, 0], sizes = [2, 768], strides = [1, 1]} : vector<2x1024xf32> to vector<2x768xf32>
    %41 = arith.negf %40 : vector<2x768xf32>
    %42 = math.exp %41 : vector<2x768xf32>
    %cst_16 = arith.constant 1.000000e+00 : f32
    %43 = vector.broadcast %cst_16 : f32 to vector<2x768xf32>
    %44 = arith.addf %43, %42 : vector<2x768xf32>
    %45 = arith.divf %43, %44 : vector<2x768xf32>
    %46 = vector.extract_strided_slice %39 {offsets = [0, 768], sizes = [2, 256], strides = [1, 1]} : vector<2x1024xf32> to vector<2x256xf32>
    %47 = math.tanh %46 : vector<2x256xf32>
    %48 = vector.extract_strided_slice %45 {offsets = [0, 0], sizes = [2, 256], strides = [1, 1]} : vector<2x768xf32> to vector<2x256xf32>
    %49 = vector.extract_strided_slice %45 {offsets = [0, 256], sizes = [2, 256], strides = [1, 1]} : vector<2x768xf32> to vector<2x256xf32>
    %50 = vector.extract_strided_slice %45 {offsets = [0, 512], sizes = [2, 256], strides = [1, 1]} : vector<2x768xf32> to vector<2x256xf32>
    %51 = arith.mulf %49, %21 : vector<2x256xf32>
    %52 = arith.mulf %48, %47 : vector<2x256xf32>
    %53 = arith.addf %51, %52 : vector<2x256xf32>
    %54 = math.tanh %53 : vector<2x256xf32>
    %55 = arith.mulf %50, %54 : vector<2x256xf32>
    %56 = vector.extract_strided_slice %55 {offsets = [0, 0], sizes = [2, 128], strides = [1, 1]} : vector<2x256xf32> to vector<2x128xf32>
    %57 = arith.truncf %56 : vector<2x128xf32> to vector<2x128xbf16>
    %c1_17 = arith.constant 1 : index
    %c0_18 = arith.constant 0 : index
    %c0_19 = arith.constant 0 : index
    %58 = vector.load %arg3[%c1_17, %c0_18, %c0_19] : memref<4x2x256xbf16, #tpu.memory_space<vmem>>, vector<1x2x128xbf16>
    %59 = vector.shape_cast %58 : vector<1x2x128xbf16> to vector<2x128xbf16>
    %60 = vector.shape_cast %57 : vector<2x128xbf16> to vector<1x2x128xbf16>
    tpu.vector_store %arg3[%c1_17, %c0_18, %c0_19], %60 {strides = array<i32>} : memref<4x2x256xbf16, #tpu.memory_space<vmem>>, vector<1x2x128xbf16>,
    %61 = vector.extract_strided_slice %55 {offsets = [0, 128], sizes = [2, 128], strides = [1, 1]} : vector<2x256xf32> to vector<2x128xf32>
    %62 = arith.truncf %61 : vector<2x128xf32> to vector<2x128xbf16>
    %c2 = arith.constant 2 : index
    %c0_20 = arith.constant 0 : index
    %c128_21 = arith.constant 128 : index
    %63 = vector.load %arg3[%c2, %c0_20, %c128_21] : memref<4x2x256xbf16, #tpu.memory_space<vmem>>, vector<1x2x128xbf16>
    %64 = vector.shape_cast %63 : vector<1x2x128xbf16> to vector<2x128xbf16>
    %65 = vector.shape_cast %62 : vector<2x128xbf16> to vector<1x2x128xbf16>
    tpu.vector_store %arg3[%c2, %c0_20, %c128_21], %65 {strides = array<i32>} : memref<4x2x256xbf16, #tpu.memory_space<vmem>>, vector<1x2x128xbf16>,
    %66 = arith.truncf %55 : vector<2x256xf32> to vector<2x256xbf16>
    %c0_22 = arith.constant 0 : index
    %c0_23 = arith.constant 0 : index
    %67 = vector.load %arg2[%c0_22, %c0_23] : memref<256x1024xbf16, #tpu.memory_space<vmem>>, vector<256x1024xbf16>
    %cst_24 = arith.constant dense<0.000000e+00> : vector<2x1024xf32>
    %68 = tpu.matmul %66, %67, %cst_24 {dimension_numbers = #tpu.dot_dimension_numbers<[1], [0], [0], [1], [0, 0, 1, 1], [], []>} : vector<2x256xbf16>, vector<256x1024xbf16>, vector<2x1024xf32> -> vector<2x1024xf32>
    %c2_25 = arith.constant 2 : index
    %c0_26 = arith.constant 0 : index
    %c0_27 = arith.constant 0 : index
    %69 = vector.load %arg1[%c2_25, %c0_26, %c0_27] : memref<4x2x1024xf32, #tpu.memory_space<vmem>>, vector<1x2x1024xf32>
    %70 = vector.shape_cast %69 : vector<1x2x1024xf32> to vector<2x1024xf32>
    %71 = arith.addf %70, %68 : vector<2x1024xf32>
    %72 = vector.extract_strided_slice %71 {offsets = [0, 0], sizes = [2, 768], strides = [1, 1]} : vector<2x1024xf32> to vector<2x768xf32>
    %73 = arith.negf %72 : vector<2x768xf32>
    %74 = math.exp %73 : vector<2x768xf32>
    %cst_28 = arith.constant 1.000000e+00 : f32
    %75 = vector.broadcast %cst_28 : f32 to vector<2x768xf32>
    %76 = arith.addf %75, %74 : vector<2x768xf32>
    %77 = arith.divf %75, %76 : vector<2x768xf32>
    %78 = vector.extract_strided_slice %71 {offsets = [0, 768], sizes = [2, 256], strides = [1, 1]} : vector<2x1024xf32> to vector<2x256xf32>
    %79 = math.tanh %78 : vector<2x256xf32>
    %80 = vector.extract_strided_slice %77 {offsets = [0, 0], sizes = [2, 256], strides = [1, 1]} : vector<2x768xf32> to vector<2x256xf32>
    %81 = vector.extract_strided_slice %77 {offsets = [0, 256], sizes = [2, 256], strides = [1, 1]} : vector<2x768xf32> to vector<2x256xf32>
    %82 = vector.extract_strided_slice %77 {offsets = [0, 512], sizes = [2, 256], strides = [1, 1]} : vector<2x768xf32> to vector<2x256xf32>
    %83 = arith.mulf %81, %53 : vector<2x256xf32>
    %84 = arith.mulf %80, %79 : vector<2x256xf32>
    %85 = arith.addf %83, %84 : vector<2x256xf32>
    %86 = math.tanh %85 : vector<2x256xf32>
    %87 = arith.mulf %82, %86 : vector<2x256xf32>
    %88 = vector.extract_strided_slice %87 {offsets = [0, 0], sizes = [2, 128], strides = [1, 1]} : vector<2x256xf32> to vector<2x128xf32>
    %89 = arith.truncf %88 : vector<2x128xf32> to vector<2x128xbf16>
    %c2_29 = arith.constant 2 : index
    %c0_30 = arith.constant 0 : index
    %c0_31 = arith.constant 0 : index
    %90 = vector.load %arg3[%c2_29, %c0_30, %c0_31] : memref<4x2x256xbf16, #tpu.memory_space<vmem>>, vector<1x2x128xbf16>
    %91 = vector.shape_cast %90 : vector<1x2x128xbf16> to vector<2x128xbf16>
    %92 = vector.shape_cast %89 : vector<2x128xbf16> to vector<1x2x128xbf16>
    tpu.vector_store %arg3[%c2_29, %c0_30, %c0_31], %92 {strides = array<i32>} : memref<4x2x256xbf16, #tpu.memory_space<vmem>>, vector<1x2x128xbf16>,
    %93 = vector.extract_strided_slice %87 {offsets = [0, 128], sizes = [2, 128], strides = [1, 1]} : vector<2x256xf32> to vector<2x128xf32>
    %94 = arith.truncf %93 : vector<2x128xf32> to vector<2x128xbf16>
    %c1_32 = arith.constant 1 : index
    %c0_33 = arith.constant 0 : index
    %c128_34 = arith.constant 128 : index
    %95 = vector.load %arg3[%c1_32, %c0_33, %c128_34] : memref<4x2x256xbf16, #tpu.memory_space<vmem>>, vector<1x2x128xbf16>
    %96 = vector.shape_cast %95 : vector<1x2x128xbf16> to vector<2x128xbf16>
    %97 = vector.shape_cast %94 : vector<2x128xbf16> to vector<1x2x128xbf16>
    tpu.vector_store %arg3[%c1_32, %c0_33, %c128_34], %97 {strides = array<i32>} : memref<4x2x256xbf16, #tpu.memory_space<vmem>>, vector<1x2x128xbf16>,
    %98 = arith.truncf %87 : vector<2x256xf32> to vector<2x256xbf16>
    %c0_35 = arith.constant 0 : index
    %c0_36 = arith.constant 0 : index
    %99 = vector.load %arg2[%c0_35, %c0_36] : memref<256x1024xbf16, #tpu.memory_space<vmem>>, vector<256x1024xbf16>
    %cst_37 = arith.constant dense<0.000000e+00> : vector<2x1024xf32>
    %100 = tpu.matmul %98, %99, %cst_37 {dimension_numbers = #tpu.dot_dimension_numbers<[1], [0], [0], [1], [0, 0, 1, 1], [], []>} : vector<2x256xbf16>, vector<256x1024xbf16>, vector<2x1024xf32> -> vector<2x1024xf32>
    %c3_38 = arith.constant 3 : index
    %c0_39 = arith.constant 0 : index
    %c0_40 = arith.constant 0 : index
    %101 = vector.load %arg1[%c3_38, %c0_39, %c0_40] : memref<4x2x1024xf32, #tpu.memory_space<vmem>>, vector<1x2x1024xf32>
    %102 = vector.shape_cast %101 : vector<1x2x1024xf32> to vector<2x1024xf32>
    %103 = arith.addf %102, %100 : vector<2x1024xf32>
    %104 = vector.extract_strided_slice %103 {offsets = [0, 0], sizes = [2, 768], strides = [1, 1]} : vector<2x1024xf32> to vector<2x768xf32>
    %105 = arith.negf %104 : vector<2x768xf32>
    %106 = math.exp %105 : vector<2x768xf32>
    %cst_41 = arith.constant 1.000000e+00 : f32
    %107 = vector.broadcast %cst_41 : f32 to vector<2x768xf32>
    %108 = arith.addf %107, %106 : vector<2x768xf32>
    %109 = arith.divf %107, %108 : vector<2x768xf32>
    %110 = vector.extract_strided_slice %103 {offsets = [0, 768], sizes = [2, 256], strides = [1, 1]} : vector<2x1024xf32> to vector<2x256xf32>
    %111 = math.tanh %110 : vector<2x256xf32>
    %112 = vector.extract_strided_slice %109 {offsets = [0, 0], sizes = [2, 256], strides = [1, 1]} : vector<2x768xf32> to vector<2x256xf32>
    %113 = vector.extract_strided_slice %109 {offsets = [0, 256], sizes = [2, 256], strides = [1, 1]} : vector<2x768xf32> to vector<2x256xf32>
    %114 = vector.extract_strided_slice %109 {offsets = [0, 512], sizes = [2, 256], strides = [1, 1]} : vector<2x768xf32> to vector<2x256xf32>
    %115 = arith.mulf %113, %85 : vector<2x256xf32>
    %116 = arith.mulf %112, %111 : vector<2x256xf32>
    %117 = arith.addf %115, %116 : vector<2x256xf32>
    %118 = math.tanh %117 : vector<2x256xf32>
    %119 = arith.mulf %114, %118 : vector<2x256xf32>
    %120 = vector.extract_strided_slice %119 {offsets = [0, 0], sizes = [2, 128], strides = [1, 1]} : vector<2x256xf32> to vector<2x128xf32>
    %121 = arith.truncf %120 : vector<2x128xf32> to vector<2x128xbf16>
    %c3_42 = arith.constant 3 : index
    %c0_43 = arith.constant 0 : index
    %c0_44 = arith.constant 0 : index
    %122 = vector.load %arg3[%c3_42, %c0_43, %c0_44] : memref<4x2x256xbf16, #tpu.memory_space<vmem>>, vector<1x2x128xbf16>
    %123 = vector.shape_cast %122 : vector<1x2x128xbf16> to vector<2x128xbf16>
    %124 = vector.shape_cast %121 : vector<2x128xbf16> to vector<1x2x128xbf16>
    tpu.vector_store %arg3[%c3_42, %c0_43, %c0_44], %124 {strides = array<i32>} : memref<4x2x256xbf16, #tpu.memory_space<vmem>>, vector<1x2x128xbf16>,
    %125 = vector.extract_strided_slice %119 {offsets = [0, 128], sizes = [2, 128], strides = [1, 1]} : vector<2x256xf32> to vector<2x128xf32>
    %126 = arith.truncf %125 : vector<2x128xf32> to vector<2x128xbf16>
    %c0_45 = arith.constant 0 : index
    %c0_46 = arith.constant 0 : index
    %c128_47 = arith.constant 128 : index
    %127 = vector.load %arg3[%c0_45, %c0_46, %c128_47] : memref<4x2x256xbf16, #tpu.memory_space<vmem>>, vector<1x2x128xbf16>
    %128 = vector.shape_cast %127 : vector<1x2x128xbf16> to vector<2x128xbf16>
    %129 = vector.shape_cast %126 : vector<2x128xbf16> to vector<1x2x128xbf16>
    tpu.vector_store %arg3[%c0_45, %c0_46, %c128_47], %129 {strides = array<i32>} : memref<4x2x256xbf16, #tpu.memory_space<vmem>>, vector<1x2x128xbf16>,
    return
  }
  func.func @transform_0(%arg0: i32) -> (i32, i32, i32) {
    %c0_i32 = arith.constant 0 : i32
    %c0_i32_0 = arith.constant 0 : i32
    %c0_i32_1 = arith.constant 0 : i32
    return %c0_i32, %arg0, %c0_i32_0 : i32, i32, i32
  }
  func.func @transform_1(%arg0: i32) -> (i32, i32) {
    %c0_i32 = arith.constant 0 : i32
    %c0_i32_0 = arith.constant 0 : i32
    %c0_i32_1 = arith.constant 0 : i32
    return %c0_i32, %c0_i32_0 : i32, i32
  }
  func.func @transform_2(%arg0: i32) -> (i32, i32, i32) {
    %c0_i32 = arith.constant 0 : i32
    %c0_i32_0 = arith.constant 0 : i32
    %c0_i32_1 = arith.constant 0 : i32
    return %c0_i32, %arg0, %c0_i32_0 : i32, i32, i32
  }
}

</mosaic_0001>

<bundles_post_ra>
// kernel: _lambda_.7
= control target key start
LH: loop header
LB: loop body
LE: loop exit
PB: predicated region body
PF: predicated region fallthrough
CT: control target
= control target key end

     0   :  { %v70_v9 = vlaneseq  ;;  %v960_v15 = vmov 1966171168   ;;  %v961_v17 = vmov 1983009808   ;;  %s1260_s0 = inlined_call_operand.vmem [shape: bf16[4,2,256], index: 0, kind: input, shape index: {}]   ;;  %s1261_s1 = inlined_call_operand.vmem [shape: bf16[256,128], index: 1, kind: input, shape index: {}]   ;;  %s1262_s2 = inlined_call_operand.vmem [shape: f32[1,128], index: 2, kind: input, shape index: {}]   ;;  %s1263_s3 = inlined_call_operand.vmem [shape: f32[1,128], index: 3, kind: input, shape index: {}]   ;;  %s1264_s4 = inlined_call_operand.vmem [shape: bf16[256,128], index: 4, kind: input, shape index: {}]   ;;  %s1265_s5 = inlined_call_operand.vmem [shape: f32[1,128], index: 5, kind: input, shape index: {}]   ;;  %s1266_s6 = inlined_call_operand.hbm [shape: f32[2,128], index: 6, kind: output, shape index: {}]  }
   0x1   :  { %v1001_v0 = vld [vmem:[%s1261_s1 + $0x40] sm:$0xff]   ;;  %v1013_v2 = vld [vmem:[%s1261_s1 + $0x48] sm:$0xff]   ;;  %v1027_v4 = vld [vmem:[%s1261_s1 + $0x50] sm:$0xff]   ;;  %v68_v16 = vunpack.c.l.s4 %v960_v15  ;;  %v479_v18 = vunpack.c.l.s4 %v961_v17 }
   0x2   :  { %v1006_v1 = vld [vmem:[%s1261_s1] sm:$0xff]   ;;  %773 = vmatprep.subr.bf16.mxu0 %v1001_v0  ;;  %795 = vmatprep.subr.bf16.mxu1 %v1001_v0  ;;  %v1020_v3 = vld [vmem:[%s1261_s1 + $0x8] sm:$0xff]   ;;  %v1034_v5 = vld [vmem:[%s1261_s1 + $0x10] sm:$0xff]   ;;  %v71_v12 = vshrl.u32 %v70_v9, 7 }
   0x3   :  { %774 = vmatpush3.bf16.msra.mxu0 %v1006_v1  ;;  %796 = vmatpush3.bf16.msra.mxu1 %v1006_v1  ;;  %v1041_v6 = vld [vmem:[%s1261_s1 + $0x58] sm:$0xff]   ;;  %v1055_v8 = vld [vmem:[%s1261_s1 + $0x60] sm:$0xff]   ;;  %v1069_v11 = vld [vmem:[%s1261_s1 + $0x68] sm:$0xff]   ;;  %v69_v22 = vunpack.c.0.s8 %v68_v16  ;;  %v480_v24 = vunpack.c.0.s8 %v479_v18 }
   0x4   :  { %775 = vmatprep.subr.bf16.mxu0 %v1013_v2  ;;  %797 = vmatprep.subr.bf16.mxu1 %v1013_v2  ;;  %v1048_v7 = vld [vmem:[%s1261_s1 + $0x18] sm:$0xff]   ;;  %v1062_v10 = vld [vmem:[%s1261_s1 + $0x20] sm:$0xff]   ;;  %v1074_v13 = vld [vmem:[%s1261_s1 + $0x28] sm:$0xff]  }
   0x5   :  { %v27_v14 = vld [vmem:[%s1260_s0] sm:$0x3]  ;;  %v753_v19 = vld [vmem:[%s1260_s0 + $0x2] sm:$0x3]  ;;  %v754_v20 = vld [vmem:[%s1260_s0 + $0x4] sm:$0x3]  ;;  %v1099_v28 = vsub.s32 %v69_v22, %v71_v12  ;;  %v1101_v29 = vsub.s32 %v480_v24, %v71_v12 }
   0x6   :  { %v1088_v21 = vld [vmem:[%s1261_s1 + $0x70] sm:$0xff]   ;;  %v476_v23 = vunpack.c.l.bf16 %v27_v14  ;;  %v493_v25 = vunpack.c.l.bf16 %v753_v19  ;;  %v510_v26 = vunpack.c.l.bf16 %v754_v20  ;;  %v1106_v30 = vld [vmem:[%s1261_s1 + $0x78] sm:$0xff]   ;;  %v1111_v31 = vld [vmem:[%s1260_s0 + $0x6] sm:$0x3] }
   0x7   :  { %776 = vmatpush3.bf16.msra.mxu0 %v1020_v3  ;;  %798 = vmatpush3.bf16.msra.mxu1 %v1020_v3  ;;  %v1097_v27 = vld [vmem:[%s1261_s1 + $0x30] sm:$0xff]   ;;  %v73_v32 = vrot.slane %v27_v14, %v1099_v28  ;;  %v248_v34 = vrot.slane %v753_v19, %v1099_v28  ;;  %v901_v37 = vld [vmem:[%s1261_s1 + $0x38] sm:$0xff]   ;;  %v320_v40 = vrot.slane %v754_v20, %v1099_v28 }
   0x8   :  { %777 = vmatprep.subr.bf16.mxu0 %v1027_v4  ;;  %799 = vmatprep.subr.bf16.mxu1 %v1027_v4  ;;  %v1117_v33 = vrot.slane %v476_v23, %v1101_v29  ;;  %v1123_v35 = vrot.slane %v493_v25, %v1101_v29  ;;  %v1126_v36 = vrot.slane %v510_v26, %v1101_v29 }
   0x9   :  { %v74_v38 = vcombine.high %v73_v32, %v73_v32  ;;  %v249_v39 = vcombine.high %v248_v34, %v248_v34  ;;  %v392_v43 = vrot.slane %v1111_v31, %v1099_v28 }
   0xb   :  { %778 = vmatpush3.bf16.msra.mxu0 %v1034_v5  ;;  %800 = vmatpush3.bf16.msra.mxu1 %v1034_v5  ;;  %v88_v41 = vrot.slane %v74_v38, %v1099_v28  ;;  %v263_v42 = vrot.slane %v249_v39, %v1099_v28 }
   0xc   :  { %779 = vmatprep.subr.bf16.mxu0 %v1041_v6  ;;  %801 = vmatprep.subr.bf16.mxu1 %v1041_v6 }
   0xf   :  { %780 = vmatpush3.bf16.msra.mxu0 %v1048_v7  ;;  %802 = vmatpush3.bf16.msra.mxu1 %v1048_v7 }
  0x10   :  { %781 = vmatprep.subr.bf16.mxu0 %v1055_v8  ;;  %803 = vmatprep.subr.bf16.mxu1 %v1055_v8 }
  0x13   :  { %782 = vmatpush3.bf16.msra.mxu0 %v1062_v10  ;;  %804 = vmatpush3.bf16.msra.mxu1 %v1062_v10 }
  0x14   :  { %783 = vmatprep.subr.bf16.mxu0 %v1069_v11  ;;  %805 = vmatprep.subr.bf16.mxu1 %v1069_v11 }
  0x17   :  { %784 = vmatpush3.bf16.msra.mxu0 %v1074_v13  ;;  %806 = vmatpush3.bf16.msra.mxu1 %v1074_v13 }
  0x18   :  { %785 = vmatprep.subr.bf16.mxu0 %v1088_v21  ;;  %807 = vmatprep.subr.bf16.mxu1 %v1088_v21 }
  0x1b   :  { %786 = vmatpush3.bf16.msra.mxu0 %v1097_v27  ;;  %808 = vmatpush3.bf16.msra.mxu1 %v1097_v27 }
  0x1c   :  { %787 = vmatprep.subr.bf16.mxu0 %v1106_v30  ;;  %809 = vmatprep.subr.bf16.mxu1 %v1106_v30 }
  0x1d   :  { %11 = vsyncpa [#allocation3], 0  ;;  %219 = vmatprep.mubr.bf16.mxu0 %v88_v41  ;;  %298 = vmatprep.mubr.bf16.mxu1 %v263_v42  ;;  %v321_v44 = vcombine.high %v320_v40, %v320_v40  ;;  %v393_v45 = vcombine.high %v392_v43, %v392_v43  ;;  %v81_v46 = vrot.slane %v73_v32, %v1099_v28  ;;  %v735_v54 = vld [vmem:[%s1262_s2] ss:$0 sm:$0xff]  ;;  %vm235_vm0 = vcmask 1041408   ;;  %v906_v32 = vld [vmem:[%s1264_s4 + $0x50] sm:$0xff]  }
  0x1e   :  { %v256_v47 = vrot.slane %v248_v34, %v1099_v28  ;;  %v328_v50 = vrot.slane %v320_v40, %v1099_v28  ;;  %v400_v51 = vrot.slane %v392_v43, %v1099_v28  ;;  %v902_v26 = vld [vmem:[%s1264_s4 + $0x40] sm:$0xff]   ;;  %v907_v34 = vld [vmem:[%s1264_s4 + $0x10] sm:$0xff]   ;;  %v909_v38 = vld [vmem:[%s1264_s4 + $0x18] sm:$0xff]   ;;  %v527_v40 = vunpack.c.l.bf16 %v1111_v31  ;;  %s962_s18 = smov [#allocation2]  }
  0x1f   :  { %788 = vmatpush3.bf16.msra.mxu0 %v901_v37  ;;  %810 = vmatpush3.bf16.msra.mxu1 %v901_v37  ;;  %v335_v48 = vrot.slane %v321_v44, %v1099_v28  ;;  %v407_v49 = vrot.slane %v393_v45, %v1099_v28  ;;  %v904_v28 = vld [vmem:[%s1264_s4 + $0x48] sm:$0xff]   ;;  %v910_v39 = vld [vmem:[%s1264_s4 + $0x60] sm:$0xff]   ;;  %v914_v31 = vld [vmem:[%s1264_s4 + $0x70] sm:$0xff]   ;;  %s727_s19 = sshll.u32 %s962_s18, 4  ;;  %s728_s19 = int_to_ptr.vmem [resolvable:$true] %s727_s19 }
  0x20   :  { %817 = vmatprep.subr.bf16.mxu0 %v1001_v0  ;;  %839 = vmatprep.subr.bf16.mxu1 %v1001_v0  ;;  %v911_v41 = vld [vmem:[%s1264_s4 + $0x20] sm:$0xff]   ;;  %v912_v42 = vld [vmem:[%s1264_s4 + $0x68] sm:$0xff]   ;;  %v535_v44 = vrot.slane %v527_v40, %v1101_v29  ;;  %v915_v45 = vld [vmem:[%s1264_s4 + $0x30] sm:$0xff]   ;;  %s936_s20 = scalar_lea.vmem %s728_s19, 32  ;;  %p941_p1 = scmp.lt.s32.totalorder %s728_s19, %s728_s19 }
  0x21   :  { %v913_v43 = vld [vmem:[%s1264_s4 + $0x28] sm:$0xff]   ;;  %v917_v29 = vld [vmem:[%s1264_s4 + $0x38] sm:$0xff]   ;;  %p937_p0 = scmp.ne.s32.totalorder %s728_s19, %s936_s20  ;;  %p942_p2 = scmp.lt.s32.totalorder %s936_s20, %s936_s20 }
  0x22   :  { %220 = vmatmul.mubr.bf16.vlgmr.msra.gmra.mrb[0].mxu0 %v81_v46  ;;  %299 = vmatmul.mubr.bf16.vlgmr.msra.gmra.mrb[0].mxu1 %v256_v47  ;;  %v916_v46 = vld [vmem:[%s1264_s4 + $0x78] sm:$0xff]  }
  0x23   :  { %818 = vmatpush3.bf16.msra.mxu0 %v1006_v1  ;;  %840 = vmatpush3.bf16.msra.mxu1 %v1006_v1  ;;  %v752_v1 = vld [vmem:[%s1263_s3] ss:$0 sm:$0xff]  ;;  %p943_p3 = por %p942_p2, %p941_p1 }
  0x24   :  { %819 = vmatprep.subr.bf16.mxu0 %v1013_v2  ;;  %841 = vmatprep.subr.bf16.mxu1 %v1013_v2 }
  0x25   :  { %370 = vmatprep.mubr.bf16.mxu0 %v335_v48  ;;  %442 = vmatprep.mubr.bf16.mxu1 %v407_v49  ;;  %p944_p4 = pnand %p943_p3, %p937_p0 }
  0x27   :  { %820 = vmatpush3.bf16.msra.mxu0 %v1020_v3  ;;  %842 = vmatpush3.bf16.msra.mxu1 %v1020_v3 }
  0x28   :  { %821 = vmatprep.subr.bf16.mxu0 %v1027_v4  ;;  %843 = vmatprep.subr.bf16.mxu1 %v1027_v4 }
  0x2b   :  { %822 = vmatpush3.bf16.msra.mxu0 %v1034_v5  ;;  %844 = vmatpush3.bf16.msra.mxu1 %v1034_v5 }
  0x2c   :  { %823 = vmatprep.subr.bf16.mxu0 %v1041_v6  ;;  %845 = vmatprep.subr.bf16.mxu1 %v1041_v6 }
  0x2f   :  { %824 = vmatpush3.bf16.msra.mxu0 %v1048_v7  ;;  %846 = vmatpush3.bf16.msra.mxu1 %v1048_v7 }
  0x30   :  { %825 = vmatprep.subr.bf16.mxu0 %v1055_v8  ;;  %847 = vmatprep.subr.bf16.mxu1 %v1055_v8 }
  0x33   :  { %826 = vmatpush3.bf16.msra.mxu0 %v1062_v10  ;;  %848 = vmatpush3.bf16.msra.mxu1 %v1062_v10 }
  0x34   :  { %827 = vmatprep.subr.bf16.mxu0 %v1069_v11  ;;  %849 = vmatprep.subr.bf16.mxu1 %v1069_v11 }
  0x37   :  { %828 = vmatpush3.bf16.msra.mxu0 %v1074_v13  ;;  %850 = vmatpush3.bf16.msra.mxu1 %v1074_v13 }
  0x38   :  { %829 = vmatprep.subr.bf16.mxu0 %v1088_v21  ;;  %851 = vmatprep.subr.bf16.mxu1 %v1088_v21 }
  0x3b   :  { %830 = vmatpush3.bf16.msra.mxu0 %v1097_v27  ;;  %852 = vmatpush3.bf16.msra.mxu1 %v1097_v27  ;;  %v903_v27 = vld [vmem:[%s1264_s4] sm:$0xff]  }
  0x3c   :  { %831 = vmatprep.subr.bf16.mxu0 %v1106_v30  ;;  %853 = vmatprep.subr.bf16.mxu1 %v1106_v30  ;;  %v905_v30 = vld [vmem:[%s1264_s4 + $0x8] sm:$0xff]  }
  0x3f   :  { %832 = vmatpush3.bf16.msra.mxu0 %v901_v37  ;;  %854 = vmatpush3.bf16.msra.mxu1 %v901_v37  ;;  %v908_v37 = vld [vmem:[%s1264_s4 + $0x58] sm:$0xff]  }
  0x40   :  { %861 = vmatprep.subr.bf16.mxu0 %v902_v26 }
  0x42   :  { %371 = vmatmul.mubr.bf16.vlgmr.msra.gmra.mrb[4].mxu0 %v328_v50  ;;  %443 = vmatmul.mubr.bf16.vlgmr.msra.gmra.mrb[4].mxu1 %v400_v51 }
  0x43   :  { %862 = vmatpush3.bf16.msra.mxu0 %v903_v27 }
  0x44   :  { %863 = vmatprep.subr.bf16.mxu0 %v904_v28 }
  0x47   :  { %864 = vmatpush3.bf16.msra.mxu0 %v905_v30 }
  0x48   :  { %865 = vmatprep.subr.bf16.mxu0 %v906_v32 }
  0x4b   :  { %866 = vmatpush3.bf16.msra.mxu0 %v907_v34 }
  0x4c   :  { %867 = vmatprep.subr.bf16.mxu0 %v908_v37 }
  0x4f   :  { %868 = vmatpush3.bf16.msra.mxu0 %v909_v38 }
  0x50   :  { %869 = vmatprep.subr.bf16.mxu0 %v910_v39 }
  0x53   :  { %870 = vmatpush3.bf16.msra.mxu0 %v911_v41 }
  0x54   :  { %871 = vmatprep.subr.bf16.mxu0 %v912_v42 }
  0x57   :  { %872 = vmatpush3.bf16.msra.mxu0 %v913_v43 }
  0x58   :  { %873 = vmatprep.subr.bf16.mxu0 %v914_v31 }
  0x5b   :  { %874 = vmatpush3.bf16.msra.mxu0 %v915_v45 }
  0x5c   :  { %875 = vmatprep.subr.bf16.mxu0 %v916_v46 }
  0x5f   :  { %876 = vmatpush3.bf16.msra.mxu0 %v917_v29 }
  0xf5   :  { %v789_v52 = vpop.f32.mrb[0].mxu0  ;;  %v811_v53 = vpop.f32.mrb[0].mxu1 }
  0xf6   :  { %v790_v55 = vpop.f32.mrb[1].mxu0  ;;  %v812_v56 = vpop.f32.mrb[1].mxu1 }
  0xf7   :  { %v791_v57 = vadd.f32 %v790_v55, %v789_v52  ;;  %v792_v58 = vpop.f32.mrb[2].mxu0  ;;  %v813_v59 = vadd.f32 %v812_v56, %v811_v53  ;;  %v814_v60 = vpop.f32.mrb[2].mxu1 }
  0xf8   :  { %v793_v61 = vpop.f32.mrb[3].mxu0  ;;  %v815_v62 = vpop.f32.mrb[3].mxu1 }
  0xf9   :  { %v222_v63 = vadd.f32 %v791_v57, %v735_v54  ;;  %v301_v0 = vadd.f32 %v813_v59, %v735_v54 }
  0xfb   :  { %918 = vtanh.f32 %v222_v63 }
  0xfc   :  { %920 = vtanh.f32 %v301_v0 }
 0x105   :  { %v919_v2 = vpop.eup %918 }
 0x106   :  { %v921_v3 = vpop.eup %920  ;;  %v234_v4 = vmul.f32 %v919_v2, %v752_v1 }
 0x107   :  { %v307_v5 = vmul.f32 %v921_v3, %v752_v1 }
 0x108   :  { %v236_v6 = vsel %vm235_vm0, %v234_v4, 0.0 }
 0x109   :  { %237 = vadd.xlane.f32.xlu0 %v236_v6  ;;  %v308_v7 = vsel %vm235_vm0, %v307_v5, 0.0  ;;  %v485_v5 = vcombine.high %v1117_v33, %v1117_v33  ;;  %v502_v6 = vcombine.high %v1123_v35, %v1123_v35 }
 0x10d   :  { %309 = vadd.xlane.f32.xlu0 %v308_v7 }
 0x115   :  { %v833_v8 = vpop.f32.mrb[4].mxu0  ;;  %v855_v9 = vpop.f32.mrb[4].mxu1 }
 0x116   :  { %v834_v10 = vpop.f32.mrb[5].mxu0  ;;  %v856_v11 = vpop.f32.mrb[5].mxu1 }
 0x117   :  { %v835_v12 = vadd.f32 %v834_v10, %v833_v8  ;;  %v836_v13 = vpop.f32.mrb[6].mxu0  ;;  %v857_v14 = vadd.f32 %v856_v11, %v855_v9  ;;  %v858_v15 = vpop.f32.mrb[6].mxu1  ;;  %v519_v11 = vcombine.high %v1126_v36, %v1126_v36 }
 0x118   :  { %v837_v16 = vpop.f32.mrb[7].mxu0  ;;  %v859_v17 = vpop.f32.mrb[7].mxu1  ;;  %v536_v15 = vcombine.high %v535_v44, %v535_v44 }
 0x119   :  { %v373_v18 = vadd.f32 %v835_v12, %v735_v54  ;;  %v445_v19 = vadd.f32 %v857_v14, %v735_v54 }
 0x11b   :  { %922 = vtanh.f32 %v373_v18 }
 0x11c   :  { %924 = vtanh.f32 %v445_v19 }
 0x125   :  { %v923_v20 = vpop.eup %922 }
 0x126   :  { %v925_v21 = vpop.eup %924  ;;  %v379_v22 = vmul.f32 %v923_v20, %v752_v1 }
 0x127   :  { %v451_v23 = vmul.f32 %v925_v21, %v752_v1 }
 0x128   :  { %v380_v24 = vsel %vm235_vm0, %v379_v22, 0.0 }
 0x129   :  { %381 = vadd.xlane.f32.xlu1 %v380_v24  ;;  %v452_v25 = vsel %vm235_vm0, %v451_v23, 0.0 }
 0x12d   :  { %453 = vadd.xlane.f32.xlu1 %v452_v25 }
 0x196   :  { %v238_v47 = vpop.xlane.xlu0 %237 }
 0x19a   :  { %v310_v48 = vpop.xlane.xlu0 %309 }
 0x19b   :  { %v455_v50 = vmax.f32 %v238_v47, %v310_v48 }
 0x1b6   :  { %v382_v49 = vpop.xlane.xlu1 %381 }
 0x1b7   :  { %v456_v51 = vmax.f32 %v455_v50, %v382_v49 }
 0x1ba   :  { %v454_v52 = vpop.xlane.xlu1 %453 }
 0x1bb   :  { %v457_v53 = vmax.f32 %v456_v51, %v454_v52 }
 0x1bd   :  { %v458_v54 = vsub.f32 %v238_v47, %v457_v53  ;;  %v461_v55 = vsub.f32 %v310_v48, %v457_v53  ;;  %v464_v56 = vsub.f32 %v382_v49, %v457_v53  ;;  %v467_v57 = vsub.f32 %v454_v52, %v457_v53 }
 0x1bf   :  { %v459_v58 = vmul.f32 1.442695, %v458_v54  ;;  %v462_v59 = vmul.f32 1.442695, %v461_v55  ;;  %v465_v60 = vmul.f32 1.442695, %v464_v56 }
 0x1c0   :  { %v468_v61 = vmul.f32 1.442695, %v467_v57 }
 0x1c1   :  { %926 = vpow2.f32 %v459_v58 }
 0x1c2   :  { %928 = vpow2.f32 %v462_v59 }
 0x1c3   :  { %930 = vpow2.f32 %v465_v60 }
 0x1c4   :  { %932 = vpow2.f32 %v468_v61 }
 0x1cb   :  { %v927_v62 = vpop.eup %926 }
 0x1cc   :  { %v929_v63 = vpop.eup %928 }
 0x1cd   :  { %v470_v0 = vadd.f32 %v929_v63, %v927_v62  ;;  %v931_v1 = vpop.eup %930 }
 0x1ce   :  { %v933_v3 = vpop.eup %932 }
 0x1cf   :  { %v471_v2 = vadd.f32 %v931_v1, %v470_v0 }
 0x1d1   :  { %v472_v4 = vadd.f32 %v933_v3, %v471_v2 }
 0x1d3   :  { %934 = vrcp.f32 %v472_v4 }
 0x1dd   :  { %v935_v7 = vpop.eup %934 }
 0x1de   :  { %v475_v8 = vmul.f32 %v935_v7, %v927_v62  ;;  %v492_v9 = vmul.f32 %v935_v7, %v929_v63  ;;  %v509_v10 = vmul.f32 %v935_v7, %v931_v1  ;;  %v526_v14 = vmul.f32 %v935_v7, %v933_v3 }
 0x1e0   :  { %v489_v12 = vmul.f32 %v485_v5, %v475_v8  ;;  %v506_v13 = vmul.f32 %v502_v6, %v492_v9  ;;  %v488_v16 = vmul.f32 %v1117_v33, %v475_v8  ;;  %v505_v17 = vmul.f32 %v1123_v35, %v492_v9  ;;  %v756_v33 = vld [vmem:[%s1265_s5] ss:$0 sm:$0xff] }
 0x1e1   :  { %v523_v19 = vmul.f32 %v519_v11, %v509_v10  ;;  %v522_v21 = vmul.f32 %v1126_v36, %v509_v10  ;;  %v540_v23 = vmul.f32 %v536_v15, %v526_v14  ;;  %v539_v25 = vmul.f32 %v535_v44, %v526_v14 }
 0x1e2   :  { %v508_v18 = vadd.f32 %v506_v13, %v489_v12  ;;  %v507_v20 = vadd.f32 %v505_v17, %v488_v16 }
 0x1e4   :  { %v525_v22 = vadd.f32 %v523_v19, %v508_v18  ;;  %v524_v24 = vadd.f32 %v522_v21, %v507_v20 }
 0x1e6   :  { %v542_v26 = vadd.f32 %v540_v23, %v525_v22  ;;  %v541_v27 = vadd.f32 %v539_v25, %v524_v24 }
 0x1e8   :  { %v544_v28 = vpack.c.bf16 %v542_v26, %v542_v26  ;;  %v543_v30 = vpack.c.bf16 %v541_v27, %v541_v27 }
 0x1ea   :  { %712 = vmatprep.mubr.bf16.mxu0 %v544_v28 }
 0x1eb   :  { %713 = vmatmul.mubr.bf16.vlgmr.msra.gmra.mrb[8].mxu0 %v543_v30 }
 0x2be   :  { %v877_v32 = vpop.f32.mrb[8].mxu0 }
 0x2bf   :  { %v878_v34 = vpop.f32.mrb[9].mxu0 }
 0x2c0   :  { %v879_v35 = vadd.f32 %v878_v34, %v877_v32  ;;  %v880_v36 = vpop.f32.mrb[10].mxu0 }
 0x2c1   :  { %v881_v37 = vpop.f32.mrb[11].mxu0 }
 0x2c2   :  { %v715_v38 = vadd.f32 %v879_v35, %v756_v33 }
 0x2c4   :  { %720 = vst [vmem:[#allocation2] sm:$0x3] %v715_v38 }
 0x2c5   :  { %947 = shalt.err (!%p944_p4)
}
 0x2c6   :  { %s948_s23 = scalar_lea.hbm %s1266_s6, 32 }
 0x2c7   :  { %p949_p5 = scmp.ne.s32.totalorder %s1266_s6, %s948_s23  ;;  %p952_p6 = scmp.lt.u32.totalorder %s948_s23, %s1266_s6 }
 0x2c9   :  { %p954_p7 = pnand %p952_p6, %p949_p5 }
 0x2cb   :  { %957 = shalt.err (!%p954_p7)
}
 0x2cc   :  { %730 = dma.vmem_to_hbm [thread:$0]  %s728_s19, 32, %s1266_s6, [#allocation3]  }
 0x2cd   :  { %958 = dma.done.wait [#allocation3], 32  }
 0x2ce   :  { %959 = vsyncadd [#allocation3], 4294967264 }
 0x2cf   :  { %734 = vsyncpa [#allocation3], 1 }

// kernel: _lambda_.5
= control target key start
LH: loop header
LB: loop body
LE: loop exit
PB: predicated region body
PF: predicated region fallthrough
CT: control target
= control target key end

     0   :  { %s2880_s1 = inlined_call_operand.vmem [shape: bf16[256,128], index: 1, kind: input, shape index: {}]   ;;  %s2881_s0 = inlined_call_operand.vmem [shape: bf16[8,8,256], index: 0, kind: input, shape index: {}]   ;;  %s2882_s2 = inlined_call_operand.vmem [shape: f32[1,128], index: 2, kind: input, shape index: {}]   ;;  %s2883_s3 = inlined_call_operand.vmem [shape: f32[1,128], index: 3, kind: input, shape index: {}]   ;;  %s2884_s4 = inlined_call_operand.vmem [shape: bf16[256,1024], index: 4, kind: input, shape index: {}]   ;;  %s2885_s5 = inlined_call_operand.vmem [shape: f32[1,1024], index: 5, kind: input, shape index: {}]   ;;  %s2886_s6 = inlined_call_operand.vmem [shape: f32[8,1024], index: 6, kind: output, shape index: {}]  }
   0x1   :  { %v2122_v0 = vld [vmem:[%s2880_s1 + $0x40] sm:$0xff]   ;;  %v2134_v2 = vld [vmem:[%s2880_s1 + $0x48] sm:$0xff]   ;;  %v2148_v4 = vld [vmem:[%s2880_s1 + $0x50] sm:$0xff]  }
   0x2   :  { %v2127_v1 = vld [vmem:[%s2880_s1] sm:$0xff]   ;;  %1842 = vmatprep.subr.bf16.mxu0 %v2122_v0  ;;  %1864 = vmatprep.subr.bf16.mxu1 %v2122_v0  ;;  %v2141_v3 = vld [vmem:[%s2880_s1 + $0x8] sm:$0xff]   ;;  %v2155_v5 = vld [vmem:[%s2880_s1 + $0x10] sm:$0xff]  }
   0x3   :  { %1843 = vmatpush3.bf16.msra.mxu0 %v2127_v1  ;;  %1865 = vmatpush3.bf16.msra.mxu1 %v2127_v1  ;;  %v2162_v6 = vld [vmem:[%s2880_s1 + $0x58] sm:$0xff]   ;;  %v2176_v8 = vld [vmem:[%s2880_s1 + $0x60] sm:$0xff]   ;;  %v2190_v10 = vld [vmem:[%s2880_s1 + $0x68] sm:$0xff]  }
   0x4   :  { %1844 = vmatprep.subr.bf16.mxu0 %v2134_v2  ;;  %1866 = vmatprep.subr.bf16.mxu1 %v2134_v2  ;;  %v2169_v7 = vld [vmem:[%s2880_s1 + $0x18] sm:$0xff]   ;;  %v2183_v9 = vld [vmem:[%s2880_s1 + $0x20] sm:$0xff]   ;;  %v2200_v12 = vld [vmem:[%s2881_s0 + $0x8] sm:$0xff] }
   0x5   :  { %v2195_v11 = vld [vmem:[%s2881_s0] sm:$0xff]  ;;  %v1695_v14 = vcombine.high %v2200_v12, %v2200_v12  ;;  %v2211_v15 = vld [vmem:[%s2880_s1 + $0x28] sm:$0xff]   ;;  %v2218_v16 = vld [vmem:[%s2880_s1 + $0x70] sm:$0xff]   ;;  %v1694_v21 = vcombine.low %v2200_v12, %v2200_v12 }
   0x6   :  { %v1675_v13 = vcombine.high %v2195_v11, %v2195_v11  ;;  %v2225_v17 = vld [vmem:[%s2880_s1 + $0x30] sm:$0xff]   ;;  %v2232_v18 = vld [vmem:[%s2880_s1 + $0x78] sm:$0xff]   ;;  %v1674_v20 = vcombine.low %v2195_v11, %v2195_v11  ;;  %v2300_v28 = vld [vmem:[%s2881_s0 + $0x20] sm:$0xff] }
   0x7   :  { %1845 = vmatpush3.bf16.msra.mxu0 %v2141_v3  ;;  %1867 = vmatpush3.bf16.msra.mxu1 %v2141_v3  ;;  %v2239_v19 = vld [vmem:[%s2880_s1 + $0x38] sm:$0xff]   ;;  %v2250_v22 = vld [vmem:[%s2881_s0 + $0x10] sm:$0xff]  ;;  %v2305_v29 = vld [vmem:[%s2881_s0 + $0x28] sm:$0xff]  ;;  %v1704_v30 = vcombine.high %v2300_v28, %v2300_v28  ;;  %v1703_v32 = vcombine.low %v2300_v28, %v2300_v28 }
   0x8   :  { %1846 = vmatprep.subr.bf16.mxu0 %v2148_v4  ;;  %1868 = vmatprep.subr.bf16.mxu1 %v2148_v4  ;;  %v2255_v23 = vld [vmem:[%s2881_s0 + $0x18] sm:$0xff]  ;;  %v1698_v24 = vcombine.high %v2250_v22, %v2250_v22  ;;  %v1697_v26 = vcombine.low %v2250_v22, %v2250_v22  ;;  %v1707_v31 = vcombine.high %v2305_v29, %v2305_v29  ;;  %v2350_v34 = vld [vmem:[%s2881_s0 + $0x30] sm:$0xff]  ;;  %v2402_v42 = vld [vmem:[%s2882_s2] ss:$0 sm:$0xff] }
   0x9   :  { %200 = vmatprep.mubr.bf16.mxu0 %v1675_v13  ;;  %259 = vmatprep.mubr.bf16.mxu1 %v1695_v14  ;;  %v1701_v25 = vcombine.high %v2255_v23, %v2255_v23  ;;  %v1700_v27 = vcombine.low %v2255_v23, %v2255_v23  ;;  %v1706_v33 = vcombine.low %v2305_v29, %v2305_v29  ;;  %v2355_v35 = vld [vmem:[%s2881_s0 + $0x38] sm:$0xff]  ;;  %v2409_v53 = vld [vmem:[%s2883_s3] ss:$0 sm:$0xff] }
   0xa   :  { %v1710_v36 = vcombine.high %v2350_v34, %v2350_v34  ;;  %v1713_v37 = vcombine.high %v2355_v35, %v2355_v35  ;;  %v1709_v38 = vcombine.low %v2350_v34, %v2350_v34  ;;  %v1712_v39 = vcombine.low %v2355_v35, %v2355_v35 }
   0xb   :  { %1847 = vmatpush3.bf16.msra.mxu0 %v2155_v5  ;;  %1869 = vmatpush3.bf16.msra.mxu1 %v2155_v5 }
   0xc   :  { %1848 = vmatprep.subr.bf16.mxu0 %v2162_v6  ;;  %1870 = vmatprep.subr.bf16.mxu1 %v2162_v6 }
   0xf   :  { %1849 = vmatpush3.bf16.msra.mxu0 %v2169_v7  ;;  %1871 = vmatpush3.bf16.msra.mxu1 %v2169_v7 }
  0x10   :  { %1850 = vmatprep.subr.bf16.mxu0 %v2176_v8  ;;  %1872 = vmatprep.subr.bf16.mxu1 %v2176_v8 }
  0x13   :  { %1851 = vmatpush3.bf16.msra.mxu0 %v2183_v9  ;;  %1873 = vmatpush3.bf16.msra.mxu1 %v2183_v9 }
  0x14   :  { %1852 = vmatprep.subr.bf16.mxu0 %v2190_v10  ;;  %1874 = vmatprep.subr.bf16.mxu1 %v2190_v10 }
  0x17   :  { %1853 = vmatpush3.bf16.msra.mxu0 %v2211_v15  ;;  %1875 = vmatpush3.bf16.msra.mxu1 %v2211_v15 }
  0x18   :  { %1854 = vmatprep.subr.bf16.mxu0 %v2218_v16  ;;  %1876 = vmatprep.subr.bf16.mxu1 %v2218_v16 }
  0x1b   :  { %1855 = vmatpush3.bf16.msra.mxu0 %v2225_v17  ;;  %1877 = vmatpush3.bf16.msra.mxu1 %v2225_v17 }
  0x1c   :  { %1856 = vmatprep.subr.bf16.mxu0 %v2232_v18  ;;  %1878 = vmatprep.subr.bf16.mxu1 %v2232_v18 }
  0x1f   :  { %1857 = vmatpush3.bf16.msra.mxu0 %v2239_v19  ;;  %1879 = vmatpush3.bf16.msra.mxu1 %v2239_v19 }
  0x20   :  { %1886 = vmatprep.subr.bf16.mxu0 %v2122_v0  ;;  %1908 = vmatprep.subr.bf16.mxu1 %v2122_v0 }
  0x22   :  { %201 = vmatmul.mubr.bf16.vlgmr.msra.gmra.mrb[0].mxu0 %v1674_v20  ;;  %260 = vmatmul.mubr.bf16.vlgmr.msra.gmra.mrb[0].mxu1 %v1694_v21 }
  0x23   :  { %1887 = vmatpush3.bf16.msra.mxu0 %v2127_v1  ;;  %1909 = vmatpush3.bf16.msra.mxu1 %v2127_v1 }
  0x24   :  { %1888 = vmatprep.subr.bf16.mxu0 %v2134_v2  ;;  %1910 = vmatprep.subr.bf16.mxu1 %v2134_v2 }
  0x25   :  { %312 = vmatprep.mubr.bf16.mxu0 %v1698_v24  ;;  %365 = vmatprep.mubr.bf16.mxu1 %v1701_v25 }
  0x27   :  { %1889 = vmatpush3.bf16.msra.mxu0 %v2141_v3  ;;  %1911 = vmatpush3.bf16.msra.mxu1 %v2141_v3 }
  0x28   :  { %1890 = vmatprep.subr.bf16.mxu0 %v2148_v4  ;;  %1912 = vmatprep.subr.bf16.mxu1 %v2148_v4 }
  0x2b   :  { %1891 = vmatpush3.bf16.msra.mxu0 %v2155_v5  ;;  %1913 = vmatpush3.bf16.msra.mxu1 %v2155_v5 }
  0x2c   :  { %1892 = vmatprep.subr.bf16.mxu0 %v2162_v6  ;;  %1914 = vmatprep.subr.bf16.mxu1 %v2162_v6 }
  0x2f   :  { %1893 = vmatpush3.bf16.msra.mxu0 %v2169_v7  ;;  %1915 = vmatpush3.bf16.msra.mxu1 %v2169_v7 }
  0x30   :  { %1894 = vmatprep.subr.bf16.mxu0 %v2176_v8  ;;  %1916 = vmatprep.subr.bf16.mxu1 %v2176_v8 }
  0x33   :  { %1895 = vmatpush3.bf16.msra.mxu0 %v2183_v9  ;;  %1917 = vmatpush3.bf16.msra.mxu1 %v2183_v9 }
  0x34   :  { %1896 = vmatprep.subr.bf16.mxu0 %v2190_v10  ;;  %1918 = vmatprep.subr.bf16.mxu1 %v2190_v10 }
  0x37   :  { %1897 = vmatpush3.bf16.msra.mxu0 %v2211_v15  ;;  %1919 = vmatpush3.bf16.msra.mxu1 %v2211_v15 }
  0x38   :  { %1898 = vmatprep.subr.bf16.mxu0 %v2218_v16  ;;  %1920 = vmatprep.subr.bf16.mxu1 %v2218_v16 }
  0x3b   :  { %1899 = vmatpush3.bf16.msra.mxu0 %v2225_v17  ;;  %1921 = vmatpush3.bf16.msra.mxu1 %v2225_v17 }
  0x3c   :  { %1900 = vmatprep.subr.bf16.mxu0 %v2232_v18  ;;  %1922 = vmatprep.subr.bf16.mxu1 %v2232_v18 }
  0x3f   :  { %1901 = vmatpush3.bf16.msra.mxu0 %v2239_v19  ;;  %1923 = vmatpush3.bf16.msra.mxu1 %v2239_v19 }
  0x40   :  { %1930 = vmatprep.subr.bf16.mxu0 %v2122_v0  ;;  %1952 = vmatprep.subr.bf16.mxu1 %v2122_v0 }
  0x42   :  { %313 = vmatmul.mubr.bf16.vlgmr.msra.gmra.mrb[4].mxu0 %v1697_v26  ;;  %366 = vmatmul.mubr.bf16.vlgmr.msra.gmra.mrb[4].mxu1 %v1700_v27 }
  0x43   :  { %1931 = vmatpush3.bf16.msra.mxu0 %v2127_v1  ;;  %1953 = vmatpush3.bf16.msra.mxu1 %v2127_v1 }
  0x44   :  { %1932 = vmatprep.subr.bf16.mxu0 %v2134_v2  ;;  %1954 = vmatprep.subr.bf16.mxu1 %v2134_v2 }
  0x45   :  { %418 = vmatprep.mubr.bf16.mxu0 %v1704_v30  ;;  %471 = vmatprep.mubr.bf16.mxu1 %v1707_v31 }
  0x47   :  { %1933 = vmatpush3.bf16.msra.mxu0 %v2141_v3  ;;  %1955 = vmatpush3.bf16.msra.mxu1 %v2141_v3 }
  0x48   :  { %1934 = vmatprep.subr.bf16.mxu0 %v2148_v4  ;;  %1956 = vmatprep.subr.bf16.mxu1 %v2148_v4 }
  0x4b   :  { %1935 = vmatpush3.bf16.msra.mxu0 %v2155_v5  ;;  %1957 = vmatpush3.bf16.msra.mxu1 %v2155_v5 }
  0x4c   :  { %1936 = vmatprep.subr.bf16.mxu0 %v2162_v6  ;;  %1958 = vmatprep.subr.bf16.mxu1 %v2162_v6 }
  0x4f   :  { %1937 = vmatpush3.bf16.msra.mxu0 %v2169_v7  ;;  %1959 = vmatpush3.bf16.msra.mxu1 %v2169_v7 }
  0x50   :  { %1938 = vmatprep.subr.bf16.mxu0 %v2176_v8  ;;  %1960 = vmatprep.subr.bf16.mxu1 %v2176_v8 }
  0x53   :  { %1939 = vmatpush3.bf16.msra.mxu0 %v2183_v9  ;;  %1961 = vmatpush3.bf16.msra.mxu1 %v2183_v9 }
  0x54   :  { %1940 = vmatprep.subr.bf16.mxu0 %v2190_v10  ;;  %1962 = vmatprep.subr.bf16.mxu1 %v2190_v10 }
  0x57   :  { %1941 = vmatpush3.bf16.msra.mxu0 %v2211_v15  ;;  %1963 = vmatpush3.bf16.msra.mxu1 %v2211_v15 }
  0x58   :  { %1942 = vmatprep.subr.bf16.mxu0 %v2218_v16  ;;  %1964 = vmatprep.subr.bf16.mxu1 %v2218_v16 }
  0x5b   :  { %1943 = vmatpush3.bf16.msra.mxu0 %v2225_v17  ;;  %1965 = vmatpush3.bf16.msra.mxu1 %v2225_v17 }
  0x5c   :  { %1944 = vmatprep.subr.bf16.mxu0 %v2232_v18  ;;  %1966 = vmatprep.subr.bf16.mxu1 %v2232_v18 }
  0x5f   :  { %1945 = vmatpush3.bf16.msra.mxu0 %v2239_v19  ;;  %1967 = vmatpush3.bf16.msra.mxu1 %v2239_v19 }
  0x60   :  { %1974 = vmatprep.subr.bf16.mxu0 %v2122_v0  ;;  %1996 = vmatprep.subr.bf16.mxu1 %v2122_v0 }
  0x62   :  { %419 = vmatmul.mubr.bf16.vlgmr.msra.gmra.mrb[8].mxu0 %v1703_v32  ;;  %472 = vmatmul.mubr.bf16.vlgmr.msra.gmra.mrb[8].mxu1 %v1706_v33 }
  0x63   :  { %1975 = vmatpush3.bf16.msra.mxu0 %v2127_v1  ;;  %1997 = vmatpush3.bf16.msra.mxu1 %v2127_v1 }
  0x64   :  { %1976 = vmatprep.subr.bf16.mxu0 %v2134_v2  ;;  %1998 = vmatprep.subr.bf16.mxu1 %v2134_v2 }
  0x65   :  { %524 = vmatprep.mubr.bf16.mxu0 %v1710_v36  ;;  %577 = vmatprep.mubr.bf16.mxu1 %v1713_v37 }
  0x67   :  { %1977 = vmatpush3.bf16.msra.mxu0 %v2141_v3  ;;  %1999 = vmatpush3.bf16.msra.mxu1 %v2141_v3 }
  0x68   :  { %1978 = vmatprep.subr.bf16.mxu0 %v2148_v4  ;;  %2000 = vmatprep.subr.bf16.mxu1 %v2148_v4 }
  0x6b   :  { %1979 = vmatpush3.bf16.msra.mxu0 %v2155_v5  ;;  %2001 = vmatpush3.bf16.msra.mxu1 %v2155_v5 }
  0x6c   :  { %1980 = vmatprep.subr.bf16.mxu0 %v2162_v6  ;;  %2002 = vmatprep.subr.bf16.mxu1 %v2162_v6 }
  0x6f   :  { %1981 = vmatpush3.bf16.msra.mxu0 %v2169_v7  ;;  %2003 = vmatpush3.bf16.msra.mxu1 %v2169_v7 }
  0x70   :  { %1982 = vmatprep.subr.bf16.mxu0 %v2176_v8  ;;  %2004 = vmatprep.subr.bf16.mxu1 %v2176_v8 }
  0x73   :  { %1983 = vmatpush3.bf16.msra.mxu0 %v2183_v9  ;;  %2005 = vmatpush3.bf16.msra.mxu1 %v2183_v9 }
  0x74   :  { %1984 = vmatprep.subr.bf16.mxu0 %v2190_v10  ;;  %2006 = vmatprep.subr.bf16.mxu1 %v2190_v10 }
  0x77   :  { %1985 = vmatpush3.bf16.msra.mxu0 %v2211_v15  ;;  %2007 = vmatpush3.bf16.msra.mxu1 %v2211_v15 }
  0x78   :  { %1986 = vmatprep.subr.bf16.mxu0 %v2218_v16  ;;  %2008 = vmatprep.subr.bf16.mxu1 %v2218_v16 }
  0x7b   :  { %1987 = vmatpush3.bf16.msra.mxu0 %v2225_v17  ;;  %2009 = vmatpush3.bf16.msra.mxu1 %v2225_v17 }
  0x7c   :  { %1988 = vmatprep.subr.bf16.mxu0 %v2232_v18  ;;  %2010 = vmatprep.subr.bf16.mxu1 %v2232_v18 }
  0x7f   :  { %1989 = vmatpush3.bf16.msra.mxu0 %v2239_v19  ;;  %2011 = vmatpush3.bf16.msra.mxu1 %v2239_v19 }
  0x82   :  { %525 = vmatmul.mubr.bf16.vlgmr.msra.gmra.mrb[12].mxu0 %v1709_v38  ;;  %578 = vmatmul.mubr.bf16.vlgmr.msra.gmra.mrb[12].mxu1 %v1712_v39 }
  0xf5   :  { %v1858_v40 = vpop.f32.mrb[0].mxu0  ;;  %v1880_v41 = vpop.f32.mrb[0].mxu1 }
  0xf6   :  { %v1859_v43 = vpop.f32.mrb[1].mxu0  ;;  %v1881_v44 = vpop.f32.mrb[1].mxu1 }
  0xf7   :  { %v1860_v45 = vadd.f32 %v1859_v43, %v1858_v40  ;;  %v1882_v46 = vadd.f32 %v1881_v44, %v1880_v41  ;;  %v1861_v47 = vpop.f32.mrb[2].mxu0  ;;  %v1883_v48 = vpop.f32.mrb[2].mxu1 }
  0xf8   :  { %v1862_v49 = vpop.f32.mrb[3].mxu0  ;;  %v1884_v50 = vpop.f32.mrb[3].mxu1 }
  0xf9   :  { %v203_v51 = vadd.f32 %v1860_v45, %v2402_v42  ;;  %v262_v52 = vadd.f32 %v1882_v46, %v2402_v42 }
  0xfb   :  { %2050 = vtanh.f32 %v203_v51  ;;  %v687_v51 = vld [vmem:[%s2884_s4] sm:$0xff] }
  0xfc   :  { %2052 = vtanh.f32 %v262_v52  ;;  %v691_v52 = vld [vmem:[%s2884_s4 + $0x20] sm:$0xff] }
 0x105   :  { %v2051_v54 = vpop.eup %2050 }
 0x106   :  { %v215_v55 = vmul.f32 %v2051_v54, %v2409_v53  ;;  %v2053_v56 = vpop.eup %2052  ;;  %v1715_v54 = vcombine.high %v687_v51, %v691_v52 }
 0x107   :  { %v268_v57 = vmul.f32 %v2053_v56, %v2409_v53 }
 0x108   :  { %216 = vadd.xlane.f32.xlu0 %v215_v55  ;;  %v692_v55 = vld [vmem:[%s2884_s4 + $0x28] sm:$0xff]  ;;  %1497 = vmatprep.subr.bf16.mxu0 %v1715_v54 }
 0x10c   :  { %269 = vadd.xlane.f32.xlu0 %v268_v57 }
 0x115   :  { %v1902_v58 = vpop.f32.mrb[4].mxu0  ;;  %v1924_v59 = vpop.f32.mrb[4].mxu1 }
 0x116   :  { %v1903_v60 = vpop.f32.mrb[5].mxu0  ;;  %v1925_v61 = vpop.f32.mrb[5].mxu1 }
 0x117   :  { %v1904_v62 = vadd.f32 %v1903_v60, %v1902_v58  ;;  %v1926_v63 = vadd.f32 %v1925_v61, %v1924_v59  ;;  %v1905_v0 = vpop.f32.mrb[6].mxu0  ;;  %v1927_v1 = vpop.f32.mrb[6].mxu1  ;;  %v695_v58 = vld [vmem:[%s2884_s4 + $0x40] sm:$0xff]  ;;  %v696_v60 = vld [vmem:[%s2884_s4 + $0x48] sm:$0xff] }
 0x118   :  { %v1906_v2 = vpop.f32.mrb[7].mxu0  ;;  %v1928_v3 = vpop.f32.mrb[7].mxu1  ;;  %v699_v59 = vld [vmem:[%s2884_s4 + $0x60] sm:$0xff] }
 0x119   :  { %v315_v4 = vadd.f32 %v1904_v62, %v2402_v42  ;;  %v368_v5 = vadd.f32 %v1926_v63, %v2402_v42  ;;  %v1723_v61 = vcombine.high %v695_v58, %v699_v59  ;;  %v700_v62 = vld [vmem:[%s2884_s4 + $0x68] sm:$0xff]  ;;  %v1722_v63 = vcombine.low %v695_v58, %v699_v59  ;;  %v703_v2 = vld [vmem:[%s2884_s4 + $0x80] sm:$0xff] }
 0x11a   :  { %v1724_v0 = vcombine.low %v696_v60, %v700_v62  ;;  %v1725_v1 = vcombine.high %v696_v60, %v700_v62  ;;  %v707_v3 = vld [vmem:[%s2884_s4 + $0xa0] sm:$0xff]  ;;  %v752_v60 = vld [vmem:[%s2884_s4 + $0x208] sm:$0xff] }
 0x11b   :  { %2054 = vtanh.f32 %v315_v4  ;;  %v704_v4 = vld [vmem:[%s2884_s4 + $0x88] sm:$0xff]  ;;  %v751_v58 = vld [vmem:[%s2884_s4 + $0x200] sm:$0xff] }
 0x11c   :  { %2056 = vtanh.f32 %v368_v5  ;;  %v1731_v5 = vcombine.high %v703_v2, %v707_v3  ;;  %v755_v59 = vld [vmem:[%s2884_s4 + $0x220] sm:$0xff]  ;;  %v756_v62 = vld [vmem:[%s2884_s4 + $0x228] sm:$0xff] }
 0x125   :  { %v2055_v6 = vpop.eup %2054 }
 0x126   :  { %v321_v7 = vmul.f32 %v2055_v6, %v2409_v53  ;;  %v2057_v8 = vpop.eup %2056  ;;  %v708_v6 = vld [vmem:[%s2884_s4 + $0xa8] sm:$0xff] }
 0x127   :  { %v374_v9 = vmul.f32 %v2057_v8, %v2409_v53  ;;  %v1732_v8 = vcombine.low %v704_v4, %v708_v6 }
 0x128   :  { %322 = vadd.xlane.f32.xlu1 %v321_v7  ;;  %v1730_v7 = vcombine.low %v703_v2, %v707_v3  ;;  %v1781_v2 = vcombine.high %v752_v60, %v756_v62  ;;  %v760_v3 = vld [vmem:[%s2884_s4 + $0x248] sm:$0xff] }
 0x12c   :  { %375 = vadd.xlane.f32.xlu1 %v374_v9  ;;  %v1733_v9 = vcombine.high %v704_v4, %v708_v6  ;;  %v764_v4 = vld [vmem:[%s2884_s4 + $0x268] sm:$0xff] }
 0x135   :  { %v1946_v10 = vpop.f32.mrb[8].mxu0  ;;  %v1968_v13 = vpop.f32.mrb[8].mxu1 }
 0x136   :  { %v1947_v14 = vpop.f32.mrb[9].mxu0  ;;  %v1969_v15 = vpop.f32.mrb[9].mxu1 }
 0x137   :  { %v1948_v16 = vadd.f32 %v1947_v14, %v1946_v10  ;;  %v1970_v17 = vadd.f32 %v1969_v15, %v1968_v13  ;;  %v1949_v18 = vpop.f32.mrb[10].mxu0  ;;  %v1971_v19 = vpop.f32.mrb[10].mxu1  ;;  %v711_v10 = vld [vmem:[%s2884_s4 + $0xc0] sm:$0xff]  ;;  %v712_v14 = vld [vmem:[%s2884_s4 + $0xc8] sm:$0xff] }
 0x138   :  { %v1950_v20 = vpop.f32.mrb[11].mxu0  ;;  %v1972_v21 = vpop.f32.mrb[11].mxu1  ;;  %v715_v13 = vld [vmem:[%s2884_s4 + $0xe0] sm:$0xff] }
 0x139   :  { %v421_v24 = vadd.f32 %v1948_v16, %v2402_v42  ;;  %v474_v25 = vadd.f32 %v1970_v17, %v2402_v42  ;;  %v1739_v15 = vcombine.high %v711_v10, %v715_v13  ;;  %v716_v16 = vld [vmem:[%s2884_s4 + $0xe8] sm:$0xff]  ;;  %v1738_v17 = vcombine.low %v711_v10, %v715_v13  ;;  %v719_v20 = vld [vmem:[%s2884_s4 + $0x100] sm:$0xff] }
 0x13a   :  { %v1740_v18 = vcombine.low %v712_v14, %v716_v16  ;;  %v1741_v19 = vcombine.high %v712_v14, %v716_v16  ;;  %v723_v21 = vld [vmem:[%s2884_s4 + $0x120] sm:$0xff]  ;;  %v768_v10 = vld [vmem:[%s2884_s4 + $0x288] sm:$0xff] }
 0x13b   :  { %2058 = vtanh.f32 %v421_v24  ;;  %v720_v24 = vld [vmem:[%s2884_s4 + $0x108] sm:$0xff] }
 0x13c   :  { %2060 = vtanh.f32 %v474_v25  ;;  %v1747_v25 = vcombine.high %v719_v20, %v723_v21  ;;  %v772_v13 = vld [vmem:[%s2884_s4 + $0x2a8] sm:$0xff] }
 0x145   :  { %v2059_v26 = vpop.eup %2058 }
 0x146   :  { %v2061_v27 = vpop.eup %2060  ;;  %v427_v30 = vmul.f32 %v2059_v26, %v2409_v53  ;;  %v724_v26 = vld [vmem:[%s2884_s4 + $0x128] sm:$0xff] }
 0x147   :  { %v480_v31 = vmul.f32 %v2061_v27, %v2409_v53  ;;  %v1746_v27 = vcombine.low %v719_v20, %v723_v21  ;;  %v776_v20 = vld [vmem:[%s2884_s4 + $0x2c8] sm:$0xff] }
 0x148   :  { %428 = vadd.xlane.f32.xlu0 %v427_v30  ;;  %v1748_v30 = vcombine.low %v720_v24, %v724_v26  ;;  %v780_v21 = vld [vmem:[%s2884_s4 + $0x2e8] sm:$0xff] }
 0x149   :  { %481 = vadd.xlane.f32.xlu1 %v480_v31  ;;  %v1749_v31 = vcombine.high %v720_v24, %v724_v26 }
 0x155   :  { %v1990_v32 = vpop.f32.mrb[12].mxu0  ;;  %v2012_v33 = vpop.f32.mrb[12].mxu1 }
 0x156   :  { %v1991_v36 = vpop.f32.mrb[13].mxu0  ;;  %v2013_v37 = vpop.f32.mrb[13].mxu1 }
 0x157   :  { %v1992_v38 = vadd.f32 %v1991_v36, %v1990_v32  ;;  %v2014_v39 = vadd.f32 %v2013_v37, %v2012_v33  ;;  %v1993_v40 = vpop.f32.mrb[14].mxu0  ;;  %v2015_v41 = vpop.f32.mrb[14].mxu1  ;;  %v727_v32 = vld [vmem:[%s2884_s4 + $0x140] sm:$0xff]  ;;  %v728_v36 = vld [vmem:[%s2884_s4 + $0x148] sm:$0xff] }
 0x158   :  { %v1994_v43 = vpop.f32.mrb[15].mxu0  ;;  %v2016_v44 = vpop.f32.mrb[15].mxu1  ;;  %v731_v33 = vld [vmem:[%s2884_s4 + $0x160] sm:$0xff] }
 0x159   :  { %v527_v45 = vadd.f32 %v1992_v38, %v2402_v42  ;;  %v580_v46 = vadd.f32 %v2014_v39, %v2402_v42  ;;  %v688_v42 = vld [vmem:[%s2884_s4 + $0x8] sm:$0xff]  ;;  %v1755_v37 = vcombine.high %v727_v32, %v731_v33  ;;  %v1754_v39 = vcombine.low %v727_v32, %v731_v33  ;;  %v735_v43 = vld [vmem:[%s2884_s4 + $0x180] sm:$0xff] }
 0x15a   :  { %v1716_v56 = vcombine.low %v688_v42, %v692_v55  ;;  %v1717_v57 = vcombine.high %v688_v42, %v692_v55  ;;  %v732_v38 = vld [vmem:[%s2884_s4 + $0x168] sm:$0xff]  ;;  %v739_v44 = vld [vmem:[%s2884_s4 + $0x1a0] sm:$0xff] }
 0x15b   :  { %2062 = vtanh.f32 %v527_v45  ;;  %v1756_v40 = vcombine.low %v728_v36, %v732_v38  ;;  %v1757_v41 = vcombine.high %v728_v36, %v732_v38  ;;  %v736_v45 = vld [vmem:[%s2884_s4 + $0x188] sm:$0xff] }
 0x15c   :  { %2064 = vtanh.f32 %v580_v46  ;;  %1538 = vmatprep.subr.bf16.mxu1 %v1717_v57  ;;  %v1763_v46 = vcombine.high %v735_v43, %v739_v44  ;;  %v744_v42 = vld [vmem:[%s2884_s4 + $0x1c8] sm:$0xff] }
 0x15d   :  { %1539 = vmatpush1.bf16.msra.mxu1 %v1716_v56  ;;  %v748_v55 = vld [vmem:[%s2884_s4 + $0x1e8] sm:$0xff] }
 0x15e   :  { %1540 = vmatprep.subr.bf16.mxu1 %v1725_v1  ;;  %v1772_v56 = vcombine.low %v744_v42, %v748_v55  ;;  %v1773_v57 = vcombine.high %v744_v42, %v748_v55  ;;  %v1778_v1 = vcombine.low %v751_v58, %v755_v59  ;;  %v784_v32 = vld [vmem:[%s2884_s4 + $0x308] sm:$0xff] }
 0x15f   :  { %v788_v33 = vld [vmem:[%s2884_s4 + $0x328] sm:$0xff] }
 0x161   :  { %1541 = vmatpush1.bf16.msra.mxu1 %v1724_v0  ;;  %v763_v0 = vld [vmem:[%s2884_s4 + $0x260] sm:$0xff] }
 0x162   :  { %1542 = vmatprep.subr.bf16.mxu1 %v1733_v9  ;;  %v771_v9 = vld [vmem:[%s2884_s4 + $0x2a0] sm:$0xff] }
 0x165   :  { %v2063_v47 = vpop.eup %2062  ;;  %1543 = vmatpush1.bf16.msra.mxu1 %v1732_v8  ;;  %v767_v8 = vld [vmem:[%s2884_s4 + $0x280] sm:$0xff] }
 0x166   :  { %v2065_v48 = vpop.eup %2064  ;;  %v533_v49 = vmul.f32 %v2063_v47, %v2409_v53  ;;  %1544 = vmatprep.subr.bf16.mxu1 %v1741_v19  ;;  %v740_v47 = vld [vmem:[%s2884_s4 + $0x1a8] sm:$0xff]  ;;  %v1795_v16 = vcombine.high %v767_v8, %v771_v9  ;;  %v779_v19 = vld [vmem:[%s2884_s4 + $0x2e0] sm:$0xff]  ;;  %v1794_v24 = vcombine.low %v767_v8, %v771_v9 }
 0x167   :  { %v586_v50 = vmul.f32 %v2065_v48, %v2409_v53  ;;  %v1714_v53 = vcombine.low %v687_v51, %v691_v52  ;;  %v1762_v48 = vcombine.low %v735_v43, %v739_v44  ;;  %v743_v51 = vld [vmem:[%s2884_s4 + $0x1c0] sm:$0xff]  ;;  %v792_v43 = vld [vmem:[%s2884_s4 + $0x348] sm:$0xff] }
 0x168   :  { %534 = vadd.xlane.f32.xlu0 %v533_v49  ;;  %v1764_v49 = vcombine.low %v736_v45, %v740_v47  ;;  %v747_v52 = vld [vmem:[%s2884_s4 + $0x1e0] sm:$0xff]  ;;  %v796_v44 = vld [vmem:[%s2884_s4 + $0x368] sm:$0xff] }
 0x169   :  { %587 = vadd.xlane.f32.xlu1 %v586_v50  ;;  %1498 = vmatpush1.bf16.msra.mxu0 %v1714_v53  ;;  %v1765_v50 = vcombine.high %v736_v45, %v740_v47  ;;  %v1771_v54 = vcombine.high %v743_v51, %v747_v52  ;;  %v1770_v53 = vcombine.low %v743_v51, %v747_v52  ;;  %v800_v51 = vld [vmem:[%s2884_s4 + $0x388] sm:$0xff] }
 0x16a   :  { %1499 = vmatprep.subr.bf16.mxu0 %v1723_v61  ;;  %1545 = vmatpush1.bf16.msra.mxu1 %v1740_v18  ;;  %v1779_v61 = vcombine.high %v751_v58, %v755_v59  ;;  %v775_v18 = vld [vmem:[%s2884_s4 + $0x2c0] sm:$0xff]  ;;  %v804_v52 = vld [vmem:[%s2884_s4 + $0x3a8] sm:$0xff] }
 0x16b   :  { %1546 = vmatprep.subr.bf16.mxu1 %v1749_v31  ;;  %v1803_v26 = vcombine.high %v775_v18, %v779_v19  ;;  %v787_v31 = vld [vmem:[%s2884_s4 + $0x320] sm:$0xff]  ;;  %v1802_v36 = vcombine.low %v775_v18, %v779_v19  ;;  %v808_v58 = vld [vmem:[%s2884_s4 + $0x3c8] sm:$0xff] }
 0x16c   :  { %v812_v59 = vld [vmem:[%s2884_s4 + $0x3e8] sm:$0xff] }
 0x16d   :  { %1500 = vmatpush1.bf16.msra.mxu0 %v1722_v63  ;;  %v759_v63 = vld [vmem:[%s2884_s4 + $0x240] sm:$0xff] }
 0x16e   :  { %1501 = vmatprep.subr.bf16.mxu0 %v1731_v5  ;;  %1547 = vmatpush1.bf16.msra.mxu1 %v1748_v30  ;;  %v1780_v5 = vcombine.low %v752_v60, %v756_v62  ;;  %v1787_v6 = vcombine.high %v759_v63, %v763_v0  ;;  %v1786_v14 = vcombine.low %v759_v63, %v763_v0  ;;  %v783_v30 = vld [vmem:[%s2884_s4 + $0x300] sm:$0xff] }
 0x16f   :  { %1548 = vmatprep.subr.bf16.mxu1 %v1757_v41  ;;  %v1811_v38 = vcombine.high %v783_v30, %v787_v31  ;;  %v795_v41 = vld [vmem:[%s2884_s4 + $0x360] sm:$0xff]  ;;  %v1810_v45 = vcombine.low %v783_v30, %v787_v31  ;;  %v1837_v63 = vcombine.high %v808_v58, %v812_v59 }
 0x171   :  { %1502 = vmatpush1.bf16.msra.mxu0 %v1730_v7  ;;  %v1789_v7 = vcombine.high %v760_v3, %v764_v4 }
 0x172   :  { %1503 = vmatprep.subr.bf16.mxu0 %v1739_v15  ;;  %1549 = vmatpush1.bf16.msra.mxu1 %v1756_v40  ;;  %v1788_v15 = vcombine.low %v760_v3, %v764_v4  ;;  %v791_v40 = vld [vmem:[%s2884_s4 + $0x340] sm:$0xff]  ;;  %v2625_v3 = vld [vmem:[%s2884_s4 + $0x30] sm:$0xff]  ;;  %v2630_v4 = vld [vmem:[%s2884_s4 + $0x18] sm:$0xff] }
 0x173   :  { %1550 = vmatprep.subr.bf16.mxu1 %v1765_v50  ;;  %v1819_v47 = vcombine.high %v791_v40, %v795_v41  ;;  %v803_v50 = vld [vmem:[%s2884_s4 + $0x3a0] sm:$0xff]  ;;  %v1818_v42 = vcombine.low %v791_v40, %v795_v41 }
 0x175   :  { %1504 = vmatpush1.bf16.msra.mxu0 %v1738_v17  ;;  %v1797_v17 = vcombine.high %v768_v10, %v772_v13 }
 0x176   :  { %1505 = vmatprep.subr.bf16.mxu0 %v1747_v25  ;;  %1551 = vmatpush1.bf16.msra.mxu1 %v1764_v49  ;;  %v1796_v25 = vcombine.low %v768_v10, %v772_v13  ;;  %v799_v49 = vld [vmem:[%s2884_s4 + $0x380] sm:$0xff] }
 0x177   :  { %1552 = vmatprep.subr.bf16.mxu1 %v1773_v57  ;;  %v1827_v55 = vcombine.high %v799_v49, %v803_v50  ;;  %v811_v57 = vld [vmem:[%s2884_s4 + $0x3e0] sm:$0xff]  ;;  %v1826_v60 = vcombine.low %v799_v49, %v803_v50 }
 0x179   :  { %1506 = vmatpush1.bf16.msra.mxu0 %v1746_v27  ;;  %v1805_v27 = vcombine.high %v776_v20, %v780_v21 }
 0x17a   :  { %1507 = vmatprep.subr.bf16.mxu0 %v1755_v37  ;;  %1553 = vmatpush1.bf16.msra.mxu1 %v1772_v56  ;;  %v1804_v37 = vcombine.low %v776_v20, %v780_v21  ;;  %v807_v56 = vld [vmem:[%s2884_s4 + $0x3c0] sm:$0xff] }
 0x17b   :  { %1554 = vmatprep.subr.bf16.mxu1 %v1781_v2  ;;  %v1835_v62 = vcombine.high %v807_v56, %v811_v57  ;;  %v1834_v0 = vcombine.low %v807_v56, %v811_v57  ;;  %v2620_v2 = vld [vmem:[%s2884_s4 + $0x10] sm:$0xff] }
 0x17d   :  { %1508 = vmatpush1.bf16.msra.mxu0 %v1754_v39  ;;  %v1813_v39 = vcombine.high %v784_v32, %v788_v33 }
 0x17e   :  { %1509 = vmatprep.subr.bf16.mxu0 %v1763_v46  ;;  %1555 = vmatpush1.bf16.msra.mxu1 %v1780_v5  ;;  %v1812_v46 = vcombine.low %v784_v32, %v788_v33  ;;  %v1718_v5 = vcombine.low %v2620_v2, %v2625_v3 }
 0x17f   :  { %1556 = vmatprep.subr.bf16.mxu1 %v1789_v7  ;;  %v2639_v7 = vld [vmem:[%s2884_s4 + $0x38] sm:$0xff] }
 0x180   :  { %v1720_v8 = vcombine.low %v2630_v4, %v2639_v7  ;;  %v1721_v9 = vcombine.high %v2630_v4, %v2639_v7  ;;  %v718_v4 = vld [vmem:[%s2884_s4 + $0xf8] sm:$0xff] }
 0x181   :  { %1510 = vmatpush1.bf16.msra.mxu0 %v1762_v48  ;;  %v1821_v48 = vcombine.high %v792_v43, %v796_v44 }
 0x182   :  { %1511 = vmatprep.subr.bf16.mxu0 %v1771_v54  ;;  %1557 = vmatpush1.bf16.msra.mxu1 %v1788_v15  ;;  %v1820_v54 = vcombine.low %v792_v43, %v796_v44 }
 0x183   :  { %1558 = vmatprep.subr.bf16.mxu1 %v1797_v17 }
 0x185   :  { %1512 = vmatpush1.bf16.msra.mxu0 %v1770_v53  ;;  %v1829_v53 = vcombine.high %v800_v51, %v804_v52 }
 0x186   :  { %1513 = vmatprep.subr.bf16.mxu0 %v1779_v61  ;;  %1559 = vmatpush1.bf16.msra.mxu1 %v1796_v25  ;;  %v1828_v61 = vcombine.low %v800_v51, %v804_v52 }
 0x187   :  { %1560 = vmatprep.subr.bf16.mxu1 %v1805_v27 }
 0x189   :  { %1514 = vmatpush1.bf16.msra.mxu0 %v1778_v1  ;;  %v1836_v1 = vcombine.low %v808_v58, %v812_v59 }
 0x18a   :  { %1515 = vmatprep.subr.bf16.mxu0 %v1787_v6  ;;  %1561 = vmatpush1.bf16.msra.mxu1 %v1804_v37  ;;  %v1719_v6 = vcombine.high %v2620_v2, %v2625_v3  ;;  %v717_v2 = vld [vmem:[%s2884_s4 + $0xf0] sm:$0xff]  ;;  %v714_v3 = vld [vmem:[%s2884_s4 + $0xd8] sm:$0xff] }
 0x18b   :  { %1562 = vmatprep.subr.bf16.mxu1 %v1813_v39 }
 0x18d   :  { %1516 = vmatpush1.bf16.msra.mxu0 %v1786_v14 }
 0x18e   :  { %1517 = vmatprep.subr.bf16.mxu0 %v1795_v16  ;;  %1563 = vmatpush1.bf16.msra.mxu1 %v1812_v46 }
 0x18f   :  { %1564 = vmatprep.subr.bf16.mxu1 %v1821_v48 }
 0x191   :  { %1518 = vmatpush1.bf16.msra.mxu0 %v1794_v24 }
 0x192   :  { %1519 = vmatprep.subr.bf16.mxu0 %v1803_v26  ;;  %1565 = vmatpush1.bf16.msra.mxu1 %v1820_v54 }
 0x193   :  { %1566 = vmatprep.subr.bf16.mxu1 %v1829_v53 }
 0x195   :  { %1520 = vmatpush1.bf16.msra.mxu0 %v1802_v36  ;;  %v217_v10 = vpop.xlane.xlu0 %216 }
 0x196   :  { %1521 = vmatprep.subr.bf16.mxu0 %v1811_v38  ;;  %1567 = vmatpush1.bf16.msra.mxu1 %v1828_v61 }
 0x197   :  { %1568 = vmatprep.subr.bf16.mxu1 %v1837_v63 }
 0x199   :  { %1522 = vmatpush1.bf16.msra.mxu0 %v1810_v45  ;;  %v270_v14 = vpop.xlane.xlu0 %269 }
 0x19a   :  { %1523 = vmatprep.subr.bf16.mxu0 %v1819_v47  ;;  %1569 = vmatpush1.bf16.msra.mxu1 %v1836_v1  ;;  %v589_v15 = vmax.f32 %v217_v10, %v270_v14  ;;  %v638_v1 = vunpack.c.h.bf16 %v2200_v12 }
 0x19b   :  { %1620 = vmatprep.subr.bf16.mxu1 %v1721_v9  ;;  %v630_v9 = vunpack.c.l.bf16 %v2195_v11 }
 0x19d   :  { %1524 = vmatpush1.bf16.msra.mxu0 %v1818_v42 }
 0x19e   :  { %1525 = vmatprep.subr.bf16.mxu0 %v1827_v55 }
 0x1a1   :  { %1526 = vmatpush1.bf16.msra.mxu0 %v1826_v60 }
 0x1a2   :  { %1527 = vmatprep.subr.bf16.mxu0 %v1835_v62 }
 0x1a5   :  { %1528 = vmatpush1.bf16.msra.mxu0 %v1834_v0  ;;  %v631_v0 = vunpack.c.h.bf16 %v2195_v11 }
 0x1a6   :  { %1579 = vmatprep.subr.bf16.mxu0 %v1719_v6 }
 0x1b5   :  { %v323_v13 = vpop.xlane.xlu1 %322 }
 0x1b6   :  { %v590_v17 = vmax.f32 %v589_v15, %v323_v13 }
 0x1b9   :  { %v376_v16 = vpop.xlane.xlu1 %375 }
 0x1ba   :  { %v591_v19 = vmax.f32 %v590_v17, %v376_v16  ;;  %v644_v17 = vunpack.c.l.bf16 %v2250_v22 }
 0x1d5   :  { %v429_v18 = vpop.xlane.xlu0 %428 }
 0x1d6   :  { %v592_v20 = vmax.f32 %v591_v19, %v429_v18  ;;  %v482_v21 = vpop.xlane.xlu1 %481 }
 0x1d8   :  { %v593_v24 = vmax.f32 %v592_v20, %v482_v21 }
 0x1f5   :  { %v535_v25 = vpop.xlane.xlu0 %534 }
 0x1f6   :  { %v594_v26 = vmax.f32 %v593_v24, %v535_v25  ;;  %v588_v27 = vpop.xlane.xlu1 %587  ;;  %v651_v24 = vunpack.c.l.bf16 %v2255_v23 }
 0x1f8   :  { %v595_v30 = vmax.f32 %v594_v26, %v588_v27 }
 0x1fa   :  { %v596_v31 = vsub.f32 %v217_v10, %v595_v30  ;;  %v599_v32 = vsub.f32 %v270_v14, %v595_v30  ;;  %v602_v33 = vsub.f32 %v323_v13, %v595_v30  ;;  %v605_v36 = vsub.f32 %v376_v16, %v595_v30 }
 0x1fb   :  { %v608_v40 = vsub.f32 %v429_v18, %v595_v30  ;;  %v611_v43 = vsub.f32 %v482_v21, %v595_v30  ;;  %v614_v45 = vsub.f32 %v535_v25, %v595_v30  ;;  %v617_v47 = vsub.f32 %v588_v27, %v595_v30 }
 0x1fc   :  { %v597_v37 = vmul.f32 1.442695, %v596_v31  ;;  %v600_v38 = vmul.f32 1.442695, %v599_v32  ;;  %v603_v39 = vmul.f32 1.442695, %v602_v33  ;;  %v637_v10 = vunpack.c.l.bf16 %v2200_v12 }
 0x1fd   :  { %v606_v41 = vmul.f32 1.442695, %v605_v36  ;;  %v609_v44 = vmul.f32 1.442695, %v608_v40  ;;  %v612_v46 = vmul.f32 1.442695, %v611_v43  ;;  %v645_v13 = vunpack.c.h.bf16 %v2250_v22 }
 0x1fe   :  { %2066 = vpow2.f32 %v597_v37  ;;  %v615_v48 = vmul.f32 1.442695, %v614_v45  ;;  %v618_v49 = vmul.f32 1.442695, %v617_v47  ;;  %v652_v18 = vunpack.c.h.bf16 %v2255_v23 }
 0x1ff   :  { %2068 = vpow2.f32 %v600_v38  ;;  %v659_v25 = vunpack.c.h.bf16 %v2300_v28  ;;  %v658_v31 = vunpack.c.l.bf16 %v2300_v28  ;;  %v666_v32 = vunpack.c.h.bf16 %v2305_v29 }
 0x200   :  { %2070 = vpow2.f32 %v603_v39  ;;  %v665_v39 = vunpack.c.l.bf16 %v2305_v29  ;;  %v673_v23 = vunpack.c.h.bf16 %v2350_v34  ;;  %v680_v28 = vunpack.c.h.bf16 %v2355_v35 }
 0x201   :  { %2072 = vpow2.f32 %v606_v41 }
 0x202   :  { %2074 = vpow2.f32 %v609_v44 }
 0x203   :  { %2076 = vpow2.f32 %v612_v46  ;;  %v672_v46 = vunpack.c.l.bf16 %v2350_v34 }
 0x204   :  { %2078 = vpow2.f32 %v615_v48 }
 0x205   :  { %2080 = vpow2.f32 %v618_v49 }
 0x208   :  { %v2067_v50 = vpop.eup %2066 }
 0x209   :  { %v2069_v51 = vpop.eup %2068 }
 0x20a   :  { %v620_v52 = vadd.f32 %v2069_v51, %v2067_v50  ;;  %v2071_v42 = vpop.eup %2070 }
 0x20b   :  { %v2073_v55 = vpop.eup %2072 }
 0x20c   :  { %v621_v54 = vadd.f32 %v2071_v42, %v620_v52  ;;  %v2075_v56 = vpop.eup %2074  ;;  %v679_v52 = vunpack.c.l.bf16 %v2355_v35  ;;  %v701_v35 = vld [vmem:[%s2884_s4 + $0x70] sm:$0xff] }
 0x20d   :  { %v2077_v58 = vpop.eup %2076 }
 0x20e   :  { %v622_v53 = vadd.f32 %v2073_v55, %v621_v54  ;;  %v2079_v60 = vpop.eup %2078 }
 0x20f   :  { %v2081_v62 = vpop.eup %2080 }
 0x210   :  { %v623_v57 = vadd.f32 %v2075_v56, %v622_v53 }
 0x212   :  { %v624_v59 = vadd.f32 %v2077_v58, %v623_v57 }
 0x214   :  { %v625_v61 = vadd.f32 %v2079_v60, %v624_v59 }
 0x216   :  { %v626_v63 = vadd.f32 %v2081_v62, %v625_v61  ;;  %v697_v61 = vld [vmem:[%s2884_s4 + $0x50] sm:$0xff] }
 0x218   :  { %2082 = vrcp.f32 %v626_v63 }
 0x222   :  { %v2083_v6 = vpop.eup %2082 }
 0x223   :  { %v629_v14 = vmul.f32 %v2083_v6, %v2067_v50  ;;  %v636_v15 = vmul.f32 %v2083_v6, %v2069_v51  ;;  %v643_v16 = vmul.f32 %v2083_v6, %v2071_v42  ;;  %v650_v21 = vmul.f32 %v2083_v6, %v2073_v55 }
 0x224   :  { %v657_v26 = vmul.f32 %v2083_v6, %v2075_v56  ;;  %v664_v33 = vmul.f32 %v2083_v6, %v2077_v58  ;;  %v671_v40 = vmul.f32 %v2083_v6, %v2079_v60  ;;  %v678_v47 = vmul.f32 %v2083_v6, %v2081_v62 }
 0x225   :  { %v633_v19 = vmul.f32 %v631_v0, %v629_v14  ;;  %v640_v20 = vmul.f32 %v638_v1, %v636_v15  ;;  %v647_v27 = vmul.f32 %v645_v13, %v643_v16  ;;  %v632_v12 = vmul.f32 %v630_v9, %v629_v14  ;;  %v698_v0 = vld [vmem:[%s2884_s4 + $0x58] sm:$0xff]  ;;  %v705_v9 = vld [vmem:[%s2884_s4 + $0x90] sm:$0xff] }
 0x226   :  { %v639_v30 = vmul.f32 %v637_v10, %v636_v15  ;;  %v654_v36 = vmul.f32 %v652_v18, %v650_v21  ;;  %v646_v38 = vmul.f32 %v644_v17, %v643_v16  ;;  %v661_v43 = vmul.f32 %v659_v25, %v657_v26  ;;  %v702_v1 = vld [vmem:[%s2884_s4 + $0x78] sm:$0xff]  ;;  %v709_v14 = vld [vmem:[%s2884_s4 + $0xb0] sm:$0xff] }
 0x227   :  { %v642_v11 = vadd.f32 %v640_v20, %v633_v19  ;;  %v653_v45 = vmul.f32 %v651_v24, %v650_v21  ;;  %v668_v49 = vmul.f32 %v666_v32, %v664_v33  ;;  %v660_v51 = vmul.f32 %v658_v31, %v657_v26  ;;  %v706_v15 = vld [vmem:[%s2884_s4 + $0x98] sm:$0xff]  ;;  %v713_v21 = vld [vmem:[%s2884_s4 + $0xd0] sm:$0xff] }
 0x228   :  { %v641_v37 = vadd.f32 %v639_v30, %v632_v12  ;;  %v675_v29 = vmul.f32 %v673_v23, %v671_v40  ;;  %v667_v55 = vmul.f32 %v665_v39, %v664_v33  ;;  %v682_v56 = vmul.f32 %v680_v28, %v678_v47  ;;  %v710_v16 = vld [vmem:[%s2884_s4 + $0xb8] sm:$0xff]  ;;  %v721_v25 = vld [vmem:[%s2884_s4 + $0x110] sm:$0xff] }
 0x229   :  { %v649_v22 = vadd.f32 %v647_v27, %v642_v11  ;;  %v674_v58 = vmul.f32 %v672_v46, %v671_v40  ;;  %v681_v34 = vmul.f32 %v679_v52, %v678_v47  ;;  %v1727_v10 = vcombine.high %v697_v61, %v701_v35  ;;  %v725_v26 = vld [vmem:[%s2884_s4 + $0x130] sm:$0xff]  ;;  %v722_v11 = vld [vmem:[%s2884_s4 + $0x118] sm:$0xff] }
 0x22a   :  { %v648_v44 = vadd.f32 %v646_v38, %v641_v37  ;;  %v1729_v13 = vcombine.high %v698_v0, %v702_v1  ;;  %v1726_v17 = vcombine.low %v697_v61, %v701_v35  ;;  %v1728_v18 = vcombine.low %v698_v0, %v702_v1  ;;  %v726_v27 = vld [vmem:[%s2884_s4 + $0x138] sm:$0xff]  ;;  %v729_v33 = vld [vmem:[%s2884_s4 + $0x150] sm:$0xff] }
 0x22b   :  { %v656_v41 = vadd.f32 %v654_v36, %v649_v22  ;;  %v1735_v19 = vcombine.high %v705_v9, %v709_v14  ;;  %v1737_v20 = vcombine.high %v706_v15, %v710_v16  ;;  %v1736_v7 = vcombine.low %v706_v15, %v710_v16  ;;  %v733_v22 = vld [vmem:[%s2884_s4 + $0x170] sm:$0xff]  ;;  %v730_v36 = vld [vmem:[%s2884_s4 + $0x158] sm:$0xff] }
 0x22c   :  { %v655_v50 = vadd.f32 %v653_v45, %v648_v44  ;;  %v1745_v24 = vcombine.high %v714_v3, %v718_v4  ;;  %v1742_v12 = vcombine.low %v713_v21, %v717_v2  ;;  %v1744_v30 = vcombine.low %v714_v3, %v718_v4  ;;  %v734_v37 = vld [vmem:[%s2884_s4 + $0x178] sm:$0xff]  ;;  %v773_v15 = vld [vmem:[%s2884_s4 + $0x2b0] sm:$0xff] }
 0x22d   :  { %v663_v48 = vadd.f32 %v661_v43, %v656_v41  ;;  %v1751_v31 = vcombine.high %v721_v25, %v725_v26  ;;  %v1753_v32 = vcombine.high %v722_v11, %v726_v27  ;;  %v1750_v38 = vcombine.low %v721_v25, %v725_v26  ;;  %v737_v41 = vld [vmem:[%s2884_s4 + $0x190] sm:$0xff]  ;;  %v738_v44 = vld [vmem:[%s2884_s4 + $0x198] sm:$0xff] }
 0x22e   :  { %v662_v54 = vadd.f32 %v660_v51, %v655_v50  ;;  %v1752_v39 = vcombine.low %v722_v11, %v726_v27  ;;  %v1759_v23 = vcombine.high %v729_v33, %v733_v22  ;;  %v1761_v40 = vcombine.high %v730_v36, %v734_v37  ;;  %v741_v43 = vld [vmem:[%s2884_s4 + $0x1b0] sm:$0xff]  ;;  %v742_v45 = vld [vmem:[%s2884_s4 + $0x1b8] sm:$0xff] }
 0x22f   :  { %v670_v42 = vadd.f32 %v668_v49, %v663_v48  ;;  %v1758_v46 = vcombine.low %v729_v33, %v733_v22  ;;  %v1760_v47 = vcombine.low %v730_v36, %v734_v37  ;;  %v1767_v28 = vcombine.high %v737_v41, %v741_v43  ;;  %v745_v49 = vld [vmem:[%s2884_s4 + $0x1d0] sm:$0xff]  ;;  %v746_v51 = vld [vmem:[%s2884_s4 + $0x1d8] sm:$0xff] }
 0x230   :  { %v669_v57 = vadd.f32 %v667_v55, %v662_v54  ;;  %v1769_v48 = vcombine.high %v738_v44, %v742_v45  ;;  %v749_v50 = vld [vmem:[%s2884_s4 + $0x1f0] sm:$0xff]  ;;  %v750_v52 = vld [vmem:[%s2884_s4 + $0x1f8] sm:$0xff] }
 0x231   :  { %v677_v53 = vadd.f32 %v675_v29, %v670_v42  ;;  %v1766_v42 = vcombine.low %v737_v41, %v741_v43  ;;  %v1768_v29 = vcombine.low %v738_v44, %v742_v45  ;;  %v1775_v54 = vcombine.high %v745_v49, %v749_v50  ;;  %v762_v35 = vld [vmem:[%s2884_s4 + $0x258] sm:$0xff]  ;;  %v781_v3 = vld [vmem:[%s2884_s4 + $0x2f0] sm:$0xff] }
 0x232   :  { %v676_v60 = vadd.f32 %v674_v58, %v669_v57  ;;  %v1777_v55 = vcombine.high %v746_v51, %v750_v52  ;;  %v754_v57 = vld [vmem:[%s2884_s4 + $0x218] sm:$0xff]  ;;  %v785_v26 = vld [vmem:[%s2884_s4 + $0x310] sm:$0xff] }
 0x233   :  { %v684_v59 = vadd.f32 %v682_v56, %v677_v53  ;;  %v753_v53 = vld [vmem:[%s2884_s4 + $0x210] sm:$0xff]  ;;  %v758_v58 = vld [vmem:[%s2884_s4 + $0x238] sm:$0xff] }
 0x234   :  { %v683_v63 = vadd.f32 %v681_v34, %v676_v60  ;;  %v757_v56 = vld [vmem:[%s2884_s4 + $0x230] sm:$0xff]  ;;  %v1776_v60 = vcombine.low %v746_v51, %v750_v52  ;;  %v1785_v61 = vcombine.high %v754_v57, %v758_v58  ;;  %v766_v0 = vld [vmem:[%s2884_s4 + $0x278] sm:$0xff] }
 0x235   :  { %v686_v62 = vpack.c.bf16 %v684_v59, %v684_v59  ;;  %v1774_v59 = vcombine.low %v745_v49, %v749_v50  ;;  %v1783_v34 = vcombine.high %v753_v53, %v757_v56  ;;  %v1782_v1 = vcombine.low %v753_v53, %v757_v56  ;;  %v770_v16 = vld [vmem:[%s2884_s4 + $0x298] sm:$0xff]  ;;  %v789_v11 = vld [vmem:[%s2884_s4 + $0x330] sm:$0xff] }
 0x236   :  { %v2673_v6 = vpack.c.bf16 %v683_v63, %v683_v63  ;;  %v765_v63 = vld [vmem:[%s2884_s4 + $0x270] sm:$0xff]  ;;  %v778_v4 = vld [vmem:[%s2884_s4 + $0x2d8] sm:$0xff] }
 0x237   :  { %1529 = vmatprep.mubr.bf16.mxu0 %v686_v62  ;;  %1570 = vmatprep.mubr.bf16.mxu1 %v686_v62  ;;  %v786_v27 = vld [vmem:[%s2884_s4 + $0x318] sm:$0xff]  ;;  %v793_v22 = vld [vmem:[%s2884_s4 + $0x350] sm:$0xff] }
 0x238   :  { %1530 = vmatmul.mubr.bf16.vlgmr.msra.gmra.mrb[16].mxu0 %v2673_v6  ;;  %1571 = vmatmul.mubr.bf16.vlgmr.msra.gmra.mrb[16].mxu1 %v2673_v6  ;;  %v797_v36 = vld [vmem:[%s2884_s4 + $0x370] sm:$0xff]  ;;  %v794_v37 = vld [vmem:[%s2884_s4 + $0x358] sm:$0xff] }
 0x239   :  { %1580 = vmatpush1.bf16.msra.mxu0 %v1718_v5  ;;  %1621 = vmatpush1.bf16.msra.mxu1 %v1720_v8  ;;  %v1734_v5 = vcombine.low %v705_v9, %v709_v14  ;;  %v1743_v8 = vcombine.high %v713_v21, %v717_v2  ;;  %v1784_v9 = vcombine.low %v754_v57, %v758_v58  ;;  %v769_v14 = vld [vmem:[%s2884_s4 + $0x290] sm:$0xff]  ;;  %v802_v45 = vld [vmem:[%s2884_s4 + $0x398] sm:$0xff]  ;;  %v817_v58 = vlaneseq }
 0x23a   :  { %1611 = vmatprep.mubr.bf16.mxu0 %v686_v62  ;;  %1652 = vmatprep.mubr.bf16.mxu1 %v686_v62  ;;  %v761_v62 = vld [vmem:[%s2884_s4 + $0x250] sm:$0xff]  ;;  %v810_v52 = vld [vmem:[%s2884_s4 + $0x3d8] sm:$0xff] }
 0x23b   :  { %1581 = vmatprep.subr.bf16.mxu0 %v1727_v10  ;;  %1622 = vmatprep.subr.bf16.mxu1 %v1729_v13  ;;  %v1791_v10 = vcombine.high %v761_v62, %v765_v63  ;;  %v1793_v13 = vcombine.high %v762_v35, %v766_v0  ;;  %v777_v2 = vld [vmem:[%s2884_s4 + $0x2d0] sm:$0xff] }
 0x23c   :  { %v801_v43 = vld [vmem:[%s2884_s4 + $0x390] sm:$0xff] }
 0x23d   :  { %1582 = vmatpush1.bf16.msra.mxu0 %v1726_v17  ;;  %1623 = vmatpush1.bf16.msra.mxu1 %v1728_v18  ;;  %v774_v17 = vld [vmem:[%s2884_s4 + $0x2b8] sm:$0xff]  ;;  %v1790_v18 = vcombine.low %v761_v62, %v765_v63  ;;  %v805_v44 = vld [vmem:[%s2884_s4 + $0x3b0] sm:$0xff] }
 0x23e   :  { %1583 = vmatprep.subr.bf16.mxu0 %v1735_v19  ;;  %1624 = vmatprep.subr.bf16.mxu1 %v1737_v20  ;;  %v1792_v19 = vcombine.low %v762_v35, %v766_v0  ;;  %v1799_v20 = vcombine.high %v769_v14, %v773_v15  ;;  %v1801_v21 = vcombine.high %v770_v16, %v774_v17  ;;  %v809_v50 = vld [vmem:[%s2884_s4 + $0x3d0] sm:$0xff] }
 0x23f   :  { %v813_v51 = vld [vmem:[%s2884_s4 + $0x3f0] sm:$0xff] }
 0x240   :  { %v1838_v56 = vcombine.low %v809_v50, %v813_v51 }
 0x241   :  { %1584 = vmatpush1.bf16.msra.mxu0 %v1734_v5  ;;  %1625 = vmatpush1.bf16.msra.mxu1 %v1736_v7  ;;  %v782_v5 = vld [vmem:[%s2884_s4 + $0x2f8] sm:$0xff]  ;;  %v1798_v7 = vcombine.low %v769_v14, %v773_v15 }
 0x242   :  { %1585 = vmatprep.subr.bf16.mxu0 %v1743_v8  ;;  %1626 = vmatprep.subr.bf16.mxu1 %v1745_v24  ;;  %v1800_v8 = vcombine.low %v770_v16, %v774_v17  ;;  %v1807_v24 = vcombine.high %v777_v2, %v781_v3  ;;  %v1809_v25 = vcombine.high %v778_v4, %v782_v5 }
 0x245   :  { %1586 = vmatpush1.bf16.msra.mxu0 %v1742_v12  ;;  %1627 = vmatpush1.bf16.msra.mxu1 %v1744_v30  ;;  %v790_v12 = vld [vmem:[%s2884_s4 + $0x338] sm:$0xff]  ;;  %v1806_v30 = vcombine.low %v777_v2, %v781_v3 }
 0x246   :  { %1587 = vmatprep.subr.bf16.mxu0 %v1751_v31  ;;  %1628 = vmatprep.subr.bf16.mxu1 %v1753_v32  ;;  %v1808_v31 = vcombine.low %v778_v4, %v782_v5  ;;  %v1815_v32 = vcombine.high %v785_v26, %v789_v11  ;;  %v1817_v33 = vcombine.high %v786_v27, %v790_v12 }
 0x249   :  { %1588 = vmatpush1.bf16.msra.mxu0 %v1750_v38  ;;  %1629 = vmatpush1.bf16.msra.mxu1 %v1752_v39  ;;  %v798_v38 = vld [vmem:[%s2884_s4 + $0x378] sm:$0xff]  ;;  %v1814_v39 = vcombine.low %v785_v26, %v789_v11 }
 0x24a   :  { %1589 = vmatprep.subr.bf16.mxu0 %v1759_v23  ;;  %1630 = vmatprep.subr.bf16.mxu1 %v1761_v40  ;;  %v1816_v23 = vcombine.low %v786_v27, %v790_v12  ;;  %v1823_v40 = vcombine.high %v793_v22, %v797_v36  ;;  %v1825_v41 = vcombine.high %v794_v37, %v798_v38 }
 0x24d   :  { %1590 = vmatpush1.bf16.msra.mxu0 %v1758_v46  ;;  %1631 = vmatpush1.bf16.msra.mxu1 %v1760_v47  ;;  %v806_v46 = vld [vmem:[%s2884_s4 + $0x3b8] sm:$0xff]  ;;  %v1822_v47 = vcombine.low %v793_v22, %v797_v36 }
 0x24e   :  { %1591 = vmatprep.subr.bf16.mxu0 %v1767_v28  ;;  %1632 = vmatprep.subr.bf16.mxu1 %v1769_v48  ;;  %v1824_v28 = vcombine.low %v794_v37, %v798_v38  ;;  %v1831_v48 = vcombine.high %v801_v43, %v805_v44  ;;  %v1833_v49 = vcombine.high %v802_v45, %v806_v46 }
 0x251   :  { %1592 = vmatpush1.bf16.msra.mxu0 %v1766_v42  ;;  %1633 = vmatpush1.bf16.msra.mxu1 %v1768_v29  ;;  %v814_v42 = vld [vmem:[%s2884_s4 + $0x3f8] sm:$0xff]  ;;  %v1830_v29 = vcombine.low %v801_v43, %v805_v44 }
 0x252   :  { %1593 = vmatprep.subr.bf16.mxu0 %v1775_v54  ;;  %1634 = vmatprep.subr.bf16.mxu1 %v1777_v55  ;;  %v1832_v54 = vcombine.low %v802_v45, %v806_v46  ;;  %v1839_v55 = vcombine.high %v809_v50, %v813_v51  ;;  %v1841_v53 = vcombine.high %v810_v52, %v814_v42 }
 0x253   :  { %v1840_v57 = vcombine.low %v810_v52, %v814_v42 }
 0x255   :  { %1594 = vmatpush1.bf16.msra.mxu0 %v1774_v59  ;;  %1635 = vmatpush1.bf16.msra.mxu1 %v1776_v60  ;;  %v818_v59 = vshrl.u32 %v817_v58, 7 }
 0x256   :  { %1595 = vmatprep.subr.bf16.mxu0 %v1783_v34  ;;  %1636 = vmatprep.subr.bf16.mxu1 %v1785_v61  ;;  %v815_v61 = vld [vmem:[%s2885_s5] sm:$0xff] }
 0x257   :  { %v819_v60 = vsub.s32 0, %v818_v59  ;;  %v827_v34 = vsub.s32 2, %v818_v59  ;;  %v823_v62 = vsub.s32 1, %v818_v59  ;;  %v831_v63 = vsub.s32 3, %v818_v59 }
 0x258   :  { %v835_v3 = vsub.s32 4, %v818_v59  ;;  %v843_v4 = vsub.s32 6, %v818_v59  ;;  %v839_v5 = vsub.s32 5, %v818_v59 }
 0x259   :  { %1596 = vmatpush1.bf16.msra.mxu0 %v1782_v1  ;;  %1637 = vmatpush1.bf16.msra.mxu1 %v1784_v9  ;;  %v820_v35 = vrot.slane %v815_v61, %v819_v60  ;;  %v828_v0 = vrot.slane %v815_v61, %v827_v34  ;;  %v824_v1 = vrot.slane %v815_v61, %v823_v62 }
 0x25a   :  { %1597 = vmatprep.subr.bf16.mxu0 %v1791_v10  ;;  %1638 = vmatprep.subr.bf16.mxu1 %v1793_v13  ;;  %v832_v9 = vrot.slane %v815_v61, %v831_v63 }
 0x25d   :  { %1598 = vmatpush1.bf16.msra.mxu0 %v1790_v18  ;;  %1639 = vmatpush1.bf16.msra.mxu1 %v1792_v19 }
 0x25e   :  { %1599 = vmatprep.subr.bf16.mxu0 %v1799_v20  ;;  %1640 = vmatprep.subr.bf16.mxu1 %v1801_v21 }
 0x261   :  { %1600 = vmatpush1.bf16.msra.mxu0 %v1798_v7  ;;  %1641 = vmatpush1.bf16.msra.mxu1 %v1800_v8  ;;  %v847_v7 = vsub.s32 7, %v818_v59  ;;  %v836_v8 = vrot.slane %v815_v61, %v835_v3 }
 0x262   :  { %1601 = vmatprep.subr.bf16.mxu0 %v1807_v24  ;;  %1642 = vmatprep.subr.bf16.mxu1 %v1809_v25  ;;  %v844_v24 = vrot.slane %v815_v61, %v843_v4  ;;  %v840_v25 = vrot.slane %v815_v61, %v839_v5 }
 0x263   :  { %v848_v26 = vrot.slane %v815_v61, %v847_v7 }
 0x265   :  { %1602 = vmatpush1.bf16.msra.mxu0 %v1806_v30  ;;  %1643 = vmatpush1.bf16.msra.mxu1 %v1808_v31 }
 0x266   :  { %1603 = vmatprep.subr.bf16.mxu0 %v1815_v32  ;;  %1644 = vmatprep.subr.bf16.mxu1 %v1817_v33 }
 0x269   :  { %1604 = vmatpush1.bf16.msra.mxu0 %v1814_v39  ;;  %1645 = vmatpush1.bf16.msra.mxu1 %v1816_v23 }
 0x26a   :  { %1605 = vmatprep.subr.bf16.mxu0 %v1823_v40  ;;  %1646 = vmatprep.subr.bf16.mxu1 %v1825_v41 }
 0x26d   :  { %1606 = vmatpush1.bf16.msra.mxu0 %v1822_v47  ;;  %1647 = vmatpush1.bf16.msra.mxu1 %v1824_v28 }
 0x26e   :  { %1607 = vmatprep.subr.bf16.mxu0 %v1831_v48  ;;  %1648 = vmatprep.subr.bf16.mxu1 %v1833_v49 }
 0x271   :  { %1608 = vmatpush1.bf16.msra.mxu0 %v1830_v29  ;;  %1649 = vmatpush1.bf16.msra.mxu1 %v1832_v54 }
 0x272   :  { %1609 = vmatprep.subr.bf16.mxu0 %v1839_v55  ;;  %1650 = vmatprep.subr.bf16.mxu1 %v1841_v53 }
 0x275   :  { %1610 = vmatpush1.bf16.msra.mxu0 %v1838_v56  ;;  %1651 = vmatpush1.bf16.msra.mxu1 %v1840_v57 }
 0x278   :  { %1612 = vmatmul.mubr.bf16.vlgmr.msra.gmra.mrb[20].mxu0 %v2673_v6  ;;  %1653 = vmatmul.mubr.bf16.vlgmr.msra.gmra.mrb[20].mxu1 %v2673_v6 }
 0x30b   :  { %v1531_v10 = vpop.f32.mrb[16].mxu0  ;;  %v1572_v13 = vpop.f32.mrb[16].mxu1 }
 0x30c   :  { %v1532_v14 = vadd.f32 %v1531_v10, %v820_v35  ;;  %v1573_v15 = vadd.f32 %v1572_v13, %v828_v0  ;;  %v1533_v16 = vpop.f32.mrb[17].mxu0  ;;  %v1574_v6 = vpop.f32.mrb[17].mxu1 }
 0x30d   :  { %v1534_v17 = vadd.f32 %v1533_v16, %v824_v1  ;;  %v1575_v18 = vadd.f32 %v1574_v6, %v832_v9  ;;  %v1535_v19 = vpop.f32.mrb[18].mxu0  ;;  %v1576_v20 = vpop.f32.mrb[18].mxu1 }
 0x30e   :  { %1661 = vst [vmem:[%s2886_s6] sm:$0xff] %v1532_v14  ;;  %1663 = vst [vmem:[%s2886_s6 + $0x10] sm:$0xff] %v1573_v15  ;;  %v1536_v21 = vpop.f32.mrb[19].mxu0  ;;  %v1577_v2 = vpop.f32.mrb[19].mxu1 }
 0x30f   :  { %1662 = vst [vmem:[%s2886_s6 + $0x8] sm:$0xff] %v1534_v17  ;;  %1664 = vst [vmem:[%s2886_s6 + $0x18] sm:$0xff] %v1575_v18 }
 0x34b   :  { %v1613_v11 = vpop.f32.mrb[20].mxu0  ;;  %v1654_v27 = vpop.f32.mrb[20].mxu1 }
 0x34c   :  { %v1614_v12 = vadd.f32 %v1613_v11, %v836_v8  ;;  %v1655_v30 = vadd.f32 %v1654_v27, %v844_v24  ;;  %v1615_v31 = vpop.f32.mrb[21].mxu0  ;;  %v1656_v32 = vpop.f32.mrb[21].mxu1 }
 0x34d   :  { %v1616_v33 = vadd.f32 %v1615_v31, %v840_v25  ;;  %v1657_v22 = vadd.f32 %v1656_v32, %v848_v26  ;;  %v1617_v36 = vpop.f32.mrb[22].mxu0  ;;  %v1658_v37 = vpop.f32.mrb[22].mxu1 }
 0x34e   :  { %1665 = vst [vmem:[%s2886_s6 + $0x20] sm:$0xff] %v1614_v12  ;;  %1667 = vst [vmem:[%s2886_s6 + $0x30] sm:$0xff] %v1655_v30  ;;  %v1618_v38 = vpop.f32.mrb[23].mxu0  ;;  %v1659_v39 = vpop.f32.mrb[23].mxu1 }
 0x34f   :  { %1666 = vst [vmem:[%s2886_s6 + $0x28] sm:$0xff] %v1616_v33  ;;  %1668 = vst [vmem:[%s2886_s6 + $0x38] sm:$0xff] %v1657_v22 }

// kernel: _lambda_.6
= control target key start
LH: loop header
LB: loop body
LE: loop exit
PB: predicated region body
PF: predicated region fallthrough
CT: control target
= control target key end

     0   :  { %v6602_v3 = vmov 0   ;;  %s6599_s1 = inlined_call_operand.vmem [shape: bf16[256,1024], index: 1, kind: input, shape index: {}]   ;;  %s6600_s0 = inlined_call_operand.vmem [shape: f32[4,2,1024], index: 0, kind: input, shape index: {}]   ;;  %s6601_s2 = inlined_call_operand.vmem [shape: bf16[4,2,256], index: 2, kind: output, shape index: {}]  }
   0x1   :  { %v12_v0 = vld [vmem:[%s6599_s1] sm:$0xff]  ;;  %v13_v2 = vld [vmem:[%s6599_s1 + $0x8] sm:$0xff]  ;;  %812 = vmatprep.mubr.bf16.mxu0 %v6602_v3  ;;  %853 = vmatprep.mubr.bf16.mxu1 %v6602_v3 }
   0x2   :  { %v16_v1 = vld [vmem:[%s6599_s1 + $0x20] sm:$0xff]  ;;  %v17_v5 = vld [vmem:[%s6599_s1 + $0x28] sm:$0xff] }
   0x3   :  { %v4710_v4 = vcombine.high %v12_v0, %v16_v1  ;;  %v4715_v6 = vcombine.low %v12_v0, %v16_v1  ;;  %v20_v7 = vld [vmem:[%s6599_s1 + $0x40] sm:$0xff]  ;;  %v4723_v9 = vcombine.high %v13_v2, %v17_v5  ;;  %v4725_v10 = vcombine.low %v13_v2, %v17_v5  ;;  %v21_v12 = vld [vmem:[%s6599_s1 + $0x48] sm:$0xff] }
   0x4   :  { %v24_v8 = vld [vmem:[%s6599_s1 + $0x60] sm:$0xff]  ;;  %v25_v13 = vld [vmem:[%s6599_s1 + $0x68] sm:$0xff] }
   0x5   :  { %v4727_v11 = vcombine.high %v20_v7, %v24_v8  ;;  %v28_v14 = vld [vmem:[%s6599_s1 + $0x80] sm:$0xff]  ;;  %780 = vmatprep.subr.bf16.mxu0 %v4710_v4  ;;  %v4739_v15 = vcombine.high %v21_v12, %v25_v13  ;;  %v29_v17 = vld [vmem:[%s6599_s1 + $0x88] sm:$0xff]  ;;  %821 = vmatprep.subr.bf16.mxu1 %v4723_v9  ;;  %v4752_v19 = vcombine.low %v20_v7, %v24_v8 }
   0x6   :  { %v32_v16 = vld [vmem:[%s6599_s1 + $0xa0] sm:$0xff]  ;;  %v33_v18 = vld [vmem:[%s6599_s1 + $0xa8] sm:$0xff]  ;;  %781 = vmatpush1.bf16.msra.mxu0 %v4715_v6  ;;  %822 = vmatpush1.bf16.msra.mxu1 %v4725_v10  ;;  %v4756_v20 = vcombine.low %v21_v12, %v25_v13 }
   0x7   :  { %782 = vmatprep.subr.bf16.mxu0 %v4727_v11  ;;  %v4758_v21 = vcombine.high %v28_v14, %v32_v16  ;;  %823 = vmatprep.subr.bf16.mxu1 %v4739_v15  ;;  %v4761_v22 = vcombine.high %v29_v17, %v33_v18  ;;  %v36_v23 = vld [vmem:[%s6599_s1 + $0xc0] sm:$0xff]  ;;  %v37_v25 = vld [vmem:[%s6599_s1 + $0xc8] sm:$0xff]  ;;  %v4776_v27 = vcombine.low %v28_v14, %v32_v16 }
   0x8   :  { %v40_v24 = vld [vmem:[%s6599_s1 + $0xe0] sm:$0xff]  ;;  %v41_v26 = vld [vmem:[%s6599_s1 + $0xe8] sm:$0xff]  ;;  %v4780_v28 = vcombine.low %v29_v17, %v33_v18 }
   0x9   :  { %v4782_v29 = vcombine.high %v36_v23, %v40_v24  ;;  %v4785_v30 = vcombine.high %v37_v25, %v41_v26  ;;  %v44_v31 = vld [vmem:[%s6599_s1 + $0x100] sm:$0xff]  ;;  %v45_v33 = vld [vmem:[%s6599_s1 + $0x108] sm:$0xff]  ;;  %v4800_v35 = vcombine.low %v36_v23, %v40_v24  ;;  %v4804_v36 = vcombine.low %v37_v25, %v41_v26 }
   0xa   :  { %783 = vmatpush1.bf16.msra.mxu0 %v4752_v19  ;;  %824 = vmatpush1.bf16.msra.mxu1 %v4756_v20  ;;  %v48_v32 = vld [vmem:[%s6599_s1 + $0x120] sm:$0xff]  ;;  %v49_v34 = vld [vmem:[%s6599_s1 + $0x128] sm:$0xff] }
   0xb   :  { %784 = vmatprep.subr.bf16.mxu0 %v4758_v21  ;;  %825 = vmatprep.subr.bf16.mxu1 %v4761_v22  ;;  %v4806_v37 = vcombine.high %v44_v31, %v48_v32  ;;  %v4809_v38 = vcombine.high %v45_v33, %v49_v34  ;;  %v52_v39 = vld [vmem:[%s6599_s1 + $0x140] sm:$0xff]  ;;  %v53_v41 = vld [vmem:[%s6599_s1 + $0x148] sm:$0xff]  ;;  %v4824_v43 = vcombine.low %v44_v31, %v48_v32 }
   0xc   :  { %v56_v40 = vld [vmem:[%s6599_s1 + $0x160] sm:$0xff]  ;;  %v57_v42 = vld [vmem:[%s6599_s1 + $0x168] sm:$0xff]  ;;  %v4828_v44 = vcombine.low %v45_v33, %v49_v34 }
   0xd   :  { %v4830_v45 = vcombine.high %v52_v39, %v56_v40  ;;  %v4833_v46 = vcombine.high %v53_v41, %v57_v42  ;;  %v60_v47 = vld [vmem:[%s6599_s1 + $0x180] sm:$0xff]  ;;  %v61_v49 = vld [vmem:[%s6599_s1 + $0x188] sm:$0xff]  ;;  %v4848_v51 = vcombine.low %v52_v39, %v56_v40  ;;  %v4852_v52 = vcombine.low %v53_v41, %v57_v42 }
   0xe   :  { %785 = vmatpush1.bf16.msra.mxu0 %v4776_v27  ;;  %826 = vmatpush1.bf16.msra.mxu1 %v4780_v28  ;;  %v64_v48 = vld [vmem:[%s6599_s1 + $0x1a0] sm:$0xff]  ;;  %v65_v50 = vld [vmem:[%s6599_s1 + $0x1a8] sm:$0xff] }
   0xf   :  { %786 = vmatprep.subr.bf16.mxu0 %v4782_v29  ;;  %827 = vmatprep.subr.bf16.mxu1 %v4785_v30  ;;  %v4854_v53 = vcombine.high %v60_v47, %v64_v48  ;;  %v4857_v54 = vcombine.high %v61_v49, %v65_v50  ;;  %v68_v55 = vld [vmem:[%s6599_s1 + $0x1c0] sm:$0xff]  ;;  %v69_v57 = vld [vmem:[%s6599_s1 + $0x1c8] sm:$0xff]  ;;  %v4872_v59 = vcombine.low %v60_v47, %v64_v48 }
  0x10   :  { %v72_v56 = vld [vmem:[%s6599_s1 + $0x1e0] sm:$0xff]  ;;  %v73_v58 = vld [vmem:[%s6599_s1 + $0x1e8] sm:$0xff]  ;;  %v4876_v60 = vcombine.low %v61_v49, %v65_v50 }
  0x11   :  { %v4878_v61 = vcombine.high %v68_v55, %v72_v56  ;;  %v4881_v62 = vcombine.high %v69_v57, %v73_v58  ;;  %v76_v63 = vld [vmem:[%s6599_s1 + $0x200] sm:$0xff]  ;;  %v77_v1 = vld [vmem:[%s6599_s1 + $0x208] sm:$0xff]  ;;  %v4896_v5 = vcombine.low %v68_v55, %v72_v56  ;;  %v4900_v7 = vcombine.low %v69_v57, %v73_v58 }
  0x12   :  { %787 = vmatpush1.bf16.msra.mxu0 %v4800_v35  ;;  %828 = vmatpush1.bf16.msra.mxu1 %v4804_v36  ;;  %v80_v0 = vld [vmem:[%s6599_s1 + $0x220] sm:$0xff]  ;;  %v81_v2 = vld [vmem:[%s6599_s1 + $0x228] sm:$0xff] }
  0x13   :  { %788 = vmatprep.subr.bf16.mxu0 %v4806_v37  ;;  %829 = vmatprep.subr.bf16.mxu1 %v4809_v38  ;;  %v4902_v8 = vcombine.high %v76_v63, %v80_v0  ;;  %v4905_v12 = vcombine.high %v77_v1, %v81_v2  ;;  %v84_v13 = vld [vmem:[%s6599_s1 + $0x240] sm:$0xff]  ;;  %v85_v16 = vld [vmem:[%s6599_s1 + $0x248] sm:$0xff]  ;;  %v4920_v18 = vcombine.low %v76_v63, %v80_v0 }
  0x14   :  { %v88_v14 = vld [vmem:[%s6599_s1 + $0x260] sm:$0xff]  ;;  %v89_v17 = vld [vmem:[%s6599_s1 + $0x268] sm:$0xff]  ;;  %v4924_v23 = vcombine.low %v77_v1, %v81_v2 }
  0x15   :  { %v4926_v24 = vcombine.high %v84_v13, %v88_v14  ;;  %v4929_v25 = vcombine.high %v85_v16, %v89_v17  ;;  %v92_v26 = vld [vmem:[%s6599_s1 + $0x280] sm:$0xff]  ;;  %v93_v32 = vld [vmem:[%s6599_s1 + $0x288] sm:$0xff]  ;;  %v4944_v34 = vcombine.low %v84_v13, %v88_v14  ;;  %v4948_v39 = vcombine.low %v85_v16, %v89_v17 }
  0x16   :  { %789 = vmatpush1.bf16.msra.mxu0 %v4824_v43  ;;  %830 = vmatpush1.bf16.msra.mxu1 %v4828_v44  ;;  %v96_v31 = vld [vmem:[%s6599_s1 + $0x2a0] sm:$0xff]  ;;  %v97_v33 = vld [vmem:[%s6599_s1 + $0x2a8] sm:$0xff] }
  0x17   :  { %790 = vmatprep.subr.bf16.mxu0 %v4830_v45  ;;  %831 = vmatprep.subr.bf16.mxu1 %v4833_v46  ;;  %v4950_v40 = vcombine.high %v92_v26, %v96_v31  ;;  %v4953_v41 = vcombine.high %v93_v32, %v97_v33  ;;  %v100_v42 = vld [vmem:[%s6599_s1 + $0x2c0] sm:$0xff]  ;;  %v101_v48 = vld [vmem:[%s6599_s1 + $0x2c8] sm:$0xff]  ;;  %v4968_v50 = vcombine.low %v92_v26, %v96_v31 }
  0x18   :  { %v104_v47 = vld [vmem:[%s6599_s1 + $0x2e0] sm:$0xff]  ;;  %v105_v49 = vld [vmem:[%s6599_s1 + $0x2e8] sm:$0xff]  ;;  %v4972_v55 = vcombine.low %v93_v32, %v97_v33 }
  0x19   :  { %v4974_v56 = vcombine.high %v100_v42, %v104_v47  ;;  %v4977_v57 = vcombine.high %v101_v48, %v105_v49  ;;  %v108_v58 = vld [vmem:[%s6599_s1 + $0x300] sm:$0xff]  ;;  %v109_v0 = vld [vmem:[%s6599_s1 + $0x308] sm:$0xff]  ;;  %v4992_v2 = vcombine.low %v100_v42, %v104_v47  ;;  %v4996_v13 = vcombine.low %v101_v48, %v105_v49 }
  0x1a   :  { %791 = vmatpush1.bf16.msra.mxu0 %v4848_v51  ;;  %832 = vmatpush1.bf16.msra.mxu1 %v4852_v52  ;;  %v112_v63 = vld [vmem:[%s6599_s1 + $0x320] sm:$0xff]  ;;  %v113_v1 = vld [vmem:[%s6599_s1 + $0x328] sm:$0xff] }
  0x1b   :  { %792 = vmatprep.subr.bf16.mxu0 %v4854_v53  ;;  %833 = vmatprep.subr.bf16.mxu1 %v4857_v54  ;;  %6751 = vst [vmem:[#allocation2_spill] sm:$0xff] %v4992_v2  ;;  %6752 = vst [vmem:[#allocation3_spill] sm:$0xff] %v4996_v13  ;;  %v4998_v14 = vcombine.high %v108_v58, %v112_v63  ;;  %v5001_v16 = vcombine.high %v109_v0, %v113_v1  ;;  %v116_v17 = vld [vmem:[%s6599_s1 + $0x340] sm:$0xff]  ;;  %v117_v31 = vld [vmem:[%s6599_s1 + $0x348] sm:$0xff] }
  0x1c   :  { %v120_v26 = vld [vmem:[%s6599_s1 + $0x360] sm:$0xff]  ;;  %v121_v32 = vld [vmem:[%s6599_s1 + $0x368] sm:$0xff]  ;;  %v5016_v33 = vcombine.low %v108_v58, %v112_v63  ;;  %v5020_v42 = vcombine.low %v109_v0, %v113_v1 }
  0x1d   :  { %6753 = vst [vmem:[#allocation4_spill] sm:$0xff] %v4998_v14  ;;  %6754 = vst [vmem:[#allocation5_spill] sm:$0xff] %v5001_v16  ;;  %v5022_v47 = vcombine.high %v116_v17, %v120_v26  ;;  %v5025_v48 = vcombine.high %v117_v31, %v121_v32  ;;  %v124_v49 = vld [vmem:[%s6599_s1 + $0x380] sm:$0xff]  ;;  %v125_v63 = vld [vmem:[%s6599_s1 + $0x388] sm:$0xff]  ;;  %v5040_v1 = vcombine.low %v116_v17, %v120_v26 }
  0x1e   :  { %793 = vmatpush1.bf16.msra.mxu0 %v4872_v59  ;;  %834 = vmatpush1.bf16.msra.mxu1 %v4876_v60  ;;  %6755 = vst [vmem:[#allocation6_spill] sm:$0xff] %v5016_v33  ;;  %6756 = vst [vmem:[#allocation7_spill] sm:$0xff] %v5020_v42  ;;  %v128_v58 = vld [vmem:[%s6599_s1 + $0x3a0] sm:$0xff]  ;;  %v129_v0 = vld [vmem:[%s6599_s1 + $0x3a8] sm:$0xff]  ;;  %v5044_v3 = vcombine.low %v117_v31, %v121_v32 }
  0x1f   :  { %794 = vmatprep.subr.bf16.mxu0 %v4878_v61  ;;  %835 = vmatprep.subr.bf16.mxu1 %v4881_v62  ;;  %6757 = vst [vmem:[#allocation8_spill] sm:$0xff] %v5022_v47  ;;  %6758 = vst [vmem:[#allocation9_spill] sm:$0xff] %v5025_v48  ;;  %v136_v17 = vld [vmem:[%s6599_s1 + $0x3e0] sm:$0xff]  ;;  %v133_v26 = vld [vmem:[%s6599_s1 + $0x3c8] sm:$0xff]  ;;  %v5064_v32 = vcombine.low %v124_v49, %v128_v58 }
  0x20   :  { %6759 = vst [vmem:[#allocation10_spill] sm:$0xff] %v5040_v1  ;;  %6760 = vst [vmem:[#allocation11_spill] sm:$0xff] %v5044_v3  ;;  %v137_v31 = vld [vmem:[%s6599_s1 + $0x3e8] sm:$0xff] }
  0x21   :  { %6763 = vst [vmem:[#allocation14_spill] sm:$0xff] %v5064_v32 }
  0x22   :  { %795 = vmatpush1.bf16.msra.mxu0 %v4896_v5  ;;  %836 = vmatpush1.bf16.msra.mxu1 %v4900_v7 }
  0x23   :  { %796 = vmatprep.subr.bf16.mxu0 %v4902_v8  ;;  %837 = vmatprep.subr.bf16.mxu1 %v4905_v12 }
  0x26   :  { %797 = vmatpush1.bf16.msra.mxu0 %v4920_v18  ;;  %838 = vmatpush1.bf16.msra.mxu1 %v4924_v23 }
  0x27   :  { %798 = vmatprep.subr.bf16.mxu0 %v4926_v24  ;;  %839 = vmatprep.subr.bf16.mxu1 %v4929_v25 }
  0x2a   :  { %799 = vmatpush1.bf16.msra.mxu0 %v4944_v34  ;;  %840 = vmatpush1.bf16.msra.mxu1 %v4948_v39 }
  0x2b   :  { %800 = vmatprep.subr.bf16.mxu0 %v4950_v40  ;;  %841 = vmatprep.subr.bf16.mxu1 %v4953_v41 }
  0x2e   :  { %801 = vmatpush1.bf16.msra.mxu0 %v4968_v50  ;;  %842 = vmatpush1.bf16.msra.mxu1 %v4972_v55 }
  0x2f   :  { %802 = vmatprep.subr.bf16.mxu0 %v4974_v56  ;;  %843 = vmatprep.subr.bf16.mxu1 %v4977_v57 }
  0x32   :  { %803 = vmatpush1.bf16.msra.mxu0 %v4992_v2  ;;  %844 = vmatpush1.bf16.msra.mxu1 %v4996_v13  ;;  %v132_v13 = vld [vmem:[%s6599_s1 + $0x3c0] sm:$0xff]  ;;  %v38_v2 = vld [vmem:[%s6599_s1 + $0xd0] sm:$0xff] }
  0x33   :  { %804 = vmatprep.subr.bf16.mxu0 %v4998_v14  ;;  %845 = vmatprep.subr.bf16.mxu1 %v5001_v16  ;;  %v5046_v16 = vcombine.high %v124_v49, %v128_v58  ;;  %v5049_v14 = vcombine.high %v125_v63, %v129_v0  ;;  %v18_v49 = vld [vmem:[%s6599_s1 + $0x30] sm:$0xff]  ;;  %v15_v58 = vld [vmem:[%s6599_s1 + $0x18] sm:$0xff] }
  0x35   :  { %6761 = vst [vmem:[#allocation12_spill] sm:$0xff] %v5046_v16  ;;  %6762 = vst [vmem:[#allocation13_spill] sm:$0xff] %v5049_v14 }
  0x36   :  { %805 = vmatpush1.bf16.msra.mxu0 %v5016_v33  ;;  %846 = vmatpush1.bf16.msra.mxu1 %v5020_v42  ;;  %v5073_v42 = vcombine.high %v133_v26, %v137_v31  ;;  %v14_v33 = vld [vmem:[%s6599_s1 + $0x10] sm:$0xff] }
  0x37   :  { %806 = vmatprep.subr.bf16.mxu0 %v5022_v47  ;;  %847 = vmatprep.subr.bf16.mxu1 %v5025_v48  ;;  %v5068_v48 = vcombine.low %v125_v63, %v129_v0  ;;  %v5070_v47 = vcombine.high %v132_v13, %v136_v17  ;;  %v19_v63 = vld [vmem:[%s6599_s1 + $0x38] sm:$0xff]  ;;  %v5088_v0 = vcombine.low %v132_v13, %v136_v17  ;;  %v26_v13 = vld [vmem:[%s6599_s1 + $0x70] sm:$0xff] }
  0x38   :  { %6766 = vst [vmem:[#allocation17_spill] sm:$0xff] %v5073_v42  ;;  %v23_v17 = vld [vmem:[%s6599_s1 + $0x58] sm:$0xff] }
  0x39   :  { %6764 = vst [vmem:[#allocation15_spill] sm:$0xff] %v5068_v48  ;;  %6765 = vst [vmem:[#allocation16_spill] sm:$0xff] %v5070_v47 }
  0x3a   :  { %807 = vmatpush1.bf16.msra.mxu0 %v5040_v1  ;;  %848 = vmatpush1.bf16.msra.mxu1 %v5044_v3  ;;  %6767 = vst [vmem:[#allocation18_spill] sm:$0xff] %v5088_v0  ;;  %v5097_v3 = vcombine.high %v15_v58, %v19_v63  ;;  %v22_v1 = vld [vmem:[%s6599_s1 + $0x50] sm:$0xff] }
  0x3b   :  { %808 = vmatprep.subr.bf16.mxu0 %v5046_v16  ;;  %849 = vmatprep.subr.bf16.mxu1 %v5049_v14  ;;  %v5092_v14 = vcombine.low %v133_v26, %v137_v31  ;;  %v5094_v16 = vcombine.high %v14_v33, %v18_v49  ;;  %v27_v26 = vld [vmem:[%s6599_s1 + $0x78] sm:$0xff]  ;;  %v5112_v31 = vcombine.low %v14_v33, %v18_v49  ;;  %v34_v33 = vld [vmem:[%s6599_s1 + $0xb0] sm:$0xff]  ;;  %v6775_v49 = vmov 0  }
  0x3c   :  { %6770 = vst [vmem:[#allocation21_spill] sm:$0xff] %v5097_v3 }
  0x3d   :  { %6768 = vst [vmem:[#allocation19_spill] sm:$0xff] %v5092_v14  ;;  %6769 = vst [vmem:[#allocation20_spill] sm:$0xff] %v5094_v16 }
  0x3e   :  { %809 = vmatpush1.bf16.msra.mxu0 %v5064_v32  ;;  %850 = vmatpush1.bf16.msra.mxu1 %v5068_v48  ;;  %6771 = vst [vmem:[#allocation22_spill] sm:$0xff] %v5112_v31  ;;  %v5121_v48 = vcombine.high %v23_v17, %v27_v26  ;;  %v30_v32 = vld [vmem:[%s6599_s1 + $0x90] sm:$0xff] }
  0x3f   :  { %810 = vmatprep.subr.bf16.mxu0 %v5070_v47  ;;  %851 = vmatprep.subr.bf16.mxu1 %v5073_v42  ;;  %v5116_v42 = vcombine.low %v15_v58, %v19_v63  ;;  %v5118_v47 = vcombine.high %v22_v1, %v26_v13  ;;  %v31_v58 = vld [vmem:[%s6599_s1 + $0x98] sm:$0xff] }
  0x40   :  { %6774 = vst [vmem:[#allocation25_spill] sm:$0xff] %v5121_v48  ;;  %v35_v63 = vld [vmem:[%s6599_s1 + $0xb8] sm:$0xff] }
  0x41   :  { %6772 = vst [vmem:[#allocation23_spill] sm:$0xff] %v5116_v42  ;;  %6773 = vst [vmem:[#allocation24_spill] sm:$0xff] %v5118_v47 }
  0x42   :  { %811 = vmatpush1.bf16.msra.mxu0 %v5088_v0  ;;  %852 = vmatpush1.bf16.msra.mxu1 %v5092_v14  ;;  %v5144_v14 = vcombine.high %v30_v32, %v34_v33  ;;  %v5147_v0 = vcombine.high %v31_v58, %v35_v63 }
  0x43   :  { %862 = vmatprep.subr.bf16.mxu0 %v5094_v16  ;;  %903 = vmatprep.subr.bf16.mxu1 %v5097_v3  ;;  %v5138_v3 = vcombine.low %v22_v1, %v26_v13  ;;  %v5142_v16 = vcombine.low %v23_v17, %v27_v26  ;;  %v42_v1 = vld [vmem:[%s6599_s1 + $0xf0] sm:$0xff]  ;;  %v39_v13 = vld [vmem:[%s6599_s1 + $0xd8] sm:$0xff]  ;;  %v5164_v26 = vcombine.low %v30_v32, %v34_v33 }
  0x44   :  { %6778 = vst [vmem:[#allocation28_spill] sm:$0xff] %v5144_v14  ;;  %6779 = vst [vmem:[#allocation29_spill] sm:$0xff] %v5147_v0  ;;  %v43_v17 = vld [vmem:[%s6599_s1 + $0xf8] sm:$0xff]  ;;  %v50_v32 = vld [vmem:[%s6599_s1 + $0x130] sm:$0xff] }
  0x45   :  { %813 = vmatmul.mubr.bf16.vlgmr.msra.gmra.mrb[0].mxu0 %v6775_v49  ;;  %854 = vmatmul.mubr.bf16.vlgmr.msra.gmra.mrb[0].mxu1 %v6775_v49  ;;  %6776 = vst [vmem:[#allocation26_spill] sm:$0xff] %v5138_v3  ;;  %6777 = vst [vmem:[#allocation27_spill] sm:$0xff] %v5142_v16  ;;  %v47_v33 = vld [vmem:[%s6599_s1 + $0x118] sm:$0xff] }
  0x46   :  { %863 = vmatpush1.bf16.msra.mxu0 %v5112_v31  ;;  %904 = vmatpush1.bf16.msra.mxu1 %v5116_v42  ;;  %6780 = vst [vmem:[#allocation30_spill] sm:$0xff] %v5164_v26  ;;  %v5173_v42 = vcombine.high %v39_v13, %v43_v17  ;;  %v46_v31 = vld [vmem:[%s6599_s1 + $0x110] sm:$0xff] }
  0x47   :  { %864 = vmatprep.subr.bf16.mxu0 %v5118_v47  ;;  %905 = vmatprep.subr.bf16.mxu1 %v5121_v48  ;;  %v5168_v48 = vcombine.low %v31_v58, %v35_v63  ;;  %v5170_v47 = vcombine.high %v38_v2, %v42_v1  ;;  %v51_v58 = vld [vmem:[%s6599_s1 + $0x138] sm:$0xff]  ;;  %v5188_v63 = vcombine.low %v38_v2, %v42_v1  ;;  %v58_v2 = vld [vmem:[%s6599_s1 + $0x170] sm:$0xff] }
  0x48   :  { %894 = vmatprep.mubr.bf16.mxu0 %v6775_v49  ;;  %935 = vmatprep.mubr.bf16.mxu1 %v6775_v49  ;;  %6783 = vst [vmem:[#allocation33_spill] sm:$0xff] %v5173_v42  ;;  %v55_v1 = vld [vmem:[%s6599_s1 + $0x158] sm:$0xff] }
  0x49   :  { %6781 = vst [vmem:[#allocation31_spill] sm:$0xff] %v5168_v48  ;;  %6782 = vst [vmem:[#allocation32_spill] sm:$0xff] %v5170_v47 }
  0x4a   :  { %865 = vmatpush1.bf16.msra.mxu0 %v5138_v3  ;;  %906 = vmatpush1.bf16.msra.mxu1 %v5142_v16  ;;  %6784 = vst [vmem:[#allocation34_spill] sm:$0xff] %v5188_v63  ;;  %v5197_v16 = vcombine.high %v47_v33, %v51_v58  ;;  %v54_v3 = vld [vmem:[%s6599_s1 + $0x150] sm:$0xff] }
  0x4b   :  { %866 = vmatprep.subr.bf16.mxu0 %v5144_v14  ;;  %907 = vmatprep.subr.bf16.mxu1 %v5147_v0  ;;  %v5192_v0 = vcombine.low %v39_v13, %v43_v17  ;;  %v5194_v14 = vcombine.high %v46_v31, %v50_v32  ;;  %v59_v13 = vld [vmem:[%s6599_s1 + $0x178] sm:$0xff]  ;;  %v5212_v17 = vcombine.low %v46_v31, %v50_v32  ;;  %v66_v31 = vld [vmem:[%s6599_s1 + $0x1b0] sm:$0xff] }
  0x4c   :  { %6787 = vst [vmem:[#allocation37_spill] sm:$0xff] %v5197_v16  ;;  %v63_v32 = vld [vmem:[%s6599_s1 + $0x198] sm:$0xff] }
  0x4d   :  { %6785 = vst [vmem:[#allocation35_spill] sm:$0xff] %v5192_v0  ;;  %6786 = vst [vmem:[#allocation36_spill] sm:$0xff] %v5194_v14 }
  0x4e   :  { %867 = vmatpush1.bf16.msra.mxu0 %v5164_v26  ;;  %908 = vmatpush1.bf16.msra.mxu1 %v5168_v48  ;;  %6788 = vst [vmem:[#allocation38_spill] sm:$0xff] %v5212_v17  ;;  %v5221_v48 = vcombine.high %v55_v1, %v59_v13  ;;  %v62_v26 = vld [vmem:[%s6599_s1 + $0x190] sm:$0xff] }
  0x4f   :  { %868 = vmatprep.subr.bf16.mxu0 %v5170_v47  ;;  %909 = vmatprep.subr.bf16.mxu1 %v5173_v42  ;;  %v5216_v42 = vcombine.low %v47_v33, %v51_v58  ;;  %v5218_v47 = vcombine.high %v54_v3, %v58_v2  ;;  %v67_v33 = vld [vmem:[%s6599_s1 + $0x1b8] sm:$0xff]  ;;  %v5236_v58 = vcombine.low %v54_v3, %v58_v2  ;;  %v74_v3 = vld [vmem:[%s6599_s1 + $0x1f0] sm:$0xff] }
  0x50   :  { %6791 = vst [vmem:[#allocation41_spill] sm:$0xff] %v5221_v48  ;;  %v71_v2 = vld [vmem:[%s6599_s1 + $0x1d8] sm:$0xff] }
  0x51   :  { %6789 = vst [vmem:[#allocation39_spill] sm:$0xff] %v5216_v42  ;;  %6790 = vst [vmem:[#allocation40_spill] sm:$0xff] %v5218_v47 }
  0x52   :  { %869 = vmatpush1.bf16.msra.mxu0 %v5188_v63  ;;  %910 = vmatpush1.bf16.msra.mxu1 %v5192_v0  ;;  %6792 = vst [vmem:[#allocation42_spill] sm:$0xff] %v5236_v58  ;;  %v5245_v0 = vcombine.high %v63_v32, %v67_v33  ;;  %v70_v63 = vld [vmem:[%s6599_s1 + $0x1d0] sm:$0xff] }
  0x53   :  { %870 = vmatprep.subr.bf16.mxu0 %v5194_v14  ;;  %911 = vmatprep.subr.bf16.mxu1 %v5197_v16  ;;  %v5240_v16 = vcombine.low %v55_v1, %v59_v13  ;;  %v5242_v14 = vcombine.high %v62_v26, %v66_v31  ;;  %v75_v1 = vld [vmem:[%s6599_s1 + $0x1f8] sm:$0xff]  ;;  %v5260_v13 = vcombine.low %v62_v26, %v66_v31  ;;  %v82_v26 = vld [vmem:[%s6599_s1 + $0x230] sm:$0xff] }
  0x54   :  { %6795 = vst [vmem:[#allocation45_spill] sm:$0xff] %v5245_v0  ;;  %v79_v31 = vld [vmem:[%s6599_s1 + $0x218] sm:$0xff] }
  0x55   :  { %6793 = vst [vmem:[#allocation43_spill] sm:$0xff] %v5240_v16  ;;  %6794 = vst [vmem:[#allocation44_spill] sm:$0xff] %v5242_v14 }
  0x56   :  { %871 = vmatpush1.bf16.msra.mxu0 %v5212_v17  ;;  %912 = vmatpush1.bf16.msra.mxu1 %v5216_v42  ;;  %6796 = vst [vmem:[#allocation46_spill] sm:$0xff] %v5260_v13  ;;  %v5269_v42 = vcombine.high %v71_v2, %v75_v1  ;;  %v78_v17 = vld [vmem:[%s6599_s1 + $0x210] sm:$0xff] }
  0x57   :  { %872 = vmatprep.subr.bf16.mxu0 %v5218_v47  ;;  %913 = vmatprep.subr.bf16.mxu1 %v5221_v48  ;;  %v5264_v48 = vcombine.low %v63_v32, %v67_v33  ;;  %v5266_v47 = vcombine.high %v70_v63, %v74_v3  ;;  %v83_v32 = vld [vmem:[%s6599_s1 + $0x238] sm:$0xff]  ;;  %v5284_v33 = vcombine.low %v70_v63, %v74_v3  ;;  %v90_v63 = vld [vmem:[%s6599_s1 + $0x270] sm:$0xff] }
  0x58   :  { %6799 = vst [vmem:[#allocation49_spill] sm:$0xff] %v5269_v42  ;;  %v87_v3 = vld [vmem:[%s6599_s1 + $0x258] sm:$0xff] }
  0x59   :  { %6797 = vst [vmem:[#allocation47_spill] sm:$0xff] %v5264_v48  ;;  %6798 = vst [vmem:[#allocation48_spill] sm:$0xff] %v5266_v47 }
  0x5a   :  { %873 = vmatpush1.bf16.msra.mxu0 %v5236_v58  ;;  %914 = vmatpush1.bf16.msra.mxu1 %v5240_v16  ;;  %6800 = vst [vmem:[#allocation50_spill] sm:$0xff] %v5284_v33  ;;  %v5293_v16 = vcombine.high %v79_v31, %v83_v32  ;;  %v86_v58 = vld [vmem:[%s6599_s1 + $0x250] sm:$0xff] }
  0x5b   :  { %874 = vmatprep.subr.bf16.mxu0 %v5242_v14  ;;  %915 = vmatprep.subr.bf16.mxu1 %v5245_v0  ;;  %v5288_v0 = vcombine.low %v71_v2, %v75_v1  ;;  %v5290_v14 = vcombine.high %v78_v17, %v82_v26  ;;  %v91_v2 = vld [vmem:[%s6599_s1 + $0x278] sm:$0xff]  ;;  %v5308_v1 = vcombine.low %v78_v17, %v82_v26  ;;  %v98_v17 = vld [vmem:[%s6599_s1 + $0x2b0] sm:$0xff] }
  0x5c   :  { %6803 = vst [vmem:[#allocation53_spill] sm:$0xff] %v5293_v16  ;;  %v95_v26 = vld [vmem:[%s6599_s1 + $0x298] sm:$0xff] }
  0x5d   :  { %6801 = vst [vmem:[#allocation51_spill] sm:$0xff] %v5288_v0  ;;  %6802 = vst [vmem:[#allocation52_spill] sm:$0xff] %v5290_v14 }
  0x5e   :  { %875 = vmatpush1.bf16.msra.mxu0 %v5260_v13  ;;  %916 = vmatpush1.bf16.msra.mxu1 %v5264_v48  ;;  %6804 = vst [vmem:[#allocation54_spill] sm:$0xff] %v5308_v1  ;;  %v5317_v48 = vcombine.high %v87_v3, %v91_v2  ;;  %v94_v13 = vld [vmem:[%s6599_s1 + $0x290] sm:$0xff] }
  0x5f   :  { %876 = vmatprep.subr.bf16.mxu0 %v5266_v47  ;;  %917 = vmatprep.subr.bf16.mxu1 %v5269_v42  ;;  %v5312_v42 = vcombine.low %v79_v31, %v83_v32  ;;  %v5314_v47 = vcombine.high %v86_v58, %v90_v63  ;;  %v99_v31 = vld [vmem:[%s6599_s1 + $0x2b8] sm:$0xff]  ;;  %v5332_v32 = vcombine.low %v86_v58, %v90_v63  ;;  %v106_v58 = vld [vmem:[%s6599_s1 + $0x2f0] sm:$0xff] }
  0x60   :  { %6807 = vst [vmem:[#allocation57_spill] sm:$0xff] %v5317_v48  ;;  %v103_v63 = vld [vmem:[%s6599_s1 + $0x2d8] sm:$0xff] }
  0x61   :  { %6805 = vst [vmem:[#allocation55_spill] sm:$0xff] %v5312_v42  ;;  %6806 = vst [vmem:[#allocation56_spill] sm:$0xff] %v5314_v47 }
  0x62   :  { %877 = vmatpush1.bf16.msra.mxu0 %v5284_v33  ;;  %918 = vmatpush1.bf16.msra.mxu1 %v5288_v0  ;;  %6808 = vst [vmem:[#allocation58_spill] sm:$0xff] %v5332_v32  ;;  %v5341_v0 = vcombine.high %v95_v26, %v99_v31  ;;  %v102_v33 = vld [vmem:[%s6599_s1 + $0x2d0] sm:$0xff] }
  0x63   :  { %878 = vmatprep.subr.bf16.mxu0 %v5290_v14  ;;  %919 = vmatprep.subr.bf16.mxu1 %v5293_v16  ;;  %v5336_v16 = vcombine.low %v87_v3, %v91_v2  ;;  %v5338_v14 = vcombine.high %v94_v13, %v98_v17  ;;  %v107_v3 = vld [vmem:[%s6599_s1 + $0x2f8] sm:$0xff]  ;;  %v5356_v2 = vcombine.low %v94_v13, %v98_v17  ;;  %v114_v13 = vld [vmem:[%s6599_s1 + $0x330] sm:$0xff] }
  0x64   :  { %6811 = vst [vmem:[#allocation61_spill] sm:$0xff] %v5341_v0  ;;  %v111_v17 = vld [vmem:[%s6599_s1 + $0x318] sm:$0xff] }
  0x65   :  { %6809 = vst [vmem:[#allocation59_spill] sm:$0xff] %v5336_v16  ;;  %6810 = vst [vmem:[#allocation60_spill] sm:$0xff] %v5338_v14 }
  0x66   :  { %879 = vmatpush1.bf16.msra.mxu0 %v5308_v1  ;;  %920 = vmatpush1.bf16.msra.mxu1 %v5312_v42  ;;  %6812 = vst [vmem:[#allocation62_spill] sm:$0xff] %v5356_v2  ;;  %v5365_v42 = vcombine.high %v103_v63, %v107_v3  ;;  %v110_v1 = vld [vmem:[%s6599_s1 + $0x310] sm:$0xff] }
  0x67   :  { %880 = vmatprep.subr.bf16.mxu0 %v5314_v47  ;;  %921 = vmatprep.subr.bf16.mxu1 %v5317_v48  ;;  %v5360_v48 = vcombine.low %v95_v26, %v99_v31  ;;  %v5362_v47 = vcombine.high %v102_v33, %v106_v58  ;;  %v115_v26 = vld [vmem:[%s6599_s1 + $0x338] sm:$0xff]  ;;  %v5380_v31 = vcombine.low %v102_v33, %v106_v58  ;;  %v122_v33 = vld [vmem:[%s6599_s1 + $0x370] sm:$0xff] }
  0x68   :  { %6815 = vst [vmem:[#allocation65_spill] sm:$0xff] %v5365_v42  ;;  %v119_v58 = vld [vmem:[%s6599_s1 + $0x358] sm:$0xff] }
  0x69   :  { %6813 = vst [vmem:[#allocation63_spill] sm:$0xff] %v5360_v48  ;;  %6814 = vst [vmem:[#allocation64_spill] sm:$0xff] %v5362_v47 }
  0x6a   :  { %881 = vmatpush1.bf16.msra.mxu0 %v5332_v32  ;;  %922 = vmatpush1.bf16.msra.mxu1 %v5336_v16  ;;  %6816 = vst [vmem:[#allocation66_spill] sm:$0xff] %v5380_v31  ;;  %v5389_v16 = vcombine.high %v111_v17, %v115_v26  ;;  %v118_v32 = vld [vmem:[%s6599_s1 + $0x350] sm:$0xff] }
  0x6b   :  { %882 = vmatprep.subr.bf16.mxu0 %v5338_v14  ;;  %923 = vmatprep.subr.bf16.mxu1 %v5341_v0  ;;  %v5384_v0 = vcombine.low %v103_v63, %v107_v3  ;;  %v5386_v14 = vcombine.high %v110_v1, %v114_v13  ;;  %v123_v63 = vld [vmem:[%s6599_s1 + $0x378] sm:$0xff]  ;;  %v5404_v3 = vcombine.low %v110_v1, %v114_v13  ;;  %v130_v1 = vld [vmem:[%s6599_s1 + $0x3b0] sm:$0xff] }
  0x6c   :  { %6819 = vst [vmem:[#allocation69_spill] sm:$0xff] %v5389_v16  ;;  %v127_v13 = vld [vmem:[%s6599_s1 + $0x398] sm:$0xff] }
  0x6d   :  { %6817 = vst [vmem:[#allocation67_spill] sm:$0xff] %v5384_v0  ;;  %6818 = vst [vmem:[#allocation68_spill] sm:$0xff] %v5386_v14 }
  0x6e   :  { %883 = vmatpush1.bf16.msra.mxu0 %v5356_v2  ;;  %924 = vmatpush1.bf16.msra.mxu1 %v5360_v48  ;;  %6820 = vst [vmem:[#allocation70_spill] sm:$0xff] %v5404_v3  ;;  %v5413_v48 = vcombine.high %v119_v58, %v123_v63  ;;  %v126_v2 = vld [vmem:[%s6599_s1 + $0x390] sm:$0xff] }
  0x6f   :  { %884 = vmatprep.subr.bf16.mxu0 %v5362_v47  ;;  %925 = vmatprep.subr.bf16.mxu1 %v5365_v42  ;;  %v5408_v42 = vcombine.low %v111_v17, %v115_v26  ;;  %v5410_v47 = vcombine.high %v118_v32, %v122_v33  ;;  %v131_v17 = vld [vmem:[%s6599_s1 + $0x3b8] sm:$0xff]  ;;  %v5428_v26 = vcombine.low %v118_v32, %v122_v33  ;;  %v138_v32 = vld [vmem:[%s6599_s1 + $0x3f0] sm:$0xff] }
  0x70   :  { %6823 = vst [vmem:[#allocation73_spill] sm:$0xff] %v5413_v48  ;;  %v135_v33 = vld [vmem:[%s6599_s1 + $0x3d8] sm:$0xff] }
  0x71   :  { %6821 = vst [vmem:[#allocation71_spill] sm:$0xff] %v5408_v42  ;;  %6822 = vst [vmem:[#allocation72_spill] sm:$0xff] %v5410_v47 }
  0x72   :  { %885 = vmatpush1.bf16.msra.mxu0 %v5380_v31  ;;  %926 = vmatpush1.bf16.msra.mxu1 %v5384_v0  ;;  %v5437_v0 = vcombine.high %v127_v13, %v131_v17  ;;  %v134_v31 = vld [vmem:[%s6599_s1 + $0x3d0] sm:$0xff] }
  0x73   :  { %886 = vmatprep.subr.bf16.mxu0 %v5386_v14  ;;  %927 = vmatprep.subr.bf16.mxu1 %v5389_v16  ;;  %v5432_v16 = vcombine.low %v119_v58, %v123_v63  ;;  %v5434_v14 = vcombine.high %v126_v2, %v130_v1  ;;  %v139_v58 = vld [vmem:[%s6599_s1 + $0x3f8] sm:$0xff]  ;;  %v5452_v63 = vcombine.low %v126_v2, %v130_v1 }
  0x74   :  { %v5468_v2 = vcombine.low %v135_v33, %v139_v58 }
  0x76   :  { %887 = vmatpush1.bf16.msra.mxu0 %v5404_v3  ;;  %928 = vmatpush1.bf16.msra.mxu1 %v5408_v42  ;;  %v5461_v42 = vcombine.high %v135_v33, %v139_v58  ;;  %v5464_v3 = vcombine.low %v134_v31, %v138_v32 }
  0x77   :  { %888 = vmatprep.subr.bf16.mxu0 %v5410_v47  ;;  %929 = vmatprep.subr.bf16.mxu1 %v5413_v48  ;;  %v5456_v48 = vcombine.low %v127_v13, %v131_v17  ;;  %v5458_v47 = vcombine.high %v134_v31, %v138_v32 }
  0x7a   :  { %889 = vmatpush1.bf16.msra.mxu0 %v5428_v26  ;;  %930 = vmatpush1.bf16.msra.mxu1 %v5432_v16 }
  0x7b   :  { %890 = vmatprep.subr.bf16.mxu0 %v5434_v14  ;;  %931 = vmatprep.subr.bf16.mxu1 %v5437_v0 }
  0x7e   :  { %891 = vmatpush1.bf16.msra.mxu0 %v5452_v63  ;;  %932 = vmatpush1.bf16.msra.mxu1 %v5456_v48 }
  0x7f   :  { %892 = vmatprep.subr.bf16.mxu0 %v5458_v47  ;;  %933 = vmatprep.subr.bf16.mxu1 %v5461_v42 }
  0x82   :  { %893 = vmatpush1.bf16.msra.mxu0 %v5464_v3  ;;  %934 = vmatpush1.bf16.msra.mxu1 %v5468_v2 }
  0x83   :  { %1801 = vmatprep.subr.bf16.mxu0 %v4710_v4  ;;  %1842 = vmatprep.subr.bf16.mxu1 %v4723_v9  ;;  %v6824_v4 = vld [vmem:[#allocation2_spill] sm:$0xff]  ;;  %v6826_v9 = vld [vmem:[#allocation4_spill] sm:$0xff] }
  0x85   :  { %895 = vmatmul.mubr.bf16.vlgmr.msra.gmra.mrb[4].mxu0 %v6775_v49  ;;  %936 = vmatmul.mubr.bf16.vlgmr.msra.gmra.mrb[4].mxu1 %v6775_v49 }
  0x86   :  { %1802 = vmatpush1.bf16.msra.mxu0 %v4715_v6  ;;  %1843 = vmatpush1.bf16.msra.mxu1 %v4725_v10  ;;  %v6825_v6 = vld [vmem:[#allocation3_spill] sm:$0xff]  ;;  %v6827_v10 = vld [vmem:[#allocation5_spill] sm:$0xff] }
  0x87   :  { %1803 = vmatprep.subr.bf16.mxu0 %v4727_v11  ;;  %1844 = vmatprep.subr.bf16.mxu1 %v4739_v15  ;;  %v6828_v11 = vld [vmem:[#allocation6_spill] sm:$0xff]  ;;  %v6829_v15 = vld [vmem:[#allocation7_spill] sm:$0xff] }
  0x8a   :  { %1804 = vmatpush1.bf16.msra.mxu0 %v4752_v19  ;;  %1845 = vmatpush1.bf16.msra.mxu1 %v4756_v20  ;;  %v6830_v19 = vld [vmem:[#allocation8_spill] sm:$0xff]  ;;  %v6831_v20 = vld [vmem:[#allocation9_spill] sm:$0xff] }
  0x8b   :  { %1805 = vmatprep.subr.bf16.mxu0 %v4758_v21  ;;  %1846 = vmatprep.subr.bf16.mxu1 %v4761_v22  ;;  %v6832_v21 = vld [vmem:[#allocation10_spill] sm:$0xff]  ;;  %v6833_v22 = vld [vmem:[#allocation11_spill] sm:$0xff] }
  0x8e   :  { %1806 = vmatpush1.bf16.msra.mxu0 %v4776_v27  ;;  %1847 = vmatpush1.bf16.msra.mxu1 %v4780_v28  ;;  %v6834_v27 = vld [vmem:[#allocation12_spill] sm:$0xff]  ;;  %v6835_v28 = vld [vmem:[#allocation13_spill] sm:$0xff] }
  0x8f   :  { %1807 = vmatprep.subr.bf16.mxu0 %v4782_v29  ;;  %1848 = vmatprep.subr.bf16.mxu1 %v4785_v30  ;;  %v6836_v29 = vld [vmem:[#allocation14_spill] sm:$0xff]  ;;  %v6837_v30 = vld [vmem:[#allocation15_spill] sm:$0xff] }
  0x92   :  { %1808 = vmatpush1.bf16.msra.mxu0 %v4800_v35  ;;  %1849 = vmatpush1.bf16.msra.mxu1 %v4804_v36  ;;  %v6838_v35 = vld [vmem:[#allocation16_spill] sm:$0xff]  ;;  %v6839_v36 = vld [vmem:[#allocation17_spill] sm:$0xff] }
  0x93   :  { %1809 = vmatprep.subr.bf16.mxu0 %v4806_v37  ;;  %1850 = vmatprep.subr.bf16.mxu1 %v4809_v38  ;;  %v6840_v37 = vld [vmem:[#allocation18_spill] sm:$0xff]  ;;  %v6841_v38 = vld [vmem:[#allocation19_spill] sm:$0xff] }
  0x96   :  { %1810 = vmatpush1.bf16.msra.mxu0 %v4824_v43  ;;  %1851 = vmatpush1.bf16.msra.mxu1 %v4828_v44  ;;  %v6842_v43 = vld [vmem:[#allocation20_spill] sm:$0xff]  ;;  %v6843_v44 = vld [vmem:[#allocation21_spill] sm:$0xff] }
  0x97   :  { %1811 = vmatprep.subr.bf16.mxu0 %v4830_v45  ;;  %1852 = vmatprep.subr.bf16.mxu1 %v4833_v46  ;;  %v4683_v45 = vmov 1983009808  }
  0x98   :  { %v957_v46 = vunpack.c.l.s4 %v4683_v45 }
  0x9a   :  { %1812 = vmatpush1.bf16.msra.mxu0 %v4848_v51  ;;  %1853 = vmatpush1.bf16.msra.mxu1 %v4852_v52  ;;  %v959_v51 = vlaneseq  ;;  %v958_v52 = vunpack.c.0.s8 %v957_v46 }
  0x9b   :  { %1813 = vmatprep.subr.bf16.mxu0 %v4854_v53  ;;  %1854 = vmatprep.subr.bf16.mxu1 %v4857_v54 }
  0x9c   :  { %v960_v53 = vshrl.u32 %v959_v51, 7 }
  0x9e   :  { %1814 = vmatpush1.bf16.msra.mxu0 %v4872_v59  ;;  %1855 = vmatpush1.bf16.msra.mxu1 %v4876_v60  ;;  %v5541_v59 = vsub.s32 %v958_v52, %v960_v53  ;;  %v6844_v52 = vld [vmem:[#allocation22_spill] sm:$0xff]  ;;  %v6845_v53 = vld [vmem:[#allocation23_spill] sm:$0xff] }
  0x9f   :  { %1815 = vmatprep.subr.bf16.mxu0 %v4878_v61  ;;  %1856 = vmatprep.subr.bf16.mxu1 %v4881_v62 }
  0xa2   :  { %1816 = vmatpush1.bf16.msra.mxu0 %v4896_v5  ;;  %1857 = vmatpush1.bf16.msra.mxu1 %v4900_v7 }
  0xa3   :  { %1817 = vmatprep.subr.bf16.mxu0 %v4902_v8  ;;  %1858 = vmatprep.subr.bf16.mxu1 %v4905_v12 }
  0xa6   :  { %1818 = vmatpush1.bf16.msra.mxu0 %v4920_v18  ;;  %1859 = vmatpush1.bf16.msra.mxu1 %v4924_v23 }
  0xa7   :  { %1819 = vmatprep.subr.bf16.mxu0 %v4926_v24  ;;  %1860 = vmatprep.subr.bf16.mxu1 %v4929_v25 }
  0xaa   :  { %1820 = vmatpush1.bf16.msra.mxu0 %v4944_v34  ;;  %1861 = vmatpush1.bf16.msra.mxu1 %v4948_v39  ;;  %v944_v39 = vld [vmem:[%s6600_s0] sm:$0xff] }
  0xab   :  { %1821 = vmatprep.subr.bf16.mxu0 %v4950_v40  ;;  %1862 = vmatprep.subr.bf16.mxu1 %v4953_v41 }
  0xae   :  { %1822 = vmatpush1.bf16.msra.mxu0 %v4968_v50  ;;  %1863 = vmatpush1.bf16.msra.mxu1 %v4972_v55 }
  0xaf   :  { %1823 = vmatprep.subr.bf16.mxu0 %v4974_v56  ;;  %1864 = vmatprep.subr.bf16.mxu1 %v4977_v57 }
  0xb2   :  { %1824 = vmatpush1.bf16.msra.mxu0 %v6824_v4  ;;  %1865 = vmatpush1.bf16.msra.mxu1 %v6825_v6 }
  0xb3   :  { %1825 = vmatprep.subr.bf16.mxu0 %v6826_v9  ;;  %1866 = vmatprep.subr.bf16.mxu1 %v6827_v10  ;;  %v945_v9 = vld [vmem:[%s6600_s0 + $0x8] sm:$0xff] }
  0xb6   :  { %1826 = vmatpush1.bf16.msra.mxu0 %v6828_v11  ;;  %1867 = vmatpush1.bf16.msra.mxu1 %v6829_v15 }
  0xb7   :  { %1827 = vmatprep.subr.bf16.mxu0 %v6830_v19  ;;  %1868 = vmatprep.subr.bf16.mxu1 %v6831_v20 }
  0xba   :  { %1828 = vmatpush1.bf16.msra.mxu0 %v6832_v21  ;;  %1869 = vmatpush1.bf16.msra.mxu1 %v6833_v22 }
  0xbb   :  { %1829 = vmatprep.subr.bf16.mxu0 %v6834_v27  ;;  %1870 = vmatprep.subr.bf16.mxu1 %v6835_v28 }
  0xbe   :  { %1830 = vmatpush1.bf16.msra.mxu0 %v6836_v29  ;;  %1871 = vmatpush1.bf16.msra.mxu1 %v6837_v30 }
  0xbf   :  { %1831 = vmatprep.subr.bf16.mxu0 %v6838_v35  ;;  %1872 = vmatprep.subr.bf16.mxu1 %v6839_v36 }
  0xc2   :  { %1832 = vmatpush1.bf16.msra.mxu0 %v6840_v37  ;;  %1873 = vmatpush1.bf16.msra.mxu1 %v6841_v38 }
  0xc3   :  { %1883 = vmatprep.subr.bf16.mxu0 %v6842_v43  ;;  %1924 = vmatprep.subr.bf16.mxu1 %v6843_v44 }
 0x118   :  { %v814_v54 = vpop.f32.mrb[0].mxu0  ;;  %v855_v60 = vpop.f32.mrb[0].mxu1 }
 0x119   :  { %v816_v61 = vpop.f32.mrb[1].mxu0  ;;  %v857_v5 = vpop.f32.mrb[1].mxu1 }
 0x11a   :  { %v954_v62 = vcombine.low %v814_v54, %v816_v61  ;;  %v818_v7 = vpop.f32.mrb[2].mxu0  ;;  %v955_v8 = vcombine.low %v855_v60, %v857_v5  ;;  %v859_v12 = vpop.f32.mrb[2].mxu1  ;;  %v6846_v54 = vld [vmem:[#allocation24_spill] sm:$0xff]  ;;  %v6847_v60 = vld [vmem:[#allocation25_spill] sm:$0xff]  ;;  %v6848_v61 = vld [vmem:[#allocation26_spill] sm:$0xff] }
 0x11b   :  { %v819_v18 = vpop.f32.mrb[3].mxu0  ;;  %v860_v24 = vpop.f32.mrb[3].mxu1  ;;  %v6850_v5 = vld [vmem:[#allocation28_spill] sm:$0xff]  ;;  %v6851_v7 = vld [vmem:[#allocation29_spill] sm:$0xff]  ;;  %v6853_v12 = vld [vmem:[#allocation31_spill] sm:$0xff] }
 0x11c   :  { %v962_v23 = vrot.slane %v954_v62, %v5541_v59  ;;  %v969_v25 = vrot.slane %v955_v8, %v5541_v59  ;;  %v6849_v62 = vld [vmem:[#allocation27_spill] sm:$0xff]  ;;  %v6852_v8 = vld [vmem:[#allocation30_spill] sm:$0xff]  ;;  %v6854_v18 = vld [vmem:[#allocation32_spill] sm:$0xff] }
 0x11d   :  { %v6856_v24 = vld [vmem:[#allocation34_spill] sm:$0xff] }
 0x11e   :  { %v970_v34 = vcombine.low %v962_v23, %v969_v25  ;;  %v6855_v23 = vld [vmem:[#allocation33_spill] sm:$0xff]  ;;  %v6857_v25 = vld [vmem:[#allocation35_spill] sm:$0xff] }
 0x120   :  { %v990_v40 = vadd.f32 %v970_v34, %v944_v39  ;;  %v6858_v34 = vld [vmem:[#allocation36_spill] sm:$0xff]  ;;  %v6859_v39 = vld [vmem:[#allocation37_spill] sm:$0xff] }
 0x122   :  { %v4228_v41 = vmul.f32 -1.442695, %v990_v40  ;;  %v6860_v40 = vld [vmem:[#allocation38_spill] sm:$0xff] }
 0x124   :  { %4634 = vpow2.f32 %v4228_v41  ;;  %v6861_v41 = vld [vmem:[#allocation39_spill] sm:$0xff] }
 0x12e   :  { %v4635_v55 = vpop.eup %4634 }
 0x12f   :  { %v998_v33 = vadd.f32 1.0, %v4635_v55  ;;  %v6863_v55 = vld [vmem:[#allocation41_spill] sm:$0xff] }
 0x131   :  { %4636 = vrcp.f32 %v998_v33  ;;  %v6872_v33 = vld [vmem:[#allocation50_spill] sm:$0xff] }
 0x13b   :  { %v4637_v20 = vpop.eup %4636 }
 0x13c   :  { %v1009_v21 = vrot.slane %v4637_v20, 4 }
 0x13e   :  { %v1011_v29 = vmul.f32 0.0, %v1009_v21  ;;  %v6882_v21 = vld [vmem:[#allocation60_spill] sm:$0xff] }
 0x158   :  { %v896_v50 = vpop.f32.mrb[4].mxu0  ;;  %v937_v56 = vpop.f32.mrb[4].mxu1 }
 0x159   :  { %v898_v57 = vpop.f32.mrb[5].mxu0  ;;  %v939_v31 = vpop.f32.mrb[5].mxu1 }
 0x15a   :  { %v971_v49 = vcombine.low %v896_v50, %v898_v57  ;;  %v900_v1 = vpop.f32.mrb[6].mxu0  ;;  %v972_v13 = vcombine.low %v937_v56, %v939_v31  ;;  %v941_v17 = vpop.f32.mrb[6].mxu1  ;;  %v6862_v50 = vld [vmem:[#allocation40_spill] sm:$0xff]  ;;  %v6864_v56 = vld [vmem:[#allocation42_spill] sm:$0xff]  ;;  %v6865_v57 = vld [vmem:[#allocation43_spill] sm:$0xff] }
 0x15b   :  { %v901_v32 = vpop.f32.mrb[7].mxu0  ;;  %v942_v4 = vpop.f32.mrb[7].mxu1  ;;  %v6867_v31 = vld [vmem:[#allocation45_spill] sm:$0xff]  ;;  %v6868_v1 = vld [vmem:[#allocation46_spill] sm:$0xff]  ;;  %v6870_v17 = vld [vmem:[#allocation48_spill] sm:$0xff] }
 0x15c   :  { %v979_v58 = vrot.slane %v971_v49, %v5541_v59  ;;  %v986_v6 = vrot.slane %v972_v13, %v5541_v59  ;;  %v6866_v49 = vld [vmem:[#allocation44_spill] sm:$0xff]  ;;  %v6869_v13 = vld [vmem:[#allocation47_spill] sm:$0xff]  ;;  %v6871_v32 = vld [vmem:[#allocation49_spill] sm:$0xff] }
 0x15d   :  { %v6874_v4 = vld [vmem:[#allocation52_spill] sm:$0xff] }
 0x15e   :  { %v987_v10 = vcombine.low %v979_v58, %v986_v6  ;;  %v6873_v58 = vld [vmem:[#allocation51_spill] sm:$0xff]  ;;  %v6875_v6 = vld [vmem:[#allocation53_spill] sm:$0xff] }
 0x160   :  { %v991_v11 = vadd.f32 %v987_v10, %v945_v9  ;;  %v6876_v9 = vld [vmem:[#allocation54_spill] sm:$0xff]  ;;  %v6877_v10 = vld [vmem:[#allocation55_spill] sm:$0xff] }
 0x162   :  { %v4229_v15 = vmul.f32 -1.442695, %v991_v11  ;;  %v1005_v19 = vrot.slane %v991_v11, 4  ;;  %v6878_v11 = vld [vmem:[#allocation56_spill] sm:$0xff] }
 0x164   :  { %4638 = vpow2.f32 %v4229_v15  ;;  %v6879_v15 = vld [vmem:[#allocation57_spill] sm:$0xff] }
 0x165   :  { %4640 = vtanh.f32 %v1005_v19  ;;  %v6880_v19 = vld [vmem:[#allocation58_spill] sm:$0xff] }
 0x16e   :  { %v4639_v22 = vpop.eup %4638 }
 0x16f   :  { %v4641_v27 = vpop.eup %4640  ;;  %v999_v28 = vadd.f32 1.0, %v4639_v22  ;;  %v6883_v22 = vld [vmem:[#allocation61_spill] sm:$0xff] }
 0x170   :  { %v1012_v30 = vmul.f32 %v4641_v27, %v4637_v20  ;;  %v6881_v20 = vld [vmem:[#allocation59_spill] sm:$0xff]  ;;  %v6884_v27 = vld [vmem:[#allocation62_spill] sm:$0xff] }
 0x171   :  { %4642 = vrcp.f32 %v999_v28  ;;  %v6885_v28 = vld [vmem:[#allocation63_spill] sm:$0xff] }
 0x172   :  { %v5553_v35 = vadd.f32 %v1012_v30, %v1011_v29  ;;  %v6886_v29 = vld [vmem:[#allocation64_spill] sm:$0xff]  ;;  %v6887_v30 = vld [vmem:[#allocation65_spill] sm:$0xff] }
 0x174   :  { %4644 = vtanh.f32 %v5553_v35 }
 0x17b   :  { %v4643_v36 = vpop.eup %4642 }
 0x17e   :  { %v4645_v37 = vpop.eup %4644 }
 0x17f   :  { %v1015_v38 = vmul.f32 %v4645_v37, %v4643_v36  ;;  %v6888_v36 = vld [vmem:[#allocation66_spill] sm:$0xff]  ;;  %v6889_v37 = vld [vmem:[#allocation67_spill] sm:$0xff] }
 0x181   :  { %v1016_v43 = vpack.c.bf16 %v1015_v38, %v1015_v38  ;;  %v1025_v44 = vrot.slane %v1015_v38, %v5541_v59  ;;  %v6890_v38 = vld [vmem:[#allocation68_spill] sm:$0xff] }
 0x183   :  { %1017 = vst [vmem:[%s6601_s2] sm:$0x1] %v1016_v43  ;;  %v1026_v45 = vcombine.high %v1025_v44, %v1025_v44  ;;  %v5560_v51 = vpack.c.bf16 %v1025_v44, %v1025_v44  ;;  %v6891_v43 = vld [vmem:[#allocation69_spill] sm:$0xff]  ;;  %v6892_v44 = vld [vmem:[#allocation70_spill] sm:$0xff] }
 0x185   :  { %v1028_v46 = vpack.c.bf16 %v1026_v45, %v1026_v45  ;;  %v6893_v45 = vld [vmem:[#allocation71_spill] sm:$0xff] }
 0x187   :  { %4230 = vst [vmem:[%s6601_s2 + $0x7] sm:$0x1] %v1028_v46  ;;  %1833 = vmatprep.mubr.bf16.mxu0 %v1028_v46  ;;  %1874 = vmatprep.mubr.bf16.mxu1 %v1028_v46 }
 0x188   :  { %1834 = vmatmul.mubr.bf16.vlgmr.msra.gmra.mrb[8].mxu0 %v5560_v51  ;;  %1875 = vmatmul.mubr.bf16.vlgmr.msra.gmra.mrb[8].mxu1 %v5560_v51 }
 0x189   :  { %1884 = vmatpush1.bf16.msra.mxu0 %v6844_v52  ;;  %1925 = vmatpush1.bf16.msra.mxu1 %v6845_v53  ;;  %v6895_v52 = vld [vmem:[#allocation73_spill] sm:$0xff]  ;;  %v2065_v53 = vld [vmem:[%s6599_s1 + $0x48] sm:$0xff] }
 0x18a   :  { %1915 = vmatprep.mubr.bf16.mxu0 %v1028_v46  ;;  %1956 = vmatprep.mubr.bf16.mxu1 %v1028_v46  ;;  %v6894_v46 = vld [vmem:[#allocation72_spill] sm:$0xff] }
 0x18b   :  { %1885 = vmatprep.subr.bf16.mxu0 %v6846_v54  ;;  %1926 = vmatprep.subr.bf16.mxu1 %v6847_v60  ;;  %v2069_v54 = vld [vmem:[%s6599_s1 + $0x68] sm:$0xff]  ;;  %v2072_v60 = vld [vmem:[%s6599_s1 + $0x80] sm:$0xff] }
 0x18d   :  { %1886 = vmatpush1.bf16.msra.mxu0 %v6848_v61  ;;  %1927 = vmatpush1.bf16.msra.mxu1 %v6849_v62  ;;  %v5669_v61 = vcombine.high %v2065_v53, %v2069_v54  ;;  %v2076_v62 = vld [vmem:[%s6599_s1 + $0xa0] sm:$0xff] }
 0x18e   :  { %1887 = vmatprep.subr.bf16.mxu0 %v6850_v5  ;;  %1928 = vmatprep.subr.bf16.mxu1 %v6851_v7  ;;  %v2073_v5 = vld [vmem:[%s6599_s1 + $0x88] sm:$0xff] }
 0x18f   :  { %v2077_v7 = vld [vmem:[%s6599_s1 + $0xa8] sm:$0xff] }
 0x191   :  { %1888 = vmatpush1.bf16.msra.mxu0 %v6852_v8  ;;  %1929 = vmatpush1.bf16.msra.mxu1 %v6853_v12  ;;  %v5686_v12 = vcombine.low %v2065_v53, %v2069_v54  ;;  %v2125_v53 = vld [vmem:[%s6599_s1 + $0x228] sm:$0xff] }
 0x192   :  { %1889 = vmatprep.subr.bf16.mxu0 %v6854_v18  ;;  %1930 = vmatprep.subr.bf16.mxu1 %v6855_v23  ;;  %v5688_v18 = vcombine.high %v2072_v60, %v2076_v62  ;;  %v5691_v23 = vcombine.high %v2073_v5, %v2077_v7 }
 0x195   :  { %1890 = vmatpush1.bf16.msra.mxu0 %v6856_v24  ;;  %1931 = vmatpush1.bf16.msra.mxu1 %v6857_v25  ;;  %v2080_v24 = vld [vmem:[%s6599_s1 + $0xc0] sm:$0xff] }
 0x196   :  { %1891 = vmatprep.subr.bf16.mxu0 %v6858_v34  ;;  %1932 = vmatprep.subr.bf16.mxu1 %v6859_v39  ;;  %v2084_v25 = vld [vmem:[%s6599_s1 + $0xe0] sm:$0xff]  ;;  %v2081_v34 = vld [vmem:[%s6599_s1 + $0xc8] sm:$0xff] }
 0x197   :  { %v2085_v39 = vld [vmem:[%s6599_s1 + $0xe8] sm:$0xff] }
 0x199   :  { %1892 = vmatpush1.bf16.msra.mxu0 %v6860_v40  ;;  %1933 = vmatpush1.bf16.msra.mxu1 %v6861_v41  ;;  %v5706_v40 = vcombine.low %v2072_v60, %v2076_v62  ;;  %v5710_v41 = vcombine.low %v2073_v5, %v2077_v7  ;;  %v2128_v5 = vld [vmem:[%s6599_s1 + $0x240] sm:$0xff] }
 0x19a   :  { %1893 = vmatprep.subr.bf16.mxu0 %v6862_v50  ;;  %1934 = vmatprep.subr.bf16.mxu1 %v6863_v55  ;;  %v5712_v50 = vcombine.high %v2080_v24, %v2084_v25  ;;  %v5715_v55 = vcombine.high %v2081_v34, %v2085_v39  ;;  %v2132_v7 = vld [vmem:[%s6599_s1 + $0x260] sm:$0xff] }
 0x19d   :  { %1894 = vmatpush1.bf16.msra.mxu0 %v6864_v56  ;;  %1935 = vmatpush1.bf16.msra.mxu1 %v6865_v57  ;;  %v2088_v56 = vld [vmem:[%s6599_s1 + $0x100] sm:$0xff] }
 0x19e   :  { %1895 = vmatprep.subr.bf16.mxu0 %v6866_v49  ;;  %1936 = vmatprep.subr.bf16.mxu1 %v6867_v31  ;;  %v2092_v57 = vld [vmem:[%s6599_s1 + $0x120] sm:$0xff]  ;;  %v2089_v49 = vld [vmem:[%s6599_s1 + $0x108] sm:$0xff] }
 0x19f   :  { %v2093_v31 = vld [vmem:[%s6599_s1 + $0x128] sm:$0xff] }
 0x1a1   :  { %1896 = vmatpush1.bf16.msra.mxu0 %v6868_v1  ;;  %1937 = vmatpush1.bf16.msra.mxu1 %v6869_v13  ;;  %v5730_v1 = vcombine.low %v2080_v24, %v2084_v25  ;;  %v5734_v13 = vcombine.low %v2081_v34, %v2085_v39  ;;  %v2129_v24 = vld [vmem:[%s6599_s1 + $0x248] sm:$0xff]  ;;  %v5856_v25 = vcombine.high %v2128_v5, %v2132_v7 }
 0x1a2   :  { %1897 = vmatprep.subr.bf16.mxu0 %v6870_v17  ;;  %1938 = vmatprep.subr.bf16.mxu1 %v6871_v32  ;;  %v5736_v17 = vcombine.high %v2088_v56, %v2092_v57  ;;  %v5739_v32 = vcombine.high %v2089_v49, %v2093_v31  ;;  %v2133_v34 = vld [vmem:[%s6599_s1 + $0x268] sm:$0xff]  ;;  %v5861_v39 = vcombine.low %v2128_v5, %v2132_v7 }
 0x1a3   :  { %v2153_v5 = vld [vmem:[%s6599_s1 + $0x308] sm:$0xff] }
 0x1a5   :  { %1898 = vmatpush1.bf16.msra.mxu0 %v6872_v33  ;;  %1939 = vmatpush1.bf16.msra.mxu1 %v6873_v58  ;;  %v5742_v33 = vcombine.low %v2088_v56, %v2092_v57  ;;  %v5746_v58 = vcombine.low %v2089_v49, %v2093_v31  ;;  %v5863_v56 = vcombine.low %v2129_v24, %v2133_v34  ;;  %v2136_v49 = vld [vmem:[%s6599_s1 + $0x280] sm:$0xff] }
 0x1a6   :  { %1899 = vmatprep.subr.bf16.mxu0 %v6874_v4  ;;  %1940 = vmatprep.subr.bf16.mxu1 %v6875_v6  ;;  %v2096_v4 = vld [vmem:[%s6599_s1 + $0x140] sm:$0xff]  ;;  %v5865_v57 = vcombine.high %v2129_v24, %v2133_v34  ;;  %v2157_v34 = vld [vmem:[%s6599_s1 + $0x328] sm:$0xff] }
 0x1a7   :  { %v2100_v6 = vld [vmem:[%s6599_s1 + $0x160] sm:$0xff] }
 0x1a8   :  { %v2140_v31 = vld [vmem:[%s6599_s1 + $0x2a0] sm:$0xff] }
 0x1a9   :  { %1900 = vmatpush1.bf16.msra.mxu0 %v6876_v9  ;;  %1941 = vmatpush1.bf16.msra.mxu1 %v6877_v10  ;;  %v2097_v9 = vld [vmem:[%s6599_s1 + $0x148] sm:$0xff]  ;;  %v5760_v10 = vcombine.high %v2096_v4, %v2100_v6 }
 0x1aa   :  { %1901 = vmatprep.subr.bf16.mxu0 %v6878_v11  ;;  %1942 = vmatprep.subr.bf16.mxu1 %v6879_v15  ;;  %v2101_v11 = vld [vmem:[%s6599_s1 + $0x168] sm:$0xff]  ;;  %v5765_v15 = vcombine.low %v2096_v4, %v2100_v6  ;;  %v5880_v6 = vcombine.high %v2136_v49, %v2140_v31 }
 0x1ab   :  { %v2137_v4 = vld [vmem:[%s6599_s1 + $0x288] sm:$0xff] }
 0x1ad   :  { %1902 = vmatpush1.bf16.msra.mxu0 %v6880_v19  ;;  %1943 = vmatpush1.bf16.msra.mxu1 %v6881_v20  ;;  %v5767_v19 = vcombine.low %v2097_v9, %v2101_v11  ;;  %v5769_v20 = vcombine.high %v2097_v9, %v2101_v11  ;;  %v2141_v9 = vld [vmem:[%s6599_s1 + $0x2a8] sm:$0xff]  ;;  %v5885_v11 = vcombine.low %v2136_v49, %v2140_v31  ;;  %v2160_v49 = vld [vmem:[%s6599_s1 + $0x340] sm:$0xff] }
 0x1ae   :  { %1903 = vmatprep.subr.bf16.mxu0 %v6882_v21  ;;  %1944 = vmatprep.subr.bf16.mxu1 %v6883_v22  ;;  %v2104_v21 = vld [vmem:[%s6599_s1 + $0x180] sm:$0xff] }
 0x1af   :  { %v2108_v22 = vld [vmem:[%s6599_s1 + $0x1a0] sm:$0xff]  ;;  %6896 = vst [vmem:[#allocation2_spill] sm:$0xff] %v5885_v11 }
 0x1b0   :  { %v2164_v31 = vld [vmem:[%s6599_s1 + $0x360] sm:$0xff] }
 0x1b1   :  { %1904 = vmatpush1.bf16.msra.mxu0 %v6884_v27  ;;  %1945 = vmatpush1.bf16.msra.mxu1 %v6885_v28  ;;  %v5781_v27 = vcombine.high %v2104_v21, %v2108_v22  ;;  %v2105_v28 = vld [vmem:[%s6599_s1 + $0x188] sm:$0xff] }
 0x1b2   :  { %1905 = vmatprep.subr.bf16.mxu0 %v6886_v29  ;;  %1946 = vmatprep.subr.bf16.mxu1 %v6887_v30  ;;  %v2109_v29 = vld [vmem:[%s6599_s1 + $0x1a8] sm:$0xff]  ;;  %v5789_v30 = vcombine.low %v2104_v21, %v2108_v22  ;;  %v5887_v21 = vcombine.low %v2137_v4, %v2141_v9  ;;  %v5889_v22 = vcombine.high %v2137_v4, %v2141_v9 }
 0x1b3   :  { %v5941_v4 = vcombine.low %v2153_v5, %v2157_v34  ;;  %v5943_v9 = vcombine.high %v2153_v5, %v2157_v34  ;;  %v2169_v5 = vld [vmem:[%s6599_s1 + $0x388] sm:$0xff] }
 0x1b4   :  { %6897 = vst [vmem:[#allocation3_spill] sm:$0xff] %v5887_v21  ;;  %6898 = vst [vmem:[#allocation4_spill] sm:$0xff] %v5889_v22  ;;  %v2173_v34 = vld [vmem:[%s6599_s1 + $0x3a8] sm:$0xff] }
 0x1b5   :  { %1906 = vmatpush1.bf16.msra.mxu0 %v6888_v36  ;;  %1947 = vmatpush1.bf16.msra.mxu1 %v6889_v37  ;;  %v5791_v36 = vcombine.low %v2105_v28, %v2109_v29  ;;  %v5793_v37 = vcombine.high %v2105_v28, %v2109_v29  ;;  %v2144_v28 = vld [vmem:[%s6599_s1 + $0x2c0] sm:$0xff]  ;;  %6905 = vst [vmem:[#allocation11_spill] sm:$0xff] %v5941_v4  ;;  %6906 = vst [vmem:[#allocation12_spill] sm:$0xff] %v5943_v9 }
 0x1b6   :  { %1907 = vmatprep.subr.bf16.mxu0 %v6890_v38  ;;  %1948 = vmatprep.subr.bf16.mxu1 %v6891_v43  ;;  %v2112_v38 = vld [vmem:[%s6599_s1 + $0x1c0] sm:$0xff] }
 0x1b7   :  { %v2116_v43 = vld [vmem:[%s6599_s1 + $0x1e0] sm:$0xff] }
 0x1b8   :  { %v2148_v29 = vld [vmem:[%s6599_s1 + $0x2e0] sm:$0xff] }
 0x1b9   :  { %1908 = vmatpush1.bf16.msra.mxu0 %v6892_v44  ;;  %1949 = vmatpush1.bf16.msra.mxu1 %v6893_v45  ;;  %v2113_v44 = vld [vmem:[%s6599_s1 + $0x1c8] sm:$0xff]  ;;  %v5808_v45 = vcombine.high %v2112_v38, %v2116_v43 }
 0x1ba   :  { %1909 = vmatprep.subr.bf16.mxu0 %v6894_v46  ;;  %1950 = vmatprep.subr.bf16.mxu1 %v6895_v52  ;;  %v2117_v46 = vld [vmem:[%s6599_s1 + $0x1e8] sm:$0xff]  ;;  %v5813_v52 = vcombine.low %v2112_v38, %v2116_v43  ;;  %v5904_v43 = vcombine.high %v2144_v28, %v2148_v29 }
 0x1bb   :  { %v2145_v38 = vld [vmem:[%s6599_s1 + $0x2c8] sm:$0xff] }
 0x1bc   :  { %6899 = vst [vmem:[#allocation5_spill] sm:$0xff] %v5904_v43 }
 0x1bd   :  { %1910 = vmatpush1.bf16.msra.mxu0 %v5428_v26  ;;  %1951 = vmatpush1.bf16.msra.mxu1 %v5432_v16  ;;  %v2060_v16 = vld [vmem:[%s6599_s1 + $0x20] sm:$0xff] }
 0x1be   :  { %1911 = vmatprep.subr.bf16.mxu0 %v5434_v14  ;;  %1952 = vmatprep.subr.bf16.mxu1 %v5437_v0  ;;  %v2056_v14 = vld [vmem:[%s6599_s1] sm:$0xff]  ;;  %v2061_v0 = vld [vmem:[%s6599_s1 + $0x28] sm:$0xff] }
 0x1bf   :  { %v2068_v26 = vld [vmem:[%s6599_s1 + $0x60] sm:$0xff] }
 0x1c1   :  { %1912 = vmatpush1.bf16.msra.mxu0 %v5452_v63  ;;  %1953 = vmatpush1.bf16.msra.mxu1 %v5456_v48  ;;  %v5642_v48 = vcombine.high %v2056_v14, %v2060_v16 }
 0x1c2   :  { %1913 = vmatprep.subr.bf16.mxu0 %v5458_v47  ;;  %1954 = vmatprep.subr.bf16.mxu1 %v5461_v42  ;;  %v2057_v42 = vld [vmem:[%s6599_s1 + $0x8] sm:$0xff]  ;;  %v5640_v47 = vcombine.low %v2056_v14, %v2060_v16  ;;  %v5815_v14 = vcombine.low %v2113_v44, %v2117_v46  ;;  %v5817_v16 = vcombine.high %v2113_v44, %v2117_v46 }
 0x1c3   :  { %v5653_v63 = vcombine.low %v2057_v42, %v2061_v0  ;;  %v2149_v44 = vld [vmem:[%s6599_s1 + $0x2e8] sm:$0xff]  ;;  %v5909_v46 = vcombine.low %v2144_v28, %v2148_v29  ;;  %v5945_v28 = vcombine.high %v2160_v49, %v2164_v31 }
 0x1c4   :  { %v2161_v29 = vld [vmem:[%s6599_s1 + $0x348] sm:$0xff] }
 0x1c5   :  { %1914 = vmatpush1.bf16.msra.mxu0 %v5464_v3  ;;  %1955 = vmatpush1.bf16.msra.mxu1 %v5468_v2  ;;  %v2064_v3 = vld [vmem:[%s6599_s1 + $0x40] sm:$0xff]  ;;  %v5655_v2 = vcombine.high %v2057_v42, %v2061_v0  ;;  %6900 = vst [vmem:[#allocation6_spill] sm:$0xff] %v5909_v46  ;;  %6907 = vst [vmem:[#allocation13_spill] sm:$0xff] %v5945_v28 }
 0x1c6   :  { %2824 = vmatprep.subr.bf16.mxu0 %v5642_v48  ;;  %v5682_v8 = vcombine.low %v2064_v3, %v2068_v26  ;;  %v2120_v42 = vld [vmem:[%s6599_s1 + $0x200] sm:$0xff] }
 0x1c7   :  { %2865 = vmatprep.subr.bf16.mxu1 %v5655_v2  ;;  %v2124_v0 = vld [vmem:[%s6599_s1 + $0x220] sm:$0xff] }
 0x1c8   :  { %1916 = vmatmul.mubr.bf16.vlgmr.msra.gmra.mrb[12].mxu0 %v5560_v51  ;;  %1957 = vmatmul.mubr.bf16.vlgmr.msra.gmra.mrb[12].mxu1 %v5560_v51  ;;  %v5657_v51 = vcombine.high %v2064_v3, %v2068_v26  ;;  %v2121_v3 = vld [vmem:[%s6599_s1 + $0x208] sm:$0xff]  ;;  %v5832_v26 = vcombine.high %v2120_v42, %v2124_v0  ;;  %v5837_v54 = vcombine.low %v2120_v42, %v2124_v0 }
 0x1c9   :  { %2825 = vmatpush1.bf16.msra.mxu0 %v5640_v47  ;;  %2866 = vmatpush1.bf16.msra.mxu1 %v5653_v63  ;;  %v5839_v60 = vcombine.low %v2121_v3, %v2125_v53  ;;  %v5841_v62 = vcombine.high %v2121_v3, %v2125_v53  ;;  %v5911_v42 = vcombine.low %v2145_v38, %v2149_v44  ;;  %v2152_v3 = vld [vmem:[%s6599_s1 + $0x300] sm:$0xff] }
 0x1ca   :  { %2826 = vmatprep.subr.bf16.mxu0 %v5657_v51  ;;  %2867 = vmatprep.subr.bf16.mxu1 %v5669_v61  ;;  %v5913_v0 = vcombine.high %v2145_v38, %v2149_v44  ;;  %v2156_v53 = vld [vmem:[%s6599_s1 + $0x320] sm:$0xff]  ;;  %v2165_v38 = vld [vmem:[%s6599_s1 + $0x368] sm:$0xff] }
 0x1cb   :  { %6901 = vst [vmem:[#allocation7_spill] sm:$0xff] %v5911_v42  ;;  %v5928_v7 = vcombine.low %v2152_v3, %v2156_v53  ;;  %v5930_v24 = vcombine.high %v2152_v3, %v2156_v53  ;;  %v2168_v44 = vld [vmem:[%s6599_s1 + $0x380] sm:$0xff]  ;;  %v5957_v3 = vcombine.high %v2161_v29, %v2165_v38 }
 0x1cc   :  { %6902 = vst [vmem:[#allocation8_spill] sm:$0xff] %v5913_v0  ;;  %v2172_v53 = vld [vmem:[%s6599_s1 + $0x3a0] sm:$0xff] }
 0x1cd   :  { %2827 = vmatpush1.bf16.msra.mxu0 %v5682_v8  ;;  %2868 = vmatpush1.bf16.msra.mxu1 %v5686_v12  ;;  %6903 = vst [vmem:[#allocation9_spill] sm:$0xff] %v5928_v7  ;;  %6904 = vst [vmem:[#allocation10_spill] sm:$0xff] %v5930_v24 }
 0x1ce   :  { %2828 = vmatprep.subr.bf16.mxu0 %v5688_v18  ;;  %2869 = vmatprep.subr.bf16.mxu1 %v5691_v23  ;;  %6908 = vst [vmem:[#allocation14_spill] sm:$0xff] %v5957_v3 }
 0x1d1   :  { %2829 = vmatpush1.bf16.msra.mxu0 %v5706_v40  ;;  %2870 = vmatpush1.bf16.msra.mxu1 %v5710_v41 }
 0x1d2   :  { %2830 = vmatprep.subr.bf16.mxu0 %v5712_v50  ;;  %2871 = vmatprep.subr.bf16.mxu1 %v5715_v55 }
 0x1d5   :  { %2831 = vmatpush1.bf16.msra.mxu0 %v5730_v1  ;;  %2872 = vmatpush1.bf16.msra.mxu1 %v5734_v13 }
 0x1d6   :  { %2832 = vmatprep.subr.bf16.mxu0 %v5736_v17  ;;  %2873 = vmatprep.subr.bf16.mxu1 %v5739_v32 }
 0x1d9   :  { %2833 = vmatpush1.bf16.msra.mxu0 %v5742_v33  ;;  %2874 = vmatpush1.bf16.msra.mxu1 %v5746_v58 }
 0x1da   :  { %2834 = vmatprep.subr.bf16.mxu0 %v5760_v10  ;;  %2875 = vmatprep.subr.bf16.mxu1 %v5769_v20 }
 0x1dd   :  { %2835 = vmatpush1.bf16.msra.mxu0 %v5765_v15  ;;  %2876 = vmatpush1.bf16.msra.mxu1 %v5767_v19 }
 0x1de   :  { %2836 = vmatprep.subr.bf16.mxu0 %v5781_v27  ;;  %2877 = vmatprep.subr.bf16.mxu1 %v5793_v37 }
 0x1e1   :  { %2837 = vmatpush1.bf16.msra.mxu0 %v5789_v30  ;;  %2878 = vmatpush1.bf16.msra.mxu1 %v5791_v36 }
 0x1e2   :  { %2838 = vmatprep.subr.bf16.mxu0 %v5808_v45  ;;  %2879 = vmatprep.subr.bf16.mxu1 %v5817_v16 }
 0x1e5   :  { %2839 = vmatpush1.bf16.msra.mxu0 %v5813_v52  ;;  %2880 = vmatpush1.bf16.msra.mxu1 %v5815_v14 }
 0x1e6   :  { %2840 = vmatprep.subr.bf16.mxu0 %v5832_v26  ;;  %2881 = vmatprep.subr.bf16.mxu1 %v5841_v62 }
 0x1e9   :  { %2841 = vmatpush1.bf16.msra.mxu0 %v5837_v54  ;;  %2882 = vmatpush1.bf16.msra.mxu1 %v5839_v60 }
 0x1ea   :  { %2842 = vmatprep.subr.bf16.mxu0 %v5856_v25  ;;  %2883 = vmatprep.subr.bf16.mxu1 %v5865_v57 }
 0x1ed   :  { %2843 = vmatpush1.bf16.msra.mxu0 %v5861_v39  ;;  %2884 = vmatpush1.bf16.msra.mxu1 %v5863_v56 }
 0x1ee   :  { %2844 = vmatprep.subr.bf16.mxu0 %v5880_v6  ;;  %2885 = vmatprep.subr.bf16.mxu1 %v5889_v22 }
 0x1f1   :  { %2845 = vmatpush1.bf16.msra.mxu0 %v5885_v11  ;;  %2886 = vmatpush1.bf16.msra.mxu1 %v5887_v21 }
 0x1f2   :  { %2846 = vmatprep.subr.bf16.mxu0 %v5904_v43  ;;  %2887 = vmatprep.subr.bf16.mxu1 %v5913_v0  ;;  %v5979_v0 = vcombine.high %v2169_v5, %v2173_v34 }
 0x1f4   :  { %6912 = vst [vmem:[#allocation18_spill] sm:$0xff] %v5979_v0 }
 0x1f5   :  { %2847 = vmatpush1.bf16.msra.mxu0 %v5909_v46  ;;  %2888 = vmatpush1.bf16.msra.mxu1 %v5911_v42  ;;  %v5970_v42 = vcombine.low %v2160_v49, %v2164_v31  ;;  %v5976_v46 = vcombine.high %v2168_v44, %v2172_v53  ;;  %v2180_v49 = vld [vmem:[%s6599_s1 + $0x3e0] sm:$0xff]  ;;  %v2177_v31 = vld [vmem:[%s6599_s1 + $0x3c8] sm:$0xff] }
 0x1f6   :  { %2848 = vmatprep.subr.bf16.mxu0 %v5930_v24  ;;  %2889 = vmatprep.subr.bf16.mxu1 %v5943_v9  ;;  %v5974_v24 = vcombine.low %v2161_v29, %v2165_v38  ;;  %v2176_v9 = vld [vmem:[%s6599_s1 + $0x3c0] sm:$0xff]  ;;  %v2181_v29 = vld [vmem:[%s6599_s1 + $0x3e8] sm:$0xff]  ;;  %v5994_v38 = vcombine.low %v2168_v44, %v2172_v53  ;;  %v2058_v53 = vld [vmem:[%s6599_s1 + $0x10] sm:$0xff] }
 0x1f7   :  { %6909 = vst [vmem:[#allocation15_spill] sm:$0xff] %v5970_v42  ;;  %6911 = vst [vmem:[#allocation17_spill] sm:$0xff] %v5976_v46  ;;  %v6010_v44 = vcombine.low %v2177_v31, %v2181_v29 }
 0x1f8   :  { %6910 = vst [vmem:[#allocation16_spill] sm:$0xff] %v5974_v24  ;;  %6913 = vst [vmem:[#allocation19_spill] sm:$0xff] %v5994_v38 }
 0x1f9   :  { %2849 = vmatpush1.bf16.msra.mxu0 %v5928_v7  ;;  %2890 = vmatpush1.bf16.msra.mxu1 %v5941_v4  ;;  %v6003_v4 = vcombine.high %v2177_v31, %v2181_v29  ;;  %v6006_v7 = vcombine.low %v2176_v9, %v2180_v49  ;;  %6918 = vst [vmem:[#allocation24_spill] sm:$0xff] %v6010_v44 }
 0x1fa   :  { %2850 = vmatprep.subr.bf16.mxu0 %v5945_v28  ;;  %2891 = vmatprep.subr.bf16.mxu1 %v5957_v3  ;;  %v5998_v3 = vcombine.low %v2169_v5, %v2173_v34  ;;  %v6000_v28 = vcombine.high %v2176_v9, %v2180_v49  ;;  %v2062_v5 = vld [vmem:[%s6599_s1 + $0x30] sm:$0xff]  ;;  %v2059_v9 = vld [vmem:[%s6599_s1 + $0x18] sm:$0xff] }
 0x1fb   :  { %6916 = vst [vmem:[#allocation22_spill] sm:$0xff] %v6003_v4  ;;  %6917 = vst [vmem:[#allocation23_spill] sm:$0xff] %v6006_v7  ;;  %v6024_v34 = vcombine.high %v2058_v53, %v2062_v5  ;;  %v2063_v49 = vld [vmem:[%s6599_s1 + $0x38] sm:$0xff]  ;;  %v6029_v31 = vcombine.low %v2058_v53, %v2062_v5 }
 0x1fc   :  { %6914 = vst [vmem:[#allocation20_spill] sm:$0xff] %v5998_v3  ;;  %6915 = vst [vmem:[#allocation21_spill] sm:$0xff] %v6000_v28  ;;  %v6031_v29 = vcombine.low %v2059_v9, %v2063_v49 }
 0x1fd   :  { %2851 = vmatpush1.bf16.msra.mxu0 %v5970_v42  ;;  %2892 = vmatpush1.bf16.msra.mxu1 %v5974_v24  ;;  %6919 = vst [vmem:[#allocation25_spill] sm:$0xff] %v6024_v34 }
 0x1fe   :  { %2852 = vmatprep.subr.bf16.mxu0 %v5976_v46  ;;  %2893 = vmatprep.subr.bf16.mxu1 %v5979_v0 }
 0x201   :  { %2853 = vmatpush1.bf16.msra.mxu0 %v5994_v38  ;;  %2894 = vmatpush1.bf16.msra.mxu1 %v5998_v3 }
 0x202   :  { %2854 = vmatprep.subr.bf16.mxu0 %v6000_v28  ;;  %2895 = vmatprep.subr.bf16.mxu1 %v6003_v4 }
 0x205   :  { %2855 = vmatpush1.bf16.msra.mxu0 %v6006_v7  ;;  %2896 = vmatpush1.bf16.msra.mxu1 %v6010_v44  ;;  %v6033_v7 = vcombine.high %v2059_v9, %v2063_v49  ;;  %v4359_v49 = vld [vmem:[%s6600_s0 + $0x10] sm:$0xff] }
 0x206   :  { %2906 = vmatprep.subr.bf16.mxu0 %v6024_v34 }
 0x207   :  { %6920 = vst [vmem:[#allocation26_spill] sm:$0xff] %v6033_v7  ;;  %2947 = vmatprep.subr.bf16.mxu1 %v6033_v7 }
 0x25b   :  { %v1835_v4 = vpop.f32.mrb[8].mxu0  ;;  %v1876_v28 = vpop.f32.mrb[8].mxu1 }
 0x25c   :  { %v1837_v3 = vpop.f32.mrb[9].mxu0  ;;  %v1878_v44 = vpop.f32.mrb[9].mxu1 }
 0x25d   :  { %v1976_v38 = vcombine.low %v1835_v4, %v1837_v3  ;;  %v1977_v0 = vcombine.low %v1876_v28, %v1878_v44  ;;  %v1839_v46 = vpop.f32.mrb[10].mxu0  ;;  %v1880_v24 = vpop.f32.mrb[10].mxu1 }
 0x25e   :  { %v1840_v42 = vpop.f32.mrb[11].mxu0  ;;  %v1881_v43 = vpop.f32.mrb[11].mxu1 }
 0x25f   :  { %v1984_v53 = vrot.slane %v1976_v38, %v5541_v59  ;;  %v1991_v5 = vrot.slane %v1977_v0, %v5541_v59 }
 0x261   :  { %v1992_v9 = vcombine.low %v1984_v53, %v1991_v5 }
 0x263   :  { %v2012_v7 = vadd.f32 %v4359_v49, %v1992_v9 }
 0x265   :  { %v4361_v34 = vmul.f32 -1.442695, %v2012_v7  ;;  %v4360_v7 = vld [vmem:[%s6600_s0 + $0x18] sm:$0xff] }
 0x267   :  { %4646 = vpow2.f32 %v4361_v34 }
 0x271   :  { %v4647_v21 = vpop.eup %4646 }
 0x272   :  { %v2020_v38 = vadd.f32 1.0, %v4647_v21 }
 0x274   :  { %4648 = vrcp.f32 %v2020_v38 }
 0x29b   :  { %v1917_v11 = vpop.f32.mrb[12].mxu0  ;;  %v1958_v4 = vpop.f32.mrb[12].mxu1 }
 0x29c   :  { %v1919_v28 = vpop.f32.mrb[13].mxu0  ;;  %v1960_v46 = vpop.f32.mrb[13].mxu1 }
 0x29d   :  { %v1993_v24 = vcombine.low %v1917_v11, %v1919_v28  ;;  %v1994_v42 = vcombine.low %v1958_v4, %v1960_v46  ;;  %v1921_v43 = vpop.f32.mrb[14].mxu0  ;;  %v1962_v3 = vpop.f32.mrb[14].mxu1 }
 0x29e   :  { %v1922_v44 = vpop.f32.mrb[15].mxu0  ;;  %v1963_v0 = vpop.f32.mrb[15].mxu1 }
 0x29f   :  { %v2001_v53 = vrot.slane %v1993_v24, %v5541_v59  ;;  %v2008_v5 = vrot.slane %v1994_v42, %v5541_v59  ;;  %v4649_v11 = vpop.eup %4648 }
 0x2a0   :  { %v2031_v4 = vrot.slane %v4649_v11, 4 }
 0x2a1   :  { %v2009_v34 = vcombine.low %v2001_v53, %v2008_v5  ;;  %v2070_v5 = vld [vmem:[%s6599_s1 + $0x70] sm:$0xff] }
 0x2a2   :  { %v2033_v24 = vmul.f32 %v2031_v4, %v5553_v35  ;;  %v2066_v35 = vld [vmem:[%s6599_s1 + $0x50] sm:$0xff] }
 0x2a3   :  { %v2013_v9 = vadd.f32 %v4360_v7, %v2009_v34  ;;  %v2067_v7 = vld [vmem:[%s6599_s1 + $0x58] sm:$0xff]  ;;  %v6075_v4 = vcombine.high %v2066_v35, %v2070_v5 }
 0x2a4   :  { %v2071_v34 = vld [vmem:[%s6599_s1 + $0x78] sm:$0xff] }
 0x2a5   :  { %v4362_v49 = vmul.f32 -1.442695, %v2013_v9  ;;  %v2027_v22 = vrot.slane %v2013_v9, 4 }
 0x2a7   :  { %4650 = vpow2.f32 %v4362_v49 }
 0x2a8   :  { %4652 = vtanh.f32 %v2027_v22 }
 0x2b1   :  { %v4651_v21 = vpop.eup %4650 }
 0x2b2   :  { %v4653_v28 = vpop.eup %4652  ;;  %v2021_v46 = vadd.f32 1.0, %v4651_v21  ;;  %v6077_v21 = vcombine.high %v2067_v7, %v2071_v34 }
 0x2b3   :  { %v2034_v43 = vmul.f32 %v4653_v28, %v4649_v11  ;;  %v2074_v11 = vld [vmem:[%s6599_s1 + $0x90] sm:$0xff] }
 0x2b4   :  { %4654 = vrcp.f32 %v2021_v46  ;;  %6921 = vst [vmem:[#allocation27_spill] sm:$0xff] %v6077_v21  ;;  %v2078_v28 = vld [vmem:[%s6599_s1 + $0xb0] sm:$0xff]  ;;  %v2075_v46 = vld [vmem:[%s6599_s1 + $0x98] sm:$0xff] }
 0x2b5   :  { %v6048_v42 = vadd.f32 %v2034_v43, %v2033_v24  ;;  %v2079_v24 = vld [vmem:[%s6599_s1 + $0xb8] sm:$0xff]  ;;  %v6092_v43 = vcombine.low %v2066_v35, %v2070_v5  ;;  %v6116_v5 = vcombine.low %v2074_v11, %v2078_v28 }
 0x2b6   :  { %v2087_v35 = vld [vmem:[%s6599_s1 + $0xf8] sm:$0xff] }
 0x2b7   :  { %4656 = vtanh.f32 %v6048_v42  ;;  %6922 = vst [vmem:[#allocation28_spill] sm:$0xff] %v6092_v43  ;;  %6926 = vst [vmem:[#allocation32_spill] sm:$0xff] %v6116_v5 }
 0x2be   :  { %v4655_v3 = vpop.eup %4654 }
 0x2c1   :  { %v4657_v38 = vpop.eup %4656 }
 0x2c2   :  { %v2037_v44 = vmul.f32 %v4657_v38, %v4655_v3  ;;  %v6094_v3 = vcombine.low %v2067_v7, %v2071_v34  ;;  %v6096_v38 = vcombine.high %v2074_v11, %v2078_v28  ;;  %v6118_v7 = vcombine.low %v2075_v46, %v2079_v24  ;;  %v2091_v11 = vld [vmem:[%s6599_s1 + $0x118] sm:$0xff] }
 0x2c3   :  { %v2095_v28 = vld [vmem:[%s6599_s1 + $0x138] sm:$0xff] }
 0x2c4   :  { %v2038_v0 = vpack.c.bf16 %v2037_v44, %v2037_v44  ;;  %v2048_v53 = vrot.slane %v2037_v44, %v5541_v59  ;;  %6923 = vst [vmem:[#allocation29_spill] sm:$0xff] %v6094_v3  ;;  %6924 = vst [vmem:[#allocation30_spill] sm:$0xff] %v6096_v38  ;;  %v6098_v44 = vcombine.high %v2075_v46, %v2079_v24 }
 0x2c5   :  { %6927 = vst [vmem:[#allocation33_spill] sm:$0xff] %v6118_v7 }
 0x2c6   :  { %4363 = vst [vmem:[%s6601_s2 + $0x2] sm:$0x1] %v2038_v0  ;;  %v2049_v22 = vcombine.high %v2048_v53, %v2048_v53  ;;  %v6067_v49 = vpack.c.bf16 %v2048_v53, %v2048_v53  ;;  %6925 = vst [vmem:[#allocation31_spill] sm:$0xff] %v6098_v44  ;;  %v2082_v0 = vld [vmem:[%s6599_s1 + $0xd0] sm:$0xff] }
 0x2c7   :  { %v2086_v53 = vld [vmem:[%s6599_s1 + $0xf0] sm:$0xff] }
 0x2c8   :  { %v2051_v9 = vpack.c.bf16 %v2049_v22, %v2049_v22  ;;  %v2083_v22 = vld [vmem:[%s6599_s1 + $0xd8] sm:$0xff]  ;;  %v6122_v34 = vcombine.high %v2082_v0, %v2086_v53  ;;  %v6140_v46 = vcombine.low %v2082_v0, %v2086_v53 }
 0x2c9   :  { %v6142_v24 = vcombine.low %v2083_v22, %v2087_v35  ;;  %v2099_v0 = vld [vmem:[%s6599_s1 + $0x158] sm:$0xff] }
 0x2ca   :  { %4364 = vst [vmem:[%s6601_s2 + $0x5] sm:$0x1] %v2051_v9  ;;  %2856 = vmatprep.mubr.bf16.mxu0 %v2051_v9  ;;  %2897 = vmatprep.mubr.bf16.mxu1 %v2051_v9  ;;  %6928 = vst [vmem:[#allocation34_spill] sm:$0xff] %v6122_v34  ;;  %v2103_v53 = vld [vmem:[%s6599_s1 + $0x178] sm:$0xff] }
 0x2cb   :  { %2857 = vmatmul.mubr.bf16.vlgmr.msra.gmra.mrb[16].mxu0 %v6067_v49  ;;  %2898 = vmatmul.mubr.bf16.vlgmr.msra.gmra.mrb[16].mxu1 %v6067_v49  ;;  %6930 = vst [vmem:[#allocation36_spill] sm:$0xff] %v6140_v46  ;;  %6931 = vst [vmem:[#allocation37_spill] sm:$0xff] %v6142_v24 }
 0x2cc   :  { %2907 = vmatpush1.bf16.msra.mxu0 %v6029_v31  ;;  %2948 = vmatpush1.bf16.msra.mxu1 %v6031_v29 }
 0x2cd   :  { %2938 = vmatprep.mubr.bf16.mxu0 %v2051_v9  ;;  %2979 = vmatprep.mubr.bf16.mxu1 %v2051_v9  ;;  %v6124_v9 = vcombine.high %v2083_v22, %v2087_v35  ;;  %v6166_v35 = vcombine.low %v2091_v11, %v2095_v28 }
 0x2ce   :  { %2908 = vmatprep.subr.bf16.mxu0 %v6075_v4  ;;  %2949 = vmatprep.subr.bf16.mxu1 %v6077_v21  ;;  %v2090_v21 = vld [vmem:[%s6599_s1 + $0x110] sm:$0xff] }
 0x2cf   :  { %6929 = vst [vmem:[#allocation35_spill] sm:$0xff] %v6124_v9  ;;  %6935 = vst [vmem:[#allocation41_spill] sm:$0xff] %v6166_v35 }
 0x2d0   :  { %2909 = vmatpush1.bf16.msra.mxu0 %v6092_v43  ;;  %2950 = vmatpush1.bf16.msra.mxu1 %v6094_v3  ;;  %v2094_v3 = vld [vmem:[%s6599_s1 + $0x130] sm:$0xff] }
 0x2d1   :  { %2910 = vmatprep.subr.bf16.mxu0 %v6096_v38  ;;  %2951 = vmatprep.subr.bf16.mxu1 %v6098_v44  ;;  %v6146_v44 = vcombine.high %v2090_v21, %v2094_v3  ;;  %v6148_v38 = vcombine.high %v2091_v11, %v2095_v28  ;;  %v2098_v43 = vld [vmem:[%s6599_s1 + $0x150] sm:$0xff]  ;;  %v6164_v22 = vcombine.low %v2090_v21, %v2094_v3  ;;  %v2107_v21 = vld [vmem:[%s6599_s1 + $0x198] sm:$0xff] }
 0x2d2   :  { %v2111_v3 = vld [vmem:[%s6599_s1 + $0x1b8] sm:$0xff]  ;;  %v6190_v28 = vcombine.low %v2099_v0, %v2103_v53 }
 0x2d3   :  { %6932 = vst [vmem:[#allocation38_spill] sm:$0xff] %v6146_v44  ;;  %6933 = vst [vmem:[#allocation39_spill] sm:$0xff] %v6148_v38 }
 0x2d4   :  { %2911 = vmatpush1.bf16.msra.mxu0 %v6116_v5  ;;  %2952 = vmatpush1.bf16.msra.mxu1 %v6118_v7  ;;  %v2102_v7 = vld [vmem:[%s6599_s1 + $0x170] sm:$0xff]  ;;  %6934 = vst [vmem:[#allocation40_spill] sm:$0xff] %v6164_v22  ;;  %6939 = vst [vmem:[#allocation45_spill] sm:$0xff] %v6190_v28 }
 0x2d5   :  { %2912 = vmatprep.subr.bf16.mxu0 %v6122_v34  ;;  %2953 = vmatprep.subr.bf16.mxu1 %v6124_v9  ;;  %v6170_v9 = vcombine.high %v2098_v43, %v2102_v7  ;;  %v6172_v34 = vcombine.high %v2099_v0, %v2103_v53  ;;  %v2106_v5 = vld [vmem:[%s6599_s1 + $0x190] sm:$0xff]  ;;  %v6188_v11 = vcombine.low %v2098_v43, %v2102_v7  ;;  %v2115_v43 = vld [vmem:[%s6599_s1 + $0x1d8] sm:$0xff] }
 0x2d6   :  { %v2119_v7 = vld [vmem:[%s6599_s1 + $0x1f8] sm:$0xff]  ;;  %v6214_v53 = vcombine.low %v2107_v21, %v2111_v3 }
 0x2d7   :  { %6936 = vst [vmem:[#allocation42_spill] sm:$0xff] %v6170_v9  ;;  %6937 = vst [vmem:[#allocation43_spill] sm:$0xff] %v6172_v34 }
 0x2d8   :  { %2913 = vmatpush1.bf16.msra.mxu0 %v6140_v46  ;;  %2954 = vmatpush1.bf16.msra.mxu1 %v6142_v24  ;;  %v2110_v24 = vld [vmem:[%s6599_s1 + $0x1b0] sm:$0xff]  ;;  %6938 = vst [vmem:[#allocation44_spill] sm:$0xff] %v6188_v11  ;;  %6943 = vst [vmem:[#allocation49_spill] sm:$0xff] %v6214_v53 }
 0x2d9   :  { %2914 = vmatprep.subr.bf16.mxu0 %v6146_v44  ;;  %2955 = vmatprep.subr.bf16.mxu1 %v6148_v38  ;;  %v6194_v38 = vcombine.high %v2106_v5, %v2110_v24  ;;  %v6196_v44 = vcombine.high %v2107_v21, %v2111_v3  ;;  %v2114_v46 = vld [vmem:[%s6599_s1 + $0x1d0] sm:$0xff]  ;;  %v6212_v0 = vcombine.low %v2106_v5, %v2110_v24  ;;  %v2123_v5 = vld [vmem:[%s6599_s1 + $0x218] sm:$0xff] }
 0x2da   :  { %v2127_v24 = vld [vmem:[%s6599_s1 + $0x238] sm:$0xff]  ;;  %v6238_v3 = vcombine.low %v2115_v43, %v2119_v7 }
 0x2db   :  { %6940 = vst [vmem:[#allocation46_spill] sm:$0xff] %v6194_v38  ;;  %6941 = vst [vmem:[#allocation47_spill] sm:$0xff] %v6196_v44 }
 0x2dc   :  { %2915 = vmatpush1.bf16.msra.mxu0 %v6164_v22  ;;  %2956 = vmatpush1.bf16.msra.mxu1 %v6166_v35  ;;  %v2118_v35 = vld [vmem:[%s6599_s1 + $0x1f0] sm:$0xff]  ;;  %6942 = vst [vmem:[#allocation48_spill] sm:$0xff] %v6212_v0  ;;  %6947 = vst [vmem:[#allocation53_spill] sm:$0xff] %v6238_v3 }
 0x2dd   :  { %2916 = vmatprep.subr.bf16.mxu0 %v6170_v9  ;;  %2957 = vmatprep.subr.bf16.mxu1 %v6172_v34  ;;  %v6218_v34 = vcombine.high %v2114_v46, %v2118_v35  ;;  %v6220_v9 = vcombine.high %v2115_v43, %v2119_v7  ;;  %v2122_v22 = vld [vmem:[%s6599_s1 + $0x210] sm:$0xff]  ;;  %v6236_v21 = vcombine.low %v2114_v46, %v2118_v35  ;;  %v2131_v46 = vld [vmem:[%s6599_s1 + $0x258] sm:$0xff] }
 0x2de   :  { %v2135_v35 = vld [vmem:[%s6599_s1 + $0x278] sm:$0xff]  ;;  %v6262_v7 = vcombine.low %v2123_v5, %v2127_v24 }
 0x2df   :  { %6944 = vst [vmem:[#allocation50_spill] sm:$0xff] %v6218_v34  ;;  %6945 = vst [vmem:[#allocation51_spill] sm:$0xff] %v6220_v9 }
 0x2e0   :  { %2917 = vmatpush1.bf16.msra.mxu0 %v6188_v11  ;;  %2958 = vmatpush1.bf16.msra.mxu1 %v6190_v28  ;;  %v2126_v28 = vld [vmem:[%s6599_s1 + $0x230] sm:$0xff]  ;;  %6946 = vst [vmem:[#allocation52_spill] sm:$0xff] %v6236_v21  ;;  %6951 = vst [vmem:[#allocation57_spill] sm:$0xff] %v6262_v7 }
 0x2e1   :  { %2918 = vmatprep.subr.bf16.mxu0 %v6194_v38  ;;  %2959 = vmatprep.subr.bf16.mxu1 %v6196_v44  ;;  %v6242_v44 = vcombine.high %v2122_v22, %v2126_v28  ;;  %v6244_v38 = vcombine.high %v2123_v5, %v2127_v24  ;;  %v2130_v11 = vld [vmem:[%s6599_s1 + $0x250] sm:$0xff]  ;;  %v6260_v43 = vcombine.low %v2122_v22, %v2126_v28  ;;  %v2139_v22 = vld [vmem:[%s6599_s1 + $0x298] sm:$0xff] }
 0x2e2   :  { %v2143_v28 = vld [vmem:[%s6599_s1 + $0x2b8] sm:$0xff]  ;;  %v6286_v24 = vcombine.low %v2131_v46, %v2135_v35 }
 0x2e3   :  { %6948 = vst [vmem:[#allocation54_spill] sm:$0xff] %v6242_v44  ;;  %6949 = vst [vmem:[#allocation55_spill] sm:$0xff] %v6244_v38 }
 0x2e4   :  { %2919 = vmatpush1.bf16.msra.mxu0 %v6212_v0  ;;  %2960 = vmatpush1.bf16.msra.mxu1 %v6214_v53  ;;  %v2134_v53 = vld [vmem:[%s6599_s1 + $0x270] sm:$0xff]  ;;  %6950 = vst [vmem:[#allocation56_spill] sm:$0xff] %v6260_v43  ;;  %6955 = vst [vmem:[#allocation61_spill] sm:$0xff] %v6286_v24 }
 0x2e5   :  { %2920 = vmatprep.subr.bf16.mxu0 %v6218_v34  ;;  %2961 = vmatprep.subr.bf16.mxu1 %v6220_v9  ;;  %v6266_v9 = vcombine.high %v2130_v11, %v2134_v53  ;;  %v6268_v34 = vcombine.high %v2131_v46, %v2135_v35  ;;  %v2138_v0 = vld [vmem:[%s6599_s1 + $0x290] sm:$0xff]  ;;  %v6284_v5 = vcombine.low %v2130_v11, %v2134_v53  ;;  %v2147_v11 = vld [vmem:[%s6599_s1 + $0x2d8] sm:$0xff] }
 0x2e6   :  { %v2151_v53 = vld [vmem:[%s6599_s1 + $0x2f8] sm:$0xff]  ;;  %v6310_v35 = vcombine.low %v2139_v22, %v2143_v28 }
 0x2e7   :  { %6952 = vst [vmem:[#allocation58_spill] sm:$0xff] %v6266_v9  ;;  %6953 = vst [vmem:[#allocation59_spill] sm:$0xff] %v6268_v34 }
 0x2e8   :  { %2921 = vmatpush1.bf16.msra.mxu0 %v6236_v21  ;;  %2962 = vmatpush1.bf16.msra.mxu1 %v6238_v3  ;;  %v2142_v3 = vld [vmem:[%s6599_s1 + $0x2b0] sm:$0xff]  ;;  %6954 = vst [vmem:[#allocation60_spill] sm:$0xff] %v6284_v5  ;;  %6959 = vst [vmem:[#allocation65_spill] sm:$0xff] %v6310_v35 }
 0x2e9   :  { %2922 = vmatprep.subr.bf16.mxu0 %v6242_v44  ;;  %2963 = vmatprep.subr.bf16.mxu1 %v6244_v38  ;;  %v6290_v38 = vcombine.high %v2138_v0, %v2142_v3  ;;  %v6292_v44 = vcombine.high %v2139_v22, %v2143_v28  ;;  %v2146_v21 = vld [vmem:[%s6599_s1 + $0x2d0] sm:$0xff]  ;;  %v6308_v46 = vcombine.low %v2138_v0, %v2142_v3  ;;  %v2155_v0 = vld [vmem:[%s6599_s1 + $0x318] sm:$0xff] }
 0x2ea   :  { %v2159_v3 = vld [vmem:[%s6599_s1 + $0x338] sm:$0xff]  ;;  %v6334_v28 = vcombine.low %v2147_v11, %v2151_v53 }
 0x2eb   :  { %6956 = vst [vmem:[#allocation62_spill] sm:$0xff] %v6290_v38  ;;  %6957 = vst [vmem:[#allocation63_spill] sm:$0xff] %v6292_v44 }
 0x2ec   :  { %2923 = vmatpush1.bf16.msra.mxu0 %v6260_v43  ;;  %2964 = vmatpush1.bf16.msra.mxu1 %v6262_v7  ;;  %v2150_v7 = vld [vmem:[%s6599_s1 + $0x2f0] sm:$0xff]  ;;  %6958 = vst [vmem:[#allocation64_spill] sm:$0xff] %v6308_v46  ;;  %6963 = vst [vmem:[#allocation69_spill] sm:$0xff] %v6334_v28 }
 0x2ed   :  { %2924 = vmatprep.subr.bf16.mxu0 %v6266_v9  ;;  %2965 = vmatprep.subr.bf16.mxu1 %v6268_v34  ;;  %v6314_v34 = vcombine.high %v2146_v21, %v2150_v7  ;;  %v6316_v9 = vcombine.high %v2147_v11, %v2151_v53  ;;  %v2154_v43 = vld [vmem:[%s6599_s1 + $0x310] sm:$0xff]  ;;  %v6332_v22 = vcombine.low %v2146_v21, %v2150_v7  ;;  %v2163_v21 = vld [vmem:[%s6599_s1 + $0x358] sm:$0xff] }
 0x2ee   :  { %v2167_v7 = vld [vmem:[%s6599_s1 + $0x378] sm:$0xff]  ;;  %v6358_v53 = vcombine.low %v2155_v0, %v2159_v3 }
 0x2ef   :  { %6960 = vst [vmem:[#allocation66_spill] sm:$0xff] %v6314_v34  ;;  %6961 = vst [vmem:[#allocation67_spill] sm:$0xff] %v6316_v9 }
 0x2f0   :  { %2925 = vmatpush1.bf16.msra.mxu0 %v6284_v5  ;;  %2966 = vmatpush1.bf16.msra.mxu1 %v6286_v24  ;;  %v2158_v24 = vld [vmem:[%s6599_s1 + $0x330] sm:$0xff]  ;;  %6962 = vst [vmem:[#allocation68_spill] sm:$0xff] %v6332_v22  ;;  %6967 = vst [vmem:[#allocation73_spill] sm:$0xff] %v6358_v53 }
 0x2f1   :  { %2926 = vmatprep.subr.bf16.mxu0 %v6290_v38  ;;  %2967 = vmatprep.subr.bf16.mxu1 %v6292_v44  ;;  %v6338_v44 = vcombine.high %v2154_v43, %v2158_v24  ;;  %v6340_v38 = vcombine.high %v2155_v0, %v2159_v3  ;;  %v2162_v5 = vld [vmem:[%s6599_s1 + $0x350] sm:$0xff]  ;;  %v6356_v11 = vcombine.low %v2154_v43, %v2158_v24  ;;  %v2171_v43 = vld [vmem:[%s6599_s1 + $0x398] sm:$0xff] }
 0x2f2   :  { %v2175_v24 = vld [vmem:[%s6599_s1 + $0x3b8] sm:$0xff]  ;;  %v6382_v3 = vcombine.low %v2163_v21, %v2167_v7 }
 0x2f3   :  { %6964 = vst [vmem:[#allocation70_spill] sm:$0xff] %v6338_v44  ;;  %6965 = vst [vmem:[#allocation71_spill] sm:$0xff] %v6340_v38 }
 0x2f4   :  { %2927 = vmatpush1.bf16.msra.mxu0 %v6308_v46  ;;  %2968 = vmatpush1.bf16.msra.mxu1 %v6310_v35  ;;  %v2166_v35 = vld [vmem:[%s6599_s1 + $0x370] sm:$0xff]  ;;  %6966 = vst [vmem:[#allocation72_spill] sm:$0xff] %v6356_v11 }
 0x2f5   :  { %2928 = vmatprep.subr.bf16.mxu0 %v6314_v34  ;;  %2969 = vmatprep.subr.bf16.mxu1 %v6316_v9  ;;  %v6362_v9 = vcombine.high %v2162_v5, %v2166_v35  ;;  %v6364_v34 = vcombine.high %v2163_v21, %v2167_v7  ;;  %v2170_v46 = vld [vmem:[%s6599_s1 + $0x390] sm:$0xff]  ;;  %v6380_v0 = vcombine.low %v2162_v5, %v2166_v35  ;;  %v2179_v5 = vld [vmem:[%s6599_s1 + $0x3d8] sm:$0xff] }
 0x2f6   :  { %v2183_v35 = vld [vmem:[%s6599_s1 + $0x3f8] sm:$0xff]  ;;  %v6406_v7 = vcombine.low %v2171_v43, %v2175_v24 }
 0x2f7   :  { %6968 = vst [vmem:[#allocation74_spill] sm:$0xff] %v6362_v9  ;;  %6969 = vst [vmem:[#allocation75_spill] sm:$0xff] %v6364_v34 }
 0x2f8   :  { %2929 = vmatpush1.bf16.msra.mxu0 %v6332_v22  ;;  %2970 = vmatpush1.bf16.msra.mxu1 %v6334_v28  ;;  %v2174_v28 = vld [vmem:[%s6599_s1 + $0x3b0] sm:$0xff]  ;;  %6970 = vst [vmem:[#allocation76_spill] sm:$0xff] %v6380_v0 }
 0x2f9   :  { %2930 = vmatprep.subr.bf16.mxu0 %v6338_v44  ;;  %2971 = vmatprep.subr.bf16.mxu1 %v6340_v38  ;;  %v6386_v38 = vcombine.high %v2170_v46, %v2174_v28  ;;  %v6388_v44 = vcombine.high %v2171_v43, %v2175_v24  ;;  %v2178_v22 = vld [vmem:[%s6599_s1 + $0x3d0] sm:$0xff]  ;;  %v6404_v21 = vcombine.low %v2170_v46, %v2174_v28 }
 0x2fc   :  { %2931 = vmatpush1.bf16.msra.mxu0 %v6356_v11  ;;  %2972 = vmatpush1.bf16.msra.mxu1 %v6358_v53  ;;  %v2182_v53 = vld [vmem:[%s6599_s1 + $0x3f0] sm:$0xff] }
 0x2fd   :  { %2932 = vmatprep.subr.bf16.mxu0 %v6362_v9  ;;  %2973 = vmatprep.subr.bf16.mxu1 %v6364_v34  ;;  %v6410_v34 = vcombine.high %v2178_v22, %v2182_v53  ;;  %v6412_v9 = vcombine.high %v2179_v5, %v2183_v35  ;;  %v6416_v11 = vcombine.low %v2178_v22, %v2182_v53 }
 0x300   :  { %2933 = vmatpush1.bf16.msra.mxu0 %v6380_v0  ;;  %2974 = vmatpush1.bf16.msra.mxu1 %v6382_v3  ;;  %v6418_v0 = vcombine.low %v2179_v5, %v2183_v35 }
 0x301   :  { %2934 = vmatprep.subr.bf16.mxu0 %v6386_v38  ;;  %2975 = vmatprep.subr.bf16.mxu1 %v6388_v44 }
 0x304   :  { %2935 = vmatpush1.bf16.msra.mxu0 %v6404_v21  ;;  %2976 = vmatpush1.bf16.msra.mxu1 %v6406_v7 }
 0x305   :  { %2936 = vmatprep.subr.bf16.mxu0 %v6410_v34  ;;  %2977 = vmatprep.subr.bf16.mxu1 %v6412_v9 }
 0x308   :  { %2937 = vmatpush1.bf16.msra.mxu0 %v6416_v11  ;;  %2978 = vmatpush1.bf16.msra.mxu1 %v6418_v0 }
 0x309   :  { %3845 = vmatprep.subr.bf16.mxu0 %v5642_v48  ;;  %3886 = vmatprep.subr.bf16.mxu1 %v5655_v2  ;;  %v6972_v48 = vld [vmem:[#allocation2_spill] sm:$0xff]  ;;  %v6974_v2 = vld [vmem:[#allocation5_spill] sm:$0xff] }
 0x30b   :  { %2939 = vmatmul.mubr.bf16.vlgmr.msra.gmra.mrb[20].mxu0 %v6067_v49  ;;  %2980 = vmatmul.mubr.bf16.vlgmr.msra.gmra.mrb[20].mxu1 %v6067_v49 }
 0x30c   :  { %3846 = vmatpush1.bf16.msra.mxu0 %v5640_v47  ;;  %3887 = vmatpush1.bf16.msra.mxu1 %v5653_v63  ;;  %v6971_v47 = vld [vmem:[#allocation4_spill] sm:$0xff]  ;;  %v6973_v63 = vld [vmem:[#allocation3_spill] sm:$0xff] }
 0x30d   :  { %3847 = vmatprep.subr.bf16.mxu0 %v5657_v51  ;;  %3888 = vmatprep.subr.bf16.mxu1 %v5669_v61  ;;  %v6975_v51 = vld [vmem:[#allocation8_spill] sm:$0xff]  ;;  %v6976_v61 = vld [vmem:[#allocation6_spill] sm:$0xff] }
 0x310   :  { %3848 = vmatpush1.bf16.msra.mxu0 %v5682_v8  ;;  %3889 = vmatpush1.bf16.msra.mxu1 %v5686_v12  ;;  %v6977_v8 = vld [vmem:[#allocation7_spill] sm:$0xff]  ;;  %v6978_v12 = vld [vmem:[#allocation10_spill] sm:$0xff] }
 0x311   :  { %3849 = vmatprep.subr.bf16.mxu0 %v5688_v18  ;;  %3890 = vmatprep.subr.bf16.mxu1 %v5691_v23  ;;  %v6979_v18 = vld [vmem:[#allocation12_spill] sm:$0xff]  ;;  %v6980_v23 = vld [vmem:[#allocation9_spill] sm:$0xff] }
 0x314   :  { %3850 = vmatpush1.bf16.msra.mxu0 %v5706_v40  ;;  %3891 = vmatpush1.bf16.msra.mxu1 %v5710_v41  ;;  %v6981_v40 = vld [vmem:[#allocation11_spill] sm:$0xff]  ;;  %v6982_v41 = vld [vmem:[#allocation13_spill] sm:$0xff] }
 0x315   :  { %3851 = vmatprep.subr.bf16.mxu0 %v5712_v50  ;;  %3892 = vmatprep.subr.bf16.mxu1 %v5715_v55  ;;  %v6983_v50 = vld [vmem:[#allocation14_spill] sm:$0xff]  ;;  %v6984_v55 = vld [vmem:[#allocation15_spill] sm:$0xff] }
 0x318   :  { %3852 = vmatpush1.bf16.msra.mxu0 %v5730_v1  ;;  %3893 = vmatpush1.bf16.msra.mxu1 %v5734_v13  ;;  %v6985_v1 = vld [vmem:[#allocation16_spill] sm:$0xff]  ;;  %v6986_v13 = vld [vmem:[#allocation17_spill] sm:$0xff] }
 0x319   :  { %3853 = vmatprep.subr.bf16.mxu0 %v5736_v17  ;;  %3894 = vmatprep.subr.bf16.mxu1 %v5739_v32  ;;  %v6987_v17 = vld [vmem:[#allocation18_spill] sm:$0xff]  ;;  %v6988_v32 = vld [vmem:[#allocation19_spill] sm:$0xff] }
 0x31c   :  { %3854 = vmatpush1.bf16.msra.mxu0 %v5742_v33  ;;  %3895 = vmatpush1.bf16.msra.mxu1 %v5746_v58  ;;  %v6989_v33 = vld [vmem:[#allocation20_spill] sm:$0xff]  ;;  %v6990_v58 = vld [vmem:[#allocation21_spill] sm:$0xff] }
 0x31d   :  { %3855 = vmatprep.subr.bf16.mxu0 %v5760_v10  ;;  %3896 = vmatprep.subr.bf16.mxu1 %v5769_v20  ;;  %v6991_v10 = vld [vmem:[#allocation22_spill] sm:$0xff]  ;;  %v6994_v20 = vld [vmem:[#allocation25_spill] sm:$0xff] }
 0x320   :  { %3856 = vmatpush1.bf16.msra.mxu0 %v5765_v15  ;;  %3897 = vmatpush1.bf16.msra.mxu1 %v5767_v19  ;;  %v6992_v15 = vld [vmem:[#allocation23_spill] sm:$0xff]  ;;  %v6993_v19 = vld [vmem:[#allocation24_spill] sm:$0xff] }
 0x321   :  { %3857 = vmatprep.subr.bf16.mxu0 %v5781_v27  ;;  %3898 = vmatprep.subr.bf16.mxu1 %v5793_v37  ;;  %v6995_v27 = vld [vmem:[#allocation26_spill] sm:$0xff] }
 0x324   :  { %3858 = vmatpush1.bf16.msra.mxu0 %v5789_v30  ;;  %3899 = vmatpush1.bf16.msra.mxu1 %v5791_v36 }
 0x325   :  { %3859 = vmatprep.subr.bf16.mxu0 %v5808_v45  ;;  %3900 = vmatprep.subr.bf16.mxu1 %v5817_v16 }
 0x328   :  { %3860 = vmatpush1.bf16.msra.mxu0 %v5813_v52  ;;  %3901 = vmatpush1.bf16.msra.mxu1 %v5815_v14 }
 0x329   :  { %3861 = vmatprep.subr.bf16.mxu0 %v5832_v26  ;;  %3902 = vmatprep.subr.bf16.mxu1 %v5841_v62 }
 0x32c   :  { %3862 = vmatpush1.bf16.msra.mxu0 %v5837_v54  ;;  %3903 = vmatpush1.bf16.msra.mxu1 %v5839_v60 }
 0x32d   :  { %3863 = vmatprep.subr.bf16.mxu0 %v5856_v25  ;;  %3904 = vmatprep.subr.bf16.mxu1 %v5865_v57 }
 0x330   :  { %3864 = vmatpush1.bf16.msra.mxu0 %v5861_v39  ;;  %3905 = vmatpush1.bf16.msra.mxu1 %v5863_v56  ;;  %v4493_v56 = vld [vmem:[%s6600_s0 + $0x20] sm:$0xff] }
 0x331   :  { %3865 = vmatprep.subr.bf16.mxu0 %v5880_v6  ;;  %3906 = vmatprep.subr.bf16.mxu1 %v6971_v47 }
 0x334   :  { %3866 = vmatpush1.bf16.msra.mxu0 %v6972_v48  ;;  %3907 = vmatpush1.bf16.msra.mxu1 %v6973_v63 }
 0x335   :  { %3867 = vmatprep.subr.bf16.mxu0 %v6974_v2  ;;  %3908 = vmatprep.subr.bf16.mxu1 %v6975_v51 }
 0x338   :  { %3868 = vmatpush1.bf16.msra.mxu0 %v6976_v61  ;;  %3909 = vmatpush1.bf16.msra.mxu1 %v6977_v8  ;;  %v4494_v61 = vld [vmem:[%s6600_s0 + $0x28] sm:$0xff] }
 0x339   :  { %3869 = vmatprep.subr.bf16.mxu0 %v6978_v12  ;;  %3910 = vmatprep.subr.bf16.mxu1 %v6979_v18 }
 0x33c   :  { %3870 = vmatpush1.bf16.msra.mxu0 %v6980_v23  ;;  %3911 = vmatpush1.bf16.msra.mxu1 %v6981_v40 }
 0x33d   :  { %3871 = vmatprep.subr.bf16.mxu0 %v6982_v41  ;;  %3912 = vmatprep.subr.bf16.mxu1 %v6983_v50 }
 0x340   :  { %3872 = vmatpush1.bf16.msra.mxu0 %v6984_v55  ;;  %3913 = vmatpush1.bf16.msra.mxu1 %v6985_v1 }
 0x341   :  { %3873 = vmatprep.subr.bf16.mxu0 %v6986_v13  ;;  %3914 = vmatprep.subr.bf16.mxu1 %v6987_v17 }
 0x344   :  { %3874 = vmatpush1.bf16.msra.mxu0 %v6988_v32  ;;  %3915 = vmatpush1.bf16.msra.mxu1 %v6989_v33 }
 0x345   :  { %3875 = vmatprep.subr.bf16.mxu0 %v6990_v58  ;;  %3916 = vmatprep.subr.bf16.mxu1 %v6991_v10 }
 0x348   :  { %3876 = vmatpush1.bf16.msra.mxu0 %v6992_v15  ;;  %3917 = vmatpush1.bf16.msra.mxu1 %v6993_v19 }
 0x349   :  { %3927 = vmatprep.subr.bf16.mxu0 %v6994_v20  ;;  %3968 = vmatprep.subr.bf16.mxu1 %v6995_v27 }
 0x39e   :  { %v2858_v30 = vpop.f32.mrb[16].mxu0  ;;  %v2899_v36 = vpop.f32.mrb[16].mxu1 }
 0x39f   :  { %v2860_v37 = vpop.f32.mrb[17].mxu0  ;;  %v2901_v45 = vpop.f32.mrb[17].mxu1 }
 0x3a0   :  { %v2999_v52 = vcombine.low %v2858_v30, %v2860_v37  ;;  %v3000_v14 = vcombine.low %v2899_v36, %v2901_v45  ;;  %v2862_v16 = vpop.f32.mrb[18].mxu0  ;;  %v2903_v26 = vpop.f32.mrb[18].mxu1  ;;  %v6997_v36 = vld [vmem:[#allocation28_spill] sm:$0xff]  ;;  %v6998_v37 = vld [vmem:[#allocation29_spill] sm:$0xff]  ;;  %v6999_v45 = vld [vmem:[#allocation30_spill] sm:$0xff] }
 0x3a1   :  { %v2863_v54 = vpop.f32.mrb[19].mxu0  ;;  %v2904_v60 = vpop.f32.mrb[19].mxu1  ;;  %v7002_v16 = vld [vmem:[#allocation33_spill] sm:$0xff]  ;;  %v7005_v26 = vld [vmem:[#allocation36_spill] sm:$0xff] }
 0x3a2   :  { %v3007_v62 = vrot.slane %v2999_v52, %v5541_v59  ;;  %v3014_v25 = vrot.slane %v3000_v14, %v5541_v59  ;;  %v7000_v52 = vld [vmem:[#allocation31_spill] sm:$0xff]  ;;  %v7001_v14 = vld [vmem:[#allocation32_spill] sm:$0xff]  ;;  %v7007_v54 = vld [vmem:[#allocation38_spill] sm:$0xff] }
 0x3a3   :  { %v7008_v60 = vld [vmem:[#allocation39_spill] sm:$0xff] }
 0x3a4   :  { %v3015_v39 = vcombine.low %v3007_v62, %v3014_v25  ;;  %v7009_v62 = vld [vmem:[#allocation40_spill] sm:$0xff]  ;;  %v7010_v25 = vld [vmem:[#allocation41_spill] sm:$0xff] }
 0x3a6   :  { %v3035_v57 = vadd.f32 %v4493_v56, %v3015_v39  ;;  %v7011_v39 = vld [vmem:[#allocation42_spill] sm:$0xff]  ;;  %v7012_v56 = vld [vmem:[#allocation43_spill] sm:$0xff] }
 0x3a8   :  { %v4495_v6 = vmul.f32 -1.442695, %v3035_v57  ;;  %v7013_v57 = vld [vmem:[#allocation44_spill] sm:$0xff] }
 0x3aa   :  { %4658 = vpow2.f32 %v4495_v6  ;;  %v7014_v6 = vld [vmem:[#allocation45_spill] sm:$0xff] }
 0x3b4   :  { %v4659_v49 = vpop.eup %4658 }
 0x3b5   :  { %v3043_v47 = vadd.f32 1.0, %v4659_v49  ;;  %v7015_v49 = vld [vmem:[#allocation46_spill] sm:$0xff] }
 0x3b7   :  { %4660 = vrcp.f32 %v3043_v47  ;;  %v7024_v47 = vld [vmem:[#allocation55_spill] sm:$0xff] }
 0x3c1   :  { %v4661_v40 = vpop.eup %4660 }
 0x3c2   :  { %v3054_v41 = vrot.slane %v4661_v40, 4 }
 0x3c4   :  { %v3056_v13 = vmul.f32 %v3054_v41, %v6048_v42  ;;  %v6996_v42 = vld [vmem:[#allocation27_spill] sm:$0xff]  ;;  %v7035_v41 = vld [vmem:[#allocation66_spill] sm:$0xff] }
 0x3de   :  { %v2940_v46 = vpop.f32.mrb[20].mxu0  ;;  %v2981_v22 = vpop.f32.mrb[20].mxu1 }
 0x3df   :  { %v2942_v28 = vpop.f32.mrb[21].mxu0  ;;  %v2983_v53 = vpop.f32.mrb[21].mxu1 }
 0x3e0   :  { %v3016_v43 = vcombine.low %v2940_v46, %v2942_v28  ;;  %v3017_v24 = vcombine.low %v2981_v22, %v2983_v53  ;;  %v2944_v5 = vpop.f32.mrb[22].mxu0  ;;  %v2985_v35 = vpop.f32.mrb[22].mxu1  ;;  %v7016_v46 = vld [vmem:[#allocation47_spill] sm:$0xff]  ;;  %v7017_v22 = vld [vmem:[#allocation48_spill] sm:$0xff]  ;;  %v7018_v28 = vld [vmem:[#allocation49_spill] sm:$0xff] }
 0x3e1   :  { %v2945_v48 = vpop.f32.mrb[23].mxu0  ;;  %v2986_v63 = vpop.f32.mrb[23].mxu1  ;;  %v7019_v53 = vld [vmem:[#allocation50_spill] sm:$0xff]  ;;  %v7022_v5 = vld [vmem:[#allocation53_spill] sm:$0xff] }
 0x3e2   :  { %v3024_v2 = vrot.slane %v3016_v43, %v5541_v59  ;;  %v3031_v51 = vrot.slane %v3017_v24, %v5541_v59  ;;  %v7020_v43 = vld [vmem:[#allocation51_spill] sm:$0xff]  ;;  %v7021_v24 = vld [vmem:[#allocation52_spill] sm:$0xff]  ;;  %v7023_v35 = vld [vmem:[#allocation54_spill] sm:$0xff] }
 0x3e3   :  { %v7025_v48 = vld [vmem:[#allocation56_spill] sm:$0xff]  ;;  %v7026_v63 = vld [vmem:[#allocation57_spill] sm:$0xff] }
 0x3e4   :  { %v3032_v8 = vcombine.low %v3024_v2, %v3031_v51  ;;  %v7027_v2 = vld [vmem:[#allocation58_spill] sm:$0xff]  ;;  %v7028_v51 = vld [vmem:[#allocation59_spill] sm:$0xff] }
 0x3e6   :  { %v3036_v12 = vadd.f32 %v4494_v61, %v3032_v8  ;;  %v7029_v61 = vld [vmem:[#allocation60_spill] sm:$0xff]  ;;  %v7030_v8 = vld [vmem:[#allocation61_spill] sm:$0xff] }
 0x3e8   :  { %v4496_v18 = vmul.f32 -1.442695, %v3036_v12  ;;  %v3050_v23 = vrot.slane %v3036_v12, 4  ;;  %v7031_v12 = vld [vmem:[#allocation62_spill] sm:$0xff] }
 0x3ea   :  { %4662 = vpow2.f32 %v4496_v18  ;;  %v7032_v18 = vld [vmem:[#allocation63_spill] sm:$0xff] }
 0x3eb   :  { %4664 = vtanh.f32 %v3050_v23  ;;  %v7033_v23 = vld [vmem:[#allocation64_spill] sm:$0xff] }
 0x3f4   :  { %v4663_v50 = vpop.eup %4662 }
 0x3f5   :  { %v4665_v55 = vpop.eup %4664  ;;  %v3044_v1 = vadd.f32 1.0, %v4663_v50  ;;  %v7036_v50 = vld [vmem:[#allocation67_spill] sm:$0xff] }
 0x3f6   :  { %v3057_v17 = vmul.f32 %v4665_v55, %v4661_v40  ;;  %v7034_v40 = vld [vmem:[#allocation65_spill] sm:$0xff]  ;;  %v7037_v55 = vld [vmem:[#allocation68_spill] sm:$0xff] }
 0x3f7   :  { %4666 = vrcp.f32 %v3044_v1  ;;  %v7038_v1 = vld [vmem:[#allocation69_spill] sm:$0xff] }
 0x3f8   :  { %v6503_v32 = vadd.f32 %v3057_v17, %v3056_v13  ;;  %v7039_v13 = vld [vmem:[#allocation70_spill] sm:$0xff]  ;;  %v7040_v17 = vld [vmem:[#allocation71_spill] sm:$0xff] }
 0x3fa   :  { %4668 = vtanh.f32 %v6503_v32 }
 0x401   :  { %v4667_v33 = vpop.eup %4666 }
 0x404   :  { %v4669_v58 = vpop.eup %4668 }
 0x405   :  { %v3060_v10 = vmul.f32 %v4669_v58, %v4667_v33  ;;  %v7041_v33 = vld [vmem:[#allocation72_spill] sm:$0xff]  ;;  %v7042_v58 = vld [vmem:[#allocation73_spill] sm:$0xff] }
 0x407   :  { %v3061_v15 = vpack.c.bf16 %v3060_v10, %v3060_v10  ;;  %v3070_v19 = vrot.slane %v3060_v10, %v5541_v59  ;;  %v7043_v10 = vld [vmem:[#allocation74_spill] sm:$0xff] }
 0x409   :  { %4497 = vst [vmem:[%s6601_s2 + $0x4] sm:$0x1] %v3061_v15  ;;  %v3071_v20 = vcombine.high %v3070_v19, %v3070_v19  ;;  %v6510_v30 = vpack.c.bf16 %v3070_v19, %v3070_v19  ;;  %v7044_v15 = vld [vmem:[#allocation75_spill] sm:$0xff]  ;;  %v7045_v19 = vld [vmem:[#allocation76_spill] sm:$0xff] }
 0x40b   :  { %v3073_v27 = vpack.c.bf16 %v3071_v20, %v3071_v20 }
 0x40d   :  { %4498 = vst [vmem:[%s6601_s2 + $0x3] sm:$0x1] %v3073_v27  ;;  %3877 = vmatprep.mubr.bf16.mxu0 %v3073_v27  ;;  %3918 = vmatprep.mubr.bf16.mxu1 %v3073_v27 }
 0x40e   :  { %3878 = vmatmul.mubr.bf16.vlgmr.msra.gmra.mrb[24].mxu0 %v6510_v30  ;;  %3919 = vmatmul.mubr.bf16.vlgmr.msra.gmra.mrb[24].mxu1 %v6510_v30 }
 0x40f   :  { %3928 = vmatpush1.bf16.msra.mxu0 %v6029_v31  ;;  %3969 = vmatpush1.bf16.msra.mxu1 %v6031_v29  ;;  %v7003_v31 = vld [vmem:[#allocation34_spill] sm:$0xff]  ;;  %v7004_v29 = vld [vmem:[#allocation35_spill] sm:$0xff] }
 0x410   :  { %3959 = vmatprep.mubr.bf16.mxu0 %v3073_v27  ;;  %4000 = vmatprep.mubr.bf16.mxu1 %v3073_v27 }
 0x411   :  { %3929 = vmatprep.subr.bf16.mxu0 %v6075_v4  ;;  %3970 = vmatprep.subr.bf16.mxu1 %v6996_v42  ;;  %v7006_v4 = vld [vmem:[#allocation37_spill] sm:$0xff] }
 0x413   :  { %3930 = vmatpush1.bf16.msra.mxu0 %v6997_v36  ;;  %3971 = vmatpush1.bf16.msra.mxu1 %v6998_v37 }
 0x414   :  { %3931 = vmatprep.subr.bf16.mxu0 %v6999_v45  ;;  %3972 = vmatprep.subr.bf16.mxu1 %v7000_v52 }
 0x417   :  { %3932 = vmatpush1.bf16.msra.mxu0 %v7001_v14  ;;  %3973 = vmatpush1.bf16.msra.mxu1 %v7002_v16 }
 0x418   :  { %3933 = vmatprep.subr.bf16.mxu0 %v7003_v31  ;;  %3974 = vmatprep.subr.bf16.mxu1 %v7004_v29 }
 0x41b   :  { %3934 = vmatpush1.bf16.msra.mxu0 %v7005_v26  ;;  %3975 = vmatpush1.bf16.msra.mxu1 %v7006_v4 }
 0x41c   :  { %3935 = vmatprep.subr.bf16.mxu0 %v7007_v54  ;;  %3976 = vmatprep.subr.bf16.mxu1 %v7008_v60 }
 0x41f   :  { %3936 = vmatpush1.bf16.msra.mxu0 %v7009_v62  ;;  %3977 = vmatpush1.bf16.msra.mxu1 %v7010_v25 }
 0x420   :  { %3937 = vmatprep.subr.bf16.mxu0 %v7011_v39  ;;  %3978 = vmatprep.subr.bf16.mxu1 %v7012_v56 }
 0x423   :  { %3938 = vmatpush1.bf16.msra.mxu0 %v7013_v57  ;;  %3979 = vmatpush1.bf16.msra.mxu1 %v7014_v6  ;;  %v4628_v6 = vld [vmem:[%s6600_s0 + $0x38] sm:$0xff] }
 0x424   :  { %3939 = vmatprep.subr.bf16.mxu0 %v7015_v49  ;;  %3980 = vmatprep.subr.bf16.mxu1 %v7016_v46 }
 0x427   :  { %3940 = vmatpush1.bf16.msra.mxu0 %v7017_v22  ;;  %3981 = vmatpush1.bf16.msra.mxu1 %v7018_v28 }
 0x428   :  { %3941 = vmatprep.subr.bf16.mxu0 %v7019_v53  ;;  %3982 = vmatprep.subr.bf16.mxu1 %v7020_v43 }
 0x42b   :  { %3942 = vmatpush1.bf16.msra.mxu0 %v7021_v24  ;;  %3983 = vmatpush1.bf16.msra.mxu1 %v7022_v5 }
 0x42c   :  { %3943 = vmatprep.subr.bf16.mxu0 %v7023_v35  ;;  %3984 = vmatprep.subr.bf16.mxu1 %v7024_v47 }
 0x42f   :  { %3944 = vmatpush1.bf16.msra.mxu0 %v7025_v48  ;;  %3985 = vmatpush1.bf16.msra.mxu1 %v7026_v63 }
 0x430   :  { %3945 = vmatprep.subr.bf16.mxu0 %v7027_v2  ;;  %3986 = vmatprep.subr.bf16.mxu1 %v7028_v51 }
 0x433   :  { %3946 = vmatpush1.bf16.msra.mxu0 %v7029_v61  ;;  %3987 = vmatpush1.bf16.msra.mxu1 %v7030_v8 }
 0x434   :  { %3947 = vmatprep.subr.bf16.mxu0 %v7031_v12  ;;  %3988 = vmatprep.subr.bf16.mxu1 %v7032_v18 }
 0x437   :  { %3948 = vmatpush1.bf16.msra.mxu0 %v7033_v23  ;;  %3989 = vmatpush1.bf16.msra.mxu1 %v7034_v40 }
 0x438   :  { %3949 = vmatprep.subr.bf16.mxu0 %v7035_v41  ;;  %3990 = vmatprep.subr.bf16.mxu1 %v7036_v50 }
 0x43b   :  { %3950 = vmatpush1.bf16.msra.mxu0 %v7037_v55  ;;  %3991 = vmatpush1.bf16.msra.mxu1 %v7038_v1 }
 0x43c   :  { %3951 = vmatprep.subr.bf16.mxu0 %v7039_v13  ;;  %3992 = vmatprep.subr.bf16.mxu1 %v7040_v17 }
 0x43f   :  { %3952 = vmatpush1.bf16.msra.mxu0 %v7041_v33  ;;  %3993 = vmatpush1.bf16.msra.mxu1 %v7042_v58 }
 0x440   :  { %3953 = vmatprep.subr.bf16.mxu0 %v7043_v10  ;;  %3994 = vmatprep.subr.bf16.mxu1 %v7044_v15 }
 0x443   :  { %3954 = vmatpush1.bf16.msra.mxu0 %v7045_v19  ;;  %3995 = vmatpush1.bf16.msra.mxu1 %v6382_v3 }
 0x444   :  { %3955 = vmatprep.subr.bf16.mxu0 %v6386_v38  ;;  %3996 = vmatprep.subr.bf16.mxu1 %v6388_v44 }
 0x447   :  { %3956 = vmatpush1.bf16.msra.mxu0 %v6404_v21  ;;  %3997 = vmatpush1.bf16.msra.mxu1 %v6406_v7 }
 0x448   :  { %3957 = vmatprep.subr.bf16.mxu0 %v6410_v34  ;;  %3998 = vmatprep.subr.bf16.mxu1 %v6412_v9 }
 0x44b   :  { %3958 = vmatpush1.bf16.msra.mxu0 %v6416_v11  ;;  %3999 = vmatpush1.bf16.msra.mxu1 %v6418_v0  ;;  %v4627_v0 = vld [vmem:[%s6600_s0 + $0x30] sm:$0xff] }
 0x44e   :  { %3960 = vmatmul.mubr.bf16.vlgmr.msra.gmra.mrb[28].mxu0 %v6510_v30  ;;  %4001 = vmatmul.mubr.bf16.vlgmr.msra.gmra.mrb[28].mxu1 %v6510_v30 }
 0x4e1   :  { %v3879_v3 = vpop.f32.mrb[24].mxu0  ;;  %v3920_v38 = vpop.f32.mrb[24].mxu1 }
 0x4e2   :  { %v3881_v20 = vpop.f32.mrb[25].mxu0  ;;  %v3922_v44 = vpop.f32.mrb[25].mxu1 }
 0x4e3   :  { %v4020_v27 = vcombine.low %v3879_v3, %v3881_v20  ;;  %v4021_v21 = vcombine.low %v3920_v38, %v3922_v44  ;;  %v3883_v42 = vpop.f32.mrb[26].mxu0  ;;  %v3924_v7 = vpop.f32.mrb[26].mxu1 }
 0x4e4   :  { %v3884_v36 = vpop.f32.mrb[27].mxu0  ;;  %v3925_v34 = vpop.f32.mrb[27].mxu1 }
 0x4e5   :  { %v4028_v9 = vrot.slane %v4020_v27, %v5541_v59  ;;  %v4035_v11 = vrot.slane %v4021_v21, %v5541_v59 }
 0x4e7   :  { %v4036_v37 = vcombine.low %v4028_v9, %v4035_v11 }
 0x4e9   :  { %v4056_v30 = vadd.f32 %v4627_v0, %v4036_v37 }
 0x4eb   :  { %v4629_v45 = vmul.f32 -1.442695, %v4056_v30 }
 0x4ed   :  { %4670 = vpow2.f32 %v4629_v45 }
 0x4f7   :  { %v4671_v52 = vpop.eup %4670 }
 0x4f8   :  { %v4064_v62 = vadd.f32 1.0, %v4671_v52 }
 0x4fa   :  { %4672 = vrcp.f32 %v4064_v62 }
 0x504   :  { %v4673_v53 = vpop.eup %4672 }
 0x505   :  { %v4075_v43 = vrot.slane %v4673_v53, 4 }
 0x507   :  { %v4077_v47 = vmul.f32 %v4075_v43, %v6503_v32 }
 0x521   :  { %v3961_v14 = vpop.f32.mrb[28].mxu0  ;;  %v4002_v16 = vpop.f32.mrb[28].mxu1 }
 0x522   :  { %v3963_v31 = vpop.f32.mrb[29].mxu0  ;;  %v4004_v29 = vpop.f32.mrb[29].mxu1 }
 0x523   :  { %v4037_v26 = vcombine.low %v3961_v14, %v3963_v31  ;;  %v4038_v4 = vcombine.low %v4002_v16, %v4004_v29  ;;  %v3965_v54 = vpop.f32.mrb[30].mxu0  ;;  %v4006_v60 = vpop.f32.mrb[30].mxu1 }
 0x524   :  { %v3966_v25 = vpop.f32.mrb[31].mxu0  ;;  %v4007_v39 = vpop.f32.mrb[31].mxu1 }
 0x525   :  { %v4045_v56 = vrot.slane %v4037_v26, %v5541_v59  ;;  %v4052_v57 = vrot.slane %v4038_v4, %v5541_v59 }
 0x527   :  { %v4053_v49 = vcombine.low %v4045_v56, %v4052_v57 }
 0x529   :  { %v4057_v46 = vadd.f32 %v4628_v6, %v4053_v49 }
 0x52b   :  { %v4630_v22 = vmul.f32 -1.442695, %v4057_v46  ;;  %v4071_v28 = vrot.slane %v4057_v46, 4 }
 0x52d   :  { %4674 = vpow2.f32 %v4630_v22 }
 0x52e   :  { %4676 = vtanh.f32 %v4071_v28 }
 0x537   :  { %v4675_v24 = vpop.eup %4674 }
 0x538   :  { %v4677_v5 = vpop.eup %4676  ;;  %v4065_v35 = vadd.f32 1.0, %v4675_v24 }
 0x539   :  { %v4078_v48 = vmul.f32 %v4677_v5, %v4673_v53 }
 0x53a   :  { %4678 = vrcp.f32 %v4065_v35 }
 0x53b   :  { %v4079_v63 = vadd.f32 %v4078_v48, %v4077_v47 }
 0x53d   :  { %4680 = vtanh.f32 %v4079_v63 }
 0x544   :  { %v4679_v2 = vpop.eup %4678 }
 0x547   :  { %v4681_v51 = vpop.eup %4680 }
 0x548   :  { %v4081_v61 = vmul.f32 %v4681_v51, %v4679_v2 }
 0x54a   :  { %v4082_v8 = vpack.c.bf16 %v4081_v61, %v4081_v61  ;;  %v4091_v12 = vrot.slane %v4081_v61, %v5541_v59 }
 0x54c   :  { %4631 = vst [vmem:[%s6601_s2 + $0x6] sm:$0x1] %v4082_v8  ;;  %v4092_v18 = vcombine.high %v4091_v12, %v4091_v12 }
 0x54e   :  { %v4094_v23 = vpack.c.bf16 %v4092_v18, %v4092_v18 }
 0x550   :  { %4095 = vst [vmem:[%s6601_s2 + $0x1] sm:$0x1] %v4094_v23 }

// kernel: _lambda_.4
= control target key start
LH: loop header
LB: loop body
LE: loop exit
PB: predicated region body
PF: predicated region fallthrough
CT: control target
= control target key end

     0   :  { %v13385_v3 = vmov 0   ;;  %s13382_s1 = inlined_call_operand.vmem [shape: bf16[256,1024], index: 1, kind: input, shape index: {}]   ;;  %s13383_s0 = inlined_call_operand.vmem [shape: f32[8,8,1024], index: 0, kind: input, shape index: {}]   ;;  %s13384_s2 = inlined_call_operand.vmem [shape: bf16[8,8,256], index: 2, kind: output, shape index: {}]  }
   0x1   :  { %v12_v0 = vld [vmem:[%s13382_s1] sm:$0xff]  ;;  %v13_v2 = vld [vmem:[%s13382_s1 + $0x8] sm:$0xff]  ;;  %812 = vmatprep.mubr.bf16.mxu0 %v13385_v3  ;;  %853 = vmatprep.mubr.bf16.mxu1 %v13385_v3 }
   0x2   :  { %v16_v1 = vld [vmem:[%s13382_s1 + $0x20] sm:$0xff]  ;;  %v17_v5 = vld [vmem:[%s13382_s1 + $0x28] sm:$0xff] }
   0x3   :  { %v9456_v4 = vcombine.high %v12_v0, %v16_v1  ;;  %v9461_v6 = vcombine.low %v12_v0, %v16_v1  ;;  %v20_v7 = vld [vmem:[%s13382_s1 + $0x40] sm:$0xff]  ;;  %v9469_v9 = vcombine.high %v13_v2, %v17_v5  ;;  %v9471_v10 = vcombine.low %v13_v2, %v17_v5  ;;  %v21_v12 = vld [vmem:[%s13382_s1 + $0x48] sm:$0xff] }
   0x4   :  { %v24_v8 = vld [vmem:[%s13382_s1 + $0x60] sm:$0xff]  ;;  %v25_v13 = vld [vmem:[%s13382_s1 + $0x68] sm:$0xff] }
   0x5   :  { %v9473_v11 = vcombine.high %v20_v7, %v24_v8  ;;  %v28_v14 = vld [vmem:[%s13382_s1 + $0x80] sm:$0xff]  ;;  %780 = vmatprep.subr.bf16.mxu0 %v9456_v4  ;;  %v9485_v15 = vcombine.high %v21_v12, %v25_v13  ;;  %v29_v17 = vld [vmem:[%s13382_s1 + $0x88] sm:$0xff]  ;;  %821 = vmatprep.subr.bf16.mxu1 %v9469_v9  ;;  %v9498_v19 = vcombine.low %v20_v7, %v24_v8 }
   0x6   :  { %v32_v16 = vld [vmem:[%s13382_s1 + $0xa0] sm:$0xff]  ;;  %v33_v18 = vld [vmem:[%s13382_s1 + $0xa8] sm:$0xff]  ;;  %781 = vmatpush1.bf16.msra.mxu0 %v9461_v6  ;;  %822 = vmatpush1.bf16.msra.mxu1 %v9471_v10  ;;  %v9502_v20 = vcombine.low %v21_v12, %v25_v13 }
   0x7   :  { %782 = vmatprep.subr.bf16.mxu0 %v9473_v11  ;;  %v9504_v21 = vcombine.high %v28_v14, %v32_v16  ;;  %823 = vmatprep.subr.bf16.mxu1 %v9485_v15  ;;  %v9507_v22 = vcombine.high %v29_v17, %v33_v18  ;;  %v36_v23 = vld [vmem:[%s13382_s1 + $0xc0] sm:$0xff]  ;;  %v37_v25 = vld [vmem:[%s13382_s1 + $0xc8] sm:$0xff]  ;;  %v9522_v27 = vcombine.low %v28_v14, %v32_v16 }
   0x8   :  { %v40_v24 = vld [vmem:[%s13382_s1 + $0xe0] sm:$0xff]  ;;  %v41_v26 = vld [vmem:[%s13382_s1 + $0xe8] sm:$0xff]  ;;  %v9526_v28 = vcombine.low %v29_v17, %v33_v18 }
   0x9   :  { %v9528_v29 = vcombine.high %v36_v23, %v40_v24  ;;  %v9531_v30 = vcombine.high %v37_v25, %v41_v26  ;;  %v44_v31 = vld [vmem:[%s13382_s1 + $0x100] sm:$0xff]  ;;  %v45_v33 = vld [vmem:[%s13382_s1 + $0x108] sm:$0xff]  ;;  %v9546_v35 = vcombine.low %v36_v23, %v40_v24  ;;  %v9550_v36 = vcombine.low %v37_v25, %v41_v26 }
   0xa   :  { %783 = vmatpush1.bf16.msra.mxu0 %v9498_v19  ;;  %824 = vmatpush1.bf16.msra.mxu1 %v9502_v20  ;;  %v48_v32 = vld [vmem:[%s13382_s1 + $0x120] sm:$0xff]  ;;  %v49_v34 = vld [vmem:[%s13382_s1 + $0x128] sm:$0xff] }
   0xb   :  { %784 = vmatprep.subr.bf16.mxu0 %v9504_v21  ;;  %825 = vmatprep.subr.bf16.mxu1 %v9507_v22  ;;  %v9552_v37 = vcombine.high %v44_v31, %v48_v32  ;;  %v9555_v38 = vcombine.high %v45_v33, %v49_v34  ;;  %v52_v39 = vld [vmem:[%s13382_s1 + $0x140] sm:$0xff]  ;;  %v53_v41 = vld [vmem:[%s13382_s1 + $0x148] sm:$0xff]  ;;  %v9570_v43 = vcombine.low %v44_v31, %v48_v32 }
   0xc   :  { %v56_v40 = vld [vmem:[%s13382_s1 + $0x160] sm:$0xff]  ;;  %v57_v42 = vld [vmem:[%s13382_s1 + $0x168] sm:$0xff]  ;;  %v9574_v44 = vcombine.low %v45_v33, %v49_v34 }
   0xd   :  { %v9576_v45 = vcombine.high %v52_v39, %v56_v40  ;;  %v9579_v46 = vcombine.high %v53_v41, %v57_v42  ;;  %v60_v47 = vld [vmem:[%s13382_s1 + $0x180] sm:$0xff]  ;;  %v61_v49 = vld [vmem:[%s13382_s1 + $0x188] sm:$0xff]  ;;  %v9594_v51 = vcombine.low %v52_v39, %v56_v40  ;;  %v9598_v52 = vcombine.low %v53_v41, %v57_v42 }
   0xe   :  { %785 = vmatpush1.bf16.msra.mxu0 %v9522_v27  ;;  %826 = vmatpush1.bf16.msra.mxu1 %v9526_v28  ;;  %v64_v48 = vld [vmem:[%s13382_s1 + $0x1a0] sm:$0xff]  ;;  %v65_v50 = vld [vmem:[%s13382_s1 + $0x1a8] sm:$0xff] }
   0xf   :  { %786 = vmatprep.subr.bf16.mxu0 %v9528_v29  ;;  %827 = vmatprep.subr.bf16.mxu1 %v9531_v30  ;;  %v9600_v53 = vcombine.high %v60_v47, %v64_v48  ;;  %v9603_v54 = vcombine.high %v61_v49, %v65_v50  ;;  %v68_v55 = vld [vmem:[%s13382_s1 + $0x1c0] sm:$0xff]  ;;  %v69_v57 = vld [vmem:[%s13382_s1 + $0x1c8] sm:$0xff]  ;;  %v9618_v59 = vcombine.low %v60_v47, %v64_v48 }
  0x10   :  { %v72_v56 = vld [vmem:[%s13382_s1 + $0x1e0] sm:$0xff]  ;;  %v73_v58 = vld [vmem:[%s13382_s1 + $0x1e8] sm:$0xff]  ;;  %v9622_v60 = vcombine.low %v61_v49, %v65_v50 }
  0x11   :  { %v9624_v61 = vcombine.high %v68_v55, %v72_v56  ;;  %v9627_v62 = vcombine.high %v69_v57, %v73_v58  ;;  %v76_v63 = vld [vmem:[%s13382_s1 + $0x200] sm:$0xff]  ;;  %v77_v1 = vld [vmem:[%s13382_s1 + $0x208] sm:$0xff]  ;;  %v9642_v5 = vcombine.low %v68_v55, %v72_v56  ;;  %v9646_v7 = vcombine.low %v69_v57, %v73_v58 }
  0x12   :  { %787 = vmatpush1.bf16.msra.mxu0 %v9546_v35  ;;  %828 = vmatpush1.bf16.msra.mxu1 %v9550_v36  ;;  %v80_v0 = vld [vmem:[%s13382_s1 + $0x220] sm:$0xff]  ;;  %v81_v2 = vld [vmem:[%s13382_s1 + $0x228] sm:$0xff] }
  0x13   :  { %788 = vmatprep.subr.bf16.mxu0 %v9552_v37  ;;  %829 = vmatprep.subr.bf16.mxu1 %v9555_v38  ;;  %v9648_v8 = vcombine.high %v76_v63, %v80_v0  ;;  %v9651_v12 = vcombine.high %v77_v1, %v81_v2  ;;  %v84_v13 = vld [vmem:[%s13382_s1 + $0x240] sm:$0xff]  ;;  %v85_v16 = vld [vmem:[%s13382_s1 + $0x248] sm:$0xff]  ;;  %v9666_v18 = vcombine.low %v76_v63, %v80_v0 }
  0x14   :  { %v88_v14 = vld [vmem:[%s13382_s1 + $0x260] sm:$0xff]  ;;  %v89_v17 = vld [vmem:[%s13382_s1 + $0x268] sm:$0xff]  ;;  %v9670_v23 = vcombine.low %v77_v1, %v81_v2 }
  0x15   :  { %v9672_v24 = vcombine.high %v84_v13, %v88_v14  ;;  %v9675_v25 = vcombine.high %v85_v16, %v89_v17  ;;  %v92_v26 = vld [vmem:[%s13382_s1 + $0x280] sm:$0xff]  ;;  %v93_v32 = vld [vmem:[%s13382_s1 + $0x288] sm:$0xff]  ;;  %v9690_v34 = vcombine.low %v84_v13, %v88_v14  ;;  %v9694_v39 = vcombine.low %v85_v16, %v89_v17 }
  0x16   :  { %789 = vmatpush1.bf16.msra.mxu0 %v9570_v43  ;;  %830 = vmatpush1.bf16.msra.mxu1 %v9574_v44  ;;  %v96_v31 = vld [vmem:[%s13382_s1 + $0x2a0] sm:$0xff]  ;;  %v97_v33 = vld [vmem:[%s13382_s1 + $0x2a8] sm:$0xff] }
  0x17   :  { %790 = vmatprep.subr.bf16.mxu0 %v9576_v45  ;;  %831 = vmatprep.subr.bf16.mxu1 %v9579_v46  ;;  %v9696_v40 = vcombine.high %v92_v26, %v96_v31  ;;  %v9699_v41 = vcombine.high %v93_v32, %v97_v33  ;;  %v100_v42 = vld [vmem:[%s13382_s1 + $0x2c0] sm:$0xff]  ;;  %v101_v48 = vld [vmem:[%s13382_s1 + $0x2c8] sm:$0xff]  ;;  %v9714_v50 = vcombine.low %v92_v26, %v96_v31 }
  0x18   :  { %v104_v47 = vld [vmem:[%s13382_s1 + $0x2e0] sm:$0xff]  ;;  %v105_v49 = vld [vmem:[%s13382_s1 + $0x2e8] sm:$0xff]  ;;  %v9718_v55 = vcombine.low %v93_v32, %v97_v33 }
  0x19   :  { %v9720_v56 = vcombine.high %v100_v42, %v104_v47  ;;  %v9723_v57 = vcombine.high %v101_v48, %v105_v49  ;;  %v108_v58 = vld [vmem:[%s13382_s1 + $0x300] sm:$0xff]  ;;  %v109_v0 = vld [vmem:[%s13382_s1 + $0x308] sm:$0xff]  ;;  %v9738_v2 = vcombine.low %v100_v42, %v104_v47  ;;  %v9742_v13 = vcombine.low %v101_v48, %v105_v49 }
  0x1a   :  { %791 = vmatpush1.bf16.msra.mxu0 %v9594_v51  ;;  %832 = vmatpush1.bf16.msra.mxu1 %v9598_v52  ;;  %v112_v63 = vld [vmem:[%s13382_s1 + $0x320] sm:$0xff]  ;;  %v113_v1 = vld [vmem:[%s13382_s1 + $0x328] sm:$0xff] }
  0x1b   :  { %792 = vmatprep.subr.bf16.mxu0 %v9600_v53  ;;  %833 = vmatprep.subr.bf16.mxu1 %v9603_v54  ;;  %13684 = vst [vmem:[#allocation2_spill] sm:$0xff] %v9738_v2  ;;  %13685 = vst [vmem:[#allocation3_spill] sm:$0xff] %v9742_v13  ;;  %v9744_v14 = vcombine.high %v108_v58, %v112_v63  ;;  %v9747_v16 = vcombine.high %v109_v0, %v113_v1  ;;  %v116_v17 = vld [vmem:[%s13382_s1 + $0x340] sm:$0xff]  ;;  %v117_v31 = vld [vmem:[%s13382_s1 + $0x348] sm:$0xff] }
  0x1c   :  { %v120_v26 = vld [vmem:[%s13382_s1 + $0x360] sm:$0xff]  ;;  %v121_v32 = vld [vmem:[%s13382_s1 + $0x368] sm:$0xff]  ;;  %v9762_v33 = vcombine.low %v108_v58, %v112_v63  ;;  %v9766_v42 = vcombine.low %v109_v0, %v113_v1 }
  0x1d   :  { %13686 = vst [vmem:[#allocation4_spill] sm:$0xff] %v9744_v14  ;;  %13687 = vst [vmem:[#allocation5_spill] sm:$0xff] %v9747_v16  ;;  %v9768_v47 = vcombine.high %v116_v17, %v120_v26  ;;  %v9771_v48 = vcombine.high %v117_v31, %v121_v32  ;;  %v124_v49 = vld [vmem:[%s13382_s1 + $0x380] sm:$0xff]  ;;  %v125_v63 = vld [vmem:[%s13382_s1 + $0x388] sm:$0xff]  ;;  %v9786_v1 = vcombine.low %v116_v17, %v120_v26 }
  0x1e   :  { %793 = vmatpush1.bf16.msra.mxu0 %v9618_v59  ;;  %834 = vmatpush1.bf16.msra.mxu1 %v9622_v60  ;;  %13688 = vst [vmem:[#allocation6_spill] sm:$0xff] %v9762_v33  ;;  %13689 = vst [vmem:[#allocation7_spill] sm:$0xff] %v9766_v42  ;;  %v128_v58 = vld [vmem:[%s13382_s1 + $0x3a0] sm:$0xff]  ;;  %v129_v0 = vld [vmem:[%s13382_s1 + $0x3a8] sm:$0xff]  ;;  %v9790_v3 = vcombine.low %v117_v31, %v121_v32 }
  0x1f   :  { %794 = vmatprep.subr.bf16.mxu0 %v9624_v61  ;;  %835 = vmatprep.subr.bf16.mxu1 %v9627_v62  ;;  %13690 = vst [vmem:[#allocation8_spill] sm:$0xff] %v9768_v47  ;;  %13691 = vst [vmem:[#allocation9_spill] sm:$0xff] %v9771_v48  ;;  %v136_v17 = vld [vmem:[%s13382_s1 + $0x3e0] sm:$0xff]  ;;  %v133_v26 = vld [vmem:[%s13382_s1 + $0x3c8] sm:$0xff]  ;;  %v9810_v32 = vcombine.low %v124_v49, %v128_v58 }
  0x20   :  { %13692 = vst [vmem:[#allocation10_spill] sm:$0xff] %v9786_v1  ;;  %13693 = vst [vmem:[#allocation11_spill] sm:$0xff] %v9790_v3  ;;  %v137_v31 = vld [vmem:[%s13382_s1 + $0x3e8] sm:$0xff] }
  0x21   :  { %13696 = vst [vmem:[#allocation14_spill] sm:$0xff] %v9810_v32 }
  0x22   :  { %795 = vmatpush1.bf16.msra.mxu0 %v9642_v5  ;;  %836 = vmatpush1.bf16.msra.mxu1 %v9646_v7 }
  0x23   :  { %796 = vmatprep.subr.bf16.mxu0 %v9648_v8  ;;  %837 = vmatprep.subr.bf16.mxu1 %v9651_v12 }
  0x26   :  { %797 = vmatpush1.bf16.msra.mxu0 %v9666_v18  ;;  %838 = vmatpush1.bf16.msra.mxu1 %v9670_v23 }
  0x27   :  { %798 = vmatprep.subr.bf16.mxu0 %v9672_v24  ;;  %839 = vmatprep.subr.bf16.mxu1 %v9675_v25 }
  0x2a   :  { %799 = vmatpush1.bf16.msra.mxu0 %v9690_v34  ;;  %840 = vmatpush1.bf16.msra.mxu1 %v9694_v39 }
  0x2b   :  { %800 = vmatprep.subr.bf16.mxu0 %v9696_v40  ;;  %841 = vmatprep.subr.bf16.mxu1 %v9699_v41 }
  0x2e   :  { %801 = vmatpush1.bf16.msra.mxu0 %v9714_v50  ;;  %842 = vmatpush1.bf16.msra.mxu1 %v9718_v55 }
  0x2f   :  { %802 = vmatprep.subr.bf16.mxu0 %v9720_v56  ;;  %843 = vmatprep.subr.bf16.mxu1 %v9723_v57 }
  0x32   :  { %803 = vmatpush1.bf16.msra.mxu0 %v9738_v2  ;;  %844 = vmatpush1.bf16.msra.mxu1 %v9742_v13  ;;  %v132_v13 = vld [vmem:[%s13382_s1 + $0x3c0] sm:$0xff]  ;;  %v38_v2 = vld [vmem:[%s13382_s1 + $0xd0] sm:$0xff] }
  0x33   :  { %804 = vmatprep.subr.bf16.mxu0 %v9744_v14  ;;  %845 = vmatprep.subr.bf16.mxu1 %v9747_v16  ;;  %v9792_v16 = vcombine.high %v124_v49, %v128_v58  ;;  %v9795_v14 = vcombine.high %v125_v63, %v129_v0  ;;  %v18_v49 = vld [vmem:[%s13382_s1 + $0x30] sm:$0xff]  ;;  %v15_v58 = vld [vmem:[%s13382_s1 + $0x18] sm:$0xff] }
  0x35   :  { %13694 = vst [vmem:[#allocation12_spill] sm:$0xff] %v9792_v16  ;;  %13695 = vst [vmem:[#allocation13_spill] sm:$0xff] %v9795_v14 }
  0x36   :  { %805 = vmatpush1.bf16.msra.mxu0 %v9762_v33  ;;  %846 = vmatpush1.bf16.msra.mxu1 %v9766_v42  ;;  %v9819_v42 = vcombine.high %v133_v26, %v137_v31  ;;  %v14_v33 = vld [vmem:[%s13382_s1 + $0x10] sm:$0xff] }
  0x37   :  { %806 = vmatprep.subr.bf16.mxu0 %v9768_v47  ;;  %847 = vmatprep.subr.bf16.mxu1 %v9771_v48  ;;  %v9814_v48 = vcombine.low %v125_v63, %v129_v0  ;;  %v9816_v47 = vcombine.high %v132_v13, %v136_v17  ;;  %v19_v63 = vld [vmem:[%s13382_s1 + $0x38] sm:$0xff]  ;;  %v9834_v0 = vcombine.low %v132_v13, %v136_v17  ;;  %v26_v13 = vld [vmem:[%s13382_s1 + $0x70] sm:$0xff] }
  0x38   :  { %13699 = vst [vmem:[#allocation17_spill] sm:$0xff] %v9819_v42  ;;  %v23_v17 = vld [vmem:[%s13382_s1 + $0x58] sm:$0xff] }
  0x39   :  { %13697 = vst [vmem:[#allocation15_spill] sm:$0xff] %v9814_v48  ;;  %13698 = vst [vmem:[#allocation16_spill] sm:$0xff] %v9816_v47 }
  0x3a   :  { %807 = vmatpush1.bf16.msra.mxu0 %v9786_v1  ;;  %848 = vmatpush1.bf16.msra.mxu1 %v9790_v3  ;;  %13700 = vst [vmem:[#allocation18_spill] sm:$0xff] %v9834_v0  ;;  %v9843_v3 = vcombine.high %v15_v58, %v19_v63  ;;  %v22_v1 = vld [vmem:[%s13382_s1 + $0x50] sm:$0xff] }
  0x3b   :  { %808 = vmatprep.subr.bf16.mxu0 %v9792_v16  ;;  %849 = vmatprep.subr.bf16.mxu1 %v9795_v14  ;;  %v9838_v14 = vcombine.low %v133_v26, %v137_v31  ;;  %v9840_v16 = vcombine.high %v14_v33, %v18_v49  ;;  %v27_v26 = vld [vmem:[%s13382_s1 + $0x78] sm:$0xff]  ;;  %v9858_v31 = vcombine.low %v14_v33, %v18_v49  ;;  %v34_v33 = vld [vmem:[%s13382_s1 + $0xb0] sm:$0xff]  ;;  %v13708_v49 = vmov 0  }
  0x3c   :  { %13703 = vst [vmem:[#allocation21_spill] sm:$0xff] %v9843_v3 }
  0x3d   :  { %13701 = vst [vmem:[#allocation19_spill] sm:$0xff] %v9838_v14  ;;  %13702 = vst [vmem:[#allocation20_spill] sm:$0xff] %v9840_v16 }
  0x3e   :  { %809 = vmatpush1.bf16.msra.mxu0 %v9810_v32  ;;  %850 = vmatpush1.bf16.msra.mxu1 %v9814_v48  ;;  %13704 = vst [vmem:[#allocation22_spill] sm:$0xff] %v9858_v31  ;;  %v9867_v48 = vcombine.high %v23_v17, %v27_v26  ;;  %v30_v32 = vld [vmem:[%s13382_s1 + $0x90] sm:$0xff] }
  0x3f   :  { %810 = vmatprep.subr.bf16.mxu0 %v9816_v47  ;;  %851 = vmatprep.subr.bf16.mxu1 %v9819_v42  ;;  %v9862_v42 = vcombine.low %v15_v58, %v19_v63  ;;  %v9864_v47 = vcombine.high %v22_v1, %v26_v13  ;;  %v31_v58 = vld [vmem:[%s13382_s1 + $0x98] sm:$0xff] }
  0x40   :  { %13707 = vst [vmem:[#allocation25_spill] sm:$0xff] %v9867_v48  ;;  %v35_v63 = vld [vmem:[%s13382_s1 + $0xb8] sm:$0xff] }
  0x41   :  { %13705 = vst [vmem:[#allocation23_spill] sm:$0xff] %v9862_v42  ;;  %13706 = vst [vmem:[#allocation24_spill] sm:$0xff] %v9864_v47 }
  0x42   :  { %811 = vmatpush1.bf16.msra.mxu0 %v9834_v0  ;;  %852 = vmatpush1.bf16.msra.mxu1 %v9838_v14  ;;  %v9890_v14 = vcombine.high %v30_v32, %v34_v33  ;;  %v9893_v0 = vcombine.high %v31_v58, %v35_v63 }
  0x43   :  { %862 = vmatprep.subr.bf16.mxu0 %v9840_v16  ;;  %903 = vmatprep.subr.bf16.mxu1 %v9843_v3  ;;  %v9884_v3 = vcombine.low %v22_v1, %v26_v13  ;;  %v9888_v16 = vcombine.low %v23_v17, %v27_v26  ;;  %v42_v1 = vld [vmem:[%s13382_s1 + $0xf0] sm:$0xff]  ;;  %v39_v13 = vld [vmem:[%s13382_s1 + $0xd8] sm:$0xff]  ;;  %v9910_v26 = vcombine.low %v30_v32, %v34_v33 }
  0x44   :  { %13711 = vst [vmem:[#allocation28_spill] sm:$0xff] %v9890_v14  ;;  %13712 = vst [vmem:[#allocation29_spill] sm:$0xff] %v9893_v0  ;;  %v43_v17 = vld [vmem:[%s13382_s1 + $0xf8] sm:$0xff]  ;;  %v50_v32 = vld [vmem:[%s13382_s1 + $0x130] sm:$0xff] }
  0x45   :  { %813 = vmatmul.mubr.bf16.vlgmr.msra.gmra.mrb[0].mxu0 %v13708_v49  ;;  %854 = vmatmul.mubr.bf16.vlgmr.msra.gmra.mrb[0].mxu1 %v13708_v49  ;;  %13709 = vst [vmem:[#allocation26_spill] sm:$0xff] %v9884_v3  ;;  %13710 = vst [vmem:[#allocation27_spill] sm:$0xff] %v9888_v16  ;;  %v47_v33 = vld [vmem:[%s13382_s1 + $0x118] sm:$0xff] }
  0x46   :  { %863 = vmatpush1.bf16.msra.mxu0 %v9858_v31  ;;  %904 = vmatpush1.bf16.msra.mxu1 %v9862_v42  ;;  %13713 = vst [vmem:[#allocation30_spill] sm:$0xff] %v9910_v26  ;;  %v9919_v42 = vcombine.high %v39_v13, %v43_v17  ;;  %v46_v31 = vld [vmem:[%s13382_s1 + $0x110] sm:$0xff] }
  0x47   :  { %864 = vmatprep.subr.bf16.mxu0 %v9864_v47  ;;  %905 = vmatprep.subr.bf16.mxu1 %v9867_v48  ;;  %v9914_v48 = vcombine.low %v31_v58, %v35_v63  ;;  %v9916_v47 = vcombine.high %v38_v2, %v42_v1  ;;  %v51_v58 = vld [vmem:[%s13382_s1 + $0x138] sm:$0xff]  ;;  %v9934_v63 = vcombine.low %v38_v2, %v42_v1  ;;  %v58_v2 = vld [vmem:[%s13382_s1 + $0x170] sm:$0xff] }
  0x48   :  { %894 = vmatprep.mubr.bf16.mxu0 %v13708_v49  ;;  %935 = vmatprep.mubr.bf16.mxu1 %v13708_v49  ;;  %13716 = vst [vmem:[#allocation33_spill] sm:$0xff] %v9919_v42  ;;  %v55_v1 = vld [vmem:[%s13382_s1 + $0x158] sm:$0xff] }
  0x49   :  { %13714 = vst [vmem:[#allocation31_spill] sm:$0xff] %v9914_v48  ;;  %13715 = vst [vmem:[#allocation32_spill] sm:$0xff] %v9916_v47 }
  0x4a   :  { %865 = vmatpush1.bf16.msra.mxu0 %v9884_v3  ;;  %906 = vmatpush1.bf16.msra.mxu1 %v9888_v16  ;;  %13717 = vst [vmem:[#allocation34_spill] sm:$0xff] %v9934_v63  ;;  %v9943_v16 = vcombine.high %v47_v33, %v51_v58  ;;  %v54_v3 = vld [vmem:[%s13382_s1 + $0x150] sm:$0xff] }
  0x4b   :  { %866 = vmatprep.subr.bf16.mxu0 %v9890_v14  ;;  %907 = vmatprep.subr.bf16.mxu1 %v9893_v0  ;;  %v9938_v0 = vcombine.low %v39_v13, %v43_v17  ;;  %v9940_v14 = vcombine.high %v46_v31, %v50_v32  ;;  %v59_v13 = vld [vmem:[%s13382_s1 + $0x178] sm:$0xff]  ;;  %v9958_v17 = vcombine.low %v46_v31, %v50_v32  ;;  %v66_v31 = vld [vmem:[%s13382_s1 + $0x1b0] sm:$0xff] }
  0x4c   :  { %13720 = vst [vmem:[#allocation37_spill] sm:$0xff] %v9943_v16  ;;  %v63_v32 = vld [vmem:[%s13382_s1 + $0x198] sm:$0xff] }
  0x4d   :  { %13718 = vst [vmem:[#allocation35_spill] sm:$0xff] %v9938_v0  ;;  %13719 = vst [vmem:[#allocation36_spill] sm:$0xff] %v9940_v14 }
  0x4e   :  { %867 = vmatpush1.bf16.msra.mxu0 %v9910_v26  ;;  %908 = vmatpush1.bf16.msra.mxu1 %v9914_v48  ;;  %13721 = vst [vmem:[#allocation38_spill] sm:$0xff] %v9958_v17  ;;  %v9967_v48 = vcombine.high %v55_v1, %v59_v13  ;;  %v62_v26 = vld [vmem:[%s13382_s1 + $0x190] sm:$0xff] }
  0x4f   :  { %868 = vmatprep.subr.bf16.mxu0 %v9916_v47  ;;  %909 = vmatprep.subr.bf16.mxu1 %v9919_v42  ;;  %v9962_v42 = vcombine.low %v47_v33, %v51_v58  ;;  %v9964_v47 = vcombine.high %v54_v3, %v58_v2  ;;  %v67_v33 = vld [vmem:[%s13382_s1 + $0x1b8] sm:$0xff]  ;;  %v9982_v58 = vcombine.low %v54_v3, %v58_v2  ;;  %v74_v3 = vld [vmem:[%s13382_s1 + $0x1f0] sm:$0xff] }
  0x50   :  { %13724 = vst [vmem:[#allocation41_spill] sm:$0xff] %v9967_v48  ;;  %v71_v2 = vld [vmem:[%s13382_s1 + $0x1d8] sm:$0xff] }
  0x51   :  { %13722 = vst [vmem:[#allocation39_spill] sm:$0xff] %v9962_v42  ;;  %13723 = vst [vmem:[#allocation40_spill] sm:$0xff] %v9964_v47 }
  0x52   :  { %869 = vmatpush1.bf16.msra.mxu0 %v9934_v63  ;;  %910 = vmatpush1.bf16.msra.mxu1 %v9938_v0  ;;  %13725 = vst [vmem:[#allocation42_spill] sm:$0xff] %v9982_v58  ;;  %v9991_v0 = vcombine.high %v63_v32, %v67_v33  ;;  %v70_v63 = vld [vmem:[%s13382_s1 + $0x1d0] sm:$0xff] }
  0x53   :  { %870 = vmatprep.subr.bf16.mxu0 %v9940_v14  ;;  %911 = vmatprep.subr.bf16.mxu1 %v9943_v16  ;;  %v9986_v16 = vcombine.low %v55_v1, %v59_v13  ;;  %v9988_v14 = vcombine.high %v62_v26, %v66_v31  ;;  %v75_v1 = vld [vmem:[%s13382_s1 + $0x1f8] sm:$0xff]  ;;  %v10006_v13 = vcombine.low %v62_v26, %v66_v31  ;;  %v82_v26 = vld [vmem:[%s13382_s1 + $0x230] sm:$0xff] }
  0x54   :  { %13728 = vst [vmem:[#allocation45_spill] sm:$0xff] %v9991_v0  ;;  %v79_v31 = vld [vmem:[%s13382_s1 + $0x218] sm:$0xff] }
  0x55   :  { %13726 = vst [vmem:[#allocation43_spill] sm:$0xff] %v9986_v16  ;;  %13727 = vst [vmem:[#allocation44_spill] sm:$0xff] %v9988_v14 }
  0x56   :  { %871 = vmatpush1.bf16.msra.mxu0 %v9958_v17  ;;  %912 = vmatpush1.bf16.msra.mxu1 %v9962_v42  ;;  %13729 = vst [vmem:[#allocation46_spill] sm:$0xff] %v10006_v13  ;;  %v10015_v42 = vcombine.high %v71_v2, %v75_v1  ;;  %v78_v17 = vld [vmem:[%s13382_s1 + $0x210] sm:$0xff] }
  0x57   :  { %872 = vmatprep.subr.bf16.mxu0 %v9964_v47  ;;  %913 = vmatprep.subr.bf16.mxu1 %v9967_v48  ;;  %v10010_v48 = vcombine.low %v63_v32, %v67_v33  ;;  %v10012_v47 = vcombine.high %v70_v63, %v74_v3  ;;  %v83_v32 = vld [vmem:[%s13382_s1 + $0x238] sm:$0xff]  ;;  %v10030_v33 = vcombine.low %v70_v63, %v74_v3  ;;  %v90_v63 = vld [vmem:[%s13382_s1 + $0x270] sm:$0xff] }
  0x58   :  { %13732 = vst [vmem:[#allocation49_spill] sm:$0xff] %v10015_v42  ;;  %v87_v3 = vld [vmem:[%s13382_s1 + $0x258] sm:$0xff] }
  0x59   :  { %13730 = vst [vmem:[#allocation47_spill] sm:$0xff] %v10010_v48  ;;  %13731 = vst [vmem:[#allocation48_spill] sm:$0xff] %v10012_v47 }
  0x5a   :  { %873 = vmatpush1.bf16.msra.mxu0 %v9982_v58  ;;  %914 = vmatpush1.bf16.msra.mxu1 %v9986_v16  ;;  %13733 = vst [vmem:[#allocation50_spill] sm:$0xff] %v10030_v33  ;;  %v10039_v16 = vcombine.high %v79_v31, %v83_v32  ;;  %v86_v58 = vld [vmem:[%s13382_s1 + $0x250] sm:$0xff] }
  0x5b   :  { %874 = vmatprep.subr.bf16.mxu0 %v9988_v14  ;;  %915 = vmatprep.subr.bf16.mxu1 %v9991_v0  ;;  %v10034_v0 = vcombine.low %v71_v2, %v75_v1  ;;  %v10036_v14 = vcombine.high %v78_v17, %v82_v26  ;;  %v91_v2 = vld [vmem:[%s13382_s1 + $0x278] sm:$0xff]  ;;  %v10054_v1 = vcombine.low %v78_v17, %v82_v26  ;;  %v98_v17 = vld [vmem:[%s13382_s1 + $0x2b0] sm:$0xff] }
  0x5c   :  { %13736 = vst [vmem:[#allocation53_spill] sm:$0xff] %v10039_v16  ;;  %v95_v26 = vld [vmem:[%s13382_s1 + $0x298] sm:$0xff] }
  0x5d   :  { %13734 = vst [vmem:[#allocation51_spill] sm:$0xff] %v10034_v0  ;;  %13735 = vst [vmem:[#allocation52_spill] sm:$0xff] %v10036_v14 }
  0x5e   :  { %875 = vmatpush1.bf16.msra.mxu0 %v10006_v13  ;;  %916 = vmatpush1.bf16.msra.mxu1 %v10010_v48  ;;  %13737 = vst [vmem:[#allocation54_spill] sm:$0xff] %v10054_v1  ;;  %v10063_v48 = vcombine.high %v87_v3, %v91_v2  ;;  %v94_v13 = vld [vmem:[%s13382_s1 + $0x290] sm:$0xff] }
  0x5f   :  { %876 = vmatprep.subr.bf16.mxu0 %v10012_v47  ;;  %917 = vmatprep.subr.bf16.mxu1 %v10015_v42  ;;  %v10058_v42 = vcombine.low %v79_v31, %v83_v32  ;;  %v10060_v47 = vcombine.high %v86_v58, %v90_v63  ;;  %v99_v31 = vld [vmem:[%s13382_s1 + $0x2b8] sm:$0xff]  ;;  %v10078_v32 = vcombine.low %v86_v58, %v90_v63  ;;  %v106_v58 = vld [vmem:[%s13382_s1 + $0x2f0] sm:$0xff] }
  0x60   :  { %13740 = vst [vmem:[#allocation57_spill] sm:$0xff] %v10063_v48  ;;  %v103_v63 = vld [vmem:[%s13382_s1 + $0x2d8] sm:$0xff] }
  0x61   :  { %13738 = vst [vmem:[#allocation55_spill] sm:$0xff] %v10058_v42  ;;  %13739 = vst [vmem:[#allocation56_spill] sm:$0xff] %v10060_v47 }
  0x62   :  { %877 = vmatpush1.bf16.msra.mxu0 %v10030_v33  ;;  %918 = vmatpush1.bf16.msra.mxu1 %v10034_v0  ;;  %13741 = vst [vmem:[#allocation58_spill] sm:$0xff] %v10078_v32  ;;  %v10087_v0 = vcombine.high %v95_v26, %v99_v31  ;;  %v102_v33 = vld [vmem:[%s13382_s1 + $0x2d0] sm:$0xff] }
  0x63   :  { %878 = vmatprep.subr.bf16.mxu0 %v10036_v14  ;;  %919 = vmatprep.subr.bf16.mxu1 %v10039_v16  ;;  %v10082_v16 = vcombine.low %v87_v3, %v91_v2  ;;  %v10084_v14 = vcombine.high %v94_v13, %v98_v17  ;;  %v107_v3 = vld [vmem:[%s13382_s1 + $0x2f8] sm:$0xff]  ;;  %v10102_v2 = vcombine.low %v94_v13, %v98_v17  ;;  %v114_v13 = vld [vmem:[%s13382_s1 + $0x330] sm:$0xff] }
  0x64   :  { %13744 = vst [vmem:[#allocation61_spill] sm:$0xff] %v10087_v0  ;;  %v111_v17 = vld [vmem:[%s13382_s1 + $0x318] sm:$0xff] }
  0x65   :  { %13742 = vst [vmem:[#allocation59_spill] sm:$0xff] %v10082_v16  ;;  %13743 = vst [vmem:[#allocation60_spill] sm:$0xff] %v10084_v14 }
  0x66   :  { %879 = vmatpush1.bf16.msra.mxu0 %v10054_v1  ;;  %920 = vmatpush1.bf16.msra.mxu1 %v10058_v42  ;;  %13745 = vst [vmem:[#allocation62_spill] sm:$0xff] %v10102_v2  ;;  %v10111_v42 = vcombine.high %v103_v63, %v107_v3  ;;  %v110_v1 = vld [vmem:[%s13382_s1 + $0x310] sm:$0xff] }
  0x67   :  { %880 = vmatprep.subr.bf16.mxu0 %v10060_v47  ;;  %921 = vmatprep.subr.bf16.mxu1 %v10063_v48  ;;  %v10106_v48 = vcombine.low %v95_v26, %v99_v31  ;;  %v10108_v47 = vcombine.high %v102_v33, %v106_v58  ;;  %v115_v26 = vld [vmem:[%s13382_s1 + $0x338] sm:$0xff]  ;;  %v10126_v31 = vcombine.low %v102_v33, %v106_v58  ;;  %v122_v33 = vld [vmem:[%s13382_s1 + $0x370] sm:$0xff] }
  0x68   :  { %13748 = vst [vmem:[#allocation65_spill] sm:$0xff] %v10111_v42  ;;  %v119_v58 = vld [vmem:[%s13382_s1 + $0x358] sm:$0xff] }
  0x69   :  { %13746 = vst [vmem:[#allocation63_spill] sm:$0xff] %v10106_v48  ;;  %13747 = vst [vmem:[#allocation64_spill] sm:$0xff] %v10108_v47 }
  0x6a   :  { %881 = vmatpush1.bf16.msra.mxu0 %v10078_v32  ;;  %922 = vmatpush1.bf16.msra.mxu1 %v10082_v16  ;;  %13749 = vst [vmem:[#allocation66_spill] sm:$0xff] %v10126_v31  ;;  %v10135_v16 = vcombine.high %v111_v17, %v115_v26  ;;  %v118_v32 = vld [vmem:[%s13382_s1 + $0x350] sm:$0xff] }
  0x6b   :  { %882 = vmatprep.subr.bf16.mxu0 %v10084_v14  ;;  %923 = vmatprep.subr.bf16.mxu1 %v10087_v0  ;;  %v10130_v0 = vcombine.low %v103_v63, %v107_v3  ;;  %v10132_v14 = vcombine.high %v110_v1, %v114_v13  ;;  %v123_v63 = vld [vmem:[%s13382_s1 + $0x378] sm:$0xff]  ;;  %v10150_v3 = vcombine.low %v110_v1, %v114_v13  ;;  %v130_v1 = vld [vmem:[%s13382_s1 + $0x3b0] sm:$0xff] }
  0x6c   :  { %13752 = vst [vmem:[#allocation69_spill] sm:$0xff] %v10135_v16  ;;  %v127_v13 = vld [vmem:[%s13382_s1 + $0x398] sm:$0xff] }
  0x6d   :  { %13750 = vst [vmem:[#allocation67_spill] sm:$0xff] %v10130_v0  ;;  %13751 = vst [vmem:[#allocation68_spill] sm:$0xff] %v10132_v14 }
  0x6e   :  { %883 = vmatpush1.bf16.msra.mxu0 %v10102_v2  ;;  %924 = vmatpush1.bf16.msra.mxu1 %v10106_v48  ;;  %13753 = vst [vmem:[#allocation70_spill] sm:$0xff] %v10150_v3  ;;  %v10159_v48 = vcombine.high %v119_v58, %v123_v63  ;;  %v126_v2 = vld [vmem:[%s13382_s1 + $0x390] sm:$0xff] }
  0x6f   :  { %884 = vmatprep.subr.bf16.mxu0 %v10108_v47  ;;  %925 = vmatprep.subr.bf16.mxu1 %v10111_v42  ;;  %v10154_v42 = vcombine.low %v111_v17, %v115_v26  ;;  %v10156_v47 = vcombine.high %v118_v32, %v122_v33  ;;  %v131_v17 = vld [vmem:[%s13382_s1 + $0x3b8] sm:$0xff]  ;;  %v10174_v26 = vcombine.low %v118_v32, %v122_v33  ;;  %v138_v32 = vld [vmem:[%s13382_s1 + $0x3f0] sm:$0xff] }
  0x70   :  { %13756 = vst [vmem:[#allocation73_spill] sm:$0xff] %v10159_v48  ;;  %v135_v33 = vld [vmem:[%s13382_s1 + $0x3d8] sm:$0xff] }
  0x71   :  { %13754 = vst [vmem:[#allocation71_spill] sm:$0xff] %v10154_v42  ;;  %13755 = vst [vmem:[#allocation72_spill] sm:$0xff] %v10156_v47 }
  0x72   :  { %885 = vmatpush1.bf16.msra.mxu0 %v10126_v31  ;;  %926 = vmatpush1.bf16.msra.mxu1 %v10130_v0  ;;  %v10183_v0 = vcombine.high %v127_v13, %v131_v17  ;;  %v134_v31 = vld [vmem:[%s13382_s1 + $0x3d0] sm:$0xff] }
  0x73   :  { %886 = vmatprep.subr.bf16.mxu0 %v10132_v14  ;;  %927 = vmatprep.subr.bf16.mxu1 %v10135_v16  ;;  %v10178_v16 = vcombine.low %v119_v58, %v123_v63  ;;  %v10180_v14 = vcombine.high %v126_v2, %v130_v1  ;;  %v139_v58 = vld [vmem:[%s13382_s1 + $0x3f8] sm:$0xff]  ;;  %v10198_v63 = vcombine.low %v126_v2, %v130_v1 }
  0x74   :  { %v10214_v2 = vcombine.low %v135_v33, %v139_v58 }
  0x76   :  { %887 = vmatpush1.bf16.msra.mxu0 %v10150_v3  ;;  %928 = vmatpush1.bf16.msra.mxu1 %v10154_v42  ;;  %v10207_v42 = vcombine.high %v135_v33, %v139_v58  ;;  %v10210_v3 = vcombine.low %v134_v31, %v138_v32  ;;  %v951_v33 = vld [vmem:[%s13383_s0 + $0x38] sm:$0xff] }
  0x77   :  { %888 = vmatprep.subr.bf16.mxu0 %v10156_v47  ;;  %929 = vmatprep.subr.bf16.mxu1 %v10159_v48  ;;  %v10202_v48 = vcombine.low %v127_v13, %v131_v17  ;;  %v10204_v47 = vcombine.high %v134_v31, %v138_v32  ;;  %v948_v31 = vld [vmem:[%s13383_s0 + $0x20] sm:$0xff]  ;;  %v950_v13 = vld [vmem:[%s13383_s0 + $0x30] sm:$0xff]  ;;  %v949_v17 = vld [vmem:[%s13383_s0 + $0x28] sm:$0xff] }
  0x7a   :  { %889 = vmatpush1.bf16.msra.mxu0 %v10174_v26  ;;  %930 = vmatpush1.bf16.msra.mxu1 %v10178_v16 }
  0x7b   :  { %890 = vmatprep.subr.bf16.mxu0 %v10180_v14  ;;  %931 = vmatprep.subr.bf16.mxu1 %v10183_v0 }
  0x7e   :  { %891 = vmatpush1.bf16.msra.mxu0 %v10198_v63  ;;  %932 = vmatpush1.bf16.msra.mxu1 %v10202_v48 }
  0x7f   :  { %892 = vmatprep.subr.bf16.mxu0 %v10204_v47  ;;  %933 = vmatprep.subr.bf16.mxu1 %v10207_v42 }
  0x82   :  { %893 = vmatpush1.bf16.msra.mxu0 %v10210_v3  ;;  %934 = vmatpush1.bf16.msra.mxu1 %v10214_v2 }
  0x83   :  { %1781 = vmatprep.subr.bf16.mxu0 %v9456_v4  ;;  %1822 = vmatprep.subr.bf16.mxu1 %v9469_v9  ;;  %v13757_v4 = vld [vmem:[#allocation2_spill] sm:$0xff]  ;;  %v13759_v9 = vld [vmem:[#allocation4_spill] sm:$0xff] }
  0x85   :  { %895 = vmatmul.mubr.bf16.vlgmr.msra.gmra.mrb[4].mxu0 %v13708_v49  ;;  %936 = vmatmul.mubr.bf16.vlgmr.msra.gmra.mrb[4].mxu1 %v13708_v49 }
  0x86   :  { %1782 = vmatpush1.bf16.msra.mxu0 %v9461_v6  ;;  %1823 = vmatpush1.bf16.msra.mxu1 %v9471_v10  ;;  %v13758_v6 = vld [vmem:[#allocation3_spill] sm:$0xff]  ;;  %v13760_v10 = vld [vmem:[#allocation5_spill] sm:$0xff] }
  0x87   :  { %1783 = vmatprep.subr.bf16.mxu0 %v9473_v11  ;;  %1824 = vmatprep.subr.bf16.mxu1 %v9485_v15  ;;  %v13761_v11 = vld [vmem:[#allocation6_spill] sm:$0xff]  ;;  %v13762_v15 = vld [vmem:[#allocation7_spill] sm:$0xff] }
  0x8a   :  { %1784 = vmatpush1.bf16.msra.mxu0 %v9498_v19  ;;  %1825 = vmatpush1.bf16.msra.mxu1 %v9502_v20  ;;  %v13763_v19 = vld [vmem:[#allocation8_spill] sm:$0xff]  ;;  %v13764_v20 = vld [vmem:[#allocation9_spill] sm:$0xff] }
  0x8b   :  { %1785 = vmatprep.subr.bf16.mxu0 %v9504_v21  ;;  %1826 = vmatprep.subr.bf16.mxu1 %v9507_v22  ;;  %v13765_v21 = vld [vmem:[#allocation10_spill] sm:$0xff]  ;;  %v13766_v22 = vld [vmem:[#allocation11_spill] sm:$0xff] }
  0x8e   :  { %1786 = vmatpush1.bf16.msra.mxu0 %v9522_v27  ;;  %1827 = vmatpush1.bf16.msra.mxu1 %v9526_v28  ;;  %v13767_v27 = vld [vmem:[#allocation12_spill] sm:$0xff]  ;;  %v13768_v28 = vld [vmem:[#allocation13_spill] sm:$0xff] }
  0x8f   :  { %1787 = vmatprep.subr.bf16.mxu0 %v9528_v29  ;;  %1828 = vmatprep.subr.bf16.mxu1 %v9531_v30  ;;  %v13769_v29 = vld [vmem:[#allocation14_spill] sm:$0xff]  ;;  %v13770_v30 = vld [vmem:[#allocation15_spill] sm:$0xff] }
  0x92   :  { %1788 = vmatpush1.bf16.msra.mxu0 %v9546_v35  ;;  %1829 = vmatpush1.bf16.msra.mxu1 %v9550_v36  ;;  %v13771_v35 = vld [vmem:[#allocation16_spill] sm:$0xff]  ;;  %v13772_v36 = vld [vmem:[#allocation17_spill] sm:$0xff] }
  0x93   :  { %1789 = vmatprep.subr.bf16.mxu0 %v9552_v37  ;;  %1830 = vmatprep.subr.bf16.mxu1 %v9555_v38  ;;  %v13773_v37 = vld [vmem:[#allocation18_spill] sm:$0xff]  ;;  %v13774_v38 = vld [vmem:[#allocation19_spill] sm:$0xff] }
  0x96   :  { %1790 = vmatpush1.bf16.msra.mxu0 %v9570_v43  ;;  %1831 = vmatpush1.bf16.msra.mxu1 %v9574_v44  ;;  %v13775_v43 = vld [vmem:[#allocation20_spill] sm:$0xff]  ;;  %v13776_v44 = vld [vmem:[#allocation21_spill] sm:$0xff] }
  0x97   :  { %1791 = vmatprep.subr.bf16.mxu0 %v9576_v45  ;;  %1832 = vmatprep.subr.bf16.mxu1 %v9579_v46 }
  0x9a   :  { %1792 = vmatpush1.bf16.msra.mxu0 %v9594_v51  ;;  %1833 = vmatpush1.bf16.msra.mxu1 %v9598_v52 }
  0x9b   :  { %1793 = vmatprep.subr.bf16.mxu0 %v9600_v53  ;;  %1834 = vmatprep.subr.bf16.mxu1 %v9603_v54 }
  0x9e   :  { %1794 = vmatpush1.bf16.msra.mxu0 %v9618_v59  ;;  %1835 = vmatpush1.bf16.msra.mxu1 %v9622_v60 }
  0x9f   :  { %1795 = vmatprep.subr.bf16.mxu0 %v9624_v61  ;;  %1836 = vmatprep.subr.bf16.mxu1 %v9627_v62  ;;  %v944_v61 = vld [vmem:[%s13383_s0] sm:$0xff]  ;;  %v946_v62 = vld [vmem:[%s13383_s0 + $0x10] sm:$0xff] }
  0xa2   :  { %1796 = vmatpush1.bf16.msra.mxu0 %v9642_v5  ;;  %1837 = vmatpush1.bf16.msra.mxu1 %v9646_v7  ;;  %v945_v5 = vld [vmem:[%s13383_s0 + $0x8] sm:$0xff] }
  0xa3   :  { %1797 = vmatprep.subr.bf16.mxu0 %v9648_v8  ;;  %1838 = vmatprep.subr.bf16.mxu1 %v9651_v12  ;;  %v947_v8 = vld [vmem:[%s13383_s0 + $0x18] sm:$0xff] }
  0xa6   :  { %1798 = vmatpush1.bf16.msra.mxu0 %v9666_v18  ;;  %1839 = vmatpush1.bf16.msra.mxu1 %v9670_v23 }
  0xa7   :  { %1799 = vmatprep.subr.bf16.mxu0 %v9672_v24  ;;  %1840 = vmatprep.subr.bf16.mxu1 %v9675_v25 }
  0xaa   :  { %1800 = vmatpush1.bf16.msra.mxu0 %v9690_v34  ;;  %1841 = vmatpush1.bf16.msra.mxu1 %v9694_v39 }
  0xab   :  { %1801 = vmatprep.subr.bf16.mxu0 %v9696_v40  ;;  %1842 = vmatprep.subr.bf16.mxu1 %v9699_v41 }
  0xae   :  { %1802 = vmatpush1.bf16.msra.mxu0 %v9714_v50  ;;  %1843 = vmatpush1.bf16.msra.mxu1 %v9718_v55 }
  0xaf   :  { %1803 = vmatprep.subr.bf16.mxu0 %v9720_v56  ;;  %1844 = vmatprep.subr.bf16.mxu1 %v9723_v57 }
  0xb2   :  { %1804 = vmatpush1.bf16.msra.mxu0 %v13757_v4  ;;  %1845 = vmatpush1.bf16.msra.mxu1 %v13758_v6 }
  0xb3   :  { %1805 = vmatprep.subr.bf16.mxu0 %v13759_v9  ;;  %1846 = vmatprep.subr.bf16.mxu1 %v13760_v10 }
  0xb6   :  { %1806 = vmatpush1.bf16.msra.mxu0 %v13761_v11  ;;  %1847 = vmatpush1.bf16.msra.mxu1 %v13762_v15 }
  0xb7   :  { %1807 = vmatprep.subr.bf16.mxu0 %v13763_v19  ;;  %1848 = vmatprep.subr.bf16.mxu1 %v13764_v20 }
  0xba   :  { %1808 = vmatpush1.bf16.msra.mxu0 %v13765_v21  ;;  %1849 = vmatpush1.bf16.msra.mxu1 %v13766_v22 }
  0xbb   :  { %1809 = vmatprep.subr.bf16.mxu0 %v13767_v27  ;;  %1850 = vmatprep.subr.bf16.mxu1 %v13768_v28 }
  0xbe   :  { %1810 = vmatpush1.bf16.msra.mxu0 %v13769_v29  ;;  %1851 = vmatpush1.bf16.msra.mxu1 %v13770_v30 }
  0xbf   :  { %1811 = vmatprep.subr.bf16.mxu0 %v13771_v35  ;;  %1852 = vmatprep.subr.bf16.mxu1 %v13772_v36 }
  0xc2   :  { %1812 = vmatpush1.bf16.msra.mxu0 %v13773_v37  ;;  %1853 = vmatpush1.bf16.msra.mxu1 %v13774_v38 }
  0xc3   :  { %1863 = vmatprep.subr.bf16.mxu0 %v13775_v43  ;;  %1904 = vmatprep.subr.bf16.mxu1 %v13776_v44 }
 0x118   :  { %v814_v45 = vpop.f32.mrb[0].mxu0  ;;  %v855_v46 = vpop.f32.mrb[0].mxu1 }
 0x119   :  { %v816_v51 = vpop.f32.mrb[1].mxu0  ;;  %v857_v52 = vpop.f32.mrb[1].mxu1  ;;  %v952_v7 = vadd.f32 %v944_v61, %v814_v45  ;;  %v954_v12 = vadd.f32 %v946_v62, %v855_v46 }
 0x11a   :  { %v818_v53 = vpop.f32.mrb[2].mxu0  ;;  %v859_v54 = vpop.f32.mrb[2].mxu1  ;;  %v953_v18 = vadd.f32 %v945_v5, %v816_v51  ;;  %v955_v23 = vadd.f32 %v947_v8, %v857_v52 }
 0x11b   :  { %v819_v59 = vpop.f32.mrb[3].mxu0  ;;  %v860_v60 = vpop.f32.mrb[3].mxu1  ;;  %v8158_v24 = vmul.f32 -1.442695, %v952_v7  ;;  %v8160_v25 = vmul.f32 -1.442695, %v954_v12 }
 0x11c   :  { %v8159_v34 = vmul.f32 -1.442695, %v953_v18  ;;  %v8161_v39 = vmul.f32 -1.442695, %v955_v23 }
 0x11d   :  { %9173 = vpow2.f32 %v8158_v24  ;;  %v13777_v24 = vld [vmem:[#allocation22_spill] sm:$0xff] }
 0x11e   :  { %9175 = vpow2.f32 %v8160_v25  ;;  %v13778_v25 = vld [vmem:[#allocation23_spill] sm:$0xff] }
 0x11f   :  { %9177 = vpow2.f32 %v8159_v34  ;;  %v13779_v34 = vld [vmem:[#allocation24_spill] sm:$0xff] }
 0x120   :  { %9179 = vpow2.f32 %v8161_v39  ;;  %v13780_v39 = vld [vmem:[#allocation25_spill] sm:$0xff] }
 0x127   :  { %v9174_v40 = vpop.eup %9173 }
 0x128   :  { %v9176_v41 = vpop.eup %9175  ;;  %v978_v56 = vadd.f32 1.0, %v9174_v40  ;;  %v13781_v40 = vld [vmem:[#allocation26_spill] sm:$0xff] }
 0x129   :  { %v9178_v50 = vpop.eup %9177  ;;  %v980_v57 = vadd.f32 1.0, %v9176_v41  ;;  %v13782_v41 = vld [vmem:[#allocation27_spill] sm:$0xff] }
 0x12a   :  { %v9180_v55 = vpop.eup %9179  ;;  %v979_v49 = vadd.f32 1.0, %v9178_v50  ;;  %9181 = vrcp.f32 %v978_v56  ;;  %v13783_v50 = vld [vmem:[#allocation28_spill] sm:$0xff]  ;;  %v13785_v56 = vld [vmem:[#allocation30_spill] sm:$0xff] }
 0x12b   :  { %v981_v1 = vadd.f32 1.0, %v9180_v55  ;;  %9183 = vrcp.f32 %v980_v57  ;;  %v13784_v55 = vld [vmem:[#allocation29_spill] sm:$0xff]  ;;  %v13786_v57 = vld [vmem:[#allocation31_spill] sm:$0xff] }
 0x12c   :  { %9185 = vrcp.f32 %v979_v49  ;;  %v13787_v49 = vld [vmem:[#allocation32_spill] sm:$0xff] }
 0x12d   :  { %9187 = vrcp.f32 %v981_v1  ;;  %v13789_v1 = vld [vmem:[#allocation34_spill] sm:$0xff] }
 0x134   :  { %v9182_v29 = vpop.eup %9181 }
 0x135   :  { %v9184_v30 = vpop.eup %9183 }
 0x136   :  { %v9186_v35 = vpop.eup %9185  ;;  %v998_v43 = vmul.f32 0.0, %v9184_v30  ;;  %v13808_v30 = vld [vmem:[#allocation53_spill] sm:$0xff] }
 0x137   :  { %v9188_v36 = vpop.eup %9187 }
 0x138   :  { %v999_v54 = vmul.f32 0.0, %v9188_v36  ;;  %v13810_v36 = vld [vmem:[#allocation55_spill] sm:$0xff] }
 0x158   :  { %v896_v32 = vpop.f32.mrb[4].mxu0  ;;  %v937_v4 = vpop.f32.mrb[4].mxu1 }
 0x159   :  { %v956_v58 = vadd.f32 %v948_v31, %v896_v32  ;;  %v898_v6 = vpop.f32.mrb[5].mxu0  ;;  %v958_v9 = vadd.f32 %v950_v13, %v937_v4  ;;  %v939_v11 = vpop.f32.mrb[5].mxu1  ;;  %v13788_v31 = vld [vmem:[#allocation33_spill] sm:$0xff]  ;;  %v13790_v13 = vld [vmem:[#allocation35_spill] sm:$0xff]  ;;  %v13795_v4 = vld [vmem:[#allocation40_spill] sm:$0xff] }
 0x15a   :  { %v957_v10 = vadd.f32 %v949_v17, %v898_v6  ;;  %v900_v15 = vpop.f32.mrb[6].mxu0  ;;  %v959_v20 = vadd.f32 %v951_v33, %v939_v11  ;;  %v941_v21 = vpop.f32.mrb[6].mxu1  ;;  %v13791_v17 = vld [vmem:[#allocation36_spill] sm:$0xff]  ;;  %v13792_v32 = vld [vmem:[#allocation37_spill] sm:$0xff]  ;;  %v13793_v33 = vld [vmem:[#allocation38_spill] sm:$0xff] }
 0x15b   :  { %v8162_v19 = vmul.f32 -1.442695, %v956_v58  ;;  %v901_v22 = vpop.f32.mrb[7].mxu0  ;;  %9189 = vtanh.f32 %v958_v9  ;;  %v942_v28 = vpop.f32.mrb[7].mxu1  ;;  %v13794_v58 = vld [vmem:[#allocation39_spill] sm:$0xff]  ;;  %v13796_v6 = vld [vmem:[#allocation41_spill] sm:$0xff] }
 0x15c   :  { %v8163_v27 = vmul.f32 -1.442695, %v957_v10  ;;  %v13797_v9 = vld [vmem:[#allocation42_spill] sm:$0xff]  ;;  %v13798_v10 = vld [vmem:[#allocation43_spill] sm:$0xff]  ;;  %v13799_v11 = vld [vmem:[#allocation44_spill] sm:$0xff] }
 0x15d   :  { %9191 = vpow2.f32 %v8162_v19  ;;  %v13800_v15 = vld [vmem:[#allocation45_spill] sm:$0xff]  ;;  %v13801_v19 = vld [vmem:[#allocation46_spill] sm:$0xff]  ;;  %v13803_v21 = vld [vmem:[#allocation48_spill] sm:$0xff] }
 0x15e   :  { %9193 = vpow2.f32 %v8163_v27  ;;  %v13804_v22 = vld [vmem:[#allocation49_spill] sm:$0xff]  ;;  %v13805_v27 = vld [vmem:[#allocation50_spill] sm:$0xff]  ;;  %v13806_v28 = vld [vmem:[#allocation51_spill] sm:$0xff] }
 0x15f   :  { %9195 = vtanh.f32 %v959_v20  ;;  %v13802_v20 = vld [vmem:[#allocation47_spill] sm:$0xff] }
 0x165   :  { %v9190_v37 = vpop.eup %9189 }
 0x166   :  { %v1000_v44 = vmul.f32 %v9190_v37, %v9182_v29  ;;  %v13807_v29 = vld [vmem:[#allocation52_spill] sm:$0xff] }
 0x167   :  { %v9192_v38 = vpop.eup %9191  ;;  %v13811_v37 = vld [vmem:[#allocation56_spill] sm:$0xff] }
 0x168   :  { %v9194_v45 = vpop.eup %9193  ;;  %v982_v46 = vadd.f32 1.0, %v9192_v38  ;;  %v10311_v52 = vadd.f32 %v1000_v44, %v998_v43  ;;  %v13812_v38 = vld [vmem:[#allocation57_spill] sm:$0xff]  ;;  %v13813_v43 = vld [vmem:[#allocation58_spill] sm:$0xff]  ;;  %v13814_v44 = vld [vmem:[#allocation59_spill] sm:$0xff] }
 0x169   :  { %v9196_v51 = vpop.eup %9195  ;;  %v983_v53 = vadd.f32 1.0, %v9194_v45  ;;  %v13815_v45 = vld [vmem:[#allocation60_spill] sm:$0xff] }
 0x16a   :  { %9197 = vrcp.f32 %v982_v46  ;;  %v1001_v59 = vmul.f32 %v9196_v51, %v9186_v35  ;;  %v13809_v35 = vld [vmem:[#allocation54_spill] sm:$0xff]  ;;  %v13816_v46 = vld [vmem:[#allocation61_spill] sm:$0xff] }
 0x16b   :  { %9199 = vtanh.f32 %v10311_v52  ;;  %v13817_v51 = vld [vmem:[#allocation62_spill] sm:$0xff] }
 0x16c   :  { %9201 = vrcp.f32 %v983_v53  ;;  %v10314_v60 = vadd.f32 %v1001_v59, %v999_v54  ;;  %v13818_v53 = vld [vmem:[#allocation63_spill] sm:$0xff]  ;;  %v13819_v54 = vld [vmem:[#allocation64_spill] sm:$0xff]  ;;  %v13820_v59 = vld [vmem:[#allocation65_spill] sm:$0xff] }
 0x16e   :  { %9203 = vtanh.f32 %v10314_v60 }
 0x174   :  { %v9198_v61 = vpop.eup %9197 }
 0x175   :  { %v9200_v62 = vpop.eup %9199 }
 0x176   :  { %v9202_v5 = vpop.eup %9201  ;;  %v1006_v7 = vmul.f32 %v9200_v62, %v9198_v61  ;;  %v13821_v61 = vld [vmem:[#allocation66_spill] sm:$0xff]  ;;  %v13822_v62 = vld [vmem:[#allocation67_spill] sm:$0xff] }
 0x178   :  { %v9204_v8 = vpop.eup %9203  ;;  %v10317_v12 = vpack.c.bf16 %v1006_v7, %v1006_v7  ;;  %v13824_v7 = vld [vmem:[#allocation69_spill] sm:$0xff] }
 0x179   :  { %v1007_v18 = vmul.f32 %v9204_v8, %v9202_v5  ;;  %v13823_v5 = vld [vmem:[#allocation68_spill] sm:$0xff]  ;;  %v13825_v8 = vld [vmem:[#allocation70_spill] sm:$0xff] }
 0x17a   :  { %1009 = vst [vmem:[%s13384_s2] sm:$0xf] %v10317_v12 }
 0x17b   :  { %v1010_v23 = vpack.c.bf16 %v1007_v18, %v1007_v18  ;;  %v13826_v18 = vld [vmem:[#allocation71_spill] sm:$0xff] }
 0x17d   :  { %8164 = vst [vmem:[%s13384_s2 + $0x3c] sm:$0xf] %v1010_v23  ;;  %1813 = vmatprep.mubr.bf16.mxu0 %v1010_v23  ;;  %1854 = vmatprep.mubr.bf16.mxu1 %v1010_v23 }
 0x17e   :  { %1814 = vmatmul.mubr.bf16.vlgmr.msra.gmra.mrb[8].mxu0 %v10317_v12  ;;  %1855 = vmatmul.mubr.bf16.vlgmr.msra.gmra.mrb[8].mxu1 %v10317_v12 }
 0x17f   :  { %1864 = vmatpush1.bf16.msra.mxu0 %v13777_v24  ;;  %1905 = vmatpush1.bf16.msra.mxu1 %v13778_v25  ;;  %v13828_v24 = vld [vmem:[#allocation73_spill] sm:$0xff]  ;;  %v2025_v25 = vld [vmem:[%s13382_s1 + $0x48] sm:$0xff] }
 0x180   :  { %1895 = vmatprep.mubr.bf16.mxu0 %v1010_v23  ;;  %1936 = vmatprep.mubr.bf16.mxu1 %v1010_v23  ;;  %v13827_v23 = vld [vmem:[#allocation72_spill] sm:$0xff] }
 0x181   :  { %1865 = vmatprep.subr.bf16.mxu0 %v13779_v34  ;;  %1906 = vmatprep.subr.bf16.mxu1 %v13780_v39  ;;  %v2029_v34 = vld [vmem:[%s13382_s1 + $0x68] sm:$0xff]  ;;  %v2032_v39 = vld [vmem:[%s13382_s1 + $0x80] sm:$0xff] }
 0x183   :  { %1866 = vmatpush1.bf16.msra.mxu0 %v13781_v40  ;;  %1907 = vmatpush1.bf16.msra.mxu1 %v13782_v41  ;;  %v10430_v40 = vcombine.high %v2025_v25, %v2029_v34  ;;  %v2036_v41 = vld [vmem:[%s13382_s1 + $0xa0] sm:$0xff] }
 0x184   :  { %1867 = vmatprep.subr.bf16.mxu0 %v13783_v50  ;;  %1908 = vmatprep.subr.bf16.mxu1 %v13784_v55  ;;  %v2033_v50 = vld [vmem:[%s13382_s1 + $0x88] sm:$0xff] }
 0x185   :  { %v2037_v55 = vld [vmem:[%s13382_s1 + $0xa8] sm:$0xff] }
 0x187   :  { %1868 = vmatpush1.bf16.msra.mxu0 %v13785_v56  ;;  %1909 = vmatpush1.bf16.msra.mxu1 %v13786_v57  ;;  %v10447_v57 = vcombine.low %v2025_v25, %v2029_v34  ;;  %v2085_v34 = vld [vmem:[%s13382_s1 + $0x228] sm:$0xff] }
 0x188   :  { %1869 = vmatprep.subr.bf16.mxu0 %v13787_v49  ;;  %1910 = vmatprep.subr.bf16.mxu1 %v13788_v31  ;;  %v10449_v49 = vcombine.high %v2032_v39, %v2036_v41  ;;  %v10452_v31 = vcombine.high %v2033_v50, %v2037_v55 }
 0x18b   :  { %1870 = vmatpush1.bf16.msra.mxu0 %v13789_v1  ;;  %1911 = vmatpush1.bf16.msra.mxu1 %v13790_v13  ;;  %v2040_v1 = vld [vmem:[%s13382_s1 + $0xc0] sm:$0xff] }
 0x18c   :  { %1871 = vmatprep.subr.bf16.mxu0 %v13791_v17  ;;  %1912 = vmatprep.subr.bf16.mxu1 %v13792_v32  ;;  %v2044_v13 = vld [vmem:[%s13382_s1 + $0xe0] sm:$0xff]  ;;  %v2041_v17 = vld [vmem:[%s13382_s1 + $0xc8] sm:$0xff] }
 0x18d   :  { %v2045_v32 = vld [vmem:[%s13382_s1 + $0xe8] sm:$0xff] }
 0x18f   :  { %1872 = vmatpush1.bf16.msra.mxu0 %v13793_v33  ;;  %1913 = vmatpush1.bf16.msra.mxu1 %v13794_v58  ;;  %v10467_v33 = vcombine.low %v2032_v39, %v2036_v41  ;;  %v10471_v58 = vcombine.low %v2033_v50, %v2037_v55  ;;  %v2088_v50 = vld [vmem:[%s13382_s1 + $0x240] sm:$0xff] }
 0x190   :  { %1873 = vmatprep.subr.bf16.mxu0 %v13795_v4  ;;  %1914 = vmatprep.subr.bf16.mxu1 %v13796_v6  ;;  %v10473_v4 = vcombine.high %v2040_v1, %v2044_v13  ;;  %v10476_v6 = vcombine.high %v2041_v17, %v2045_v32  ;;  %v2092_v55 = vld [vmem:[%s13382_s1 + $0x260] sm:$0xff] }
 0x193   :  { %1874 = vmatpush1.bf16.msra.mxu0 %v13797_v9  ;;  %1915 = vmatpush1.bf16.msra.mxu1 %v13798_v10  ;;  %v2048_v9 = vld [vmem:[%s13382_s1 + $0x100] sm:$0xff] }
 0x194   :  { %1875 = vmatprep.subr.bf16.mxu0 %v13799_v11  ;;  %1916 = vmatprep.subr.bf16.mxu1 %v13800_v15  ;;  %v2052_v10 = vld [vmem:[%s13382_s1 + $0x120] sm:$0xff]  ;;  %v2049_v11 = vld [vmem:[%s13382_s1 + $0x108] sm:$0xff] }
 0x195   :  { %v2053_v15 = vld [vmem:[%s13382_s1 + $0x128] sm:$0xff] }
 0x197   :  { %1876 = vmatpush1.bf16.msra.mxu0 %v13801_v19  ;;  %1917 = vmatpush1.bf16.msra.mxu1 %v13802_v20  ;;  %v10491_v19 = vcombine.low %v2040_v1, %v2044_v13  ;;  %v10495_v20 = vcombine.low %v2041_v17, %v2045_v32  ;;  %v2089_v1 = vld [vmem:[%s13382_s1 + $0x248] sm:$0xff]  ;;  %v10616_v13 = vcombine.high %v2088_v50, %v2092_v55 }
 0x198   :  { %1877 = vmatprep.subr.bf16.mxu0 %v13803_v21  ;;  %1918 = vmatprep.subr.bf16.mxu1 %v13804_v22  ;;  %v10497_v21 = vcombine.high %v2048_v9, %v2052_v10  ;;  %v10500_v22 = vcombine.high %v2049_v11, %v2053_v15  ;;  %v2093_v17 = vld [vmem:[%s13382_s1 + $0x268] sm:$0xff]  ;;  %v10622_v32 = vcombine.low %v2088_v50, %v2092_v55 }
 0x199   :  { %v2113_v50 = vld [vmem:[%s13382_s1 + $0x308] sm:$0xff] }
 0x19a   :  { %13829 = vst [vmem:[#allocation2_spill] sm:$0xff] %v10622_v32 }
 0x19b   :  { %1878 = vmatpush1.bf16.msra.mxu0 %v13805_v27  ;;  %1919 = vmatpush1.bf16.msra.mxu1 %v13806_v28  ;;  %v2056_v27 = vld [vmem:[%s13382_s1 + $0x140] sm:$0xff] }
 0x19c   :  { %1879 = vmatprep.subr.bf16.mxu0 %v13807_v29  ;;  %1920 = vmatprep.subr.bf16.mxu1 %v13808_v30  ;;  %v2060_v28 = vld [vmem:[%s13382_s1 + $0x160] sm:$0xff]  ;;  %v2057_v29 = vld [vmem:[%s13382_s1 + $0x148] sm:$0xff] }
 0x19d   :  { %v2061_v30 = vld [vmem:[%s13382_s1 + $0x168] sm:$0xff] }
 0x19f   :  { %1880 = vmatpush1.bf16.msra.mxu0 %v13809_v35  ;;  %1921 = vmatpush1.bf16.msra.mxu1 %v13810_v36  ;;  %v10515_v35 = vcombine.low %v2048_v9, %v2052_v10  ;;  %v10519_v36 = vcombine.low %v2049_v11, %v2053_v15  ;;  %v10624_v9 = vcombine.low %v2089_v1, %v2093_v17  ;;  %v2096_v11 = vld [vmem:[%s13382_s1 + $0x280] sm:$0xff] }
 0x1a0   :  { %1881 = vmatprep.subr.bf16.mxu0 %v13811_v37  ;;  %1922 = vmatprep.subr.bf16.mxu1 %v13812_v38  ;;  %v10521_v37 = vcombine.high %v2056_v27, %v2060_v28  ;;  %v10524_v38 = vcombine.high %v2057_v29, %v2061_v30  ;;  %v10626_v10 = vcombine.high %v2089_v1, %v2093_v17  ;;  %v2100_v15 = vld [vmem:[%s13382_s1 + $0x2a0] sm:$0xff]  ;;  %v2117_v1 = vld [vmem:[%s13382_s1 + $0x328] sm:$0xff] }
 0x1a1   :  { %13830 = vst [vmem:[#allocation3_spill] sm:$0xff] %v10624_v9 }
 0x1a3   :  { %1882 = vmatpush1.bf16.msra.mxu0 %v13813_v43  ;;  %1923 = vmatpush1.bf16.msra.mxu1 %v13814_v44  ;;  %v2064_v43 = vld [vmem:[%s13382_s1 + $0x180] sm:$0xff] }
 0x1a4   :  { %1883 = vmatprep.subr.bf16.mxu0 %v13815_v45  ;;  %1924 = vmatprep.subr.bf16.mxu1 %v13816_v46  ;;  %v2068_v44 = vld [vmem:[%s13382_s1 + $0x1a0] sm:$0xff]  ;;  %v2065_v45 = vld [vmem:[%s13382_s1 + $0x188] sm:$0xff] }
 0x1a5   :  { %v2069_v46 = vld [vmem:[%s13382_s1 + $0x1a8] sm:$0xff] }
 0x1a7   :  { %1884 = vmatpush1.bf16.msra.mxu0 %v13817_v51  ;;  %1925 = vmatpush1.bf16.msra.mxu1 %v13818_v53  ;;  %v10539_v51 = vcombine.low %v2056_v27, %v2060_v28  ;;  %v10543_v53 = vcombine.low %v2057_v29, %v2061_v30  ;;  %v2097_v27 = vld [vmem:[%s13382_s1 + $0x288] sm:$0xff]  ;;  %v10640_v28 = vcombine.high %v2096_v11, %v2100_v15 }
 0x1a8   :  { %1885 = vmatprep.subr.bf16.mxu0 %v13819_v54  ;;  %1926 = vmatprep.subr.bf16.mxu1 %v13820_v59  ;;  %v10545_v54 = vcombine.high %v2064_v43, %v2068_v44  ;;  %v10548_v59 = vcombine.high %v2065_v45, %v2069_v46  ;;  %v2101_v29 = vld [vmem:[%s13382_s1 + $0x2a8] sm:$0xff]  ;;  %v10646_v30 = vcombine.low %v2096_v11, %v2100_v15 }
 0x1a9   :  { %13831 = vst [vmem:[#allocation4_spill] sm:$0xff] %v10640_v28  ;;  %v10696_v11 = vcombine.low %v2113_v50, %v2117_v1  ;;  %v10698_v15 = vcombine.high %v2113_v50, %v2117_v1 }
 0x1aa   :  { %13832 = vst [vmem:[#allocation5_spill] sm:$0xff] %v10646_v30 }
 0x1ab   :  { %1886 = vmatpush1.bf16.msra.mxu0 %v13821_v61  ;;  %1927 = vmatpush1.bf16.msra.mxu1 %v13822_v62  ;;  %v2072_v61 = vld [vmem:[%s13382_s1 + $0x1c0] sm:$0xff]  ;;  %13841 = vst [vmem:[#allocation14_spill] sm:$0xff] %v10696_v11  ;;  %13842 = vst [vmem:[#allocation15_spill] sm:$0xff] %v10698_v15 }
 0x1ac   :  { %1887 = vmatprep.subr.bf16.mxu0 %v13823_v5  ;;  %1928 = vmatprep.subr.bf16.mxu1 %v13824_v7  ;;  %v2076_v62 = vld [vmem:[%s13382_s1 + $0x1e0] sm:$0xff]  ;;  %v2073_v5 = vld [vmem:[%s13382_s1 + $0x1c8] sm:$0xff] }
 0x1ad   :  { %v2077_v7 = vld [vmem:[%s13382_s1 + $0x1e8] sm:$0xff] }
 0x1af   :  { %1888 = vmatpush1.bf16.msra.mxu0 %v13825_v8  ;;  %1929 = vmatpush1.bf16.msra.mxu1 %v13826_v18  ;;  %v10563_v8 = vcombine.low %v2064_v43, %v2068_v44  ;;  %v10567_v18 = vcombine.low %v2065_v45, %v2069_v46  ;;  %v10648_v43 = vcombine.low %v2097_v27, %v2101_v29  ;;  %v2104_v45 = vld [vmem:[%s13382_s1 + $0x2c0] sm:$0xff] }
 0x1b0   :  { %1889 = vmatprep.subr.bf16.mxu0 %v13827_v23  ;;  %1930 = vmatprep.subr.bf16.mxu1 %v13828_v24  ;;  %v10569_v23 = vcombine.high %v2072_v61, %v2076_v62  ;;  %v10572_v24 = vcombine.high %v2073_v5, %v2077_v7  ;;  %v10650_v44 = vcombine.high %v2097_v27, %v2101_v29  ;;  %v2108_v46 = vld [vmem:[%s13382_s1 + $0x2e0] sm:$0xff] }
 0x1b1   :  { %13833 = vst [vmem:[#allocation6_spill] sm:$0xff] %v10648_v43  ;;  %v2120_v27 = vld [vmem:[%s13382_s1 + $0x340] sm:$0xff] }
 0x1b2   :  { %13834 = vst [vmem:[#allocation7_spill] sm:$0xff] %v10650_v44  ;;  %v2124_v29 = vld [vmem:[%s13382_s1 + $0x360] sm:$0xff] }
 0x1b3   :  { %1890 = vmatpush1.bf16.msra.mxu0 %v10174_v26  ;;  %1931 = vmatpush1.bf16.msra.mxu1 %v10178_v16  ;;  %v2020_v16 = vld [vmem:[%s13382_s1 + $0x20] sm:$0xff] }
 0x1b4   :  { %1891 = vmatprep.subr.bf16.mxu0 %v10180_v14  ;;  %1932 = vmatprep.subr.bf16.mxu1 %v10183_v0  ;;  %v2016_v14 = vld [vmem:[%s13382_s1] sm:$0xff]  ;;  %v2021_v0 = vld [vmem:[%s13382_s1 + $0x28] sm:$0xff] }
 0x1b5   :  { %v2028_v26 = vld [vmem:[%s13382_s1 + $0x60] sm:$0xff] }
 0x1b7   :  { %1892 = vmatpush1.bf16.msra.mxu0 %v10198_v63  ;;  %1933 = vmatpush1.bf16.msra.mxu1 %v10202_v48  ;;  %v10403_v48 = vcombine.high %v2016_v14, %v2020_v16 }
 0x1b8   :  { %1893 = vmatprep.subr.bf16.mxu0 %v10204_v47  ;;  %1934 = vmatprep.subr.bf16.mxu1 %v10207_v42  ;;  %v2017_v42 = vld [vmem:[%s13382_s1 + $0x8] sm:$0xff]  ;;  %v10401_v47 = vcombine.low %v2016_v14, %v2020_v16  ;;  %v10575_v14 = vcombine.low %v2072_v61, %v2076_v62  ;;  %v10579_v16 = vcombine.low %v2073_v5, %v2077_v7 }
 0x1b9   :  { %v10414_v63 = vcombine.low %v2017_v42, %v2021_v0  ;;  %v2105_v61 = vld [vmem:[%s13382_s1 + $0x2c8] sm:$0xff]  ;;  %v10664_v62 = vcombine.high %v2104_v45, %v2108_v46  ;;  %v10670_v7 = vcombine.low %v2104_v45, %v2108_v46  ;;  %v10712_v46 = vcombine.low %v2120_v27, %v2124_v29 }
 0x1ba   :  { %v2109_v5 = vld [vmem:[%s13382_s1 + $0x2e8] sm:$0xff] }
 0x1bb   :  { %1894 = vmatpush1.bf16.msra.mxu0 %v10210_v3  ;;  %1935 = vmatpush1.bf16.msra.mxu1 %v10214_v2  ;;  %v2024_v3 = vld [vmem:[%s13382_s1 + $0x40] sm:$0xff]  ;;  %v10416_v2 = vcombine.high %v2017_v42, %v2021_v0  ;;  %13835 = vst [vmem:[#allocation8_spill] sm:$0xff] %v10664_v62  ;;  %13836 = vst [vmem:[#allocation9_spill] sm:$0xff] %v10670_v7  ;;  %v2121_v45 = vld [vmem:[%s13382_s1 + $0x348] sm:$0xff] }
 0x1bc   :  { %2784 = vmatprep.subr.bf16.mxu0 %v10403_v48  ;;  %v10443_v56 = vcombine.low %v2024_v3, %v2028_v26  ;;  %v2080_v42 = vld [vmem:[%s13382_s1 + $0x200] sm:$0xff]  ;;  %13843 = vst [vmem:[#allocation16_spill] sm:$0xff] %v10712_v46 }
 0x1bd   :  { %2825 = vmatprep.subr.bf16.mxu1 %v10416_v2  ;;  %v2084_v0 = vld [vmem:[%s13382_s1 + $0x220] sm:$0xff] }
 0x1be   :  { %1896 = vmatmul.mubr.bf16.vlgmr.msra.gmra.mrb[12].mxu0 %v10317_v12  ;;  %1937 = vmatmul.mubr.bf16.vlgmr.msra.gmra.mrb[12].mxu1 %v10317_v12  ;;  %v10418_v12 = vcombine.high %v2024_v3, %v2028_v26  ;;  %v10590_v3 = vcombine.high %v2080_v42, %v2084_v0  ;;  %v2081_v26 = vld [vmem:[%s13382_s1 + $0x208] sm:$0xff]  ;;  %v10595_v25 = vcombine.low %v2080_v42, %v2084_v0 }
 0x1bf   :  { %2785 = vmatpush1.bf16.msra.mxu0 %v10401_v47  ;;  %2826 = vmatpush1.bf16.msra.mxu1 %v10414_v63  ;;  %v10601_v39 = vcombine.low %v2081_v26, %v2085_v34  ;;  %v10603_v41 = vcombine.high %v2081_v26, %v2085_v34  ;;  %v10672_v42 = vcombine.low %v2105_v61, %v2109_v5  ;;  %v2112_v26 = vld [vmem:[%s13382_s1 + $0x300] sm:$0xff] }
 0x1c0   :  { %2786 = vmatprep.subr.bf16.mxu0 %v10418_v12  ;;  %2827 = vmatprep.subr.bf16.mxu1 %v10430_v40  ;;  %v10674_v0 = vcombine.high %v2105_v61, %v2109_v5  ;;  %v2116_v34 = vld [vmem:[%s13382_s1 + $0x320] sm:$0xff]  ;;  %v10714_v61 = vcombine.high %v2120_v27, %v2124_v29  ;;  %v2125_v5 = vld [vmem:[%s13382_s1 + $0x368] sm:$0xff] }
 0x1c1   :  { %13837 = vst [vmem:[#allocation10_spill] sm:$0xff] %v10672_v42  ;;  %v10688_v55 = vcombine.high %v2112_v26, %v2116_v34  ;;  %v10694_v17 = vcombine.low %v2112_v26, %v2116_v34  ;;  %v2128_v26 = vld [vmem:[%s13382_s1 + $0x380] sm:$0xff]  ;;  %v10726_v50 = vcombine.low %v2121_v45, %v2125_v5  ;;  %v10728_v1 = vcombine.high %v2121_v45, %v2125_v5  ;;  %v2129_v29 = vld [vmem:[%s13382_s1 + $0x388] sm:$0xff] }
 0x1c2   :  { %13838 = vst [vmem:[#allocation11_spill] sm:$0xff] %v10674_v0  ;;  %13844 = vst [vmem:[#allocation17_spill] sm:$0xff] %v10714_v61  ;;  %v2132_v34 = vld [vmem:[%s13382_s1 + $0x3a0] sm:$0xff] }
 0x1c3   :  { %2787 = vmatpush1.bf16.msra.mxu0 %v10443_v56  ;;  %2828 = vmatpush1.bf16.msra.mxu1 %v10447_v57  ;;  %13839 = vst [vmem:[#allocation12_spill] sm:$0xff] %v10688_v55  ;;  %13840 = vst [vmem:[#allocation13_spill] sm:$0xff] %v10694_v17  ;;  %v10730_v27 = vcombine.high %v2128_v26, %v2132_v34  ;;  %v2140_v45 = vld [vmem:[%s13382_s1 + $0x3e0] sm:$0xff]  ;;  %v10749_v5 = vcombine.low %v2128_v26, %v2132_v34 }
 0x1c4   :  { %2788 = vmatprep.subr.bf16.mxu0 %v10449_v49  ;;  %2829 = vmatprep.subr.bf16.mxu1 %v10452_v31  ;;  %13845 = vst [vmem:[#allocation18_spill] sm:$0xff] %v10726_v50  ;;  %13846 = vst [vmem:[#allocation19_spill] sm:$0xff] %v10728_v1 }
 0x1c5   :  { %13847 = vst [vmem:[#allocation20_spill] sm:$0xff] %v10730_v27  ;;  %13849 = vst [vmem:[#allocation22_spill] sm:$0xff] %v10749_v5 }
 0x1c7   :  { %2789 = vmatpush1.bf16.msra.mxu0 %v10467_v33  ;;  %2830 = vmatpush1.bf16.msra.mxu1 %v10471_v58 }
 0x1c8   :  { %2790 = vmatprep.subr.bf16.mxu0 %v10473_v4  ;;  %2831 = vmatprep.subr.bf16.mxu1 %v10476_v6 }
 0x1cb   :  { %2791 = vmatpush1.bf16.msra.mxu0 %v10491_v19  ;;  %2832 = vmatpush1.bf16.msra.mxu1 %v10495_v20 }
 0x1cc   :  { %2792 = vmatprep.subr.bf16.mxu0 %v10497_v21  ;;  %2833 = vmatprep.subr.bf16.mxu1 %v10500_v22 }
 0x1cf   :  { %2793 = vmatpush1.bf16.msra.mxu0 %v10515_v35  ;;  %2834 = vmatpush1.bf16.msra.mxu1 %v10519_v36 }
 0x1d0   :  { %2794 = vmatprep.subr.bf16.mxu0 %v10521_v37  ;;  %2835 = vmatprep.subr.bf16.mxu1 %v10524_v38 }
 0x1d3   :  { %2795 = vmatpush1.bf16.msra.mxu0 %v10539_v51  ;;  %2836 = vmatpush1.bf16.msra.mxu1 %v10543_v53 }
 0x1d4   :  { %2796 = vmatprep.subr.bf16.mxu0 %v10545_v54  ;;  %2837 = vmatprep.subr.bf16.mxu1 %v10548_v59 }
 0x1d7   :  { %2797 = vmatpush1.bf16.msra.mxu0 %v10563_v8  ;;  %2838 = vmatpush1.bf16.msra.mxu1 %v10567_v18 }
 0x1d8   :  { %2798 = vmatprep.subr.bf16.mxu0 %v10569_v23  ;;  %2839 = vmatprep.subr.bf16.mxu1 %v10572_v24 }
 0x1db   :  { %2799 = vmatpush1.bf16.msra.mxu0 %v10575_v14  ;;  %2840 = vmatpush1.bf16.msra.mxu1 %v10579_v16 }
 0x1dc   :  { %2800 = vmatprep.subr.bf16.mxu0 %v10590_v3  ;;  %2841 = vmatprep.subr.bf16.mxu1 %v10603_v41 }
 0x1df   :  { %2801 = vmatpush1.bf16.msra.mxu0 %v10595_v25  ;;  %2842 = vmatpush1.bf16.msra.mxu1 %v10601_v39 }
 0x1e0   :  { %2802 = vmatprep.subr.bf16.mxu0 %v10616_v13  ;;  %2843 = vmatprep.subr.bf16.mxu1 %v10626_v10 }
 0x1e3   :  { %2803 = vmatpush1.bf16.msra.mxu0 %v10622_v32  ;;  %2844 = vmatpush1.bf16.msra.mxu1 %v10624_v9 }
 0x1e4   :  { %2804 = vmatprep.subr.bf16.mxu0 %v10640_v28  ;;  %2845 = vmatprep.subr.bf16.mxu1 %v10650_v44 }
 0x1e7   :  { %2805 = vmatpush1.bf16.msra.mxu0 %v10646_v30  ;;  %2846 = vmatpush1.bf16.msra.mxu1 %v10648_v43 }
 0x1e8   :  { %2806 = vmatprep.subr.bf16.mxu0 %v10664_v62  ;;  %2847 = vmatprep.subr.bf16.mxu1 %v10674_v0 }
 0x1eb   :  { %2807 = vmatpush1.bf16.msra.mxu0 %v10670_v7  ;;  %2848 = vmatpush1.bf16.msra.mxu1 %v10672_v42 }
 0x1ec   :  { %2808 = vmatprep.subr.bf16.mxu0 %v10688_v55  ;;  %2849 = vmatprep.subr.bf16.mxu1 %v10698_v15  ;;  %v2136_v15 = vld [vmem:[%s13382_s1 + $0x3c0] sm:$0xff]  ;;  %v2137_v55 = vld [vmem:[%s13382_s1 + $0x3c8] sm:$0xff] }
 0x1ed   :  { %v10758_v42 = vcombine.high %v2136_v15, %v2140_v45  ;;  %v10767_v34 = vcombine.low %v2136_v15, %v2140_v45  ;;  %v2019_v15 = vld [vmem:[%s13382_s1 + $0x18] sm:$0xff] }
 0x1ef   :  { %2809 = vmatpush1.bf16.msra.mxu0 %v10694_v17  ;;  %2850 = vmatpush1.bf16.msra.mxu1 %v10696_v11  ;;  %v2133_v17 = vld [vmem:[%s13382_s1 + $0x3a8] sm:$0xff]  ;;  %13850 = vst [vmem:[#allocation23_spill] sm:$0xff] %v10758_v42  ;;  %13853 = vst [vmem:[#allocation26_spill] sm:$0xff] %v10767_v34 }
 0x1f0   :  { %2810 = vmatprep.subr.bf16.mxu0 %v10714_v61  ;;  %v10742_v11 = vcombine.high %v2129_v29, %v2133_v17  ;;  %2851 = vmatprep.subr.bf16.mxu1 %v10728_v1  ;;  %v2141_v61 = vld [vmem:[%s13382_s1 + $0x3e8] sm:$0xff]  ;;  %v10761_v7 = vcombine.low %v2129_v29, %v2133_v17  ;;  %v2018_v17 = vld [vmem:[%s13382_s1 + $0x10] sm:$0xff] }
 0x1f1   :  { %v10764_v26 = vcombine.high %v2137_v55, %v2141_v61  ;;  %v2022_v29 = vld [vmem:[%s13382_s1 + $0x30] sm:$0xff] }
 0x1f2   :  { %13848 = vst [vmem:[#allocation21_spill] sm:$0xff] %v10742_v11  ;;  %13851 = vst [vmem:[#allocation24_spill] sm:$0xff] %v10761_v7  ;;  %v10784_v45 = vcombine.high %v2018_v17, %v2022_v29 }
 0x1f3   :  { %2811 = vmatpush1.bf16.msra.mxu0 %v10712_v46  ;;  %2852 = vmatpush1.bf16.msra.mxu1 %v10726_v50  ;;  %13852 = vst [vmem:[#allocation25_spill] sm:$0xff] %v10764_v26  ;;  %v10771_v46 = vcombine.low %v2137_v55, %v2141_v61  ;;  %v2023_v55 = vld [vmem:[%s13382_s1 + $0x38] sm:$0xff]  ;;  %v10790_v61 = vcombine.low %v2018_v17, %v2022_v29  ;;  %v8293_v17 = vld [vmem:[%s13383_s0 + $0x40] sm:$0xff]  ;;  %v8295_v29 = vld [vmem:[%s13383_s0 + $0x50] sm:$0xff] }
 0x1f4   :  { %2812 = vmatprep.subr.bf16.mxu0 %v10730_v27  ;;  %2853 = vmatprep.subr.bf16.mxu1 %v10742_v11  ;;  %13855 = vst [vmem:[#allocation28_spill] sm:$0xff] %v10784_v45 }
 0x1f5   :  { %13854 = vst [vmem:[#allocation27_spill] sm:$0xff] %v10771_v46 }
 0x1f7   :  { %2813 = vmatpush1.bf16.msra.mxu0 %v10749_v5  ;;  %2854 = vmatpush1.bf16.msra.mxu1 %v10761_v7 }
 0x1f8   :  { %2814 = vmatprep.subr.bf16.mxu0 %v10758_v42  ;;  %2855 = vmatprep.subr.bf16.mxu1 %v10764_v26  ;;  %v10794_v26 = vcombine.high %v2019_v15, %v2023_v55 }
 0x1fa   :  { %13856 = vst [vmem:[#allocation29_spill] sm:$0xff] %v10794_v26 }
 0x1fb   :  { %2815 = vmatpush1.bf16.msra.mxu0 %v10767_v34  ;;  %2856 = vmatpush1.bf16.msra.mxu1 %v10771_v46  ;;  %v10792_v34 = vcombine.low %v2019_v15, %v2023_v55  ;;  %v8294_v15 = vld [vmem:[%s13383_s0 + $0x48] sm:$0xff] }
 0x1fc   :  { %2866 = vmatprep.subr.bf16.mxu0 %v10784_v45  ;;  %2907 = vmatprep.subr.bf16.mxu1 %v10794_v26 }
 0x251   :  { %v1815_v42 = vpop.f32.mrb[8].mxu0  ;;  %v1856_v7 = vpop.f32.mrb[8].mxu1 }
 0x252   :  { %v1817_v5 = vpop.f32.mrb[9].mxu0  ;;  %v1858_v11 = vpop.f32.mrb[9].mxu1  ;;  %v1954_v55 = vadd.f32 %v8293_v17, %v1815_v42 }
 0x253   :  { %v1819_v27 = vpop.f32.mrb[10].mxu0  ;;  %v1860_v50 = vpop.f32.mrb[10].mxu1 }
 0x254   :  { %v1820_v1 = vpop.f32.mrb[11].mxu0  ;;  %v1861_v0 = vpop.f32.mrb[11].mxu1  ;;  %v8296_v27 = vld [vmem:[%s13383_s0 + $0x58] sm:$0xff]  ;;  %v1956_v50 = vadd.f32 %v8295_v29, %v1856_v7  ;;  %v8301_v26 = vmul.f32 -1.442695, %v1954_v55  ;;  %v8297_v7 = vld [vmem:[%s13383_s0 + $0x60] sm:$0xff] }
 0x255   :  { %v1955_v1 = vadd.f32 %v8294_v15, %v1817_v5  ;;  %v1957_v0 = vadd.f32 %v8296_v27, %v1858_v11  ;;  %v8299_v11 = vld [vmem:[%s13383_s0 + $0x70] sm:$0xff] }
 0x256   :  { %v8303_v45 = vmul.f32 -1.442695, %v1956_v50  ;;  %9205 = vpow2.f32 %v8301_v26 }
 0x257   :  { %v8302_v46 = vmul.f32 -1.442695, %v1955_v1  ;;  %v8304_v62 = vmul.f32 -1.442695, %v1957_v0 }
 0x258   :  { %9207 = vpow2.f32 %v8303_v45 }
 0x259   :  { %9209 = vpow2.f32 %v8302_v46 }
 0x25a   :  { %9211 = vpow2.f32 %v8304_v62  ;;  %v8298_v62 = vld [vmem:[%s13383_s0 + $0x68] sm:$0xff] }
 0x260   :  { %v9206_v43 = vpop.eup %9205 }
 0x261   :  { %v1980_v42 = vadd.f32 1.0, %v9206_v43  ;;  %v8300_v43 = vld [vmem:[%s13383_s0 + $0x78] sm:$0xff] }
 0x262   :  { %v9208_v30 = vpop.eup %9207 }
 0x263   :  { %v9210_v44 = vpop.eup %9209  ;;  %v1982_v17 = vadd.f32 1.0, %v9208_v30  ;;  %9213 = vrcp.f32 %v1980_v42 }
 0x264   :  { %v9212_v28 = vpop.eup %9211  ;;  %v1981_v9 = vadd.f32 1.0, %v9210_v44 }
 0x265   :  { %v1983_v32 = vadd.f32 1.0, %v9212_v28  ;;  %9215 = vrcp.f32 %v1982_v17 }
 0x266   :  { %9217 = vrcp.f32 %v1981_v9 }
 0x267   :  { %9219 = vrcp.f32 %v1983_v32 }
 0x26d   :  { %v9214_v42 = vpop.eup %9213 }
 0x26f   :  { %v9216_v17 = vpop.eup %9215 }
 0x270   :  { %v9218_v9 = vpop.eup %9217  ;;  %v2000_v32 = vmul.f32 %v9216_v17, %v10311_v52  ;;  %v2027_v17 = vld [vmem:[%s13382_s1 + $0x58] sm:$0xff] }
 0x291   :  { %v1897_v30 = vpop.f32.mrb[12].mxu0  ;;  %v1938_v28 = vpop.f32.mrb[12].mxu1 }
 0x292   :  { %v1958_v44 = vadd.f32 %v8297_v7, %v1897_v30  ;;  %v1960_v46 = vadd.f32 %v8299_v11, %v1938_v28  ;;  %v1899_v5 = vpop.f32.mrb[13].mxu0  ;;  %v1940_v26 = vpop.f32.mrb[13].mxu1 }
 0x293   :  { %v1959_v45 = vadd.f32 %v8298_v62, %v1899_v5  ;;  %v1961_v29 = vadd.f32 %v8300_v43, %v1940_v26  ;;  %v1901_v15 = vpop.f32.mrb[14].mxu0  ;;  %v1942_v55 = vpop.f32.mrb[14].mxu1 }
 0x294   :  { %v8305_v27 = vmul.f32 -1.442695, %v1958_v44  ;;  %9221 = vtanh.f32 %v1960_v46  ;;  %v1902_v50 = vpop.f32.mrb[15].mxu0  ;;  %v1943_v1 = vpop.f32.mrb[15].mxu1 }
 0x295   :  { %v8306_v0 = vmul.f32 -1.442695, %v1959_v45  ;;  %9223 = vtanh.f32 %v1961_v29  ;;  %v9220_v7 = vpop.eup %9219 }
 0x296   :  { %9225 = vpow2.f32 %v8305_v27  ;;  %v2001_v28 = vmul.f32 %v9220_v7, %v10314_v60 }
 0x297   :  { %9227 = vpow2.f32 %v8306_v0  ;;  %v2026_v0 = vld [vmem:[%s13382_s1 + $0x50] sm:$0xff] }
 0x29e   :  { %v9222_v11 = vpop.eup %9221 }
 0x29f   :  { %v9224_v30 = vpop.eup %9223  ;;  %v2002_v62 = vmul.f32 %v9222_v11, %v9214_v42  ;;  %v2030_v42 = vld [vmem:[%s13382_s1 + $0x70] sm:$0xff] }
 0x2a0   :  { %v9226_v43 = vpop.eup %9225  ;;  %v2003_v44 = vmul.f32 %v9224_v30, %v9218_v9  ;;  %v2031_v9 = vld [vmem:[%s13382_s1 + $0x78] sm:$0xff]  ;;  %v2034_v11 = vld [vmem:[%s13382_s1 + $0x90] sm:$0xff]  ;;  %v10854_v30 = vcombine.high %v2026_v0, %v2030_v42 }
 0x2a1   :  { %v9228_v46 = vpop.eup %9227  ;;  %v1984_v5 = vadd.f32 1.0, %v9226_v43  ;;  %v10824_v26 = vadd.f32 %v2002_v62, %v2000_v32  ;;  %v10856_v32 = vcombine.high %v2027_v17, %v2031_v9  ;;  %v2038_v62 = vld [vmem:[%s13382_s1 + $0xb0] sm:$0xff]  ;;  %v2035_v43 = vld [vmem:[%s13382_s1 + $0x98] sm:$0xff] }
 0x2a2   :  { %v1985_v45 = vadd.f32 1.0, %v9228_v46  ;;  %v10826_v29 = vadd.f32 %v2003_v44, %v2001_v28  ;;  %v2039_v28 = vld [vmem:[%s13382_s1 + $0xb8] sm:$0xff]  ;;  %v10871_v44 = vcombine.low %v2026_v0, %v2030_v42  ;;  %v10873_v46 = vcombine.low %v2027_v17, %v2031_v9  ;;  %v2050_v17 = vld [vmem:[%s13382_s1 + $0x110] sm:$0xff] }
 0x2a3   :  { %9229 = vrcp.f32 %v1984_v5  ;;  %v10875_v5 = vcombine.high %v2034_v11, %v2038_v62  ;;  %v2054_v9 = vld [vmem:[%s13382_s1 + $0x130] sm:$0xff] }
 0x2a4   :  { %9231 = vtanh.f32 %v10824_v26 }
 0x2a5   :  { %9233 = vrcp.f32 %v1985_v45  ;;  %13857 = vst [vmem:[#allocation30_spill] sm:$0xff] %v10875_v5  ;;  %v10877_v45 = vcombine.high %v2035_v43, %v2039_v28 }
 0x2a6   :  { %9235 = vtanh.f32 %v10826_v29 }
 0x2a7   :  { %13858 = vst [vmem:[#allocation31_spill] sm:$0xff] %v10877_v45 }
 0x2ad   :  { %v9230_v15 = vpop.eup %9229 }
 0x2ae   :  { %v9232_v52 = vpop.eup %9231 }
 0x2af   :  { %v9234_v55 = vpop.eup %9233  ;;  %v2008_v27 = vmul.f32 %v9232_v52, %v9230_v15  ;;  %v2042_v15 = vld [vmem:[%s13382_s1 + $0xd0] sm:$0xff] }
 0x2b0   :  { %v9236_v50 = vpop.eup %9235  ;;  %v2046_v52 = vld [vmem:[%s13382_s1 + $0xf0] sm:$0xff] }
 0x2b1   :  { %v2009_v60 = vmul.f32 %v9236_v50, %v9234_v55  ;;  %v10830_v1 = vpack.c.bf16 %v2008_v27, %v2008_v27  ;;  %v2043_v55 = vld [vmem:[%s13382_s1 + $0xd8] sm:$0xff]  ;;  %v10895_v50 = vcombine.low %v2034_v11, %v2038_v62  ;;  %v10901_v0 = vcombine.high %v2042_v15, %v2046_v52 }
 0x2b2   :  { %v2047_v27 = vld [vmem:[%s13382_s1 + $0xf8] sm:$0xff]  ;;  %v10919_v62 = vcombine.low %v2042_v15, %v2046_v52 }
 0x2b3   :  { %v2013_v7 = vpack.c.bf16 %v2009_v60, %v2009_v60  ;;  %8307 = vst [vmem:[%s13384_s2 + $0x8] sm:$0xf] %v10830_v1  ;;  %13859 = vst [vmem:[#allocation32_spill] sm:$0xff] %v10895_v50  ;;  %v10897_v60 = vcombine.low %v2035_v43, %v2039_v28  ;;  %v10903_v42 = vcombine.high %v2043_v55, %v2047_v27  ;;  %v2055_v11 = vld [vmem:[%s13382_s1 + $0x138] sm:$0xff] }
 0x2b4   :  { %13861 = vst [vmem:[#allocation34_spill] sm:$0xff] %v10901_v0  ;;  %13863 = vst [vmem:[#allocation36_spill] sm:$0xff] %v10919_v62  ;;  %v10921_v43 = vcombine.low %v2043_v55, %v2047_v27  ;;  %v10925_v28 = vcombine.high %v2050_v17, %v2054_v9  ;;  %v2059_v15 = vld [vmem:[%s13382_s1 + $0x158] sm:$0xff]  ;;  %v10943_v55 = vcombine.low %v2050_v17, %v2054_v9 }
 0x2b5   :  { %8308 = vst [vmem:[%s13384_s2 + $0x34] sm:$0xf] %v2013_v7  ;;  %2816 = vmatprep.mubr.bf16.mxu0 %v2013_v7  ;;  %2857 = vmatprep.mubr.bf16.mxu1 %v2013_v7  ;;  %13860 = vst [vmem:[#allocation33_spill] sm:$0xff] %v10897_v60  ;;  %v2063_v52 = vld [vmem:[%s13382_s1 + $0x178] sm:$0xff] }
 0x2b6   :  { %2817 = vmatmul.mubr.bf16.vlgmr.msra.gmra.mrb[16].mxu0 %v10830_v1  ;;  %2858 = vmatmul.mubr.bf16.vlgmr.msra.gmra.mrb[16].mxu1 %v10830_v1  ;;  %13862 = vst [vmem:[#allocation35_spill] sm:$0xff] %v10903_v42  ;;  %13864 = vst [vmem:[#allocation37_spill] sm:$0xff] %v10921_v43  ;;  %v2067_v17 = vld [vmem:[%s13382_s1 + $0x198] sm:$0xff] }
 0x2b7   :  { %2867 = vmatpush1.bf16.msra.mxu0 %v10790_v61  ;;  %2908 = vmatpush1.bf16.msra.mxu1 %v10792_v34  ;;  %13865 = vst [vmem:[#allocation38_spill] sm:$0xff] %v10925_v28  ;;  %13867 = vst [vmem:[#allocation40_spill] sm:$0xff] %v10943_v55  ;;  %v2071_v9 = vld [vmem:[%s13382_s1 + $0x1b8] sm:$0xff] }
 0x2b8   :  { %2898 = vmatprep.mubr.bf16.mxu0 %v2013_v7  ;;  %2939 = vmatprep.mubr.bf16.mxu1 %v2013_v7  ;;  %v2051_v7 = vld [vmem:[%s13382_s1 + $0x118] sm:$0xff] }
 0x2b9   :  { %2868 = vmatprep.subr.bf16.mxu0 %v10854_v30  ;;  %2909 = vmatprep.subr.bf16.mxu1 %v10856_v32  ;;  %v10945_v27 = vcombine.low %v2051_v7, %v2055_v11 }
 0x2bb   :  { %2869 = vmatpush1.bf16.msra.mxu0 %v10871_v44  ;;  %2910 = vmatpush1.bf16.msra.mxu1 %v10873_v46  ;;  %13868 = vst [vmem:[#allocation41_spill] sm:$0xff] %v10945_v27 }
 0x2bc   :  { %2870 = vmatprep.subr.bf16.mxu0 %v10875_v5  ;;  %2911 = vmatprep.subr.bf16.mxu1 %v10877_v45  ;;  %v10927_v45 = vcombine.high %v2051_v7, %v2055_v11  ;;  %v2058_v5 = vld [vmem:[%s13382_s1 + $0x150] sm:$0xff]  ;;  %v10969_v11 = vcombine.low %v2059_v15, %v2063_v52 }
 0x2be   :  { %13866 = vst [vmem:[#allocation39_spill] sm:$0xff] %v10927_v45  ;;  %13872 = vst [vmem:[#allocation45_spill] sm:$0xff] %v10969_v11 }
 0x2bf   :  { %2871 = vmatpush1.bf16.msra.mxu0 %v10895_v50  ;;  %2912 = vmatpush1.bf16.msra.mxu1 %v10897_v60  ;;  %v2062_v60 = vld [vmem:[%s13382_s1 + $0x170] sm:$0xff] }
 0x2c0   :  { %2872 = vmatprep.subr.bf16.mxu0 %v10901_v0  ;;  %2913 = vmatprep.subr.bf16.mxu1 %v10903_v42  ;;  %v10949_v42 = vcombine.high %v2058_v5, %v2062_v60  ;;  %v10951_v0 = vcombine.high %v2059_v15, %v2063_v52  ;;  %v2066_v50 = vld [vmem:[%s13382_s1 + $0x190] sm:$0xff]  ;;  %v10967_v7 = vcombine.low %v2058_v5, %v2062_v60  ;;  %v2075_v5 = vld [vmem:[%s13382_s1 + $0x1d8] sm:$0xff] }
 0x2c1   :  { %v2079_v60 = vld [vmem:[%s13382_s1 + $0x1f8] sm:$0xff]  ;;  %v10993_v52 = vcombine.low %v2067_v17, %v2071_v9 }
 0x2c2   :  { %13869 = vst [vmem:[#allocation42_spill] sm:$0xff] %v10949_v42  ;;  %13870 = vst [vmem:[#allocation43_spill] sm:$0xff] %v10951_v0 }
 0x2c3   :  { %2873 = vmatpush1.bf16.msra.mxu0 %v10919_v62  ;;  %2914 = vmatpush1.bf16.msra.mxu1 %v10921_v43  ;;  %v2070_v43 = vld [vmem:[%s13382_s1 + $0x1b0] sm:$0xff]  ;;  %13871 = vst [vmem:[#allocation44_spill] sm:$0xff] %v10967_v7  ;;  %13876 = vst [vmem:[#allocation49_spill] sm:$0xff] %v10993_v52 }
 0x2c4   :  { %2874 = vmatprep.subr.bf16.mxu0 %v10925_v28  ;;  %2915 = vmatprep.subr.bf16.mxu1 %v10927_v45  ;;  %v10973_v45 = vcombine.high %v2066_v50, %v2070_v43  ;;  %v10975_v28 = vcombine.high %v2067_v17, %v2071_v9  ;;  %v2074_v62 = vld [vmem:[%s13382_s1 + $0x1d0] sm:$0xff]  ;;  %v10991_v15 = vcombine.low %v2066_v50, %v2070_v43  ;;  %v2083_v50 = vld [vmem:[%s13382_s1 + $0x218] sm:$0xff] }
 0x2c5   :  { %v2087_v43 = vld [vmem:[%s13382_s1 + $0x238] sm:$0xff]  ;;  %v11017_v9 = vcombine.low %v2075_v5, %v2079_v60 }
 0x2c6   :  { %13873 = vst [vmem:[#allocation46_spill] sm:$0xff] %v10973_v45  ;;  %13874 = vst [vmem:[#allocation47_spill] sm:$0xff] %v10975_v28 }
 0x2c7   :  { %2875 = vmatpush1.bf16.msra.mxu0 %v10943_v55  ;;  %2916 = vmatpush1.bf16.msra.mxu1 %v10945_v27  ;;  %v2078_v27 = vld [vmem:[%s13382_s1 + $0x1f0] sm:$0xff]  ;;  %13875 = vst [vmem:[#allocation48_spill] sm:$0xff] %v10991_v15  ;;  %13880 = vst [vmem:[#allocation53_spill] sm:$0xff] %v11017_v9 }
 0x2c8   :  { %2876 = vmatprep.subr.bf16.mxu0 %v10949_v42  ;;  %2917 = vmatprep.subr.bf16.mxu1 %v10951_v0  ;;  %v10997_v0 = vcombine.high %v2074_v62, %v2078_v27  ;;  %v10999_v42 = vcombine.high %v2075_v5, %v2079_v60  ;;  %v2082_v55 = vld [vmem:[%s13382_s1 + $0x210] sm:$0xff]  ;;  %v11015_v17 = vcombine.low %v2074_v62, %v2078_v27  ;;  %v2091_v62 = vld [vmem:[%s13382_s1 + $0x258] sm:$0xff] }
 0x2c9   :  { %v2095_v27 = vld [vmem:[%s13382_s1 + $0x278] sm:$0xff]  ;;  %v11041_v60 = vcombine.low %v2083_v50, %v2087_v43 }
 0x2ca   :  { %13877 = vst [vmem:[#allocation50_spill] sm:$0xff] %v10997_v0  ;;  %13878 = vst [vmem:[#allocation51_spill] sm:$0xff] %v10999_v42 }
 0x2cb   :  { %2877 = vmatpush1.bf16.msra.mxu0 %v10967_v7  ;;  %2918 = vmatpush1.bf16.msra.mxu1 %v10969_v11  ;;  %v2086_v11 = vld [vmem:[%s13382_s1 + $0x230] sm:$0xff]  ;;  %13879 = vst [vmem:[#allocation52_spill] sm:$0xff] %v11015_v17  ;;  %13884 = vst [vmem:[#allocation57_spill] sm:$0xff] %v11041_v60 }
 0x2cc   :  { %2878 = vmatprep.subr.bf16.mxu0 %v10973_v45  ;;  %2919 = vmatprep.subr.bf16.mxu1 %v10975_v28  ;;  %v11021_v28 = vcombine.high %v2082_v55, %v2086_v11  ;;  %v11023_v45 = vcombine.high %v2083_v50, %v2087_v43  ;;  %v2090_v7 = vld [vmem:[%s13382_s1 + $0x250] sm:$0xff]  ;;  %v11039_v5 = vcombine.low %v2082_v55, %v2086_v11  ;;  %v2099_v55 = vld [vmem:[%s13382_s1 + $0x298] sm:$0xff] }
 0x2cd   :  { %v2103_v11 = vld [vmem:[%s13382_s1 + $0x2b8] sm:$0xff]  ;;  %v11065_v43 = vcombine.low %v2091_v62, %v2095_v27 }
 0x2ce   :  { %13881 = vst [vmem:[#allocation54_spill] sm:$0xff] %v11021_v28  ;;  %13882 = vst [vmem:[#allocation55_spill] sm:$0xff] %v11023_v45 }
 0x2cf   :  { %2879 = vmatpush1.bf16.msra.mxu0 %v10991_v15  ;;  %2920 = vmatpush1.bf16.msra.mxu1 %v10993_v52  ;;  %v2094_v52 = vld [vmem:[%s13382_s1 + $0x270] sm:$0xff]  ;;  %13883 = vst [vmem:[#allocation56_spill] sm:$0xff] %v11039_v5  ;;  %13888 = vst [vmem:[#allocation61_spill] sm:$0xff] %v11065_v43 }
 0x2d0   :  { %2880 = vmatprep.subr.bf16.mxu0 %v10997_v0  ;;  %2921 = vmatprep.subr.bf16.mxu1 %v10999_v42  ;;  %v11045_v42 = vcombine.high %v2090_v7, %v2094_v52  ;;  %v11047_v0 = vcombine.high %v2091_v62, %v2095_v27  ;;  %v2098_v15 = vld [vmem:[%s13382_s1 + $0x290] sm:$0xff]  ;;  %v11063_v50 = vcombine.low %v2090_v7, %v2094_v52  ;;  %v2107_v7 = vld [vmem:[%s13382_s1 + $0x2d8] sm:$0xff] }
 0x2d1   :  { %v2111_v52 = vld [vmem:[%s13382_s1 + $0x2f8] sm:$0xff]  ;;  %v11089_v27 = vcombine.low %v2099_v55, %v2103_v11 }
 0x2d2   :  { %13885 = vst [vmem:[#allocation58_spill] sm:$0xff] %v11045_v42  ;;  %13886 = vst [vmem:[#allocation59_spill] sm:$0xff] %v11047_v0 }
 0x2d3   :  { %2881 = vmatpush1.bf16.msra.mxu0 %v11015_v17  ;;  %2922 = vmatpush1.bf16.msra.mxu1 %v11017_v9  ;;  %v2102_v9 = vld [vmem:[%s13382_s1 + $0x2b0] sm:$0xff]  ;;  %13887 = vst [vmem:[#allocation60_spill] sm:$0xff] %v11063_v50  ;;  %13892 = vst [vmem:[#allocation65_spill] sm:$0xff] %v11089_v27 }
 0x2d4   :  { %2882 = vmatprep.subr.bf16.mxu0 %v11021_v28  ;;  %2923 = vmatprep.subr.bf16.mxu1 %v11023_v45  ;;  %v11069_v45 = vcombine.high %v2098_v15, %v2102_v9  ;;  %v11071_v28 = vcombine.high %v2099_v55, %v2103_v11  ;;  %v2106_v17 = vld [vmem:[%s13382_s1 + $0x2d0] sm:$0xff]  ;;  %v11087_v62 = vcombine.low %v2098_v15, %v2102_v9  ;;  %v2115_v15 = vld [vmem:[%s13382_s1 + $0x318] sm:$0xff] }
 0x2d5   :  { %v2119_v9 = vld [vmem:[%s13382_s1 + $0x338] sm:$0xff]  ;;  %v11113_v11 = vcombine.low %v2107_v7, %v2111_v52 }
 0x2d6   :  { %13889 = vst [vmem:[#allocation62_spill] sm:$0xff] %v11069_v45  ;;  %13890 = vst [vmem:[#allocation63_spill] sm:$0xff] %v11071_v28 }
 0x2d7   :  { %2883 = vmatpush1.bf16.msra.mxu0 %v11039_v5  ;;  %2924 = vmatpush1.bf16.msra.mxu1 %v11041_v60  ;;  %v2110_v60 = vld [vmem:[%s13382_s1 + $0x2f0] sm:$0xff]  ;;  %13891 = vst [vmem:[#allocation64_spill] sm:$0xff] %v11087_v62  ;;  %13896 = vst [vmem:[#allocation69_spill] sm:$0xff] %v11113_v11 }
 0x2d8   :  { %2884 = vmatprep.subr.bf16.mxu0 %v11045_v42  ;;  %2925 = vmatprep.subr.bf16.mxu1 %v11047_v0  ;;  %v11093_v0 = vcombine.high %v2106_v17, %v2110_v60  ;;  %v11095_v42 = vcombine.high %v2107_v7, %v2111_v52  ;;  %v2114_v5 = vld [vmem:[%s13382_s1 + $0x310] sm:$0xff]  ;;  %v11111_v55 = vcombine.low %v2106_v17, %v2110_v60  ;;  %v2123_v17 = vld [vmem:[%s13382_s1 + $0x358] sm:$0xff] }
 0x2d9   :  { %v2127_v60 = vld [vmem:[%s13382_s1 + $0x378] sm:$0xff]  ;;  %v11137_v52 = vcombine.low %v2115_v15, %v2119_v9 }
 0x2da   :  { %13893 = vst [vmem:[#allocation66_spill] sm:$0xff] %v11093_v0  ;;  %13894 = vst [vmem:[#allocation67_spill] sm:$0xff] %v11095_v42 }
 0x2db   :  { %2885 = vmatpush1.bf16.msra.mxu0 %v11063_v50  ;;  %2926 = vmatpush1.bf16.msra.mxu1 %v11065_v43  ;;  %v2118_v43 = vld [vmem:[%s13382_s1 + $0x330] sm:$0xff]  ;;  %13895 = vst [vmem:[#allocation68_spill] sm:$0xff] %v11111_v55  ;;  %13900 = vst [vmem:[#allocation73_spill] sm:$0xff] %v11137_v52 }
 0x2dc   :  { %2886 = vmatprep.subr.bf16.mxu0 %v11069_v45  ;;  %2927 = vmatprep.subr.bf16.mxu1 %v11071_v28  ;;  %v11117_v28 = vcombine.high %v2114_v5, %v2118_v43  ;;  %v11119_v45 = vcombine.high %v2115_v15, %v2119_v9  ;;  %v2122_v50 = vld [vmem:[%s13382_s1 + $0x350] sm:$0xff]  ;;  %v11135_v7 = vcombine.low %v2114_v5, %v2118_v43  ;;  %v2131_v5 = vld [vmem:[%s13382_s1 + $0x398] sm:$0xff] }
 0x2dd   :  { %v2135_v43 = vld [vmem:[%s13382_s1 + $0x3b8] sm:$0xff]  ;;  %v11161_v9 = vcombine.low %v2123_v17, %v2127_v60 }
 0x2de   :  { %13897 = vst [vmem:[#allocation70_spill] sm:$0xff] %v11117_v28  ;;  %13898 = vst [vmem:[#allocation71_spill] sm:$0xff] %v11119_v45 }
 0x2df   :  { %2887 = vmatpush1.bf16.msra.mxu0 %v11087_v62  ;;  %2928 = vmatpush1.bf16.msra.mxu1 %v11089_v27  ;;  %v2126_v27 = vld [vmem:[%s13382_s1 + $0x370] sm:$0xff]  ;;  %13899 = vst [vmem:[#allocation72_spill] sm:$0xff] %v11135_v7 }
 0x2e0   :  { %2888 = vmatprep.subr.bf16.mxu0 %v11093_v0  ;;  %2929 = vmatprep.subr.bf16.mxu1 %v11095_v42  ;;  %v11141_v42 = vcombine.high %v2122_v50, %v2126_v27  ;;  %v11143_v0 = vcombine.high %v2123_v17, %v2127_v60  ;;  %v2130_v62 = vld [vmem:[%s13382_s1 + $0x390] sm:$0xff]  ;;  %v11159_v15 = vcombine.low %v2122_v50, %v2126_v27  ;;  %v2139_v50 = vld [vmem:[%s13382_s1 + $0x3d8] sm:$0xff] }
 0x2e1   :  { %v2143_v27 = vld [vmem:[%s13382_s1 + $0x3f8] sm:$0xff]  ;;  %v11185_v60 = vcombine.low %v2131_v5, %v2135_v43 }
 0x2e2   :  { %13901 = vst [vmem:[#allocation74_spill] sm:$0xff] %v11141_v42  ;;  %13902 = vst [vmem:[#allocation75_spill] sm:$0xff] %v11143_v0 }
 0x2e3   :  { %2889 = vmatpush1.bf16.msra.mxu0 %v11111_v55  ;;  %2930 = vmatpush1.bf16.msra.mxu1 %v11113_v11  ;;  %v2134_v11 = vld [vmem:[%s13382_s1 + $0x3b0] sm:$0xff]  ;;  %13903 = vst [vmem:[#allocation76_spill] sm:$0xff] %v11159_v15 }
 0x2e4   :  { %2890 = vmatprep.subr.bf16.mxu0 %v11117_v28  ;;  %2931 = vmatprep.subr.bf16.mxu1 %v11119_v45  ;;  %v11165_v45 = vcombine.high %v2130_v62, %v2134_v11  ;;  %v11167_v28 = vcombine.high %v2131_v5, %v2135_v43  ;;  %v2138_v55 = vld [vmem:[%s13382_s1 + $0x3d0] sm:$0xff]  ;;  %v11183_v17 = vcombine.low %v2130_v62, %v2134_v11 }
 0x2e7   :  { %2891 = vmatpush1.bf16.msra.mxu0 %v11135_v7  ;;  %2932 = vmatpush1.bf16.msra.mxu1 %v11137_v52  ;;  %v2142_v52 = vld [vmem:[%s13382_s1 + $0x3f0] sm:$0xff] }
 0x2e8   :  { %2892 = vmatprep.subr.bf16.mxu0 %v11141_v42  ;;  %2933 = vmatprep.subr.bf16.mxu1 %v11143_v0  ;;  %v11189_v0 = vcombine.high %v2138_v55, %v2142_v52  ;;  %v11191_v42 = vcombine.high %v2139_v50, %v2143_v27  ;;  %v11195_v7 = vcombine.low %v2138_v55, %v2142_v52  ;;  %v8440_v55 = vld [vmem:[%s13383_s0 + $0x98] sm:$0xff] }
 0x2eb   :  { %2893 = vmatpush1.bf16.msra.mxu0 %v11159_v15  ;;  %2934 = vmatpush1.bf16.msra.mxu1 %v11161_v9  ;;  %v11197_v15 = vcombine.low %v2139_v50, %v2143_v27 }
 0x2ec   :  { %2894 = vmatprep.subr.bf16.mxu0 %v11165_v45  ;;  %2935 = vmatprep.subr.bf16.mxu1 %v11167_v28 }
 0x2ef   :  { %2895 = vmatpush1.bf16.msra.mxu0 %v11183_v17  ;;  %2936 = vmatpush1.bf16.msra.mxu1 %v11185_v60 }
 0x2f0   :  { %2896 = vmatprep.subr.bf16.mxu0 %v11189_v0  ;;  %2937 = vmatprep.subr.bf16.mxu1 %v11191_v42 }
 0x2f3   :  { %2897 = vmatpush1.bf16.msra.mxu0 %v11195_v7  ;;  %2938 = vmatpush1.bf16.msra.mxu1 %v11197_v15 }
 0x2f4   :  { %3787 = vmatprep.subr.bf16.mxu0 %v10403_v48  ;;  %3828 = vmatprep.subr.bf16.mxu1 %v10416_v2  ;;  %v13905_v48 = vld [vmem:[#allocation3_spill] sm:$0xff] }
 0x2f5   :  { %v13907_v2 = vld [vmem:[#allocation7_spill] sm:$0xff] }
 0x2f6   :  { %2899 = vmatmul.mubr.bf16.vlgmr.msra.gmra.mrb[20].mxu0 %v10830_v1  ;;  %2940 = vmatmul.mubr.bf16.vlgmr.msra.gmra.mrb[20].mxu1 %v10830_v1  ;;  %v8438_v1 = vld [vmem:[%s13383_s0 + $0x88] sm:$0xff] }
 0x2f7   :  { %3788 = vmatpush1.bf16.msra.mxu0 %v10401_v47  ;;  %3829 = vmatpush1.bf16.msra.mxu1 %v10414_v63  ;;  %v13904_v47 = vld [vmem:[#allocation2_spill] sm:$0xff]  ;;  %v13906_v63 = vld [vmem:[#allocation4_spill] sm:$0xff] }
 0x2f8   :  { %3789 = vmatprep.subr.bf16.mxu0 %v10418_v12  ;;  %3830 = vmatprep.subr.bf16.mxu1 %v10430_v40  ;;  %v13908_v12 = vld [vmem:[#allocation5_spill] sm:$0xff]  ;;  %v13909_v40 = vld [vmem:[#allocation6_spill] sm:$0xff] }
 0x2fb   :  { %3790 = vmatpush1.bf16.msra.mxu0 %v10443_v56  ;;  %3831 = vmatpush1.bf16.msra.mxu1 %v10447_v57  ;;  %v13910_v56 = vld [vmem:[#allocation8_spill] sm:$0xff]  ;;  %v13911_v57 = vld [vmem:[#allocation11_spill] sm:$0xff] }
 0x2fc   :  { %3791 = vmatprep.subr.bf16.mxu0 %v10449_v49  ;;  %3832 = vmatprep.subr.bf16.mxu1 %v10452_v31  ;;  %v13912_v49 = vld [vmem:[#allocation9_spill] sm:$0xff]  ;;  %v13913_v31 = vld [vmem:[#allocation10_spill] sm:$0xff] }
 0x2ff   :  { %3792 = vmatpush1.bf16.msra.mxu0 %v10467_v33  ;;  %3833 = vmatpush1.bf16.msra.mxu1 %v10471_v58  ;;  %v13914_v33 = vld [vmem:[#allocation12_spill] sm:$0xff]  ;;  %v13915_v58 = vld [vmem:[#allocation15_spill] sm:$0xff] }
 0x300   :  { %3793 = vmatprep.subr.bf16.mxu0 %v10473_v4  ;;  %3834 = vmatprep.subr.bf16.mxu1 %v10476_v6  ;;  %v13916_v4 = vld [vmem:[#allocation13_spill] sm:$0xff]  ;;  %v13917_v6 = vld [vmem:[#allocation14_spill] sm:$0xff] }
 0x303   :  { %3794 = vmatpush1.bf16.msra.mxu0 %v10491_v19  ;;  %3835 = vmatpush1.bf16.msra.mxu1 %v10495_v20  ;;  %v13918_v19 = vld [vmem:[#allocation17_spill] sm:$0xff]  ;;  %v13919_v20 = vld [vmem:[#allocation19_spill] sm:$0xff] }
 0x304   :  { %3795 = vmatprep.subr.bf16.mxu0 %v10497_v21  ;;  %3836 = vmatprep.subr.bf16.mxu1 %v10500_v22  ;;  %v13920_v21 = vld [vmem:[#allocation16_spill] sm:$0xff]  ;;  %v13921_v22 = vld [vmem:[#allocation18_spill] sm:$0xff] }
 0x307   :  { %3796 = vmatpush1.bf16.msra.mxu0 %v10515_v35  ;;  %3837 = vmatpush1.bf16.msra.mxu1 %v10519_v36  ;;  %v13922_v35 = vld [vmem:[#allocation20_spill] sm:$0xff]  ;;  %v13923_v36 = vld [vmem:[#allocation21_spill] sm:$0xff] }
 0x308   :  { %3797 = vmatprep.subr.bf16.mxu0 %v10521_v37  ;;  %3838 = vmatprep.subr.bf16.mxu1 %v10524_v38  ;;  %v13924_v37 = vld [vmem:[#allocation22_spill] sm:$0xff]  ;;  %v13925_v38 = vld [vmem:[#allocation24_spill] sm:$0xff] }
 0x30b   :  { %3798 = vmatpush1.bf16.msra.mxu0 %v10539_v51  ;;  %3839 = vmatpush1.bf16.msra.mxu1 %v10543_v53  ;;  %v13926_v51 = vld [vmem:[#allocation23_spill] sm:$0xff]  ;;  %v13927_v53 = vld [vmem:[#allocation25_spill] sm:$0xff] }
 0x30c   :  { %3799 = vmatprep.subr.bf16.mxu0 %v10545_v54  ;;  %3840 = vmatprep.subr.bf16.mxu1 %v10548_v59  ;;  %v13928_v54 = vld [vmem:[#allocation26_spill] sm:$0xff]  ;;  %v13929_v59 = vld [vmem:[#allocation27_spill] sm:$0xff] }
 0x30f   :  { %3800 = vmatpush1.bf16.msra.mxu0 %v10563_v8  ;;  %3841 = vmatpush1.bf16.msra.mxu1 %v10567_v18  ;;  %v13930_v8 = vld [vmem:[#allocation28_spill] sm:$0xff]  ;;  %v13931_v18 = vld [vmem:[#allocation29_spill] sm:$0xff] }
 0x310   :  { %3801 = vmatprep.subr.bf16.mxu0 %v10569_v23  ;;  %3842 = vmatprep.subr.bf16.mxu1 %v10572_v24 }
 0x313   :  { %3802 = vmatpush1.bf16.msra.mxu0 %v10575_v14  ;;  %3843 = vmatpush1.bf16.msra.mxu1 %v10579_v16 }
 0x314   :  { %3803 = vmatprep.subr.bf16.mxu0 %v10590_v3  ;;  %3844 = vmatprep.subr.bf16.mxu1 %v10603_v41 }
 0x317   :  { %3804 = vmatpush1.bf16.msra.mxu0 %v10595_v25  ;;  %3845 = vmatpush1.bf16.msra.mxu1 %v10601_v39 }
 0x318   :  { %3805 = vmatprep.subr.bf16.mxu0 %v10616_v13  ;;  %3846 = vmatprep.subr.bf16.mxu1 %v10626_v10  ;;  %v8437_v13 = vld [vmem:[%s13383_s0 + $0x80] sm:$0xff]  ;;  %v8439_v10 = vld [vmem:[%s13383_s0 + $0x90] sm:$0xff] }
 0x31b   :  { %3806 = vmatpush1.bf16.msra.mxu0 %v13904_v47  ;;  %3847 = vmatpush1.bf16.msra.mxu1 %v13905_v48 }
 0x31c   :  { %3807 = vmatprep.subr.bf16.mxu0 %v13906_v63  ;;  %3848 = vmatprep.subr.bf16.mxu1 %v13907_v2 }
 0x31f   :  { %3808 = vmatpush1.bf16.msra.mxu0 %v13908_v12  ;;  %3849 = vmatpush1.bf16.msra.mxu1 %v13909_v40 }
 0x320   :  { %3809 = vmatprep.subr.bf16.mxu0 %v13910_v56  ;;  %3850 = vmatprep.subr.bf16.mxu1 %v13911_v57 }
 0x323   :  { %3810 = vmatpush1.bf16.msra.mxu0 %v13912_v49  ;;  %3851 = vmatpush1.bf16.msra.mxu1 %v13913_v31  ;;  %v8441_v31 = vld [vmem:[%s13383_s0 + $0xa0] sm:$0xff] }
 0x324   :  { %3811 = vmatprep.subr.bf16.mxu0 %v13914_v33  ;;  %3852 = vmatprep.subr.bf16.mxu1 %v13915_v58  ;;  %v8443_v33 = vld [vmem:[%s13383_s0 + $0xb0] sm:$0xff]  ;;  %v8442_v58 = vld [vmem:[%s13383_s0 + $0xa8] sm:$0xff] }
 0x327   :  { %3812 = vmatpush1.bf16.msra.mxu0 %v13916_v4  ;;  %3853 = vmatpush1.bf16.msra.mxu1 %v13917_v6  ;;  %v8444_v4 = vld [vmem:[%s13383_s0 + $0xb8] sm:$0xff] }
 0x328   :  { %3813 = vmatprep.subr.bf16.mxu0 %v13918_v19  ;;  %3854 = vmatprep.subr.bf16.mxu1 %v13919_v20 }
 0x32b   :  { %3814 = vmatpush1.bf16.msra.mxu0 %v13920_v21  ;;  %3855 = vmatpush1.bf16.msra.mxu1 %v13921_v22 }
 0x32c   :  { %3815 = vmatprep.subr.bf16.mxu0 %v13922_v35  ;;  %3856 = vmatprep.subr.bf16.mxu1 %v13923_v36 }
 0x32f   :  { %3816 = vmatpush1.bf16.msra.mxu0 %v13924_v37  ;;  %3857 = vmatpush1.bf16.msra.mxu1 %v13925_v38 }
 0x330   :  { %3817 = vmatprep.subr.bf16.mxu0 %v13926_v51  ;;  %3858 = vmatprep.subr.bf16.mxu1 %v13927_v53 }
 0x333   :  { %3818 = vmatpush1.bf16.msra.mxu0 %v13928_v54  ;;  %3859 = vmatpush1.bf16.msra.mxu1 %v13929_v59 }
 0x334   :  { %3869 = vmatprep.subr.bf16.mxu0 %v13930_v8  ;;  %3910 = vmatprep.subr.bf16.mxu1 %v13931_v18 }
 0x389   :  { %v2818_v23 = vpop.f32.mrb[16].mxu0  ;;  %v2859_v24 = vpop.f32.mrb[16].mxu1 }
 0x38a   :  { %v2820_v14 = vpop.f32.mrb[17].mxu0  ;;  %v2861_v16 = vpop.f32.mrb[17].mxu1  ;;  %v2957_v62 = vadd.f32 %v8437_v13, %v2818_v23  ;;  %v2959_v11 = vadd.f32 %v8439_v10, %v2859_v24 }
 0x38b   :  { %v2822_v3 = vpop.f32.mrb[18].mxu0  ;;  %v2863_v25 = vpop.f32.mrb[18].mxu1  ;;  %v2958_v52 = vadd.f32 %v8438_v1, %v2820_v14  ;;  %v2960_v5 = vadd.f32 %v8440_v55, %v2861_v16 }
 0x38c   :  { %v2823_v39 = vpop.f32.mrb[19].mxu0  ;;  %v2864_v41 = vpop.f32.mrb[19].mxu1  ;;  %v8445_v43 = vmul.f32 -1.442695, %v2957_v62  ;;  %v8447_v50 = vmul.f32 -1.442695, %v2959_v11 }
 0x38d   :  { %v8446_v27 = vmul.f32 -1.442695, %v2958_v52  ;;  %v8448_v47 = vmul.f32 -1.442695, %v2960_v5 }
 0x38e   :  { %9237 = vpow2.f32 %v8445_v43 }
 0x38f   :  { %9239 = vpow2.f32 %v8447_v50 }
 0x390   :  { %9241 = vpow2.f32 %v8446_v27 }
 0x391   :  { %9243 = vpow2.f32 %v8448_v47 }
 0x398   :  { %v9238_v48 = vpop.eup %9237 }
 0x399   :  { %v9240_v63 = vpop.eup %9239  ;;  %v2983_v40 = vadd.f32 1.0, %v9238_v48 }
 0x39a   :  { %v9242_v2 = vpop.eup %9241  ;;  %v2985_v56 = vadd.f32 1.0, %v9240_v63  ;;  %v13932_v63 = vld [vmem:[#allocation30_spill] sm:$0xff] }
 0x39b   :  { %v9244_v12 = vpop.eup %9243  ;;  %v2984_v57 = vadd.f32 1.0, %v9242_v2  ;;  %9245 = vrcp.f32 %v2983_v40  ;;  %v13933_v2 = vld [vmem:[#allocation31_spill] sm:$0xff]  ;;  %v13935_v40 = vld [vmem:[#allocation33_spill] sm:$0xff] }
 0x39c   :  { %v2986_v49 = vadd.f32 1.0, %v9244_v12  ;;  %9247 = vrcp.f32 %v2985_v56  ;;  %v13934_v12 = vld [vmem:[#allocation32_spill] sm:$0xff] }
 0x39d   :  { %9249 = vrcp.f32 %v2984_v57  ;;  %v13938_v56 = vld [vmem:[#allocation36_spill] sm:$0xff]  ;;  %v13943_v57 = vld [vmem:[#allocation41_spill] sm:$0xff] }
 0x39e   :  { %9251 = vrcp.f32 %v2986_v49  ;;  %v13944_v49 = vld [vmem:[#allocation42_spill] sm:$0xff] }
 0x3a5   :  { %v9246_v18 = vpop.eup %9245 }
 0x3a6   :  { %v9248_v23 = vpop.eup %9247 }
 0x3a7   :  { %v9250_v24 = vpop.eup %9249  ;;  %v3003_v25 = vmul.f32 %v9248_v23, %v10824_v26  ;;  %v13964_v23 = vld [vmem:[#allocation62_spill] sm:$0xff] }
 0x3a8   :  { %v9252_v14 = vpop.eup %9251 }
 0x3a9   :  { %v3004_v13 = vmul.f32 %v9252_v14, %v10826_v29  ;;  %v13966_v14 = vld [vmem:[#allocation64_spill] sm:$0xff] }
 0x3c9   :  { %v2900_v6 = vpop.f32.mrb[20].mxu0  ;;  %v2941_v19 = vpop.f32.mrb[20].mxu1 }
 0x3ca   :  { %v2961_v20 = vadd.f32 %v8441_v31, %v2900_v6  ;;  %v2963_v21 = vadd.f32 %v8443_v33, %v2941_v19  ;;  %v2902_v22 = vpop.f32.mrb[21].mxu0  ;;  %v2943_v35 = vpop.f32.mrb[21].mxu1  ;;  %v13945_v31 = vld [vmem:[#allocation43_spill] sm:$0xff]  ;;  %v13946_v33 = vld [vmem:[#allocation44_spill] sm:$0xff] }
 0x3cb   :  { %v2962_v36 = vadd.f32 %v8442_v58, %v2902_v22  ;;  %v2964_v37 = vadd.f32 %v8444_v4, %v2943_v35  ;;  %v2904_v38 = vpop.f32.mrb[22].mxu0  ;;  %v2945_v51 = vpop.f32.mrb[22].mxu1  ;;  %v13947_v58 = vld [vmem:[#allocation45_spill] sm:$0xff]  ;;  %v13948_v4 = vld [vmem:[#allocation46_spill] sm:$0xff]  ;;  %v13949_v6 = vld [vmem:[#allocation47_spill] sm:$0xff] }
 0x3cc   :  { %v8449_v53 = vmul.f32 -1.442695, %v2961_v20  ;;  %9253 = vtanh.f32 %v2963_v21  ;;  %v2905_v54 = vpop.f32.mrb[23].mxu0  ;;  %v2946_v59 = vpop.f32.mrb[23].mxu1  ;;  %v13950_v19 = vld [vmem:[#allocation48_spill] sm:$0xff]  ;;  %v13951_v20 = vld [vmem:[#allocation49_spill] sm:$0xff] }
 0x3cd   :  { %v8450_v8 = vmul.f32 -1.442695, %v2962_v36  ;;  %9255 = vtanh.f32 %v2964_v37  ;;  %v13952_v21 = vld [vmem:[#allocation50_spill] sm:$0xff]  ;;  %v13953_v22 = vld [vmem:[#allocation51_spill] sm:$0xff]  ;;  %v13954_v35 = vld [vmem:[#allocation52_spill] sm:$0xff] }
 0x3ce   :  { %9257 = vpow2.f32 %v8449_v53  ;;  %v13955_v36 = vld [vmem:[#allocation53_spill] sm:$0xff]  ;;  %v13956_v37 = vld [vmem:[#allocation54_spill] sm:$0xff]  ;;  %v13957_v38 = vld [vmem:[#allocation55_spill] sm:$0xff] }
 0x3cf   :  { %9259 = vpow2.f32 %v8450_v8  ;;  %v13958_v51 = vld [vmem:[#allocation56_spill] sm:$0xff]  ;;  %v13959_v53 = vld [vmem:[#allocation57_spill] sm:$0xff]  ;;  %v13960_v54 = vld [vmem:[#allocation58_spill] sm:$0xff] }
 0x3d0   :  { %v13961_v59 = vld [vmem:[#allocation59_spill] sm:$0xff]  ;;  %v13962_v8 = vld [vmem:[#allocation60_spill] sm:$0xff] }
 0x3d6   :  { %v9254_v16 = vpop.eup %9253 }
 0x3d7   :  { %v9256_v3 = vpop.eup %9255  ;;  %v3005_v39 = vmul.f32 %v9254_v16, %v9246_v18  ;;  %v13963_v18 = vld [vmem:[#allocation61_spill] sm:$0xff] }
 0x3d8   :  { %v9258_v41 = vpop.eup %9257  ;;  %v3006_v10 = vmul.f32 %v9256_v3, %v9250_v24  ;;  %v13965_v24 = vld [vmem:[#allocation63_spill] sm:$0xff]  ;;  %v13967_v16 = vld [vmem:[#allocation65_spill] sm:$0xff]  ;;  %v13968_v3 = vld [vmem:[#allocation66_spill] sm:$0xff] }
 0x3d9   :  { %v9260_v1 = vpop.eup %9259  ;;  %v2987_v62 = vadd.f32 1.0, %v9258_v41  ;;  %v11297_v55 = vadd.f32 %v3005_v39, %v3003_v25  ;;  %v13969_v25 = vld [vmem:[#allocation67_spill] sm:$0xff]  ;;  %v13970_v39 = vld [vmem:[#allocation68_spill] sm:$0xff]  ;;  %v13971_v41 = vld [vmem:[#allocation69_spill] sm:$0xff] }
 0x3da   :  { %v2988_v11 = vadd.f32 1.0, %v9260_v1  ;;  %v11299_v52 = vadd.f32 %v3006_v10, %v3004_v13  ;;  %v13972_v13 = vld [vmem:[#allocation70_spill] sm:$0xff]  ;;  %v13973_v10 = vld [vmem:[#allocation71_spill] sm:$0xff]  ;;  %v13974_v1 = vld [vmem:[#allocation72_spill] sm:$0xff] }
 0x3db   :  { %9261 = vrcp.f32 %v2987_v62  ;;  %v13975_v62 = vld [vmem:[#allocation73_spill] sm:$0xff] }
 0x3dc   :  { %9263 = vtanh.f32 %v11297_v55 }
 0x3dd   :  { %9265 = vrcp.f32 %v2988_v11  ;;  %v13976_v11 = vld [vmem:[#allocation74_spill] sm:$0xff] }
 0x3de   :  { %9267 = vtanh.f32 %v11299_v52 }
 0x3e5   :  { %v9262_v5 = vpop.eup %9261 }
 0x3e6   :  { %v9264_v26 = vpop.eup %9263 }
 0x3e7   :  { %v9266_v43 = vpop.eup %9265  ;;  %v3011_v50 = vmul.f32 %v9264_v26, %v9262_v5  ;;  %v13977_v5 = vld [vmem:[#allocation75_spill] sm:$0xff]  ;;  %v13978_v26 = vld [vmem:[#allocation76_spill] sm:$0xff] }
 0x3e8   :  { %v9268_v27 = vpop.eup %9267 }
 0x3e9   :  { %v3012_v29 = vmul.f32 %v9268_v27, %v9266_v43  ;;  %v11303_v47 = vpack.c.bf16 %v3011_v50, %v3011_v50  ;;  %v4031_v27 = vld [vmem:[%s13382_s1 + $0x48] sm:$0xff] }
 0x3eb   :  { %v3016_v48 = vpack.c.bf16 %v3012_v29, %v3012_v29  ;;  %8451 = vst [vmem:[%s13384_s2 + $0x10] sm:$0xf] %v11303_v47  ;;  %v4035_v29 = vld [vmem:[%s13382_s1 + $0x68] sm:$0xff] }
 0x3ed   :  { %8452 = vst [vmem:[%s13384_s2 + $0x2c] sm:$0xf] %v3016_v48  ;;  %3819 = vmatprep.mubr.bf16.mxu0 %v3016_v48  ;;  %3860 = vmatprep.mubr.bf16.mxu1 %v3016_v48 }
 0x3ee   :  { %3820 = vmatmul.mubr.bf16.vlgmr.msra.gmra.mrb[24].mxu0 %v11303_v47  ;;  %3861 = vmatmul.mubr.bf16.vlgmr.msra.gmra.mrb[24].mxu1 %v11303_v47 }
 0x3ef   :  { %3870 = vmatpush1.bf16.msra.mxu0 %v10790_v61  ;;  %3911 = vmatpush1.bf16.msra.mxu1 %v10792_v34  ;;  %v13936_v61 = vld [vmem:[#allocation34_spill] sm:$0xff]  ;;  %v13937_v34 = vld [vmem:[#allocation35_spill] sm:$0xff] }
 0x3f0   :  { %3901 = vmatprep.mubr.bf16.mxu0 %v3016_v48  ;;  %3942 = vmatprep.mubr.bf16.mxu1 %v3016_v48  ;;  %v11416_v48 = vcombine.high %v4031_v27, %v4035_v29 }
 0x3f1   :  { %3871 = vmatprep.subr.bf16.mxu0 %v10854_v30  ;;  %3912 = vmatprep.subr.bf16.mxu1 %v10856_v32  ;;  %v13939_v30 = vld [vmem:[#allocation37_spill] sm:$0xff]  ;;  %v13940_v32 = vld [vmem:[#allocation38_spill] sm:$0xff] }
 0x3f3   :  { %3872 = vmatpush1.bf16.msra.mxu0 %v10871_v44  ;;  %3913 = vmatpush1.bf16.msra.mxu1 %v10873_v46  ;;  %v13941_v44 = vld [vmem:[#allocation39_spill] sm:$0xff]  ;;  %v13942_v46 = vld [vmem:[#allocation40_spill] sm:$0xff] }
 0x3f4   :  { %3873 = vmatprep.subr.bf16.mxu0 %v13932_v63  ;;  %3914 = vmatprep.subr.bf16.mxu1 %v13933_v2  ;;  %v4042_v63 = vld [vmem:[%s13382_s1 + $0xa0] sm:$0xff]  ;;  %v4039_v2 = vld [vmem:[%s13382_s1 + $0x88] sm:$0xff] }
 0x3f7   :  { %3874 = vmatpush1.bf16.msra.mxu0 %v13934_v12  ;;  %3915 = vmatpush1.bf16.msra.mxu1 %v13935_v40  ;;  %v4043_v12 = vld [vmem:[%s13382_s1 + $0xa8] sm:$0xff] }
 0x3f8   :  { %3875 = vmatprep.subr.bf16.mxu0 %v13936_v61  ;;  %3916 = vmatprep.subr.bf16.mxu1 %v13937_v34  ;;  %v11433_v61 = vcombine.low %v4031_v27, %v4035_v29  ;;  %v4091_v29 = vld [vmem:[%s13382_s1 + $0x228] sm:$0xff] }
 0x3fb   :  { %3876 = vmatpush1.bf16.msra.mxu0 %v13938_v56  ;;  %3917 = vmatpush1.bf16.msra.mxu1 %v13939_v30  ;;  %v11438_v56 = vcombine.high %v4039_v2, %v4043_v12  ;;  %v4046_v30 = vld [vmem:[%s13382_s1 + $0xc0] sm:$0xff] }
 0x3fc   :  { %3877 = vmatprep.subr.bf16.mxu0 %v13940_v32  ;;  %3918 = vmatprep.subr.bf16.mxu1 %v13941_v44  ;;  %v4050_v32 = vld [vmem:[%s13382_s1 + $0xe0] sm:$0xff]  ;;  %v4047_v44 = vld [vmem:[%s13382_s1 + $0xc8] sm:$0xff] }
 0x3ff   :  { %3878 = vmatpush1.bf16.msra.mxu0 %v13942_v46  ;;  %3919 = vmatpush1.bf16.msra.mxu1 %v13943_v57  ;;  %v4051_v46 = vld [vmem:[%s13382_s1 + $0xe8] sm:$0xff] }
 0x400   :  { %3879 = vmatprep.subr.bf16.mxu0 %v13944_v49  ;;  %3920 = vmatprep.subr.bf16.mxu1 %v13945_v31  ;;  %v11457_v49 = vcombine.low %v4039_v2, %v4043_v12  ;;  %v11459_v31 = vcombine.high %v4046_v30, %v4050_v32  ;;  %v4094_v2 = vld [vmem:[%s13382_s1 + $0x240] sm:$0xff] }
 0x401   :  { %v4098_v12 = vld [vmem:[%s13382_s1 + $0x260] sm:$0xff] }
 0x403   :  { %3880 = vmatpush1.bf16.msra.mxu0 %v13946_v33  ;;  %3921 = vmatpush1.bf16.msra.mxu1 %v13947_v58  ;;  %v11462_v33 = vcombine.high %v4047_v44, %v4051_v46  ;;  %v4054_v58 = vld [vmem:[%s13382_s1 + $0x100] sm:$0xff] }
 0x404   :  { %3881 = vmatprep.subr.bf16.mxu0 %v13948_v4  ;;  %3922 = vmatprep.subr.bf16.mxu1 %v13949_v6  ;;  %v4058_v4 = vld [vmem:[%s13382_s1 + $0x120] sm:$0xff]  ;;  %v4055_v6 = vld [vmem:[%s13382_s1 + $0x108] sm:$0xff] }
 0x407   :  { %3882 = vmatpush1.bf16.msra.mxu0 %v13950_v19  ;;  %3923 = vmatpush1.bf16.msra.mxu1 %v13951_v20  ;;  %v4059_v19 = vld [vmem:[%s13382_s1 + $0x128] sm:$0xff]  ;;  %v11477_v20 = vcombine.low %v4046_v30, %v4050_v32  ;;  %v11602_v32 = vcombine.high %v4094_v2, %v4098_v12 }
 0x408   :  { %3883 = vmatprep.subr.bf16.mxu0 %v13952_v21  ;;  %3924 = vmatprep.subr.bf16.mxu1 %v13953_v22  ;;  %v11481_v21 = vcombine.low %v4047_v44, %v4051_v46  ;;  %v11483_v22 = vcombine.high %v4054_v58, %v4058_v4  ;;  %v4095_v30 = vld [vmem:[%s13382_s1 + $0x248] sm:$0xff]  ;;  %v11608_v46 = vcombine.low %v4094_v2, %v4098_v12 }
 0x409   :  { %v4099_v44 = vld [vmem:[%s13382_s1 + $0x268] sm:$0xff] }
 0x40a   :  { %13979 = vst [vmem:[#allocation2_spill] sm:$0xff] %v11608_v46  ;;  %v4119_v2 = vld [vmem:[%s13382_s1 + $0x308] sm:$0xff] }
 0x40b   :  { %3884 = vmatpush1.bf16.msra.mxu0 %v13954_v35  ;;  %3925 = vmatpush1.bf16.msra.mxu1 %v13955_v36  ;;  %v11486_v35 = vcombine.high %v4055_v6, %v4059_v19  ;;  %v4062_v36 = vld [vmem:[%s13382_s1 + $0x140] sm:$0xff] }
 0x40c   :  { %3885 = vmatprep.subr.bf16.mxu0 %v13956_v37  ;;  %3926 = vmatprep.subr.bf16.mxu1 %v13957_v38  ;;  %v4066_v37 = vld [vmem:[%s13382_s1 + $0x160] sm:$0xff]  ;;  %v4063_v38 = vld [vmem:[%s13382_s1 + $0x148] sm:$0xff] }
 0x40f   :  { %3886 = vmatpush1.bf16.msra.mxu0 %v13958_v51  ;;  %3927 = vmatpush1.bf16.msra.mxu1 %v13959_v53  ;;  %v4067_v51 = vld [vmem:[%s13382_s1 + $0x168] sm:$0xff]  ;;  %v11501_v53 = vcombine.low %v4054_v58, %v4058_v4  ;;  %v11610_v58 = vcombine.low %v4095_v30, %v4099_v44  ;;  %v11612_v4 = vcombine.high %v4095_v30, %v4099_v44 }
 0x410   :  { %3887 = vmatprep.subr.bf16.mxu0 %v13960_v54  ;;  %3928 = vmatprep.subr.bf16.mxu1 %v13961_v59  ;;  %v11505_v54 = vcombine.low %v4055_v6, %v4059_v19  ;;  %v11507_v59 = vcombine.high %v4062_v36, %v4066_v37  ;;  %v4102_v6 = vld [vmem:[%s13382_s1 + $0x280] sm:$0xff]  ;;  %v4123_v30 = vld [vmem:[%s13382_s1 + $0x328] sm:$0xff] }
 0x411   :  { %13980 = vst [vmem:[#allocation3_spill] sm:$0xff] %v11610_v58  ;;  %v4106_v19 = vld [vmem:[%s13382_s1 + $0x2a0] sm:$0xff] }
 0x413   :  { %3888 = vmatpush1.bf16.msra.mxu0 %v13962_v8  ;;  %3929 = vmatpush1.bf16.msra.mxu1 %v13963_v18  ;;  %v11510_v8 = vcombine.high %v4063_v38, %v4067_v51  ;;  %v4070_v18 = vld [vmem:[%s13382_s1 + $0x180] sm:$0xff] }
 0x414   :  { %3889 = vmatprep.subr.bf16.mxu0 %v13964_v23  ;;  %3930 = vmatprep.subr.bf16.mxu1 %v13965_v24  ;;  %v4074_v23 = vld [vmem:[%s13382_s1 + $0x1a0] sm:$0xff]  ;;  %v4071_v24 = vld [vmem:[%s13382_s1 + $0x188] sm:$0xff] }
 0x417   :  { %3890 = vmatpush1.bf16.msra.mxu0 %v13966_v14  ;;  %3931 = vmatpush1.bf16.msra.mxu1 %v13967_v16  ;;  %v4075_v14 = vld [vmem:[%s13382_s1 + $0x1a8] sm:$0xff]  ;;  %v11525_v16 = vcombine.low %v4062_v36, %v4066_v37  ;;  %v11626_v37 = vcombine.high %v4102_v6, %v4106_v19 }
 0x418   :  { %3891 = vmatprep.subr.bf16.mxu0 %v13968_v3  ;;  %3932 = vmatprep.subr.bf16.mxu1 %v13969_v25  ;;  %v11529_v3 = vcombine.low %v4063_v38, %v4067_v51  ;;  %v11531_v25 = vcombine.high %v4070_v18, %v4074_v23  ;;  %v4103_v36 = vld [vmem:[%s13382_s1 + $0x288] sm:$0xff]  ;;  %v11632_v51 = vcombine.low %v4102_v6, %v4106_v19 }
 0x419   :  { %13981 = vst [vmem:[#allocation4_spill] sm:$0xff] %v11626_v37  ;;  %v4107_v38 = vld [vmem:[%s13382_s1 + $0x2a8] sm:$0xff]  ;;  %v11682_v6 = vcombine.low %v4119_v2, %v4123_v30  ;;  %v11684_v19 = vcombine.high %v4119_v2, %v4123_v30 }
 0x41a   :  { %13982 = vst [vmem:[#allocation7_spill] sm:$0xff] %v11632_v51 }
 0x41b   :  { %3892 = vmatpush1.bf16.msra.mxu0 %v13970_v39  ;;  %3933 = vmatpush1.bf16.msra.mxu1 %v13971_v41  ;;  %v11534_v39 = vcombine.high %v4071_v24, %v4075_v14  ;;  %v4078_v41 = vld [vmem:[%s13382_s1 + $0x1c0] sm:$0xff]  ;;  %13991 = vst [vmem:[#allocation13_spill] sm:$0xff] %v11682_v6  ;;  %13992 = vst [vmem:[#allocation14_spill] sm:$0xff] %v11684_v19 }
 0x41c   :  { %3893 = vmatprep.subr.bf16.mxu0 %v13972_v13  ;;  %3934 = vmatprep.subr.bf16.mxu1 %v13973_v10  ;;  %v4082_v13 = vld [vmem:[%s13382_s1 + $0x1e0] sm:$0xff]  ;;  %v4079_v10 = vld [vmem:[%s13382_s1 + $0x1c8] sm:$0xff] }
 0x41f   :  { %3894 = vmatpush1.bf16.msra.mxu0 %v13974_v1  ;;  %3935 = vmatpush1.bf16.msra.mxu1 %v13975_v62  ;;  %v4083_v1 = vld [vmem:[%s13382_s1 + $0x1e8] sm:$0xff]  ;;  %v11549_v62 = vcombine.low %v4070_v18, %v4074_v23  ;;  %v11634_v18 = vcombine.low %v4103_v36, %v4107_v38  ;;  %v11636_v23 = vcombine.high %v4103_v36, %v4107_v38  ;;  %v4126_v36 = vld [vmem:[%s13382_s1 + $0x340] sm:$0xff] }
 0x420   :  { %3895 = vmatprep.subr.bf16.mxu0 %v13976_v11  ;;  %3936 = vmatprep.subr.bf16.mxu1 %v13977_v5  ;;  %v11553_v11 = vcombine.low %v4071_v24, %v4075_v14  ;;  %v11555_v5 = vcombine.high %v4078_v41, %v4082_v13  ;;  %v4110_v24 = vld [vmem:[%s13382_s1 + $0x2c0] sm:$0xff] }
 0x421   :  { %13983 = vst [vmem:[#allocation5_spill] sm:$0xff] %v11634_v18  ;;  %13984 = vst [vmem:[#allocation6_spill] sm:$0xff] %v11636_v23  ;;  %v4114_v14 = vld [vmem:[%s13382_s1 + $0x2e0] sm:$0xff] }
 0x422   :  { %v4130_v38 = vld [vmem:[%s13382_s1 + $0x360] sm:$0xff] }
 0x423   :  { %3896 = vmatpush1.bf16.msra.mxu0 %v13978_v26  ;;  %3937 = vmatpush1.bf16.msra.mxu1 %v11161_v9  ;;  %v4030_v9 = vld [vmem:[%s13382_s1 + $0x40] sm:$0xff]  ;;  %v11558_v26 = vcombine.high %v4079_v10, %v4083_v1 }
 0x424   :  { %3897 = vmatprep.subr.bf16.mxu0 %v11165_v45  ;;  %3938 = vmatprep.subr.bf16.mxu1 %v11167_v28  ;;  %v4022_v45 = vld [vmem:[%s13382_s1] sm:$0xff] }
 0x425   :  { %v4026_v28 = vld [vmem:[%s13382_s1 + $0x20] sm:$0xff] }
 0x427   :  { %3898 = vmatpush1.bf16.msra.mxu0 %v11183_v17  ;;  %3939 = vmatpush1.bf16.msra.mxu1 %v11185_v60  ;;  %v4034_v17 = vld [vmem:[%s13382_s1 + $0x60] sm:$0xff] }
 0x428   :  { %3899 = vmatprep.subr.bf16.mxu0 %v11189_v0  ;;  %3940 = vmatprep.subr.bf16.mxu1 %v11191_v42  ;;  %v4023_v0 = vld [vmem:[%s13382_s1 + $0x8] sm:$0xff]  ;;  %v11387_v42 = vcombine.low %v4022_v45, %v4026_v28  ;;  %v11404_v50 = vcombine.high %v4030_v9, %v4034_v17  ;;  %v11429_v40 = vcombine.low %v4030_v9, %v4034_v17 }
 0x429   :  { %v4087_v17 = vld [vmem:[%s13382_s1 + $0x208] sm:$0xff] }
 0x42b   :  { %3900 = vmatpush1.bf16.msra.mxu0 %v11195_v7  ;;  %3941 = vmatpush1.bf16.msra.mxu1 %v11197_v15  ;;  %v11389_v7 = vcombine.high %v4022_v45, %v4026_v28  ;;  %v4027_v15 = vld [vmem:[%s13382_s1 + $0x28] sm:$0xff]  ;;  %v11561_v45 = vcombine.low %v4078_v41, %v4082_v13  ;;  %v11565_v28 = vcombine.low %v4079_v10, %v4083_v1 }
 0x42c   :  { %v11400_v60 = vcombine.low %v4023_v0, %v4027_v15  ;;  %v11402_v43 = vcombine.high %v4023_v0, %v4027_v15  ;;  %v4086_v0 = vld [vmem:[%s13382_s1 + $0x200] sm:$0xff]  ;;  %v4111_v41 = vld [vmem:[%s13382_s1 + $0x2c8] sm:$0xff]  ;;  %v11650_v13 = vcombine.high %v4110_v24, %v4114_v14  ;;  %v11656_v1 = vcombine.low %v4110_v24, %v4114_v14 }
 0x42d   :  { %4790 = vmatprep.subr.bf16.mxu0 %v11389_v7  ;;  %v4090_v15 = vld [vmem:[%s13382_s1 + $0x220] sm:$0xff]  ;;  %v4115_v10 = vld [vmem:[%s13382_s1 + $0x2e8] sm:$0xff]  ;;  %v11698_v14 = vcombine.low %v4126_v36, %v4130_v38 }
 0x42e   :  { %3902 = vmatmul.mubr.bf16.vlgmr.msra.gmra.mrb[28].mxu0 %v11303_v47  ;;  %3943 = vmatmul.mubr.bf16.vlgmr.msra.gmra.mrb[28].mxu1 %v11303_v47  ;;  %v4038_v47 = vld [vmem:[%s13382_s1 + $0x80] sm:$0xff]  ;;  %v11576_v9 = vcombine.high %v4086_v0, %v4090_v15  ;;  %v11581_v27 = vcombine.low %v4086_v0, %v4090_v15  ;;  %13985 = vst [vmem:[#allocation8_spill] sm:$0xff] %v11650_v13  ;;  %13986 = vst [vmem:[#allocation11_spill] sm:$0xff] %v11656_v1  ;;  %v4127_v24 = vld [vmem:[%s13382_s1 + $0x348] sm:$0xff] }
 0x42f   :  { %4831 = vmatprep.subr.bf16.mxu1 %v11402_v43  ;;  %4791 = vmatpush1.bf16.msra.mxu0 %v11387_v42  ;;  %v11435_v34 = vcombine.high %v4038_v47, %v4042_v63  ;;  %v11453_v57 = vcombine.low %v4038_v47, %v4042_v63  ;;  %v11587_v47 = vcombine.low %v4087_v17, %v4091_v29 }
 0x430   :  { %4832 = vmatpush1.bf16.msra.mxu1 %v11400_v60  ;;  %4792 = vmatprep.subr.bf16.mxu0 %v11404_v50  ;;  %v11589_v63 = vcombine.high %v4087_v17, %v4091_v29  ;;  %v11658_v0 = vcombine.low %v4111_v41, %v4115_v10  ;;  %v11660_v15 = vcombine.high %v4111_v41, %v4115_v10  ;;  %v4118_v17 = vld [vmem:[%s13382_s1 + $0x300] sm:$0xff]  ;;  %v4131_v10 = vld [vmem:[%s13382_s1 + $0x368] sm:$0xff] }
 0x431   :  { %4833 = vmatprep.subr.bf16.mxu1 %v11416_v48  ;;  %v4122_v29 = vld [vmem:[%s13382_s1 + $0x320] sm:$0xff]  ;;  %13993 = vst [vmem:[#allocation17_spill] sm:$0xff] %v11698_v14  ;;  %v11700_v41 = vcombine.high %v4126_v36, %v4130_v38  ;;  %v11712_v2 = vcombine.low %v4127_v24, %v4131_v10  ;;  %v11714_v30 = vcombine.high %v4127_v24, %v4131_v10  ;;  %v4135_v38 = vld [vmem:[%s13382_s1 + $0x388] sm:$0xff] }
 0x432   :  { %13987 = vst [vmem:[#allocation9_spill] sm:$0xff] %v11658_v0  ;;  %13988 = vst [vmem:[#allocation10_spill] sm:$0xff] %v11660_v15  ;;  %v11674_v12 = vcombine.high %v4118_v17, %v4122_v29  ;;  %v11680_v44 = vcombine.low %v4118_v17, %v4122_v29  ;;  %v4134_v17 = vld [vmem:[%s13382_s1 + $0x380] sm:$0xff] }
 0x433   :  { %4793 = vmatpush1.bf16.msra.mxu0 %v11429_v40  ;;  %13994 = vst [vmem:[#allocation19_spill] sm:$0xff] %v11700_v41  ;;  %v4138_v29 = vld [vmem:[%s13382_s1 + $0x3a0] sm:$0xff]  ;;  %13995 = vst [vmem:[#allocation16_spill] sm:$0xff] %v11712_v2 }
 0x434   :  { %4834 = vmatpush1.bf16.msra.mxu1 %v11433_v61  ;;  %4794 = vmatprep.subr.bf16.mxu0 %v11435_v34  ;;  %13989 = vst [vmem:[#allocation12_spill] sm:$0xff] %v11674_v12  ;;  %13990 = vst [vmem:[#allocation15_spill] sm:$0xff] %v11680_v44  ;;  %v11716_v36 = vcombine.high %v4134_v17, %v4138_v29  ;;  %v4146_v24 = vld [vmem:[%s13382_s1 + $0x3e0] sm:$0xff]  ;;  %v11735_v10 = vcombine.low %v4134_v17, %v4138_v29 }
 0x435   :  { %4835 = vmatprep.subr.bf16.mxu1 %v11438_v56  ;;  %13996 = vst [vmem:[#allocation18_spill] sm:$0xff] %v11714_v30 }
 0x436   :  { %13997 = vst [vmem:[#allocation20_spill] sm:$0xff] %v11716_v36  ;;  %13999 = vst [vmem:[#allocation22_spill] sm:$0xff] %v11735_v10 }
 0x437   :  { %4795 = vmatpush1.bf16.msra.mxu0 %v11453_v57 }
 0x438   :  { %4836 = vmatpush1.bf16.msra.mxu1 %v11457_v49  ;;  %4796 = vmatprep.subr.bf16.mxu0 %v11459_v31 }
 0x439   :  { %4837 = vmatprep.subr.bf16.mxu1 %v11462_v33 }
 0x43b   :  { %4797 = vmatpush1.bf16.msra.mxu0 %v11477_v20 }
 0x43c   :  { %4838 = vmatpush1.bf16.msra.mxu1 %v11481_v21  ;;  %4798 = vmatprep.subr.bf16.mxu0 %v11483_v22 }
 0x43d   :  { %4839 = vmatprep.subr.bf16.mxu1 %v11486_v35 }
 0x43f   :  { %4799 = vmatpush1.bf16.msra.mxu0 %v11501_v53 }
 0x440   :  { %4840 = vmatpush1.bf16.msra.mxu1 %v11505_v54  ;;  %4800 = vmatprep.subr.bf16.mxu0 %v11507_v59 }
 0x441   :  { %4841 = vmatprep.subr.bf16.mxu1 %v11510_v8 }
 0x443   :  { %4801 = vmatpush1.bf16.msra.mxu0 %v11525_v16 }
 0x444   :  { %4842 = vmatpush1.bf16.msra.mxu1 %v11529_v3  ;;  %4802 = vmatprep.subr.bf16.mxu0 %v11531_v25 }
 0x445   :  { %4843 = vmatprep.subr.bf16.mxu1 %v11534_v39 }
 0x447   :  { %4803 = vmatpush1.bf16.msra.mxu0 %v11549_v62 }
 0x448   :  { %4844 = vmatpush1.bf16.msra.mxu1 %v11553_v11  ;;  %4804 = vmatprep.subr.bf16.mxu0 %v11555_v5 }
 0x449   :  { %4845 = vmatprep.subr.bf16.mxu1 %v11558_v26 }
 0x44b   :  { %4805 = vmatpush1.bf16.msra.mxu0 %v11561_v45 }
 0x44c   :  { %4846 = vmatpush1.bf16.msra.mxu1 %v11565_v28  ;;  %4806 = vmatprep.subr.bf16.mxu0 %v11576_v9 }
 0x44d   :  { %4847 = vmatprep.subr.bf16.mxu1 %v11589_v63 }
 0x44f   :  { %4807 = vmatpush1.bf16.msra.mxu0 %v11581_v27 }
 0x450   :  { %4848 = vmatpush1.bf16.msra.mxu1 %v11587_v47  ;;  %4808 = vmatprep.subr.bf16.mxu0 %v11602_v32 }
 0x451   :  { %4849 = vmatprep.subr.bf16.mxu1 %v11612_v4 }
 0x453   :  { %4809 = vmatpush1.bf16.msra.mxu0 %v11608_v46 }
 0x454   :  { %4850 = vmatpush1.bf16.msra.mxu1 %v11610_v58  ;;  %4810 = vmatprep.subr.bf16.mxu0 %v11626_v37 }
 0x455   :  { %4851 = vmatprep.subr.bf16.mxu1 %v11636_v23 }
 0x457   :  { %4811 = vmatpush1.bf16.msra.mxu0 %v11632_v51 }
 0x458   :  { %4852 = vmatpush1.bf16.msra.mxu1 %v11634_v18  ;;  %4812 = vmatprep.subr.bf16.mxu0 %v11650_v13 }
 0x459   :  { %4853 = vmatprep.subr.bf16.mxu1 %v11660_v15 }
 0x45b   :  { %4813 = vmatpush1.bf16.msra.mxu0 %v11656_v1 }
 0x45c   :  { %4854 = vmatpush1.bf16.msra.mxu1 %v11658_v0  ;;  %4814 = vmatprep.subr.bf16.mxu0 %v11674_v12  ;;  %v4143_v12 = vld [vmem:[%s13382_s1 + $0x3c8] sm:$0xff] }
 0x45d   :  { %4855 = vmatprep.subr.bf16.mxu1 %v11684_v19  ;;  %v4142_v19 = vld [vmem:[%s13382_s1 + $0x3c0] sm:$0xff] }
 0x45e   :  { %v11744_v0 = vcombine.high %v4142_v19, %v4146_v24  ;;  %v11753_v29 = vcombine.low %v4142_v19, %v4146_v24  ;;  %v4025_v19 = vld [vmem:[%s13382_s1 + $0x18] sm:$0xff] }
 0x45f   :  { %4815 = vmatpush1.bf16.msra.mxu0 %v11680_v44  ;;  %v4139_v44 = vld [vmem:[%s13382_s1 + $0x3a8] sm:$0xff] }
 0x460   :  { %4856 = vmatpush1.bf16.msra.mxu1 %v11682_v6  ;;  %4816 = vmatprep.subr.bf16.mxu0 %v11700_v41  ;;  %v11728_v6 = vcombine.high %v4135_v38, %v4139_v44  ;;  %v4147_v41 = vld [vmem:[%s13382_s1 + $0x3e8] sm:$0xff]  ;;  %14000 = vst [vmem:[#allocation24_spill] sm:$0xff] %v11744_v0  ;;  %v11747_v1 = vcombine.low %v4135_v38, %v4139_v44  ;;  %14003 = vst [vmem:[#allocation26_spill] sm:$0xff] %v11753_v29  ;;  %v4024_v44 = vld [vmem:[%s13382_s1 + $0x10] sm:$0xff] }
 0x461   :  { %4857 = vmatprep.subr.bf16.mxu1 %v11714_v30  ;;  %v11750_v17 = vcombine.high %v4143_v12, %v4147_v41  ;;  %v4028_v38 = vld [vmem:[%s13382_s1 + $0x30] sm:$0xff] }
 0x462   :  { %13998 = vst [vmem:[#allocation21_spill] sm:$0xff] %v11728_v6  ;;  %14001 = vst [vmem:[#allocation23_spill] sm:$0xff] %v11747_v1  ;;  %v11770_v24 = vcombine.high %v4024_v44, %v4028_v38 }
 0x463   :  { %4817 = vmatpush1.bf16.msra.mxu0 %v11698_v14  ;;  %14002 = vst [vmem:[#allocation25_spill] sm:$0xff] %v11750_v17  ;;  %v11757_v14 = vcombine.low %v4143_v12, %v4147_v41  ;;  %v4029_v12 = vld [vmem:[%s13382_s1 + $0x38] sm:$0xff]  ;;  %v11776_v41 = vcombine.low %v4024_v44, %v4028_v38  ;;  %v8581_v44 = vld [vmem:[%s13383_s0 + $0xc0] sm:$0xff]  ;;  %v8583_v38 = vld [vmem:[%s13383_s0 + $0xd0] sm:$0xff] }
 0x464   :  { %4818 = vmatprep.subr.bf16.mxu0 %v11716_v36  ;;  %4858 = vmatpush1.bf16.msra.mxu1 %v11712_v2  ;;  %14005 = vst [vmem:[#allocation28_spill] sm:$0xff] %v11770_v24 }
 0x465   :  { %4859 = vmatprep.subr.bf16.mxu1 %v11728_v6  ;;  %14004 = vst [vmem:[#allocation27_spill] sm:$0xff] %v11757_v14 }
 0x467   :  { %4819 = vmatpush1.bf16.msra.mxu0 %v11735_v10 }
 0x468   :  { %4820 = vmatprep.subr.bf16.mxu0 %v11744_v0  ;;  %4860 = vmatpush1.bf16.msra.mxu1 %v11747_v1 }
 0x469   :  { %4861 = vmatprep.subr.bf16.mxu1 %v11750_v17  ;;  %v11780_v17 = vcombine.high %v4025_v19, %v4029_v12 }
 0x46b   :  { %4821 = vmatpush1.bf16.msra.mxu0 %v11753_v29  ;;  %v11778_v29 = vcombine.low %v4025_v19, %v4029_v12  ;;  %14006 = vst [vmem:[#allocation29_spill] sm:$0xff] %v11780_v17  ;;  %v8582_v19 = vld [vmem:[%s13383_s0 + $0xc8] sm:$0xff] }
 0x46c   :  { %4862 = vmatpush1.bf16.msra.mxu1 %v11757_v14  ;;  %4872 = vmatprep.subr.bf16.mxu0 %v11770_v24 }
 0x46d   :  { %4913 = vmatprep.subr.bf16.mxu1 %v11780_v17 }
 0x4c1   :  { %v3821_v0 = vpop.f32.mrb[24].mxu0  ;;  %v3862_v1 = vpop.f32.mrb[24].mxu1 }
 0x4c2   :  { %v3823_v10 = vpop.f32.mrb[25].mxu0  ;;  %v3864_v6 = vpop.f32.mrb[25].mxu1  ;;  %v3960_v12 = vadd.f32 %v8581_v44, %v3821_v0 }
 0x4c3   :  { %v3825_v36 = vpop.f32.mrb[26].mxu0  ;;  %v3866_v2 = vpop.f32.mrb[26].mxu1 }
 0x4c4   :  { %v3826_v30 = vpop.f32.mrb[27].mxu0  ;;  %v3867_v15 = vpop.f32.mrb[27].mxu1  ;;  %v8584_v36 = vld [vmem:[%s13383_s0 + $0xd8] sm:$0xff]  ;;  %v3962_v2 = vadd.f32 %v8583_v38, %v3862_v1  ;;  %v8589_v17 = vmul.f32 -1.442695, %v3960_v12  ;;  %v8585_v1 = vld [vmem:[%s13383_s0 + $0xe0] sm:$0xff] }
 0x4c5   :  { %v3961_v30 = vadd.f32 %v8582_v19, %v3823_v10  ;;  %v3963_v15 = vadd.f32 %v8584_v36, %v3864_v6  ;;  %v8587_v6 = vld [vmem:[%s13383_s0 + $0xf0] sm:$0xff] }
 0x4c6   :  { %v8591_v24 = vmul.f32 -1.442695, %v3962_v2  ;;  %9269 = vpow2.f32 %v8589_v17 }
 0x4c7   :  { %v8590_v14 = vmul.f32 -1.442695, %v3961_v30  ;;  %v8592_v13 = vmul.f32 -1.442695, %v3963_v15 }
 0x4c8   :  { %9271 = vpow2.f32 %v8591_v24 }
 0x4c9   :  { %9273 = vpow2.f32 %v8590_v14 }
 0x4ca   :  { %9275 = vpow2.f32 %v8592_v13  ;;  %v8586_v13 = vld [vmem:[%s13383_s0 + $0xe8] sm:$0xff] }
 0x4d0   :  { %v9270_v18 = vpop.eup %9269 }
 0x4d1   :  { %v3986_v0 = vadd.f32 1.0, %v9270_v18  ;;  %v8588_v18 = vld [vmem:[%s13383_s0 + $0xf8] sm:$0xff] }
 0x4d2   :  { %v9272_v51 = vpop.eup %9271 }
 0x4d3   :  { %v9274_v23 = vpop.eup %9273  ;;  %v3988_v44 = vadd.f32 1.0, %v9272_v51  ;;  %9277 = vrcp.f32 %v3986_v0 }
 0x4d4   :  { %v9276_v37 = vpop.eup %9275  ;;  %v3987_v58 = vadd.f32 1.0, %v9274_v23 }
 0x4d5   :  { %v3989_v46 = vadd.f32 1.0, %v9276_v37  ;;  %9279 = vrcp.f32 %v3988_v44 }
 0x4d6   :  { %9281 = vrcp.f32 %v3987_v58 }
 0x4d7   :  { %9283 = vrcp.f32 %v3989_v46 }
 0x4dd   :  { %v9278_v0 = vpop.eup %9277 }
 0x4df   :  { %v9280_v44 = vpop.eup %9279 }
 0x4e0   :  { %v9282_v58 = vpop.eup %9281  ;;  %v4006_v46 = vmul.f32 %v9280_v44, %v11297_v55  ;;  %v4033_v44 = vld [vmem:[%s13382_s1 + $0x58] sm:$0xff] }
 0x501   :  { %v3903_v51 = vpop.f32.mrb[28].mxu0  ;;  %v3944_v37 = vpop.f32.mrb[28].mxu1 }
 0x502   :  { %v3964_v23 = vadd.f32 %v8585_v1, %v3903_v51  ;;  %v3966_v14 = vadd.f32 %v8587_v6, %v3944_v37  ;;  %v3905_v10 = vpop.f32.mrb[29].mxu0  ;;  %v3946_v17 = vpop.f32.mrb[29].mxu1 }
 0x503   :  { %v3965_v24 = vadd.f32 %v8586_v13, %v3905_v10  ;;  %v3967_v38 = vadd.f32 %v8588_v18, %v3946_v17  ;;  %v3907_v19 = vpop.f32.mrb[30].mxu0  ;;  %v3948_v12 = vpop.f32.mrb[30].mxu1 }
 0x504   :  { %v8593_v36 = vmul.f32 -1.442695, %v3964_v23  ;;  %9285 = vtanh.f32 %v3966_v14  ;;  %v3908_v2 = vpop.f32.mrb[31].mxu0  ;;  %v3949_v30 = vpop.f32.mrb[31].mxu1 }
 0x505   :  { %v8594_v15 = vmul.f32 -1.442695, %v3965_v24  ;;  %9287 = vtanh.f32 %v3967_v38  ;;  %v9284_v1 = vpop.eup %9283 }
 0x506   :  { %9289 = vpow2.f32 %v8593_v36  ;;  %v4007_v37 = vmul.f32 %v9284_v1, %v11299_v52 }
 0x507   :  { %9291 = vpow2.f32 %v8594_v15  ;;  %v4032_v15 = vld [vmem:[%s13382_s1 + $0x50] sm:$0xff] }
 0x50e   :  { %v9286_v6 = vpop.eup %9285 }
 0x50f   :  { %v9288_v51 = vpop.eup %9287  ;;  %v4008_v13 = vmul.f32 %v9286_v6, %v9278_v0  ;;  %v4036_v0 = vld [vmem:[%s13382_s1 + $0x70] sm:$0xff] }
 0x510   :  { %v9290_v18 = vpop.eup %9289  ;;  %v4009_v23 = vmul.f32 %v9288_v51, %v9282_v58  ;;  %v4037_v58 = vld [vmem:[%s13382_s1 + $0x78] sm:$0xff]  ;;  %v4040_v6 = vld [vmem:[%s13382_s1 + $0x90] sm:$0xff]  ;;  %v11840_v51 = vcombine.high %v4032_v15, %v4036_v0 }
 0x511   :  { %v9292_v14 = vpop.eup %9291  ;;  %v3990_v10 = vadd.f32 1.0, %v9290_v18  ;;  %v11810_v17 = vadd.f32 %v4008_v13, %v4006_v46  ;;  %v11842_v46 = vcombine.high %v4033_v44, %v4037_v58  ;;  %v4044_v13 = vld [vmem:[%s13382_s1 + $0xb0] sm:$0xff]  ;;  %v4041_v18 = vld [vmem:[%s13382_s1 + $0x98] sm:$0xff] }
 0x512   :  { %v3991_v24 = vadd.f32 1.0, %v9292_v14  ;;  %v11812_v38 = vadd.f32 %v4009_v23, %v4007_v37  ;;  %v4045_v37 = vld [vmem:[%s13382_s1 + $0xb8] sm:$0xff]  ;;  %v11857_v23 = vcombine.low %v4032_v15, %v4036_v0  ;;  %v11859_v14 = vcombine.low %v4033_v44, %v4037_v58  ;;  %v4056_v44 = vld [vmem:[%s13382_s1 + $0x110] sm:$0xff] }
 0x513   :  { %9293 = vrcp.f32 %v3990_v10  ;;  %v11861_v10 = vcombine.high %v4040_v6, %v4044_v13  ;;  %v4060_v58 = vld [vmem:[%s13382_s1 + $0x130] sm:$0xff] }
 0x514   :  { %9295 = vtanh.f32 %v11810_v17 }
 0x515   :  { %9297 = vrcp.f32 %v3991_v24  ;;  %14007 = vst [vmem:[#allocation30_spill] sm:$0xff] %v11861_v10  ;;  %v11863_v24 = vcombine.high %v4041_v18, %v4045_v37 }
 0x516   :  { %9299 = vtanh.f32 %v11812_v38 }
 0x517   :  { %14008 = vst [vmem:[#allocation31_spill] sm:$0xff] %v11863_v24 }
 0x51d   :  { %v9294_v19 = vpop.eup %9293 }
 0x51e   :  { %v9296_v55 = vpop.eup %9295 }
 0x51f   :  { %v9298_v12 = vpop.eup %9297  ;;  %v4014_v36 = vmul.f32 %v9296_v55, %v9294_v19  ;;  %v4048_v19 = vld [vmem:[%s13382_s1 + $0xd0] sm:$0xff] }
 0x520   :  { %v9300_v2 = vpop.eup %9299  ;;  %v4052_v55 = vld [vmem:[%s13382_s1 + $0xf0] sm:$0xff] }
 0x521   :  { %v4015_v52 = vmul.f32 %v9300_v2, %v9298_v12  ;;  %v11816_v30 = vpack.c.bf16 %v4014_v36, %v4014_v36  ;;  %v4049_v12 = vld [vmem:[%s13382_s1 + $0xd8] sm:$0xff]  ;;  %v11881_v2 = vcombine.low %v4040_v6, %v4044_v13  ;;  %v11887_v15 = vcombine.high %v4048_v19, %v4052_v55 }
 0x522   :  { %v4053_v36 = vld [vmem:[%s13382_s1 + $0xf8] sm:$0xff]  ;;  %v11905_v13 = vcombine.low %v4048_v19, %v4052_v55 }
 0x523   :  { %v4019_v1 = vpack.c.bf16 %v4015_v52, %v4015_v52  ;;  %8595 = vst [vmem:[%s13384_s2 + $0x18] sm:$0xf] %v11816_v30  ;;  %14009 = vst [vmem:[#allocation32_spill] sm:$0xff] %v11881_v2  ;;  %v11883_v52 = vcombine.low %v4041_v18, %v4045_v37  ;;  %v11889_v0 = vcombine.high %v4049_v12, %v4053_v36  ;;  %v4061_v6 = vld [vmem:[%s13382_s1 + $0x138] sm:$0xff] }
 0x524   :  { %14011 = vst [vmem:[#allocation34_spill] sm:$0xff] %v11887_v15  ;;  %14013 = vst [vmem:[#allocation36_spill] sm:$0xff] %v11905_v13  ;;  %v11907_v18 = vcombine.low %v4049_v12, %v4053_v36  ;;  %v11911_v37 = vcombine.high %v4056_v44, %v4060_v58  ;;  %v4065_v19 = vld [vmem:[%s13382_s1 + $0x158] sm:$0xff]  ;;  %v11929_v12 = vcombine.low %v4056_v44, %v4060_v58 }
 0x525   :  { %8596 = vst [vmem:[%s13384_s2 + $0x24] sm:$0xf] %v4019_v1  ;;  %4822 = vmatprep.mubr.bf16.mxu0 %v4019_v1  ;;  %4863 = vmatprep.mubr.bf16.mxu1 %v4019_v1  ;;  %14010 = vst [vmem:[#allocation33_spill] sm:$0xff] %v11883_v52  ;;  %v4069_v55 = vld [vmem:[%s13382_s1 + $0x178] sm:$0xff] }
 0x526   :  { %4823 = vmatmul.mubr.bf16.vlgmr.msra.gmra.mrb[32].mxu0 %v11816_v30  ;;  %4864 = vmatmul.mubr.bf16.vlgmr.msra.gmra.mrb[32].mxu1 %v11816_v30  ;;  %14012 = vst [vmem:[#allocation35_spill] sm:$0xff] %v11889_v0  ;;  %14014 = vst [vmem:[#allocation37_spill] sm:$0xff] %v11907_v18  ;;  %v4073_v44 = vld [vmem:[%s13382_s1 + $0x198] sm:$0xff] }
 0x527   :  { %4873 = vmatpush1.bf16.msra.mxu0 %v11776_v41  ;;  %4914 = vmatpush1.bf16.msra.mxu1 %v11778_v29  ;;  %14015 = vst [vmem:[#allocation38_spill] sm:$0xff] %v11911_v37  ;;  %14017 = vst [vmem:[#allocation40_spill] sm:$0xff] %v11929_v12  ;;  %v4077_v58 = vld [vmem:[%s13382_s1 + $0x1b8] sm:$0xff] }
 0x528   :  { %4904 = vmatprep.mubr.bf16.mxu0 %v4019_v1  ;;  %4945 = vmatprep.mubr.bf16.mxu1 %v4019_v1  ;;  %v4057_v1 = vld [vmem:[%s13382_s1 + $0x118] sm:$0xff] }
 0x529   :  { %4874 = vmatprep.subr.bf16.mxu0 %v11840_v51  ;;  %4915 = vmatprep.subr.bf16.mxu1 %v11842_v46  ;;  %v11931_v36 = vcombine.low %v4057_v1, %v4061_v6 }
 0x52b   :  { %4875 = vmatpush1.bf16.msra.mxu0 %v11857_v23  ;;  %4916 = vmatpush1.bf16.msra.mxu1 %v11859_v14  ;;  %14018 = vst [vmem:[#allocation41_spill] sm:$0xff] %v11931_v36 }
 0x52c   :  { %4876 = vmatprep.subr.bf16.mxu0 %v11861_v10  ;;  %4917 = vmatprep.subr.bf16.mxu1 %v11863_v24  ;;  %v11913_v24 = vcombine.high %v4057_v1, %v4061_v6  ;;  %v4064_v10 = vld [vmem:[%s13382_s1 + $0x150] sm:$0xff]  ;;  %v11955_v6 = vcombine.low %v4065_v19, %v4069_v55 }
 0x52e   :  { %14016 = vst [vmem:[#allocation39_spill] sm:$0xff] %v11913_v24  ;;  %14022 = vst [vmem:[#allocation45_spill] sm:$0xff] %v11955_v6 }
 0x52f   :  { %4877 = vmatpush1.bf16.msra.mxu0 %v11881_v2  ;;  %4918 = vmatpush1.bf16.msra.mxu1 %v11883_v52  ;;  %v4068_v52 = vld [vmem:[%s13382_s1 + $0x170] sm:$0xff] }
 0x530   :  { %4878 = vmatprep.subr.bf16.mxu0 %v11887_v15  ;;  %4919 = vmatprep.subr.bf16.mxu1 %v11889_v0  ;;  %v11935_v0 = vcombine.high %v4064_v10, %v4068_v52  ;;  %v11937_v15 = vcombine.high %v4065_v19, %v4069_v55  ;;  %v4072_v2 = vld [vmem:[%s13382_s1 + $0x190] sm:$0xff]  ;;  %v11953_v1 = vcombine.low %v4064_v10, %v4068_v52  ;;  %v4081_v10 = vld [vmem:[%s13382_s1 + $0x1d8] sm:$0xff] }
 0x531   :  { %v4085_v52 = vld [vmem:[%s13382_s1 + $0x1f8] sm:$0xff]  ;;  %v11979_v55 = vcombine.low %v4073_v44, %v4077_v58 }
 0x532   :  { %14019 = vst [vmem:[#allocation42_spill] sm:$0xff] %v11935_v0  ;;  %14020 = vst [vmem:[#allocation43_spill] sm:$0xff] %v11937_v15 }
 0x533   :  { %4879 = vmatpush1.bf16.msra.mxu0 %v11905_v13  ;;  %4920 = vmatpush1.bf16.msra.mxu1 %v11907_v18  ;;  %v4076_v18 = vld [vmem:[%s13382_s1 + $0x1b0] sm:$0xff]  ;;  %14021 = vst [vmem:[#allocation44_spill] sm:$0xff] %v11953_v1  ;;  %14026 = vst [vmem:[#allocation49_spill] sm:$0xff] %v11979_v55 }
 0x534   :  { %4880 = vmatprep.subr.bf16.mxu0 %v11911_v37  ;;  %4921 = vmatprep.subr.bf16.mxu1 %v11913_v24  ;;  %v11959_v24 = vcombine.high %v4072_v2, %v4076_v18  ;;  %v11961_v37 = vcombine.high %v4073_v44, %v4077_v58  ;;  %v4080_v13 = vld [vmem:[%s13382_s1 + $0x1d0] sm:$0xff]  ;;  %v11977_v19 = vcombine.low %v4072_v2, %v4076_v18  ;;  %v4089_v2 = vld [vmem:[%s13382_s1 + $0x218] sm:$0xff] }
 0x535   :  { %v4093_v18 = vld [vmem:[%s13382_s1 + $0x238] sm:$0xff]  ;;  %v12003_v58 = vcombine.low %v4081_v10, %v4085_v52 }
 0x536   :  { %14023 = vst [vmem:[#allocation46_spill] sm:$0xff] %v11959_v24  ;;  %14024 = vst [vmem:[#allocation47_spill] sm:$0xff] %v11961_v37 }
 0x537   :  { %4881 = vmatpush1.bf16.msra.mxu0 %v11929_v12  ;;  %4922 = vmatpush1.bf16.msra.mxu1 %v11931_v36  ;;  %v4084_v36 = vld [vmem:[%s13382_s1 + $0x1f0] sm:$0xff]  ;;  %14025 = vst [vmem:[#allocation48_spill] sm:$0xff] %v11977_v19  ;;  %14030 = vst [vmem:[#allocation53_spill] sm:$0xff] %v12003_v58 }
 0x538   :  { %4882 = vmatprep.subr.bf16.mxu0 %v11935_v0  ;;  %4923 = vmatprep.subr.bf16.mxu1 %v11937_v15  ;;  %v11983_v15 = vcombine.high %v4080_v13, %v4084_v36  ;;  %v11985_v0 = vcombine.high %v4081_v10, %v4085_v52  ;;  %v4088_v12 = vld [vmem:[%s13382_s1 + $0x210] sm:$0xff]  ;;  %v12001_v44 = vcombine.low %v4080_v13, %v4084_v36  ;;  %v4097_v13 = vld [vmem:[%s13382_s1 + $0x258] sm:$0xff] }
 0x539   :  { %v4101_v36 = vld [vmem:[%s13382_s1 + $0x278] sm:$0xff]  ;;  %v12027_v52 = vcombine.low %v4089_v2, %v4093_v18 }
 0x53a   :  { %14027 = vst [vmem:[#allocation50_spill] sm:$0xff] %v11983_v15  ;;  %14028 = vst [vmem:[#allocation51_spill] sm:$0xff] %v11985_v0 }
 0x53b   :  { %4883 = vmatpush1.bf16.msra.mxu0 %v11953_v1  ;;  %4924 = vmatpush1.bf16.msra.mxu1 %v11955_v6  ;;  %v4092_v6 = vld [vmem:[%s13382_s1 + $0x230] sm:$0xff]  ;;  %14029 = vst [vmem:[#allocation52_spill] sm:$0xff] %v12001_v44  ;;  %14034 = vst [vmem:[#allocation57_spill] sm:$0xff] %v12027_v52 }
 0x53c   :  { %4884 = vmatprep.subr.bf16.mxu0 %v11959_v24  ;;  %4925 = vmatprep.subr.bf16.mxu1 %v11961_v37  ;;  %v12007_v37 = vcombine.high %v4088_v12, %v4092_v6  ;;  %v12009_v24 = vcombine.high %v4089_v2, %v4093_v18  ;;  %v4096_v1 = vld [vmem:[%s13382_s1 + $0x250] sm:$0xff]  ;;  %v12025_v10 = vcombine.low %v4088_v12, %v4092_v6  ;;  %v4105_v12 = vld [vmem:[%s13382_s1 + $0x298] sm:$0xff] }
 0x53d   :  { %v4109_v6 = vld [vmem:[%s13382_s1 + $0x2b8] sm:$0xff]  ;;  %v12051_v18 = vcombine.low %v4097_v13, %v4101_v36 }
 0x53e   :  { %14031 = vst [vmem:[#allocation54_spill] sm:$0xff] %v12007_v37  ;;  %14032 = vst [vmem:[#allocation55_spill] sm:$0xff] %v12009_v24 }
 0x53f   :  { %4885 = vmatpush1.bf16.msra.mxu0 %v11977_v19  ;;  %4926 = vmatpush1.bf16.msra.mxu1 %v11979_v55  ;;  %v4100_v55 = vld [vmem:[%s13382_s1 + $0x270] sm:$0xff]  ;;  %14033 = vst [vmem:[#allocation56_spill] sm:$0xff] %v12025_v10  ;;  %14038 = vst [vmem:[#allocation61_spill] sm:$0xff] %v12051_v18 }
 0x540   :  { %4886 = vmatprep.subr.bf16.mxu0 %v11983_v15  ;;  %4927 = vmatprep.subr.bf16.mxu1 %v11985_v0  ;;  %v12031_v0 = vcombine.high %v4096_v1, %v4100_v55  ;;  %v12033_v15 = vcombine.high %v4097_v13, %v4101_v36  ;;  %v4104_v19 = vld [vmem:[%s13382_s1 + $0x290] sm:$0xff]  ;;  %v12049_v2 = vcombine.low %v4096_v1, %v4100_v55  ;;  %v4113_v1 = vld [vmem:[%s13382_s1 + $0x2d8] sm:$0xff] }
 0x541   :  { %v4117_v55 = vld [vmem:[%s13382_s1 + $0x2f8] sm:$0xff]  ;;  %v12075_v36 = vcombine.low %v4105_v12, %v4109_v6 }
 0x542   :  { %14035 = vst [vmem:[#allocation58_spill] sm:$0xff] %v12031_v0  ;;  %14036 = vst [vmem:[#allocation59_spill] sm:$0xff] %v12033_v15 }
 0x543   :  { %4887 = vmatpush1.bf16.msra.mxu0 %v12001_v44  ;;  %4928 = vmatpush1.bf16.msra.mxu1 %v12003_v58  ;;  %v4108_v58 = vld [vmem:[%s13382_s1 + $0x2b0] sm:$0xff]  ;;  %14037 = vst [vmem:[#allocation60_spill] sm:$0xff] %v12049_v2  ;;  %14042 = vst [vmem:[#allocation65_spill] sm:$0xff] %v12075_v36 }
 0x544   :  { %4888 = vmatprep.subr.bf16.mxu0 %v12007_v37  ;;  %4929 = vmatprep.subr.bf16.mxu1 %v12009_v24  ;;  %v12055_v24 = vcombine.high %v4104_v19, %v4108_v58  ;;  %v12057_v37 = vcombine.high %v4105_v12, %v4109_v6  ;;  %v4112_v44 = vld [vmem:[%s13382_s1 + $0x2d0] sm:$0xff]  ;;  %v12073_v13 = vcombine.low %v4104_v19, %v4108_v58  ;;  %v4121_v19 = vld [vmem:[%s13382_s1 + $0x318] sm:$0xff] }
 0x545   :  { %v4125_v58 = vld [vmem:[%s13382_s1 + $0x338] sm:$0xff]  ;;  %v12099_v6 = vcombine.low %v4113_v1, %v4117_v55 }
 0x546   :  { %14039 = vst [vmem:[#allocation62_spill] sm:$0xff] %v12055_v24  ;;  %14040 = vst [vmem:[#allocation63_spill] sm:$0xff] %v12057_v37 }
 0x547   :  { %4889 = vmatpush1.bf16.msra.mxu0 %v12025_v10  ;;  %4930 = vmatpush1.bf16.msra.mxu1 %v12027_v52  ;;  %v4116_v52 = vld [vmem:[%s13382_s1 + $0x2f0] sm:$0xff]  ;;  %14041 = vst [vmem:[#allocation64_spill] sm:$0xff] %v12073_v13  ;;  %14046 = vst [vmem:[#allocation69_spill] sm:$0xff] %v12099_v6 }
 0x548   :  { %4890 = vmatprep.subr.bf16.mxu0 %v12031_v0  ;;  %4931 = vmatprep.subr.bf16.mxu1 %v12033_v15  ;;  %v12079_v15 = vcombine.high %v4112_v44, %v4116_v52  ;;  %v12081_v0 = vcombine.high %v4113_v1, %v4117_v55  ;;  %v4120_v10 = vld [vmem:[%s13382_s1 + $0x310] sm:$0xff]  ;;  %v12097_v12 = vcombine.low %v4112_v44, %v4116_v52  ;;  %v4129_v44 = vld [vmem:[%s13382_s1 + $0x358] sm:$0xff] }
 0x549   :  { %v4133_v52 = vld [vmem:[%s13382_s1 + $0x378] sm:$0xff]  ;;  %v12123_v55 = vcombine.low %v4121_v19, %v4125_v58 }
 0x54a   :  { %14043 = vst [vmem:[#allocation66_spill] sm:$0xff] %v12079_v15  ;;  %14044 = vst [vmem:[#allocation67_spill] sm:$0xff] %v12081_v0 }
 0x54b   :  { %4891 = vmatpush1.bf16.msra.mxu0 %v12049_v2  ;;  %4932 = vmatpush1.bf16.msra.mxu1 %v12051_v18  ;;  %v4124_v18 = vld [vmem:[%s13382_s1 + $0x330] sm:$0xff]  ;;  %14045 = vst [vmem:[#allocation68_spill] sm:$0xff] %v12097_v12  ;;  %14050 = vst [vmem:[#allocation73_spill] sm:$0xff] %v12123_v55 }
 0x54c   :  { %4892 = vmatprep.subr.bf16.mxu0 %v12055_v24  ;;  %4933 = vmatprep.subr.bf16.mxu1 %v12057_v37  ;;  %v12103_v37 = vcombine.high %v4120_v10, %v4124_v18  ;;  %v12105_v24 = vcombine.high %v4121_v19, %v4125_v58  ;;  %v4128_v2 = vld [vmem:[%s13382_s1 + $0x350] sm:$0xff]  ;;  %v12121_v1 = vcombine.low %v4120_v10, %v4124_v18  ;;  %v4137_v10 = vld [vmem:[%s13382_s1 + $0x398] sm:$0xff] }
 0x54d   :  { %v4141_v18 = vld [vmem:[%s13382_s1 + $0x3b8] sm:$0xff]  ;;  %v12147_v58 = vcombine.low %v4129_v44, %v4133_v52 }
 0x54e   :  { %14047 = vst [vmem:[#allocation70_spill] sm:$0xff] %v12103_v37  ;;  %14048 = vst [vmem:[#allocation71_spill] sm:$0xff] %v12105_v24 }
 0x54f   :  { %4893 = vmatpush1.bf16.msra.mxu0 %v12073_v13  ;;  %4934 = vmatpush1.bf16.msra.mxu1 %v12075_v36  ;;  %v4132_v36 = vld [vmem:[%s13382_s1 + $0x370] sm:$0xff]  ;;  %14049 = vst [vmem:[#allocation72_spill] sm:$0xff] %v12121_v1 }
 0x550   :  { %4894 = vmatprep.subr.bf16.mxu0 %v12079_v15  ;;  %4935 = vmatprep.subr.bf16.mxu1 %v12081_v0  ;;  %v12127_v0 = vcombine.high %v4128_v2, %v4132_v36  ;;  %v12129_v15 = vcombine.high %v4129_v44, %v4133_v52  ;;  %v4136_v13 = vld [vmem:[%s13382_s1 + $0x390] sm:$0xff]  ;;  %v12145_v19 = vcombine.low %v4128_v2, %v4132_v36  ;;  %v4145_v2 = vld [vmem:[%s13382_s1 + $0x3d8] sm:$0xff] }
 0x551   :  { %v4149_v36 = vld [vmem:[%s13382_s1 + $0x3f8] sm:$0xff]  ;;  %v12171_v52 = vcombine.low %v4137_v10, %v4141_v18 }
 0x552   :  { %14051 = vst [vmem:[#allocation74_spill] sm:$0xff] %v12127_v0  ;;  %14052 = vst [vmem:[#allocation75_spill] sm:$0xff] %v12129_v15 }
 0x553   :  { %4895 = vmatpush1.bf16.msra.mxu0 %v12097_v12  ;;  %4936 = vmatpush1.bf16.msra.mxu1 %v12099_v6  ;;  %v4140_v6 = vld [vmem:[%s13382_s1 + $0x3b0] sm:$0xff]  ;;  %14053 = vst [vmem:[#allocation76_spill] sm:$0xff] %v12145_v19 }
 0x554   :  { %4896 = vmatprep.subr.bf16.mxu0 %v12103_v37  ;;  %4937 = vmatprep.subr.bf16.mxu1 %v12105_v24  ;;  %v12151_v24 = vcombine.high %v4136_v13, %v4140_v6  ;;  %v12153_v37 = vcombine.high %v4137_v10, %v4141_v18  ;;  %v4144_v12 = vld [vmem:[%s13382_s1 + $0x3d0] sm:$0xff]  ;;  %v12169_v44 = vcombine.low %v4136_v13, %v4140_v6 }
 0x557   :  { %4897 = vmatpush1.bf16.msra.mxu0 %v12121_v1  ;;  %4938 = vmatpush1.bf16.msra.mxu1 %v12123_v55  ;;  %v4148_v55 = vld [vmem:[%s13382_s1 + $0x3f0] sm:$0xff] }
 0x558   :  { %4898 = vmatprep.subr.bf16.mxu0 %v12127_v0  ;;  %4939 = vmatprep.subr.bf16.mxu1 %v12129_v15  ;;  %v12175_v15 = vcombine.high %v4144_v12, %v4148_v55  ;;  %v12177_v0 = vcombine.high %v4145_v2, %v4149_v36  ;;  %v12181_v1 = vcombine.low %v4144_v12, %v4148_v55  ;;  %v8728_v12 = vld [vmem:[%s13383_s0 + $0x118] sm:$0xff] }
 0x55b   :  { %4899 = vmatpush1.bf16.msra.mxu0 %v12145_v19  ;;  %4940 = vmatpush1.bf16.msra.mxu1 %v12147_v58  ;;  %v12183_v19 = vcombine.low %v4145_v2, %v4149_v36 }
 0x55c   :  { %4900 = vmatprep.subr.bf16.mxu0 %v12151_v24  ;;  %4941 = vmatprep.subr.bf16.mxu1 %v12153_v37 }
 0x55f   :  { %4901 = vmatpush1.bf16.msra.mxu0 %v12169_v44  ;;  %4942 = vmatpush1.bf16.msra.mxu1 %v12171_v52 }
 0x560   :  { %4902 = vmatprep.subr.bf16.mxu0 %v12175_v15  ;;  %4943 = vmatprep.subr.bf16.mxu1 %v12177_v0 }
 0x563   :  { %4903 = vmatpush1.bf16.msra.mxu0 %v12181_v1  ;;  %4944 = vmatpush1.bf16.msra.mxu1 %v12183_v19 }
 0x564   :  { %5791 = vmatprep.subr.bf16.mxu0 %v11389_v7  ;;  %5832 = vmatprep.subr.bf16.mxu1 %v11402_v43  ;;  %v14055_v7 = vld [vmem:[#allocation3_spill] sm:$0xff]  ;;  %v14057_v43 = vld [vmem:[#allocation6_spill] sm:$0xff] }
 0x566   :  { %4905 = vmatmul.mubr.bf16.vlgmr.msra.gmra.mrb[36].mxu0 %v11816_v30  ;;  %4946 = vmatmul.mubr.bf16.vlgmr.msra.gmra.mrb[36].mxu1 %v11816_v30  ;;  %v8726_v30 = vld [vmem:[%s13383_s0 + $0x108] sm:$0xff] }
 0x567   :  { %5792 = vmatpush1.bf16.msra.mxu0 %v11387_v42  ;;  %5833 = vmatpush1.bf16.msra.mxu1 %v11400_v60  ;;  %v14054_v42 = vld [vmem:[#allocation2_spill] sm:$0xff]  ;;  %v14056_v60 = vld [vmem:[#allocation4_spill] sm:$0xff] }
 0x568   :  { %5793 = vmatprep.subr.bf16.mxu0 %v11404_v50  ;;  %5834 = vmatprep.subr.bf16.mxu1 %v11416_v48  ;;  %v14058_v50 = vld [vmem:[#allocation7_spill] sm:$0xff]  ;;  %v14059_v48 = vld [vmem:[#allocation5_spill] sm:$0xff] }
 0x56b   :  { %5794 = vmatpush1.bf16.msra.mxu0 %v11429_v40  ;;  %5835 = vmatpush1.bf16.msra.mxu1 %v11433_v61  ;;  %v14060_v40 = vld [vmem:[#allocation8_spill] sm:$0xff]  ;;  %v14061_v61 = vld [vmem:[#allocation10_spill] sm:$0xff] }
 0x56c   :  { %5795 = vmatprep.subr.bf16.mxu0 %v11435_v34  ;;  %5836 = vmatprep.subr.bf16.mxu1 %v11438_v56  ;;  %v14062_v34 = vld [vmem:[#allocation11_spill] sm:$0xff]  ;;  %v14063_v56 = vld [vmem:[#allocation9_spill] sm:$0xff] }
 0x56f   :  { %5796 = vmatpush1.bf16.msra.mxu0 %v11453_v57  ;;  %5837 = vmatpush1.bf16.msra.mxu1 %v11457_v49  ;;  %v14064_v57 = vld [vmem:[#allocation12_spill] sm:$0xff]  ;;  %v14065_v49 = vld [vmem:[#allocation14_spill] sm:$0xff] }
 0x570   :  { %5797 = vmatprep.subr.bf16.mxu0 %v11459_v31  ;;  %5838 = vmatprep.subr.bf16.mxu1 %v11462_v33  ;;  %v14066_v31 = vld [vmem:[#allocation15_spill] sm:$0xff]  ;;  %v14067_v33 = vld [vmem:[#allocation13_spill] sm:$0xff] }
 0x573   :  { %5798 = vmatpush1.bf16.msra.mxu0 %v11477_v20  ;;  %5839 = vmatpush1.bf16.msra.mxu1 %v11481_v21  ;;  %v14068_v20 = vld [vmem:[#allocation19_spill] sm:$0xff]  ;;  %v14069_v21 = vld [vmem:[#allocation18_spill] sm:$0xff] }
 0x574   :  { %5799 = vmatprep.subr.bf16.mxu0 %v11483_v22  ;;  %5840 = vmatprep.subr.bf16.mxu1 %v11486_v35  ;;  %v14070_v22 = vld [vmem:[#allocation17_spill] sm:$0xff]  ;;  %v14071_v35 = vld [vmem:[#allocation16_spill] sm:$0xff] }
 0x577   :  { %5800 = vmatpush1.bf16.msra.mxu0 %v11501_v53  ;;  %5841 = vmatpush1.bf16.msra.mxu1 %v11505_v54  ;;  %v14072_v53 = vld [vmem:[#allocation20_spill] sm:$0xff]  ;;  %v14073_v54 = vld [vmem:[#allocation21_spill] sm:$0xff] }
 0x578   :  { %5801 = vmatprep.subr.bf16.mxu0 %v11507_v59  ;;  %5842 = vmatprep.subr.bf16.mxu1 %v11510_v8  ;;  %v14074_v59 = vld [vmem:[#allocation22_spill] sm:$0xff]  ;;  %v14075_v8 = vld [vmem:[#allocation23_spill] sm:$0xff] }
 0x57b   :  { %5802 = vmatpush1.bf16.msra.mxu0 %v11525_v16  ;;  %5843 = vmatpush1.bf16.msra.mxu1 %v11529_v3  ;;  %v14076_v16 = vld [vmem:[#allocation24_spill] sm:$0xff]  ;;  %v14077_v3 = vld [vmem:[#allocation25_spill] sm:$0xff] }
 0x57c   :  { %5803 = vmatprep.subr.bf16.mxu0 %v11531_v25  ;;  %5844 = vmatprep.subr.bf16.mxu1 %v11534_v39  ;;  %v14078_v25 = vld [vmem:[#allocation26_spill] sm:$0xff]  ;;  %v14079_v39 = vld [vmem:[#allocation27_spill] sm:$0xff] }
 0x57f   :  { %5804 = vmatpush1.bf16.msra.mxu0 %v11549_v62  ;;  %5845 = vmatpush1.bf16.msra.mxu1 %v11553_v11  ;;  %v14080_v62 = vld [vmem:[#allocation28_spill] sm:$0xff]  ;;  %v14081_v11 = vld [vmem:[#allocation29_spill] sm:$0xff] }
 0x580   :  { %5805 = vmatprep.subr.bf16.mxu0 %v11555_v5  ;;  %5846 = vmatprep.subr.bf16.mxu1 %v11558_v26 }
 0x583   :  { %5806 = vmatpush1.bf16.msra.mxu0 %v11561_v45  ;;  %5847 = vmatpush1.bf16.msra.mxu1 %v11565_v28 }
 0x584   :  { %5807 = vmatprep.subr.bf16.mxu0 %v11576_v9  ;;  %5848 = vmatprep.subr.bf16.mxu1 %v11589_v63 }
 0x587   :  { %5808 = vmatpush1.bf16.msra.mxu0 %v11581_v27  ;;  %5849 = vmatpush1.bf16.msra.mxu1 %v11587_v47 }
 0x588   :  { %5809 = vmatprep.subr.bf16.mxu0 %v11602_v32  ;;  %5850 = vmatprep.subr.bf16.mxu1 %v11612_v4  ;;  %v8725_v32 = vld [vmem:[%s13383_s0 + $0x100] sm:$0xff]  ;;  %v8727_v4 = vld [vmem:[%s13383_s0 + $0x110] sm:$0xff] }
 0x58b   :  { %5810 = vmatpush1.bf16.msra.mxu0 %v14054_v42  ;;  %5851 = vmatpush1.bf16.msra.mxu1 %v14055_v7 }
 0x58c   :  { %5811 = vmatprep.subr.bf16.mxu0 %v14056_v60  ;;  %5852 = vmatprep.subr.bf16.mxu1 %v14057_v43 }
 0x58f   :  { %5812 = vmatpush1.bf16.msra.mxu0 %v14058_v50  ;;  %5853 = vmatpush1.bf16.msra.mxu1 %v14059_v48 }
 0x590   :  { %5813 = vmatprep.subr.bf16.mxu0 %v14060_v40  ;;  %5854 = vmatprep.subr.bf16.mxu1 %v14061_v61 }
 0x593   :  { %5814 = vmatpush1.bf16.msra.mxu0 %v14062_v34  ;;  %5855 = vmatpush1.bf16.msra.mxu1 %v14063_v56  ;;  %v8729_v56 = vld [vmem:[%s13383_s0 + $0x120] sm:$0xff] }
 0x594   :  { %5815 = vmatprep.subr.bf16.mxu0 %v14064_v57  ;;  %5856 = vmatprep.subr.bf16.mxu1 %v14065_v49  ;;  %v8731_v57 = vld [vmem:[%s13383_s0 + $0x130] sm:$0xff]  ;;  %v8730_v49 = vld [vmem:[%s13383_s0 + $0x128] sm:$0xff] }
 0x597   :  { %5816 = vmatpush1.bf16.msra.mxu0 %v14066_v31  ;;  %5857 = vmatpush1.bf16.msra.mxu1 %v14067_v33  ;;  %v8732_v31 = vld [vmem:[%s13383_s0 + $0x138] sm:$0xff] }
 0x598   :  { %5817 = vmatprep.subr.bf16.mxu0 %v14068_v20  ;;  %5858 = vmatprep.subr.bf16.mxu1 %v14069_v21 }
 0x59b   :  { %5818 = vmatpush1.bf16.msra.mxu0 %v14070_v22  ;;  %5859 = vmatpush1.bf16.msra.mxu1 %v14071_v35 }
 0x59c   :  { %5819 = vmatprep.subr.bf16.mxu0 %v14072_v53  ;;  %5860 = vmatprep.subr.bf16.mxu1 %v14073_v54 }
 0x59f   :  { %5820 = vmatpush1.bf16.msra.mxu0 %v14074_v59  ;;  %5861 = vmatpush1.bf16.msra.mxu1 %v14075_v8 }
 0x5a0   :  { %5821 = vmatprep.subr.bf16.mxu0 %v14076_v16  ;;  %5862 = vmatprep.subr.bf16.mxu1 %v14077_v3 }
 0x5a3   :  { %5822 = vmatpush1.bf16.msra.mxu0 %v14078_v25  ;;  %5863 = vmatpush1.bf16.msra.mxu1 %v14079_v39 }
 0x5a4   :  { %5873 = vmatprep.subr.bf16.mxu0 %v14080_v62  ;;  %5914 = vmatprep.subr.bf16.mxu1 %v14081_v11 }
 0x5f9   :  { %v4824_v5 = vpop.f32.mrb[32].mxu0  ;;  %v4865_v26 = vpop.f32.mrb[32].mxu1 }
 0x5fa   :  { %v4826_v45 = vpop.f32.mrb[33].mxu0  ;;  %v4867_v28 = vpop.f32.mrb[33].mxu1  ;;  %v4963_v13 = vadd.f32 %v8725_v32, %v4824_v5  ;;  %v4965_v6 = vadd.f32 %v8727_v4, %v4865_v26 }
 0x5fb   :  { %v4828_v9 = vpop.f32.mrb[34].mxu0  ;;  %v4869_v27 = vpop.f32.mrb[34].mxu1  ;;  %v4964_v55 = vadd.f32 %v8726_v30, %v4826_v45  ;;  %v4966_v10 = vadd.f32 %v8728_v12, %v4867_v28 }
 0x5fc   :  { %v4829_v47 = vpop.f32.mrb[35].mxu0  ;;  %v4870_v63 = vpop.f32.mrb[35].mxu1  ;;  %v8733_v18 = vmul.f32 -1.442695, %v4963_v13  ;;  %v8735_v2 = vmul.f32 -1.442695, %v4965_v6 }
 0x5fd   :  { %v8734_v36 = vmul.f32 -1.442695, %v4964_v55  ;;  %v8736_v42 = vmul.f32 -1.442695, %v4966_v10 }
 0x5fe   :  { %9301 = vpow2.f32 %v8733_v18 }
 0x5ff   :  { %9303 = vpow2.f32 %v8735_v2 }
 0x600   :  { %9305 = vpow2.f32 %v8734_v36 }
 0x601   :  { %9307 = vpow2.f32 %v8736_v42 }
 0x608   :  { %v9302_v7 = vpop.eup %9301 }
 0x609   :  { %v9304_v60 = vpop.eup %9303  ;;  %v4989_v48 = vadd.f32 1.0, %v9302_v7 }
 0x60a   :  { %v9306_v43 = vpop.eup %9305  ;;  %v4991_v40 = vadd.f32 1.0, %v9304_v60  ;;  %v14082_v60 = vld [vmem:[#allocation30_spill] sm:$0xff] }
 0x60b   :  { %v9308_v50 = vpop.eup %9307  ;;  %v4990_v61 = vadd.f32 1.0, %v9306_v43  ;;  %9309 = vrcp.f32 %v4989_v48  ;;  %v14083_v43 = vld [vmem:[#allocation31_spill] sm:$0xff]  ;;  %v14085_v48 = vld [vmem:[#allocation33_spill] sm:$0xff] }
 0x60c   :  { %v4992_v34 = vadd.f32 1.0, %v9308_v50  ;;  %9311 = vrcp.f32 %v4991_v40  ;;  %v14084_v50 = vld [vmem:[#allocation32_spill] sm:$0xff] }
 0x60d   :  { %9313 = vrcp.f32 %v4990_v61  ;;  %v14088_v40 = vld [vmem:[#allocation36_spill] sm:$0xff]  ;;  %v14093_v61 = vld [vmem:[#allocation41_spill] sm:$0xff] }
 0x60e   :  { %9315 = vrcp.f32 %v4992_v34  ;;  %v14094_v34 = vld [vmem:[#allocation42_spill] sm:$0xff] }
 0x615   :  { %v9310_v11 = vpop.eup %9309 }
 0x616   :  { %v9312_v5 = vpop.eup %9311 }
 0x617   :  { %v9314_v26 = vpop.eup %9313  ;;  %v5009_v27 = vmul.f32 %v9312_v5, %v11810_v17  ;;  %v14114_v5 = vld [vmem:[#allocation62_spill] sm:$0xff] }
 0x618   :  { %v9316_v45 = vpop.eup %9315 }
 0x619   :  { %v5010_v32 = vmul.f32 %v9316_v45, %v11812_v38  ;;  %v14116_v45 = vld [vmem:[#allocation64_spill] sm:$0xff] }
 0x639   :  { %v4906_v33 = vpop.f32.mrb[36].mxu0  ;;  %v4947_v20 = vpop.f32.mrb[36].mxu1 }
 0x63a   :  { %v4967_v21 = vadd.f32 %v8729_v56, %v4906_v33  ;;  %v4969_v22 = vadd.f32 %v8731_v57, %v4947_v20  ;;  %v4908_v35 = vpop.f32.mrb[37].mxu0  ;;  %v4949_v53 = vpop.f32.mrb[37].mxu1  ;;  %v14095_v56 = vld [vmem:[#allocation43_spill] sm:$0xff]  ;;  %v14096_v57 = vld [vmem:[#allocation44_spill] sm:$0xff] }
 0x63b   :  { %v4968_v54 = vadd.f32 %v8730_v49, %v4908_v35  ;;  %v4970_v59 = vadd.f32 %v8732_v31, %v4949_v53  ;;  %v4910_v8 = vpop.f32.mrb[38].mxu0  ;;  %v4951_v16 = vpop.f32.mrb[38].mxu1  ;;  %v14097_v49 = vld [vmem:[#allocation45_spill] sm:$0xff]  ;;  %v14098_v31 = vld [vmem:[#allocation46_spill] sm:$0xff]  ;;  %v14099_v33 = vld [vmem:[#allocation47_spill] sm:$0xff] }
 0x63c   :  { %v8737_v3 = vmul.f32 -1.442695, %v4967_v21  ;;  %9317 = vtanh.f32 %v4969_v22  ;;  %v4911_v25 = vpop.f32.mrb[39].mxu0  ;;  %v4952_v39 = vpop.f32.mrb[39].mxu1  ;;  %v14100_v20 = vld [vmem:[#allocation48_spill] sm:$0xff]  ;;  %v14101_v21 = vld [vmem:[#allocation49_spill] sm:$0xff] }
 0x63d   :  { %v8738_v62 = vmul.f32 -1.442695, %v4968_v54  ;;  %9319 = vtanh.f32 %v4970_v59  ;;  %v14102_v22 = vld [vmem:[#allocation50_spill] sm:$0xff]  ;;  %v14103_v35 = vld [vmem:[#allocation51_spill] sm:$0xff]  ;;  %v14104_v53 = vld [vmem:[#allocation52_spill] sm:$0xff] }
 0x63e   :  { %9321 = vpow2.f32 %v8737_v3  ;;  %v14105_v54 = vld [vmem:[#allocation53_spill] sm:$0xff]  ;;  %v14106_v59 = vld [vmem:[#allocation54_spill] sm:$0xff]  ;;  %v14107_v8 = vld [vmem:[#allocation55_spill] sm:$0xff] }
 0x63f   :  { %9323 = vpow2.f32 %v8738_v62  ;;  %v14108_v16 = vld [vmem:[#allocation56_spill] sm:$0xff]  ;;  %v14109_v3 = vld [vmem:[#allocation57_spill] sm:$0xff]  ;;  %v14110_v25 = vld [vmem:[#allocation58_spill] sm:$0xff] }
 0x640   :  { %v14111_v39 = vld [vmem:[#allocation59_spill] sm:$0xff]  ;;  %v14112_v62 = vld [vmem:[#allocation60_spill] sm:$0xff] }
 0x646   :  { %v9318_v28 = vpop.eup %9317 }
 0x647   :  { %v9320_v9 = vpop.eup %9319  ;;  %v5011_v47 = vmul.f32 %v9318_v28, %v9310_v11  ;;  %v14113_v11 = vld [vmem:[#allocation61_spill] sm:$0xff] }
 0x648   :  { %v9322_v63 = vpop.eup %9321  ;;  %v5012_v4 = vmul.f32 %v9320_v9, %v9314_v26  ;;  %v14115_v26 = vld [vmem:[#allocation63_spill] sm:$0xff]  ;;  %v14117_v28 = vld [vmem:[#allocation65_spill] sm:$0xff]  ;;  %v14118_v9 = vld [vmem:[#allocation66_spill] sm:$0xff] }
 0x649   :  { %v9324_v30 = vpop.eup %9323  ;;  %v4993_v13 = vadd.f32 1.0, %v9322_v63  ;;  %v12283_v12 = vadd.f32 %v5011_v47, %v5009_v27  ;;  %v14119_v27 = vld [vmem:[#allocation67_spill] sm:$0xff]  ;;  %v14120_v47 = vld [vmem:[#allocation68_spill] sm:$0xff]  ;;  %v14121_v63 = vld [vmem:[#allocation69_spill] sm:$0xff] }
 0x64a   :  { %v4994_v6 = vadd.f32 1.0, %v9324_v30  ;;  %v12285_v55 = vadd.f32 %v5012_v4, %v5010_v32  ;;  %v14122_v32 = vld [vmem:[#allocation70_spill] sm:$0xff]  ;;  %v14123_v4 = vld [vmem:[#allocation71_spill] sm:$0xff]  ;;  %v14124_v30 = vld [vmem:[#allocation72_spill] sm:$0xff] }
 0x64b   :  { %9325 = vrcp.f32 %v4993_v13  ;;  %v14125_v13 = vld [vmem:[#allocation73_spill] sm:$0xff] }
 0x64c   :  { %9327 = vtanh.f32 %v12283_v12 }
 0x64d   :  { %9329 = vrcp.f32 %v4994_v6  ;;  %v14126_v6 = vld [vmem:[#allocation74_spill] sm:$0xff] }
 0x64e   :  { %9331 = vtanh.f32 %v12285_v55 }
 0x655   :  { %v9326_v10 = vpop.eup %9325 }
 0x656   :  { %v9328_v17 = vpop.eup %9327 }
 0x657   :  { %v9330_v18 = vpop.eup %9329  ;;  %v5017_v2 = vmul.f32 %v9328_v17, %v9326_v10  ;;  %v14127_v10 = vld [vmem:[#allocation75_spill] sm:$0xff]  ;;  %v14128_v17 = vld [vmem:[#allocation76_spill] sm:$0xff] }
 0x658   :  { %v9332_v36 = vpop.eup %9331 }
 0x659   :  { %v5018_v38 = vmul.f32 %v9332_v36, %v9330_v18  ;;  %v12289_v42 = vpack.c.bf16 %v5017_v2, %v5017_v2  ;;  %v6033_v36 = vld [vmem:[%s13382_s1 + $0x48] sm:$0xff] }
 0x65b   :  { %v5021_v7 = vpack.c.bf16 %v5018_v38, %v5018_v38  ;;  %8739 = vst [vmem:[%s13384_s2 + $0x20] sm:$0xf] %v12289_v42  ;;  %v6037_v38 = vld [vmem:[%s13382_s1 + $0x68] sm:$0xff] }
 0x65d   :  { %8740 = vst [vmem:[%s13384_s2 + $0x1c] sm:$0xf] %v5021_v7  ;;  %5823 = vmatprep.mubr.bf16.mxu0 %v5021_v7  ;;  %5864 = vmatprep.mubr.bf16.mxu1 %v5021_v7 }
 0x65e   :  { %5824 = vmatmul.mubr.bf16.vlgmr.msra.gmra.mrb[40].mxu0 %v12289_v42  ;;  %5865 = vmatmul.mubr.bf16.vlgmr.msra.gmra.mrb[40].mxu1 %v12289_v42 }
 0x65f   :  { %5874 = vmatpush1.bf16.msra.mxu0 %v11776_v41  ;;  %5915 = vmatpush1.bf16.msra.mxu1 %v11778_v29  ;;  %v14086_v41 = vld [vmem:[#allocation34_spill] sm:$0xff]  ;;  %v14087_v29 = vld [vmem:[#allocation35_spill] sm:$0xff] }
 0x660   :  { %5905 = vmatprep.mubr.bf16.mxu0 %v5021_v7  ;;  %5946 = vmatprep.mubr.bf16.mxu1 %v5021_v7  ;;  %v12402_v7 = vcombine.high %v6033_v36, %v6037_v38 }
 0x661   :  { %5875 = vmatprep.subr.bf16.mxu0 %v11840_v51  ;;  %5916 = vmatprep.subr.bf16.mxu1 %v11842_v46  ;;  %v14089_v51 = vld [vmem:[#allocation37_spill] sm:$0xff]  ;;  %v14090_v46 = vld [vmem:[#allocation38_spill] sm:$0xff] }
 0x663   :  { %5876 = vmatpush1.bf16.msra.mxu0 %v11857_v23  ;;  %5917 = vmatpush1.bf16.msra.mxu1 %v11859_v14  ;;  %v14091_v23 = vld [vmem:[#allocation39_spill] sm:$0xff]  ;;  %v14092_v14 = vld [vmem:[#allocation40_spill] sm:$0xff] }
 0x664   :  { %5877 = vmatprep.subr.bf16.mxu0 %v14082_v60  ;;  %5918 = vmatprep.subr.bf16.mxu1 %v14083_v43  ;;  %v6044_v60 = vld [vmem:[%s13382_s1 + $0xa0] sm:$0xff]  ;;  %v6041_v43 = vld [vmem:[%s13382_s1 + $0x88] sm:$0xff] }
 0x667   :  { %5878 = vmatpush1.bf16.msra.mxu0 %v14084_v50  ;;  %5919 = vmatpush1.bf16.msra.mxu1 %v14085_v48  ;;  %v6045_v50 = vld [vmem:[%s13382_s1 + $0xa8] sm:$0xff] }
 0x668   :  { %5879 = vmatprep.subr.bf16.mxu0 %v14086_v41  ;;  %5920 = vmatprep.subr.bf16.mxu1 %v14087_v29  ;;  %v12419_v41 = vcombine.low %v6033_v36, %v6037_v38  ;;  %v6093_v38 = vld [vmem:[%s13382_s1 + $0x228] sm:$0xff] }
 0x66b   :  { %5880 = vmatpush1.bf16.msra.mxu0 %v14088_v40  ;;  %5921 = vmatpush1.bf16.msra.mxu1 %v14089_v51  ;;  %v12424_v40 = vcombine.high %v6041_v43, %v6045_v50  ;;  %v6048_v51 = vld [vmem:[%s13382_s1 + $0xc0] sm:$0xff] }
 0x66c   :  { %5881 = vmatprep.subr.bf16.mxu0 %v14090_v46  ;;  %5922 = vmatprep.subr.bf16.mxu1 %v14091_v23  ;;  %v6052_v46 = vld [vmem:[%s13382_s1 + $0xe0] sm:$0xff]  ;;  %v6049_v23 = vld [vmem:[%s13382_s1 + $0xc8] sm:$0xff] }
 0x66f   :  { %5882 = vmatpush1.bf16.msra.mxu0 %v14092_v14  ;;  %5923 = vmatpush1.bf16.msra.mxu1 %v14093_v61  ;;  %v6053_v14 = vld [vmem:[%s13382_s1 + $0xe8] sm:$0xff] }
 0x670   :  { %5883 = vmatprep.subr.bf16.mxu0 %v14094_v34  ;;  %5924 = vmatprep.subr.bf16.mxu1 %v14095_v56  ;;  %v12443_v34 = vcombine.low %v6041_v43, %v6045_v50  ;;  %v12445_v56 = vcombine.high %v6048_v51, %v6052_v46  ;;  %v6096_v43 = vld [vmem:[%s13382_s1 + $0x240] sm:$0xff] }
 0x671   :  { %v6100_v50 = vld [vmem:[%s13382_s1 + $0x260] sm:$0xff] }
 0x673   :  { %5884 = vmatpush1.bf16.msra.mxu0 %v14096_v57  ;;  %5925 = vmatpush1.bf16.msra.mxu1 %v14097_v49  ;;  %v12448_v57 = vcombine.high %v6049_v23, %v6053_v14  ;;  %v6056_v49 = vld [vmem:[%s13382_s1 + $0x100] sm:$0xff] }
 0x674   :  { %5885 = vmatprep.subr.bf16.mxu0 %v14098_v31  ;;  %5926 = vmatprep.subr.bf16.mxu1 %v14099_v33  ;;  %v6060_v31 = vld [vmem:[%s13382_s1 + $0x120] sm:$0xff]  ;;  %v6057_v33 = vld [vmem:[%s13382_s1 + $0x108] sm:$0xff] }
 0x677   :  { %5886 = vmatpush1.bf16.msra.mxu0 %v14100_v20  ;;  %5927 = vmatpush1.bf16.msra.mxu1 %v14101_v21  ;;  %v6061_v20 = vld [vmem:[%s13382_s1 + $0x128] sm:$0xff]  ;;  %v12463_v21 = vcombine.low %v6048_v51, %v6052_v46  ;;  %v12588_v46 = vcombine.high %v6096_v43, %v6100_v50 }
 0x678   :  { %5887 = vmatprep.subr.bf16.mxu0 %v14102_v22  ;;  %5928 = vmatprep.subr.bf16.mxu1 %v14103_v35  ;;  %v12467_v22 = vcombine.low %v6049_v23, %v6053_v14  ;;  %v12469_v35 = vcombine.high %v6056_v49, %v6060_v31  ;;  %v6097_v51 = vld [vmem:[%s13382_s1 + $0x248] sm:$0xff]  ;;  %v12594_v14 = vcombine.low %v6096_v43, %v6100_v50 }
 0x679   :  { %v6101_v23 = vld [vmem:[%s13382_s1 + $0x268] sm:$0xff] }
 0x67a   :  { %14129 = vst [vmem:[#allocation2_spill] sm:$0xff] %v12594_v14  ;;  %v6121_v43 = vld [vmem:[%s13382_s1 + $0x308] sm:$0xff] }
 0x67b   :  { %5888 = vmatpush1.bf16.msra.mxu0 %v14104_v53  ;;  %5929 = vmatpush1.bf16.msra.mxu1 %v14105_v54  ;;  %v12472_v53 = vcombine.high %v6057_v33, %v6061_v20  ;;  %v6064_v54 = vld [vmem:[%s13382_s1 + $0x140] sm:$0xff] }
 0x67c   :  { %5889 = vmatprep.subr.bf16.mxu0 %v14106_v59  ;;  %5930 = vmatprep.subr.bf16.mxu1 %v14107_v8  ;;  %v6068_v59 = vld [vmem:[%s13382_s1 + $0x160] sm:$0xff]  ;;  %v6065_v8 = vld [vmem:[%s13382_s1 + $0x148] sm:$0xff] }
 0x67f   :  { %5890 = vmatpush1.bf16.msra.mxu0 %v14108_v16  ;;  %5931 = vmatpush1.bf16.msra.mxu1 %v14109_v3  ;;  %v6069_v16 = vld [vmem:[%s13382_s1 + $0x168] sm:$0xff]  ;;  %v12487_v3 = vcombine.low %v6056_v49, %v6060_v31  ;;  %v12596_v49 = vcombine.low %v6097_v51, %v6101_v23  ;;  %v12598_v31 = vcombine.high %v6097_v51, %v6101_v23 }
 0x680   :  { %5891 = vmatprep.subr.bf16.mxu0 %v14110_v25  ;;  %5932 = vmatprep.subr.bf16.mxu1 %v14111_v39  ;;  %v12491_v25 = vcombine.low %v6057_v33, %v6061_v20  ;;  %v12493_v39 = vcombine.high %v6064_v54, %v6068_v59  ;;  %v6104_v33 = vld [vmem:[%s13382_s1 + $0x280] sm:$0xff]  ;;  %v6125_v51 = vld [vmem:[%s13382_s1 + $0x328] sm:$0xff] }
 0x681   :  { %14130 = vst [vmem:[#allocation3_spill] sm:$0xff] %v12596_v49  ;;  %v6108_v20 = vld [vmem:[%s13382_s1 + $0x2a0] sm:$0xff] }
 0x683   :  { %5892 = vmatpush1.bf16.msra.mxu0 %v14112_v62  ;;  %5933 = vmatpush1.bf16.msra.mxu1 %v14113_v11  ;;  %v12496_v62 = vcombine.high %v6065_v8, %v6069_v16  ;;  %v6072_v11 = vld [vmem:[%s13382_s1 + $0x180] sm:$0xff] }
 0x684   :  { %5893 = vmatprep.subr.bf16.mxu0 %v14114_v5  ;;  %5934 = vmatprep.subr.bf16.mxu1 %v14115_v26  ;;  %v6076_v5 = vld [vmem:[%s13382_s1 + $0x1a0] sm:$0xff]  ;;  %v6073_v26 = vld [vmem:[%s13382_s1 + $0x188] sm:$0xff] }
 0x687   :  { %5894 = vmatpush1.bf16.msra.mxu0 %v14116_v45  ;;  %5935 = vmatpush1.bf16.msra.mxu1 %v14117_v28  ;;  %v6077_v45 = vld [vmem:[%s13382_s1 + $0x1a8] sm:$0xff]  ;;  %v12511_v28 = vcombine.low %v6064_v54, %v6068_v59  ;;  %v12612_v59 = vcombine.high %v6104_v33, %v6108_v20 }
 0x688   :  { %5895 = vmatprep.subr.bf16.mxu0 %v14118_v9  ;;  %5936 = vmatprep.subr.bf16.mxu1 %v14119_v27  ;;  %v12515_v9 = vcombine.low %v6065_v8, %v6069_v16  ;;  %v12517_v27 = vcombine.high %v6072_v11, %v6076_v5  ;;  %v6105_v54 = vld [vmem:[%s13382_s1 + $0x288] sm:$0xff]  ;;  %v12618_v16 = vcombine.low %v6104_v33, %v6108_v20 }
 0x689   :  { %14131 = vst [vmem:[#allocation4_spill] sm:$0xff] %v12612_v59  ;;  %v6109_v8 = vld [vmem:[%s13382_s1 + $0x2a8] sm:$0xff]  ;;  %v12668_v33 = vcombine.low %v6121_v43, %v6125_v51  ;;  %v12670_v20 = vcombine.high %v6121_v43, %v6125_v51 }
 0x68a   :  { %14132 = vst [vmem:[#allocation6_spill] sm:$0xff] %v12618_v16 }
 0x68b   :  { %5896 = vmatpush1.bf16.msra.mxu0 %v14120_v47  ;;  %5937 = vmatpush1.bf16.msra.mxu1 %v14121_v63  ;;  %v12520_v47 = vcombine.high %v6073_v26, %v6077_v45  ;;  %v6080_v63 = vld [vmem:[%s13382_s1 + $0x1c0] sm:$0xff]  ;;  %14141 = vst [vmem:[#allocation15_spill] sm:$0xff] %v12668_v33  ;;  %14142 = vst [vmem:[#allocation13_spill] sm:$0xff] %v12670_v20 }
 0x68c   :  { %5897 = vmatprep.subr.bf16.mxu0 %v14122_v32  ;;  %5938 = vmatprep.subr.bf16.mxu1 %v14123_v4  ;;  %v6084_v32 = vld [vmem:[%s13382_s1 + $0x1e0] sm:$0xff]  ;;  %v6081_v4 = vld [vmem:[%s13382_s1 + $0x1c8] sm:$0xff] }
 0x68f   :  { %5898 = vmatpush1.bf16.msra.mxu0 %v14124_v30  ;;  %5939 = vmatpush1.bf16.msra.mxu1 %v14125_v13  ;;  %v6085_v30 = vld [vmem:[%s13382_s1 + $0x1e8] sm:$0xff]  ;;  %v12535_v13 = vcombine.low %v6072_v11, %v6076_v5  ;;  %v12620_v11 = vcombine.low %v6105_v54, %v6109_v8  ;;  %v12622_v5 = vcombine.high %v6105_v54, %v6109_v8  ;;  %v6128_v54 = vld [vmem:[%s13382_s1 + $0x340] sm:$0xff] }
 0x690   :  { %5899 = vmatprep.subr.bf16.mxu0 %v14126_v6  ;;  %5940 = vmatprep.subr.bf16.mxu1 %v14127_v10  ;;  %v12539_v6 = vcombine.low %v6073_v26, %v6077_v45  ;;  %v12541_v10 = vcombine.high %v6080_v63, %v6084_v32  ;;  %v6112_v26 = vld [vmem:[%s13382_s1 + $0x2c0] sm:$0xff] }
 0x691   :  { %14133 = vst [vmem:[#allocation7_spill] sm:$0xff] %v12620_v11  ;;  %14134 = vst [vmem:[#allocation5_spill] sm:$0xff] %v12622_v5  ;;  %v6116_v45 = vld [vmem:[%s13382_s1 + $0x2e0] sm:$0xff] }
 0x692   :  { %v6132_v8 = vld [vmem:[%s13382_s1 + $0x360] sm:$0xff] }
 0x693   :  { %5900 = vmatpush1.bf16.msra.mxu0 %v14128_v17  ;;  %5941 = vmatpush1.bf16.msra.mxu1 %v12147_v58  ;;  %v6032_v58 = vld [vmem:[%s13382_s1 + $0x40] sm:$0xff]  ;;  %v12544_v17 = vcombine.high %v6081_v4, %v6085_v30 }
 0x694   :  { %5901 = vmatprep.subr.bf16.mxu0 %v12151_v24  ;;  %5942 = vmatprep.subr.bf16.mxu1 %v12153_v37  ;;  %v6024_v24 = vld [vmem:[%s13382_s1] sm:$0xff] }
 0x695   :  { %v6028_v37 = vld [vmem:[%s13382_s1 + $0x20] sm:$0xff] }
 0x697   :  { %5902 = vmatpush1.bf16.msra.mxu0 %v12169_v44  ;;  %5943 = vmatpush1.bf16.msra.mxu1 %v12171_v52  ;;  %v6036_v44 = vld [vmem:[%s13382_s1 + $0x60] sm:$0xff] }
 0x698   :  { %5903 = vmatprep.subr.bf16.mxu0 %v12175_v15  ;;  %5944 = vmatprep.subr.bf16.mxu1 %v12177_v0  ;;  %v6025_v15 = vld [vmem:[%s13382_s1 + $0x8] sm:$0xff]  ;;  %v12373_v0 = vcombine.low %v6024_v24, %v6028_v37  ;;  %v12390_v2 = vcombine.high %v6032_v58, %v6036_v44  ;;  %v12415_v48 = vcombine.low %v6032_v58, %v6036_v44 }
 0x699   :  { %v6089_v44 = vld [vmem:[%s13382_s1 + $0x208] sm:$0xff] }
 0x69b   :  { %5904 = vmatpush1.bf16.msra.mxu0 %v12181_v1  ;;  %5945 = vmatpush1.bf16.msra.mxu1 %v12183_v19  ;;  %v12375_v1 = vcombine.high %v6024_v24, %v6028_v37  ;;  %v6029_v19 = vld [vmem:[%s13382_s1 + $0x28] sm:$0xff]  ;;  %v12547_v24 = vcombine.low %v6080_v63, %v6084_v32  ;;  %v12551_v37 = vcombine.low %v6081_v4, %v6085_v30 }
 0x69c   :  { %v12386_v52 = vcombine.low %v6025_v15, %v6029_v19  ;;  %v12388_v18 = vcombine.high %v6025_v15, %v6029_v19  ;;  %v6088_v15 = vld [vmem:[%s13382_s1 + $0x200] sm:$0xff]  ;;  %v6113_v63 = vld [vmem:[%s13382_s1 + $0x2c8] sm:$0xff]  ;;  %v12636_v32 = vcombine.high %v6112_v26, %v6116_v45  ;;  %v12642_v30 = vcombine.low %v6112_v26, %v6116_v45 }
 0x69d   :  { %6792 = vmatprep.subr.bf16.mxu0 %v12375_v1  ;;  %v6092_v19 = vld [vmem:[%s13382_s1 + $0x220] sm:$0xff]  ;;  %v6117_v4 = vld [vmem:[%s13382_s1 + $0x2e8] sm:$0xff]  ;;  %v12684_v45 = vcombine.low %v6128_v54, %v6132_v8 }
 0x69e   :  { %5906 = vmatmul.mubr.bf16.vlgmr.msra.gmra.mrb[44].mxu0 %v12289_v42  ;;  %5947 = vmatmul.mubr.bf16.vlgmr.msra.gmra.mrb[44].mxu1 %v12289_v42  ;;  %v6040_v42 = vld [vmem:[%s13382_s1 + $0x80] sm:$0xff]  ;;  %v12562_v58 = vcombine.high %v6088_v15, %v6092_v19  ;;  %v12567_v36 = vcombine.low %v6088_v15, %v6092_v19  ;;  %14135 = vst [vmem:[#allocation8_spill] sm:$0xff] %v12636_v32  ;;  %14136 = vst [vmem:[#allocation10_spill] sm:$0xff] %v12642_v30  ;;  %v6129_v26 = vld [vmem:[%s13382_s1 + $0x348] sm:$0xff] }
 0x69f   :  { %6833 = vmatprep.subr.bf16.mxu1 %v12388_v18  ;;  %6793 = vmatpush1.bf16.msra.mxu0 %v12373_v0  ;;  %v12421_v29 = vcombine.high %v6040_v42, %v6044_v60  ;;  %v12439_v61 = vcombine.low %v6040_v42, %v6044_v60  ;;  %v12573_v42 = vcombine.low %v6089_v44, %v6093_v38 }
 0x6a0   :  { %6834 = vmatpush1.bf16.msra.mxu1 %v12386_v52  ;;  %6794 = vmatprep.subr.bf16.mxu0 %v12390_v2  ;;  %v12575_v60 = vcombine.high %v6089_v44, %v6093_v38  ;;  %v12644_v15 = vcombine.low %v6113_v63, %v6117_v4  ;;  %v12646_v19 = vcombine.high %v6113_v63, %v6117_v4  ;;  %v6120_v44 = vld [vmem:[%s13382_s1 + $0x300] sm:$0xff]  ;;  %v6133_v4 = vld [vmem:[%s13382_s1 + $0x368] sm:$0xff] }
 0x6a1   :  { %6835 = vmatprep.subr.bf16.mxu1 %v12402_v7  ;;  %v6124_v38 = vld [vmem:[%s13382_s1 + $0x320] sm:$0xff]  ;;  %14143 = vst [vmem:[#allocation19_spill] sm:$0xff] %v12684_v45  ;;  %v12686_v63 = vcombine.high %v6128_v54, %v6132_v8  ;;  %v12698_v43 = vcombine.low %v6129_v26, %v6133_v4  ;;  %v12700_v51 = vcombine.high %v6129_v26, %v6133_v4  ;;  %v6137_v8 = vld [vmem:[%s13382_s1 + $0x388] sm:$0xff] }
 0x6a2   :  { %14137 = vst [vmem:[#allocation11_spill] sm:$0xff] %v12644_v15  ;;  %14138 = vst [vmem:[#allocation9_spill] sm:$0xff] %v12646_v19  ;;  %v12660_v50 = vcombine.high %v6120_v44, %v6124_v38  ;;  %v12666_v23 = vcombine.low %v6120_v44, %v6124_v38  ;;  %v6136_v44 = vld [vmem:[%s13382_s1 + $0x380] sm:$0xff] }
 0x6a3   :  { %6795 = vmatpush1.bf16.msra.mxu0 %v12415_v48  ;;  %14144 = vst [vmem:[#allocation18_spill] sm:$0xff] %v12686_v63  ;;  %v6140_v38 = vld [vmem:[%s13382_s1 + $0x3a0] sm:$0xff]  ;;  %14145 = vst [vmem:[#allocation17_spill] sm:$0xff] %v12698_v43 }
 0x6a4   :  { %6836 = vmatpush1.bf16.msra.mxu1 %v12419_v41  ;;  %6796 = vmatprep.subr.bf16.mxu0 %v12421_v29  ;;  %14139 = vst [vmem:[#allocation12_spill] sm:$0xff] %v12660_v50  ;;  %14140 = vst [vmem:[#allocation14_spill] sm:$0xff] %v12666_v23  ;;  %v12702_v54 = vcombine.high %v6136_v44, %v6140_v38  ;;  %v6148_v26 = vld [vmem:[%s13382_s1 + $0x3e0] sm:$0xff]  ;;  %v12721_v4 = vcombine.low %v6136_v44, %v6140_v38 }
 0x6a5   :  { %6837 = vmatprep.subr.bf16.mxu1 %v12424_v40  ;;  %14146 = vst [vmem:[#allocation16_spill] sm:$0xff] %v12700_v51 }
 0x6a6   :  { %14147 = vst [vmem:[#allocation20_spill] sm:$0xff] %v12702_v54  ;;  %14149 = vst [vmem:[#allocation22_spill] sm:$0xff] %v12721_v4 }
 0x6a7   :  { %6797 = vmatpush1.bf16.msra.mxu0 %v12439_v61 }
 0x6a8   :  { %6838 = vmatpush1.bf16.msra.mxu1 %v12443_v34  ;;  %6798 = vmatprep.subr.bf16.mxu0 %v12445_v56 }
 0x6a9   :  { %6839 = vmatprep.subr.bf16.mxu1 %v12448_v57 }
 0x6ab   :  { %6799 = vmatpush1.bf16.msra.mxu0 %v12463_v21 }
 0x6ac   :  { %6840 = vmatpush1.bf16.msra.mxu1 %v12467_v22  ;;  %6800 = vmatprep.subr.bf16.mxu0 %v12469_v35 }
 0x6ad   :  { %6841 = vmatprep.subr.bf16.mxu1 %v12472_v53 }
 0x6af   :  { %6801 = vmatpush1.bf16.msra.mxu0 %v12487_v3 }
 0x6b0   :  { %6842 = vmatpush1.bf16.msra.mxu1 %v12491_v25  ;;  %6802 = vmatprep.subr.bf16.mxu0 %v12493_v39 }
 0x6b1   :  { %6843 = vmatprep.subr.bf16.mxu1 %v12496_v62 }
 0x6b3   :  { %6803 = vmatpush1.bf16.msra.mxu0 %v12511_v28 }
 0x6b4   :  { %6844 = vmatpush1.bf16.msra.mxu1 %v12515_v9  ;;  %6804 = vmatprep.subr.bf16.mxu0 %v12517_v27 }
 0x6b5   :  { %6845 = vmatprep.subr.bf16.mxu1 %v12520_v47 }
 0x6b7   :  { %6805 = vmatpush1.bf16.msra.mxu0 %v12535_v13 }
 0x6b8   :  { %6846 = vmatpush1.bf16.msra.mxu1 %v12539_v6  ;;  %6806 = vmatprep.subr.bf16.mxu0 %v12541_v10 }
 0x6b9   :  { %6847 = vmatprep.subr.bf16.mxu1 %v12544_v17 }
 0x6bb   :  { %6807 = vmatpush1.bf16.msra.mxu0 %v12547_v24 }
 0x6bc   :  { %6848 = vmatpush1.bf16.msra.mxu1 %v12551_v37  ;;  %6808 = vmatprep.subr.bf16.mxu0 %v12562_v58 }
 0x6bd   :  { %6849 = vmatprep.subr.bf16.mxu1 %v12575_v60 }
 0x6bf   :  { %6809 = vmatpush1.bf16.msra.mxu0 %v12567_v36 }
 0x6c0   :  { %6850 = vmatpush1.bf16.msra.mxu1 %v12573_v42  ;;  %6810 = vmatprep.subr.bf16.mxu0 %v12588_v46 }
 0x6c1   :  { %6851 = vmatprep.subr.bf16.mxu1 %v12598_v31 }
 0x6c3   :  { %6811 = vmatpush1.bf16.msra.mxu0 %v12594_v14 }
 0x6c4   :  { %6852 = vmatpush1.bf16.msra.mxu1 %v12596_v49  ;;  %6812 = vmatprep.subr.bf16.mxu0 %v12612_v59 }
 0x6c5   :  { %6853 = vmatprep.subr.bf16.mxu1 %v12622_v5 }
 0x6c7   :  { %6813 = vmatpush1.bf16.msra.mxu0 %v12618_v16 }
 0x6c8   :  { %6854 = vmatpush1.bf16.msra.mxu1 %v12620_v11  ;;  %6814 = vmatprep.subr.bf16.mxu0 %v12636_v32 }
 0x6c9   :  { %6855 = vmatprep.subr.bf16.mxu1 %v12646_v19 }
 0x6cb   :  { %6815 = vmatpush1.bf16.msra.mxu0 %v12642_v30 }
 0x6cc   :  { %6856 = vmatpush1.bf16.msra.mxu1 %v12644_v15  ;;  %6816 = vmatprep.subr.bf16.mxu0 %v12660_v50  ;;  %v6145_v50 = vld [vmem:[%s13382_s1 + $0x3c8] sm:$0xff] }
 0x6cd   :  { %6857 = vmatprep.subr.bf16.mxu1 %v12670_v20  ;;  %v6144_v20 = vld [vmem:[%s13382_s1 + $0x3c0] sm:$0xff] }
 0x6ce   :  { %v12730_v15 = vcombine.high %v6144_v20, %v6148_v26  ;;  %v12739_v38 = vcombine.low %v6144_v20, %v6148_v26  ;;  %v6027_v20 = vld [vmem:[%s13382_s1 + $0x18] sm:$0xff] }
 0x6cf   :  { %6817 = vmatpush1.bf16.msra.mxu0 %v12666_v23  ;;  %v6141_v23 = vld [vmem:[%s13382_s1 + $0x3a8] sm:$0xff] }
 0x6d0   :  { %6858 = vmatpush1.bf16.msra.mxu1 %v12668_v33  ;;  %6818 = vmatprep.subr.bf16.mxu0 %v12686_v63  ;;  %v12714_v33 = vcombine.high %v6137_v8, %v6141_v23  ;;  %v6149_v63 = vld [vmem:[%s13382_s1 + $0x3e8] sm:$0xff]  ;;  %14150 = vst [vmem:[#allocation23_spill] sm:$0xff] %v12730_v15  ;;  %v12733_v30 = vcombine.low %v6137_v8, %v6141_v23  ;;  %14153 = vst [vmem:[#allocation26_spill] sm:$0xff] %v12739_v38  ;;  %v6026_v23 = vld [vmem:[%s13382_s1 + $0x10] sm:$0xff] }
 0x6d1   :  { %6859 = vmatprep.subr.bf16.mxu1 %v12700_v51  ;;  %v12736_v44 = vcombine.high %v6145_v50, %v6149_v63  ;;  %v6030_v8 = vld [vmem:[%s13382_s1 + $0x30] sm:$0xff] }
 0x6d2   :  { %14148 = vst [vmem:[#allocation21_spill] sm:$0xff] %v12714_v33  ;;  %14151 = vst [vmem:[#allocation24_spill] sm:$0xff] %v12733_v30  ;;  %v12756_v26 = vcombine.high %v6026_v23, %v6030_v8 }
 0x6d3   :  { %6819 = vmatpush1.bf16.msra.mxu0 %v12684_v45  ;;  %14152 = vst [vmem:[#allocation25_spill] sm:$0xff] %v12736_v44  ;;  %v12743_v45 = vcombine.low %v6145_v50, %v6149_v63  ;;  %v6031_v50 = vld [vmem:[%s13382_s1 + $0x38] sm:$0xff]  ;;  %v12762_v63 = vcombine.low %v6026_v23, %v6030_v8  ;;  %v8869_v23 = vld [vmem:[%s13383_s0 + $0x140] sm:$0xff]  ;;  %v8871_v8 = vld [vmem:[%s13383_s0 + $0x150] sm:$0xff] }
 0x6d4   :  { %6820 = vmatprep.subr.bf16.mxu0 %v12702_v54  ;;  %6860 = vmatpush1.bf16.msra.mxu1 %v12698_v43  ;;  %14155 = vst [vmem:[#allocation28_spill] sm:$0xff] %v12756_v26 }
 0x6d5   :  { %6861 = vmatprep.subr.bf16.mxu1 %v12714_v33  ;;  %14154 = vst [vmem:[#allocation27_spill] sm:$0xff] %v12743_v45 }
 0x6d7   :  { %6821 = vmatpush1.bf16.msra.mxu0 %v12721_v4 }
 0x6d8   :  { %6822 = vmatprep.subr.bf16.mxu0 %v12730_v15  ;;  %6862 = vmatpush1.bf16.msra.mxu1 %v12733_v30 }
 0x6d9   :  { %6863 = vmatprep.subr.bf16.mxu1 %v12736_v44  ;;  %v12766_v44 = vcombine.high %v6027_v20, %v6031_v50 }
 0x6db   :  { %6823 = vmatpush1.bf16.msra.mxu0 %v12739_v38  ;;  %v12764_v38 = vcombine.low %v6027_v20, %v6031_v50  ;;  %14156 = vst [vmem:[#allocation29_spill] sm:$0xff] %v12766_v44  ;;  %v8870_v20 = vld [vmem:[%s13383_s0 + $0x148] sm:$0xff] }
 0x6dc   :  { %6864 = vmatpush1.bf16.msra.mxu1 %v12743_v45  ;;  %6874 = vmatprep.subr.bf16.mxu0 %v12756_v26 }
 0x6dd   :  { %6915 = vmatprep.subr.bf16.mxu1 %v12766_v44 }
 0x731   :  { %v5825_v15 = vpop.f32.mrb[40].mxu0  ;;  %v5866_v30 = vpop.f32.mrb[40].mxu1 }
 0x732   :  { %v5827_v4 = vpop.f32.mrb[41].mxu0  ;;  %v5868_v33 = vpop.f32.mrb[41].mxu1  ;;  %v5964_v50 = vadd.f32 %v8869_v23, %v5825_v15 }
 0x733   :  { %v5829_v54 = vpop.f32.mrb[42].mxu0  ;;  %v5870_v43 = vpop.f32.mrb[42].mxu1 }
 0x734   :  { %v5830_v51 = vpop.f32.mrb[43].mxu0  ;;  %v5871_v19 = vpop.f32.mrb[43].mxu1  ;;  %v8872_v54 = vld [vmem:[%s13383_s0 + $0x158] sm:$0xff]  ;;  %v5966_v43 = vadd.f32 %v8871_v8, %v5866_v30  ;;  %v8877_v44 = vmul.f32 -1.442695, %v5964_v50  ;;  %v8873_v30 = vld [vmem:[%s13383_s0 + $0x160] sm:$0xff] }
 0x735   :  { %v5965_v51 = vadd.f32 %v8870_v20, %v5827_v4  ;;  %v5967_v19 = vadd.f32 %v8872_v54, %v5868_v33  ;;  %v8875_v33 = vld [vmem:[%s13383_s0 + $0x170] sm:$0xff] }
 0x736   :  { %v8879_v26 = vmul.f32 -1.442695, %v5966_v43  ;;  %9333 = vpow2.f32 %v8877_v44 }
 0x737   :  { %v8878_v45 = vmul.f32 -1.442695, %v5965_v51  ;;  %v8880_v32 = vmul.f32 -1.442695, %v5967_v19 }
 0x738   :  { %9335 = vpow2.f32 %v8879_v26 }
 0x739   :  { %9337 = vpow2.f32 %v8878_v45 }
 0x73a   :  { %9339 = vpow2.f32 %v8880_v32  ;;  %v8874_v32 = vld [vmem:[%s13383_s0 + $0x168] sm:$0xff] }
 0x740   :  { %v9334_v11 = vpop.eup %9333 }
 0x741   :  { %v5990_v15 = vadd.f32 1.0, %v9334_v11  ;;  %v8876_v11 = vld [vmem:[%s13383_s0 + $0x178] sm:$0xff] }
 0x742   :  { %v9336_v16 = vpop.eup %9335 }
 0x743   :  { %v9338_v5 = vpop.eup %9337  ;;  %v5992_v23 = vadd.f32 1.0, %v9336_v16  ;;  %9341 = vrcp.f32 %v5990_v15 }
 0x744   :  { %v9340_v59 = vpop.eup %9339  ;;  %v5991_v49 = vadd.f32 1.0, %v9338_v5 }
 0x745   :  { %v5993_v14 = vadd.f32 1.0, %v9340_v59  ;;  %9343 = vrcp.f32 %v5992_v23 }
 0x746   :  { %9345 = vrcp.f32 %v5991_v49 }
 0x747   :  { %9347 = vrcp.f32 %v5993_v14 }
 0x74d   :  { %v9342_v15 = vpop.eup %9341 }
 0x74f   :  { %v9344_v23 = vpop.eup %9343 }
 0x750   :  { %v9346_v49 = vpop.eup %9345  ;;  %v6010_v14 = vmul.f32 %v9344_v23, %v12283_v12  ;;  %v6035_v23 = vld [vmem:[%s13382_s1 + $0x58] sm:$0xff] }
 0x771   :  { %v5907_v16 = vpop.f32.mrb[44].mxu0  ;;  %v5948_v59 = vpop.f32.mrb[44].mxu1 }
 0x772   :  { %v5968_v5 = vadd.f32 %v8873_v30, %v5907_v16  ;;  %v5970_v45 = vadd.f32 %v8875_v33, %v5948_v59  ;;  %v5909_v4 = vpop.f32.mrb[45].mxu0  ;;  %v5950_v44 = vpop.f32.mrb[45].mxu1 }
 0x773   :  { %v5969_v26 = vadd.f32 %v8874_v32, %v5909_v4  ;;  %v5971_v8 = vadd.f32 %v8876_v11, %v5950_v44  ;;  %v5911_v20 = vpop.f32.mrb[46].mxu0  ;;  %v5952_v50 = vpop.f32.mrb[46].mxu1 }
 0x774   :  { %v8881_v54 = vmul.f32 -1.442695, %v5968_v5  ;;  %9349 = vtanh.f32 %v5970_v45  ;;  %v5912_v43 = vpop.f32.mrb[47].mxu0  ;;  %v5953_v51 = vpop.f32.mrb[47].mxu1 }
 0x775   :  { %v8882_v19 = vmul.f32 -1.442695, %v5969_v26  ;;  %9351 = vtanh.f32 %v5971_v8  ;;  %v9348_v30 = vpop.eup %9347 }
 0x776   :  { %9353 = vpow2.f32 %v8881_v54  ;;  %v6011_v59 = vmul.f32 %v9348_v30, %v12285_v55 }
 0x777   :  { %9355 = vpow2.f32 %v8882_v19  ;;  %v6034_v19 = vld [vmem:[%s13382_s1 + $0x50] sm:$0xff] }
 0x77e   :  { %v9350_v33 = vpop.eup %9349 }
 0x77f   :  { %v9352_v16 = vpop.eup %9351  ;;  %v6012_v32 = vmul.f32 %v9350_v33, %v9342_v15  ;;  %v6038_v15 = vld [vmem:[%s13382_s1 + $0x70] sm:$0xff] }
 0x780   :  { %v9354_v11 = vpop.eup %9353  ;;  %v6013_v5 = vmul.f32 %v9352_v16, %v9346_v49  ;;  %v6039_v49 = vld [vmem:[%s13382_s1 + $0x78] sm:$0xff]  ;;  %v6042_v33 = vld [vmem:[%s13382_s1 + $0x90] sm:$0xff]  ;;  %v12826_v16 = vcombine.high %v6034_v19, %v6038_v15 }
 0x781   :  { %v9356_v45 = vpop.eup %9355  ;;  %v5994_v4 = vadd.f32 1.0, %v9354_v11  ;;  %v12796_v44 = vadd.f32 %v6012_v32, %v6010_v14  ;;  %v12828_v14 = vcombine.high %v6035_v23, %v6039_v49  ;;  %v6046_v32 = vld [vmem:[%s13382_s1 + $0xb0] sm:$0xff]  ;;  %v6043_v11 = vld [vmem:[%s13382_s1 + $0x98] sm:$0xff] }
 0x782   :  { %v5995_v26 = vadd.f32 1.0, %v9356_v45  ;;  %v12798_v8 = vadd.f32 %v6013_v5, %v6011_v59  ;;  %v6047_v59 = vld [vmem:[%s13382_s1 + $0xb8] sm:$0xff]  ;;  %v12843_v5 = vcombine.low %v6034_v19, %v6038_v15  ;;  %v12845_v45 = vcombine.low %v6035_v23, %v6039_v49  ;;  %v6058_v23 = vld [vmem:[%s13382_s1 + $0x110] sm:$0xff] }
 0x783   :  { %9357 = vrcp.f32 %v5994_v4  ;;  %v12847_v4 = vcombine.high %v6042_v33, %v6046_v32  ;;  %v6062_v49 = vld [vmem:[%s13382_s1 + $0x130] sm:$0xff] }
 0x784   :  { %9359 = vtanh.f32 %v12796_v44 }
 0x785   :  { %9361 = vrcp.f32 %v5995_v26  ;;  %14157 = vst [vmem:[#allocation30_spill] sm:$0xff] %v12847_v4  ;;  %v12849_v26 = vcombine.high %v6043_v11, %v6047_v59 }
 0x786   :  { %9363 = vtanh.f32 %v12798_v8 }
 0x787   :  { %14158 = vst [vmem:[#allocation31_spill] sm:$0xff] %v12849_v26 }
 0x78d   :  { %v9358_v20 = vpop.eup %9357 }
 0x78e   :  { %v9360_v12 = vpop.eup %9359 }
 0x78f   :  { %v9362_v50 = vpop.eup %9361  ;;  %v6018_v54 = vmul.f32 %v9360_v12, %v9358_v20  ;;  %v6050_v20 = vld [vmem:[%s13382_s1 + $0xd0] sm:$0xff] }
 0x790   :  { %v9364_v43 = vpop.eup %9363  ;;  %v6054_v12 = vld [vmem:[%s13382_s1 + $0xf0] sm:$0xff] }
 0x791   :  { %v6019_v55 = vmul.f32 %v9364_v43, %v9362_v50  ;;  %v12802_v51 = vpack.c.bf16 %v6018_v54, %v6018_v54  ;;  %v6051_v50 = vld [vmem:[%s13382_s1 + $0xd8] sm:$0xff]  ;;  %v12867_v43 = vcombine.low %v6042_v33, %v6046_v32  ;;  %v12873_v19 = vcombine.high %v6050_v20, %v6054_v12 }
 0x792   :  { %v6055_v54 = vld [vmem:[%s13382_s1 + $0xf8] sm:$0xff]  ;;  %v12891_v32 = vcombine.low %v6050_v20, %v6054_v12 }
 0x793   :  { %v6022_v30 = vpack.c.bf16 %v6019_v55, %v6019_v55  ;;  %8883 = vst [vmem:[%s13384_s2 + $0x28] sm:$0xf] %v12802_v51  ;;  %14159 = vst [vmem:[#allocation32_spill] sm:$0xff] %v12867_v43  ;;  %v12869_v55 = vcombine.low %v6043_v11, %v6047_v59  ;;  %v12875_v15 = vcombine.high %v6051_v50, %v6055_v54  ;;  %v6063_v33 = vld [vmem:[%s13382_s1 + $0x138] sm:$0xff] }
 0x794   :  { %14161 = vst [vmem:[#allocation34_spill] sm:$0xff] %v12873_v19  ;;  %14163 = vst [vmem:[#allocation36_spill] sm:$0xff] %v12891_v32  ;;  %v12893_v11 = vcombine.low %v6051_v50, %v6055_v54  ;;  %v12897_v59 = vcombine.high %v6058_v23, %v6062_v49  ;;  %v6067_v20 = vld [vmem:[%s13382_s1 + $0x158] sm:$0xff]  ;;  %v12915_v50 = vcombine.low %v6058_v23, %v6062_v49 }
 0x795   :  { %8884 = vst [vmem:[%s13384_s2 + $0x14] sm:$0xf] %v6022_v30  ;;  %6824 = vmatprep.mubr.bf16.mxu0 %v6022_v30  ;;  %6865 = vmatprep.mubr.bf16.mxu1 %v6022_v30  ;;  %14160 = vst [vmem:[#allocation33_spill] sm:$0xff] %v12869_v55  ;;  %v6071_v12 = vld [vmem:[%s13382_s1 + $0x178] sm:$0xff] }
 0x796   :  { %6825 = vmatmul.mubr.bf16.vlgmr.msra.gmra.mrb[48].mxu0 %v12802_v51  ;;  %6866 = vmatmul.mubr.bf16.vlgmr.msra.gmra.mrb[48].mxu1 %v12802_v51  ;;  %14162 = vst [vmem:[#allocation35_spill] sm:$0xff] %v12875_v15  ;;  %14164 = vst [vmem:[#allocation37_spill] sm:$0xff] %v12893_v11  ;;  %v6075_v23 = vld [vmem:[%s13382_s1 + $0x198] sm:$0xff] }
 0x797   :  { %6875 = vmatpush1.bf16.msra.mxu0 %v12762_v63  ;;  %6916 = vmatpush1.bf16.msra.mxu1 %v12764_v38  ;;  %14165 = vst [vmem:[#allocation38_spill] sm:$0xff] %v12897_v59  ;;  %14167 = vst [vmem:[#allocation40_spill] sm:$0xff] %v12915_v50  ;;  %v6079_v49 = vld [vmem:[%s13382_s1 + $0x1b8] sm:$0xff] }
 0x798   :  { %6906 = vmatprep.mubr.bf16.mxu0 %v6022_v30  ;;  %6947 = vmatprep.mubr.bf16.mxu1 %v6022_v30  ;;  %v6059_v30 = vld [vmem:[%s13382_s1 + $0x118] sm:$0xff] }
 0x799   :  { %6876 = vmatprep.subr.bf16.mxu0 %v12826_v16  ;;  %6917 = vmatprep.subr.bf16.mxu1 %v12828_v14  ;;  %v12917_v54 = vcombine.low %v6059_v30, %v6063_v33 }
 0x79b   :  { %6877 = vmatpush1.bf16.msra.mxu0 %v12843_v5  ;;  %6918 = vmatpush1.bf16.msra.mxu1 %v12845_v45  ;;  %14168 = vst [vmem:[#allocation41_spill] sm:$0xff] %v12917_v54 }
 0x79c   :  { %6878 = vmatprep.subr.bf16.mxu0 %v12847_v4  ;;  %6919 = vmatprep.subr.bf16.mxu1 %v12849_v26  ;;  %v12899_v26 = vcombine.high %v6059_v30, %v6063_v33  ;;  %v6066_v4 = vld [vmem:[%s13382_s1 + $0x150] sm:$0xff]  ;;  %v12941_v33 = vcombine.low %v6067_v20, %v6071_v12 }
 0x79e   :  { %14166 = vst [vmem:[#allocation39_spill] sm:$0xff] %v12899_v26  ;;  %14172 = vst [vmem:[#allocation45_spill] sm:$0xff] %v12941_v33 }
 0x79f   :  { %6879 = vmatpush1.bf16.msra.mxu0 %v12867_v43  ;;  %6920 = vmatpush1.bf16.msra.mxu1 %v12869_v55  ;;  %v6070_v55 = vld [vmem:[%s13382_s1 + $0x170] sm:$0xff] }
 0x7a0   :  { %6880 = vmatprep.subr.bf16.mxu0 %v12873_v19  ;;  %6921 = vmatprep.subr.bf16.mxu1 %v12875_v15  ;;  %v12921_v15 = vcombine.high %v6066_v4, %v6070_v55  ;;  %v12923_v19 = vcombine.high %v6067_v20, %v6071_v12  ;;  %v6074_v43 = vld [vmem:[%s13382_s1 + $0x190] sm:$0xff]  ;;  %v12939_v30 = vcombine.low %v6066_v4, %v6070_v55  ;;  %v6083_v4 = vld [vmem:[%s13382_s1 + $0x1d8] sm:$0xff] }
 0x7a1   :  { %v6087_v55 = vld [vmem:[%s13382_s1 + $0x1f8] sm:$0xff]  ;;  %v12965_v12 = vcombine.low %v6075_v23, %v6079_v49 }
 0x7a2   :  { %14169 = vst [vmem:[#allocation42_spill] sm:$0xff] %v12921_v15  ;;  %14170 = vst [vmem:[#allocation43_spill] sm:$0xff] %v12923_v19 }
 0x7a3   :  { %6881 = vmatpush1.bf16.msra.mxu0 %v12891_v32  ;;  %6922 = vmatpush1.bf16.msra.mxu1 %v12893_v11  ;;  %v6078_v11 = vld [vmem:[%s13382_s1 + $0x1b0] sm:$0xff]  ;;  %14171 = vst [vmem:[#allocation44_spill] sm:$0xff] %v12939_v30  ;;  %14176 = vst [vmem:[#allocation49_spill] sm:$0xff] %v12965_v12 }
 0x7a4   :  { %6882 = vmatprep.subr.bf16.mxu0 %v12897_v59  ;;  %6923 = vmatprep.subr.bf16.mxu1 %v12899_v26  ;;  %v12945_v26 = vcombine.high %v6074_v43, %v6078_v11  ;;  %v12947_v59 = vcombine.high %v6075_v23, %v6079_v49  ;;  %v6082_v32 = vld [vmem:[%s13382_s1 + $0x1d0] sm:$0xff]  ;;  %v12963_v20 = vcombine.low %v6074_v43, %v6078_v11  ;;  %v6091_v43 = vld [vmem:[%s13382_s1 + $0x218] sm:$0xff] }
 0x7a5   :  { %v6095_v11 = vld [vmem:[%s13382_s1 + $0x238] sm:$0xff]  ;;  %v12989_v49 = vcombine.low %v6083_v4, %v6087_v55 }
 0x7a6   :  { %14173 = vst [vmem:[#allocation46_spill] sm:$0xff] %v12945_v26  ;;  %14174 = vst [vmem:[#allocation47_spill] sm:$0xff] %v12947_v59 }
 0x7a7   :  { %6883 = vmatpush1.bf16.msra.mxu0 %v12915_v50  ;;  %6924 = vmatpush1.bf16.msra.mxu1 %v12917_v54  ;;  %v6086_v54 = vld [vmem:[%s13382_s1 + $0x1f0] sm:$0xff]  ;;  %14175 = vst [vmem:[#allocation48_spill] sm:$0xff] %v12963_v20  ;;  %14180 = vst [vmem:[#allocation53_spill] sm:$0xff] %v12989_v49 }
 0x7a8   :  { %6884 = vmatprep.subr.bf16.mxu0 %v12921_v15  ;;  %6925 = vmatprep.subr.bf16.mxu1 %v12923_v19  ;;  %v12969_v19 = vcombine.high %v6082_v32, %v6086_v54  ;;  %v12971_v15 = vcombine.high %v6083_v4, %v6087_v55  ;;  %v6090_v50 = vld [vmem:[%s13382_s1 + $0x210] sm:$0xff]  ;;  %v12987_v23 = vcombine.low %v6082_v32, %v6086_v54  ;;  %v6099_v32 = vld [vmem:[%s13382_s1 + $0x258] sm:$0xff] }
 0x7a9   :  { %v6103_v54 = vld [vmem:[%s13382_s1 + $0x278] sm:$0xff]  ;;  %v13013_v55 = vcombine.low %v6091_v43, %v6095_v11 }
 0x7aa   :  { %14177 = vst [vmem:[#allocation50_spill] sm:$0xff] %v12969_v19  ;;  %14178 = vst [vmem:[#allocation51_spill] sm:$0xff] %v12971_v15 }
 0x7ab   :  { %6885 = vmatpush1.bf16.msra.mxu0 %v12939_v30  ;;  %6926 = vmatpush1.bf16.msra.mxu1 %v12941_v33  ;;  %v6094_v33 = vld [vmem:[%s13382_s1 + $0x230] sm:$0xff]  ;;  %14179 = vst [vmem:[#allocation52_spill] sm:$0xff] %v12987_v23  ;;  %14184 = vst [vmem:[#allocation57_spill] sm:$0xff] %v13013_v55 }
 0x7ac   :  { %6886 = vmatprep.subr.bf16.mxu0 %v12945_v26  ;;  %6927 = vmatprep.subr.bf16.mxu1 %v12947_v59  ;;  %v12993_v59 = vcombine.high %v6090_v50, %v6094_v33  ;;  %v12995_v26 = vcombine.high %v6091_v43, %v6095_v11  ;;  %v6098_v30 = vld [vmem:[%s13382_s1 + $0x250] sm:$0xff]  ;;  %v13011_v4 = vcombine.low %v6090_v50, %v6094_v33  ;;  %v6107_v50 = vld [vmem:[%s13382_s1 + $0x298] sm:$0xff] }
 0x7ad   :  { %v6111_v33 = vld [vmem:[%s13382_s1 + $0x2b8] sm:$0xff]  ;;  %v13037_v11 = vcombine.low %v6099_v32, %v6103_v54 }
 0x7ae   :  { %14181 = vst [vmem:[#allocation54_spill] sm:$0xff] %v12993_v59  ;;  %14182 = vst [vmem:[#allocation55_spill] sm:$0xff] %v12995_v26 }
 0x7af   :  { %6887 = vmatpush1.bf16.msra.mxu0 %v12963_v20  ;;  %6928 = vmatpush1.bf16.msra.mxu1 %v12965_v12  ;;  %v6102_v12 = vld [vmem:[%s13382_s1 + $0x270] sm:$0xff]  ;;  %14183 = vst [vmem:[#allocation56_spill] sm:$0xff] %v13011_v4  ;;  %14188 = vst [vmem:[#allocation61_spill] sm:$0xff] %v13037_v11 }
 0x7b0   :  { %6888 = vmatprep.subr.bf16.mxu0 %v12969_v19  ;;  %6929 = vmatprep.subr.bf16.mxu1 %v12971_v15  ;;  %v13017_v15 = vcombine.high %v6098_v30, %v6102_v12  ;;  %v13019_v19 = vcombine.high %v6099_v32, %v6103_v54  ;;  %v6106_v20 = vld [vmem:[%s13382_s1 + $0x290] sm:$0xff]  ;;  %v13035_v43 = vcombine.low %v6098_v30, %v6102_v12  ;;  %v6115_v30 = vld [vmem:[%s13382_s1 + $0x2d8] sm:$0xff] }
 0x7b1   :  { %v6119_v12 = vld [vmem:[%s13382_s1 + $0x2f8] sm:$0xff]  ;;  %v13061_v54 = vcombine.low %v6107_v50, %v6111_v33 }
 0x7b2   :  { %14185 = vst [vmem:[#allocation58_spill] sm:$0xff] %v13017_v15  ;;  %14186 = vst [vmem:[#allocation59_spill] sm:$0xff] %v13019_v19 }
 0x7b3   :  { %6889 = vmatpush1.bf16.msra.mxu0 %v12987_v23  ;;  %6930 = vmatpush1.bf16.msra.mxu1 %v12989_v49  ;;  %v6110_v49 = vld [vmem:[%s13382_s1 + $0x2b0] sm:$0xff]  ;;  %14187 = vst [vmem:[#allocation60_spill] sm:$0xff] %v13035_v43  ;;  %14192 = vst [vmem:[#allocation65_spill] sm:$0xff] %v13061_v54 }
 0x7b4   :  { %6890 = vmatprep.subr.bf16.mxu0 %v12993_v59  ;;  %6931 = vmatprep.subr.bf16.mxu1 %v12995_v26  ;;  %v13041_v26 = vcombine.high %v6106_v20, %v6110_v49  ;;  %v13043_v59 = vcombine.high %v6107_v50, %v6111_v33  ;;  %v6114_v23 = vld [vmem:[%s13382_s1 + $0x2d0] sm:$0xff]  ;;  %v13059_v32 = vcombine.low %v6106_v20, %v6110_v49  ;;  %v6123_v20 = vld [vmem:[%s13382_s1 + $0x318] sm:$0xff] }
 0x7b5   :  { %v6127_v49 = vld [vmem:[%s13382_s1 + $0x338] sm:$0xff]  ;;  %v13085_v33 = vcombine.low %v6115_v30, %v6119_v12 }
 0x7b6   :  { %14189 = vst [vmem:[#allocation62_spill] sm:$0xff] %v13041_v26  ;;  %14190 = vst [vmem:[#allocation63_spill] sm:$0xff] %v13043_v59 }
 0x7b7   :  { %6891 = vmatpush1.bf16.msra.mxu0 %v13011_v4  ;;  %6932 = vmatpush1.bf16.msra.mxu1 %v13013_v55  ;;  %v6118_v55 = vld [vmem:[%s13382_s1 + $0x2f0] sm:$0xff]  ;;  %14191 = vst [vmem:[#allocation64_spill] sm:$0xff] %v13059_v32  ;;  %14196 = vst [vmem:[#allocation69_spill] sm:$0xff] %v13085_v33 }
 0x7b8   :  { %6892 = vmatprep.subr.bf16.mxu0 %v13017_v15  ;;  %6933 = vmatprep.subr.bf16.mxu1 %v13019_v19  ;;  %v13065_v19 = vcombine.high %v6114_v23, %v6118_v55  ;;  %v13067_v15 = vcombine.high %v6115_v30, %v6119_v12  ;;  %v6122_v4 = vld [vmem:[%s13382_s1 + $0x310] sm:$0xff]  ;;  %v13083_v50 = vcombine.low %v6114_v23, %v6118_v55  ;;  %v6131_v23 = vld [vmem:[%s13382_s1 + $0x358] sm:$0xff] }
 0x7b9   :  { %v6135_v55 = vld [vmem:[%s13382_s1 + $0x378] sm:$0xff]  ;;  %v13109_v12 = vcombine.low %v6123_v20, %v6127_v49 }
 0x7ba   :  { %14193 = vst [vmem:[#allocation66_spill] sm:$0xff] %v13065_v19  ;;  %14194 = vst [vmem:[#allocation67_spill] sm:$0xff] %v13067_v15 }
 0x7bb   :  { %6893 = vmatpush1.bf16.msra.mxu0 %v13035_v43  ;;  %6934 = vmatpush1.bf16.msra.mxu1 %v13037_v11  ;;  %v6126_v11 = vld [vmem:[%s13382_s1 + $0x330] sm:$0xff]  ;;  %14195 = vst [vmem:[#allocation68_spill] sm:$0xff] %v13083_v50  ;;  %14200 = vst [vmem:[#allocation73_spill] sm:$0xff] %v13109_v12 }
 0x7bc   :  { %6894 = vmatprep.subr.bf16.mxu0 %v13041_v26  ;;  %6935 = vmatprep.subr.bf16.mxu1 %v13043_v59  ;;  %v13089_v59 = vcombine.high %v6122_v4, %v6126_v11  ;;  %v13091_v26 = vcombine.high %v6123_v20, %v6127_v49  ;;  %v6130_v43 = vld [vmem:[%s13382_s1 + $0x350] sm:$0xff]  ;;  %v13107_v30 = vcombine.low %v6122_v4, %v6126_v11  ;;  %v6139_v4 = vld [vmem:[%s13382_s1 + $0x398] sm:$0xff] }
 0x7bd   :  { %v6143_v11 = vld [vmem:[%s13382_s1 + $0x3b8] sm:$0xff]  ;;  %v13133_v49 = vcombine.low %v6131_v23, %v6135_v55 }
 0x7be   :  { %14197 = vst [vmem:[#allocation70_spill] sm:$0xff] %v13089_v59  ;;  %14198 = vst [vmem:[#allocation71_spill] sm:$0xff] %v13091_v26 }
 0x7bf   :  { %6895 = vmatpush1.bf16.msra.mxu0 %v13059_v32  ;;  %6936 = vmatpush1.bf16.msra.mxu1 %v13061_v54  ;;  %v6134_v54 = vld [vmem:[%s13382_s1 + $0x370] sm:$0xff]  ;;  %14199 = vst [vmem:[#allocation72_spill] sm:$0xff] %v13107_v30 }
 0x7c0   :  { %6896 = vmatprep.subr.bf16.mxu0 %v13065_v19  ;;  %6937 = vmatprep.subr.bf16.mxu1 %v13067_v15  ;;  %v13113_v15 = vcombine.high %v6130_v43, %v6134_v54  ;;  %v13115_v19 = vcombine.high %v6131_v23, %v6135_v55  ;;  %v6138_v32 = vld [vmem:[%s13382_s1 + $0x390] sm:$0xff]  ;;  %v13131_v20 = vcombine.low %v6130_v43, %v6134_v54  ;;  %v6147_v43 = vld [vmem:[%s13382_s1 + $0x3d8] sm:$0xff] }
 0x7c1   :  { %v6151_v54 = vld [vmem:[%s13382_s1 + $0x3f8] sm:$0xff]  ;;  %v13157_v55 = vcombine.low %v6139_v4, %v6143_v11 }
 0x7c2   :  { %14201 = vst [vmem:[#allocation74_spill] sm:$0xff] %v13113_v15  ;;  %14202 = vst [vmem:[#allocation75_spill] sm:$0xff] %v13115_v19 }
 0x7c3   :  { %6897 = vmatpush1.bf16.msra.mxu0 %v13083_v50  ;;  %6938 = vmatpush1.bf16.msra.mxu1 %v13085_v33  ;;  %v6142_v33 = vld [vmem:[%s13382_s1 + $0x3b0] sm:$0xff]  ;;  %14203 = vst [vmem:[#allocation76_spill] sm:$0xff] %v13131_v20 }
 0x7c4   :  { %6898 = vmatprep.subr.bf16.mxu0 %v13089_v59  ;;  %6939 = vmatprep.subr.bf16.mxu1 %v13091_v26  ;;  %v13137_v26 = vcombine.high %v6138_v32, %v6142_v33  ;;  %v13139_v59 = vcombine.high %v6139_v4, %v6143_v11  ;;  %v6146_v50 = vld [vmem:[%s13382_s1 + $0x3d0] sm:$0xff]  ;;  %v13155_v23 = vcombine.low %v6138_v32, %v6142_v33 }
 0x7c7   :  { %6899 = vmatpush1.bf16.msra.mxu0 %v13107_v30  ;;  %6940 = vmatpush1.bf16.msra.mxu1 %v13109_v12  ;;  %v6150_v12 = vld [vmem:[%s13382_s1 + $0x3f0] sm:$0xff] }
 0x7c8   :  { %6900 = vmatprep.subr.bf16.mxu0 %v13113_v15  ;;  %6941 = vmatprep.subr.bf16.mxu1 %v13115_v19  ;;  %v13161_v19 = vcombine.high %v6146_v50, %v6150_v12  ;;  %v13163_v15 = vcombine.high %v6147_v43, %v6151_v54  ;;  %v13167_v30 = vcombine.low %v6146_v50, %v6150_v12  ;;  %v9016_v50 = vld [vmem:[%s13383_s0 + $0x198] sm:$0xff] }
 0x7cb   :  { %6901 = vmatpush1.bf16.msra.mxu0 %v13131_v20  ;;  %6942 = vmatpush1.bf16.msra.mxu1 %v13133_v49  ;;  %v13169_v20 = vcombine.low %v6147_v43, %v6151_v54 }
 0x7cc   :  { %6902 = vmatprep.subr.bf16.mxu0 %v13137_v26  ;;  %6943 = vmatprep.subr.bf16.mxu1 %v13139_v59 }
 0x7cf   :  { %6903 = vmatpush1.bf16.msra.mxu0 %v13155_v23  ;;  %6944 = vmatpush1.bf16.msra.mxu1 %v13157_v55 }
 0x7d0   :  { %6904 = vmatprep.subr.bf16.mxu0 %v13161_v19  ;;  %6945 = vmatprep.subr.bf16.mxu1 %v13163_v15 }
 0x7d3   :  { %6905 = vmatpush1.bf16.msra.mxu0 %v13167_v30  ;;  %6946 = vmatpush1.bf16.msra.mxu1 %v13169_v20 }
 0x7d4   :  { %7793 = vmatprep.subr.bf16.mxu0 %v12375_v1  ;;  %7834 = vmatprep.subr.bf16.mxu1 %v12388_v18  ;;  %v14205_v1 = vld [vmem:[#allocation3_spill] sm:$0xff]  ;;  %v14207_v18 = vld [vmem:[#allocation5_spill] sm:$0xff] }
 0x7d6   :  { %6907 = vmatmul.mubr.bf16.vlgmr.msra.gmra.mrb[52].mxu0 %v12802_v51  ;;  %6948 = vmatmul.mubr.bf16.vlgmr.msra.gmra.mrb[52].mxu1 %v12802_v51  ;;  %v9014_v51 = vld [vmem:[%s13383_s0 + $0x188] sm:$0xff] }
 0x7d7   :  { %7794 = vmatpush1.bf16.msra.mxu0 %v12373_v0  ;;  %7835 = vmatpush1.bf16.msra.mxu1 %v12386_v52  ;;  %v14204_v0 = vld [vmem:[#allocation2_spill] sm:$0xff]  ;;  %v14206_v52 = vld [vmem:[#allocation4_spill] sm:$0xff] }
 0x7d8   :  { %7795 = vmatprep.subr.bf16.mxu0 %v12390_v2  ;;  %7836 = vmatprep.subr.bf16.mxu1 %v12402_v7  ;;  %v14208_v2 = vld [vmem:[#allocation6_spill] sm:$0xff]  ;;  %v14209_v7 = vld [vmem:[#allocation7_spill] sm:$0xff] }
 0x7db   :  { %7796 = vmatpush1.bf16.msra.mxu0 %v12415_v48  ;;  %7837 = vmatpush1.bf16.msra.mxu1 %v12419_v41  ;;  %v14210_v48 = vld [vmem:[#allocation8_spill] sm:$0xff]  ;;  %v14211_v41 = vld [vmem:[#allocation9_spill] sm:$0xff] }
 0x7dc   :  { %7797 = vmatprep.subr.bf16.mxu0 %v12421_v29  ;;  %7838 = vmatprep.subr.bf16.mxu1 %v12424_v40  ;;  %v14212_v29 = vld [vmem:[#allocation10_spill] sm:$0xff]  ;;  %v14213_v40 = vld [vmem:[#allocation11_spill] sm:$0xff] }
 0x7df   :  { %7798 = vmatpush1.bf16.msra.mxu0 %v12439_v61  ;;  %7839 = vmatpush1.bf16.msra.mxu1 %v12443_v34  ;;  %v14214_v61 = vld [vmem:[#allocation12_spill] sm:$0xff]  ;;  %v14215_v34 = vld [vmem:[#allocation13_spill] sm:$0xff] }
 0x7e0   :  { %7799 = vmatprep.subr.bf16.mxu0 %v12445_v56  ;;  %7840 = vmatprep.subr.bf16.mxu1 %v12448_v57  ;;  %v14216_v56 = vld [vmem:[#allocation14_spill] sm:$0xff]  ;;  %v14217_v57 = vld [vmem:[#allocation15_spill] sm:$0xff] }
 0x7e3   :  { %7800 = vmatpush1.bf16.msra.mxu0 %v12463_v21  ;;  %7841 = vmatpush1.bf16.msra.mxu1 %v12467_v22  ;;  %v14218_v21 = vld [vmem:[#allocation18_spill] sm:$0xff]  ;;  %v14219_v22 = vld [vmem:[#allocation16_spill] sm:$0xff] }
 0x7e4   :  { %7801 = vmatprep.subr.bf16.mxu0 %v12469_v35  ;;  %7842 = vmatprep.subr.bf16.mxu1 %v12472_v53  ;;  %v14220_v35 = vld [vmem:[#allocation19_spill] sm:$0xff]  ;;  %v14221_v53 = vld [vmem:[#allocation17_spill] sm:$0xff] }
 0x7e7   :  { %7802 = vmatpush1.bf16.msra.mxu0 %v12487_v3  ;;  %7843 = vmatpush1.bf16.msra.mxu1 %v12491_v25  ;;  %v14222_v3 = vld [vmem:[#allocation20_spill] sm:$0xff]  ;;  %v14223_v25 = vld [vmem:[#allocation21_spill] sm:$0xff] }
 0x7e8   :  { %7803 = vmatprep.subr.bf16.mxu0 %v12493_v39  ;;  %7844 = vmatprep.subr.bf16.mxu1 %v12496_v62  ;;  %v14224_v39 = vld [vmem:[#allocation22_spill] sm:$0xff]  ;;  %v14225_v62 = vld [vmem:[#allocation24_spill] sm:$0xff] }
 0x7eb   :  { %7804 = vmatpush1.bf16.msra.mxu0 %v12511_v28  ;;  %7845 = vmatpush1.bf16.msra.mxu1 %v12515_v9  ;;  %v14226_v28 = vld [vmem:[#allocation23_spill] sm:$0xff]  ;;  %v14227_v9 = vld [vmem:[#allocation25_spill] sm:$0xff] }
 0x7ec   :  { %7805 = vmatprep.subr.bf16.mxu0 %v12517_v27  ;;  %7846 = vmatprep.subr.bf16.mxu1 %v12520_v47  ;;  %v14228_v27 = vld [vmem:[#allocation26_spill] sm:$0xff]  ;;  %v14229_v47 = vld [vmem:[#allocation27_spill] sm:$0xff] }
 0x7ef   :  { %7806 = vmatpush1.bf16.msra.mxu0 %v12535_v13  ;;  %7847 = vmatpush1.bf16.msra.mxu1 %v12539_v6  ;;  %v14230_v13 = vld [vmem:[#allocation28_spill] sm:$0xff]  ;;  %v14231_v6 = vld [vmem:[#allocation29_spill] sm:$0xff] }
 0x7f0   :  { %7807 = vmatprep.subr.bf16.mxu0 %v12541_v10  ;;  %7848 = vmatprep.subr.bf16.mxu1 %v12544_v17 }
 0x7f3   :  { %7808 = vmatpush1.bf16.msra.mxu0 %v12547_v24  ;;  %7849 = vmatpush1.bf16.msra.mxu1 %v12551_v37 }
 0x7f4   :  { %7809 = vmatprep.subr.bf16.mxu0 %v12562_v58  ;;  %7850 = vmatprep.subr.bf16.mxu1 %v12575_v60 }
 0x7f7   :  { %7810 = vmatpush1.bf16.msra.mxu0 %v12567_v36  ;;  %7851 = vmatpush1.bf16.msra.mxu1 %v12573_v42 }
 0x7f8   :  { %7811 = vmatprep.subr.bf16.mxu0 %v12588_v46  ;;  %7852 = vmatprep.subr.bf16.mxu1 %v12598_v31  ;;  %v9013_v46 = vld [vmem:[%s13383_s0 + $0x180] sm:$0xff]  ;;  %v9015_v31 = vld [vmem:[%s13383_s0 + $0x190] sm:$0xff] }
 0x7fb   :  { %7812 = vmatpush1.bf16.msra.mxu0 %v14204_v0  ;;  %7853 = vmatpush1.bf16.msra.mxu1 %v14205_v1 }
 0x7fc   :  { %7813 = vmatprep.subr.bf16.mxu0 %v14206_v52  ;;  %7854 = vmatprep.subr.bf16.mxu1 %v14207_v18 }
 0x7ff   :  { %7814 = vmatpush1.bf16.msra.mxu0 %v14208_v2  ;;  %7855 = vmatpush1.bf16.msra.mxu1 %v14209_v7 }
 0x800   :  { %7815 = vmatprep.subr.bf16.mxu0 %v14210_v48  ;;  %7856 = vmatprep.subr.bf16.mxu1 %v14211_v41 }
 0x803   :  { %7816 = vmatpush1.bf16.msra.mxu0 %v14212_v29  ;;  %7857 = vmatpush1.bf16.msra.mxu1 %v14213_v40  ;;  %v9017_v40 = vld [vmem:[%s13383_s0 + $0x1a0] sm:$0xff] }
 0x804   :  { %7817 = vmatprep.subr.bf16.mxu0 %v14214_v61  ;;  %7858 = vmatprep.subr.bf16.mxu1 %v14215_v34  ;;  %v9019_v61 = vld [vmem:[%s13383_s0 + $0x1b0] sm:$0xff]  ;;  %v9018_v34 = vld [vmem:[%s13383_s0 + $0x1a8] sm:$0xff] }
 0x807   :  { %7818 = vmatpush1.bf16.msra.mxu0 %v14216_v56  ;;  %7859 = vmatpush1.bf16.msra.mxu1 %v14217_v57  ;;  %v9020_v56 = vld [vmem:[%s13383_s0 + $0x1b8] sm:$0xff] }
 0x808   :  { %7819 = vmatprep.subr.bf16.mxu0 %v14218_v21  ;;  %7860 = vmatprep.subr.bf16.mxu1 %v14219_v22 }
 0x80b   :  { %7820 = vmatpush1.bf16.msra.mxu0 %v14220_v35  ;;  %7861 = vmatpush1.bf16.msra.mxu1 %v14221_v53 }
 0x80c   :  { %7821 = vmatprep.subr.bf16.mxu0 %v14222_v3  ;;  %7862 = vmatprep.subr.bf16.mxu1 %v14223_v25 }
 0x80f   :  { %7822 = vmatpush1.bf16.msra.mxu0 %v14224_v39  ;;  %7863 = vmatpush1.bf16.msra.mxu1 %v14225_v62 }
 0x810   :  { %7823 = vmatprep.subr.bf16.mxu0 %v14226_v28  ;;  %7864 = vmatprep.subr.bf16.mxu1 %v14227_v9 }
 0x813   :  { %7824 = vmatpush1.bf16.msra.mxu0 %v14228_v27  ;;  %7865 = vmatpush1.bf16.msra.mxu1 %v14229_v47 }
 0x814   :  { %7875 = vmatprep.subr.bf16.mxu0 %v14230_v13  ;;  %7916 = vmatprep.subr.bf16.mxu1 %v14231_v6 }
 0x869   :  { %v6826_v10 = vpop.f32.mrb[48].mxu0  ;;  %v6867_v17 = vpop.f32.mrb[48].mxu1 }
 0x86a   :  { %v6828_v24 = vpop.f32.mrb[49].mxu0  ;;  %v6869_v37 = vpop.f32.mrb[49].mxu1  ;;  %v6965_v32 = vadd.f32 %v9013_v46, %v6826_v10  ;;  %v6967_v33 = vadd.f32 %v9015_v31, %v6867_v17 }
 0x86b   :  { %v6830_v58 = vpop.f32.mrb[50].mxu0  ;;  %v6871_v36 = vpop.f32.mrb[50].mxu1  ;;  %v6966_v12 = vadd.f32 %v9014_v51, %v6828_v24  ;;  %v6968_v4 = vadd.f32 %v9016_v50, %v6869_v37 }
 0x86c   :  { %v6831_v42 = vpop.f32.mrb[51].mxu0  ;;  %v6872_v60 = vpop.f32.mrb[51].mxu1  ;;  %v9021_v11 = vmul.f32 -1.442695, %v6965_v32  ;;  %v9023_v43 = vmul.f32 -1.442695, %v6967_v33 }
 0x86d   :  { %v9022_v54 = vmul.f32 -1.442695, %v6966_v12  ;;  %v9024_v0 = vmul.f32 -1.442695, %v6968_v4 }
 0x86e   :  { %9365 = vpow2.f32 %v9021_v11 }
 0x86f   :  { %9367 = vpow2.f32 %v9023_v43 }
 0x870   :  { %9369 = vpow2.f32 %v9022_v54 }
 0x871   :  { %9371 = vpow2.f32 %v9024_v0 }
 0x878   :  { %v9366_v1 = vpop.eup %9365 }
 0x879   :  { %v9368_v52 = vpop.eup %9367  ;;  %v6991_v7 = vadd.f32 1.0, %v9366_v1 }
 0x87a   :  { %v9370_v18 = vpop.eup %9369  ;;  %v6993_v48 = vadd.f32 1.0, %v9368_v52  ;;  %v14232_v52 = vld [vmem:[#allocation30_spill] sm:$0xff] }
 0x87b   :  { %v9372_v2 = vpop.eup %9371  ;;  %v6992_v41 = vadd.f32 1.0, %v9370_v18  ;;  %9373 = vrcp.f32 %v6991_v7  ;;  %v14233_v18 = vld [vmem:[#allocation31_spill] sm:$0xff]  ;;  %v14235_v7 = vld [vmem:[#allocation33_spill] sm:$0xff] }
 0x87c   :  { %v6994_v29 = vadd.f32 1.0, %v9372_v2  ;;  %9375 = vrcp.f32 %v6993_v48  ;;  %v14234_v2 = vld [vmem:[#allocation32_spill] sm:$0xff] }
 0x87d   :  { %9377 = vrcp.f32 %v6992_v41  ;;  %v14238_v48 = vld [vmem:[#allocation36_spill] sm:$0xff]  ;;  %v14243_v41 = vld [vmem:[#allocation41_spill] sm:$0xff] }
 0x87e   :  { %9379 = vrcp.f32 %v6994_v29  ;;  %v14244_v29 = vld [vmem:[#allocation42_spill] sm:$0xff] }
 0x885   :  { %v9374_v6 = vpop.eup %9373 }
 0x886   :  { %v9376_v10 = vpop.eup %9375 }
 0x887   :  { %v9378_v17 = vpop.eup %9377  ;;  %v7011_v36 = vmul.f32 %v9376_v10, %v12796_v44  ;;  %v14264_v10 = vld [vmem:[#allocation62_spill] sm:$0xff] }
 0x888   :  { %v9380_v24 = vpop.eup %9379 }
 0x889   :  { %v7012_v46 = vmul.f32 %v9380_v24, %v12798_v8  ;;  %v14266_v24 = vld [vmem:[#allocation64_spill] sm:$0xff] }
 0x8a9   :  { %v6908_v57 = vpop.f32.mrb[52].mxu0  ;;  %v6949_v21 = vpop.f32.mrb[52].mxu1 }
 0x8aa   :  { %v6969_v22 = vadd.f32 %v9017_v40, %v6908_v57  ;;  %v6971_v35 = vadd.f32 %v9019_v61, %v6949_v21  ;;  %v6910_v53 = vpop.f32.mrb[53].mxu0  ;;  %v6951_v3 = vpop.f32.mrb[53].mxu1  ;;  %v14245_v40 = vld [vmem:[#allocation43_spill] sm:$0xff]  ;;  %v14246_v61 = vld [vmem:[#allocation44_spill] sm:$0xff] }
 0x8ab   :  { %v6970_v25 = vadd.f32 %v9018_v34, %v6910_v53  ;;  %v6972_v39 = vadd.f32 %v9020_v56, %v6951_v3  ;;  %v6912_v62 = vpop.f32.mrb[54].mxu0  ;;  %v6953_v28 = vpop.f32.mrb[54].mxu1  ;;  %v14247_v34 = vld [vmem:[#allocation45_spill] sm:$0xff]  ;;  %v14248_v56 = vld [vmem:[#allocation46_spill] sm:$0xff]  ;;  %v14249_v57 = vld [vmem:[#allocation47_spill] sm:$0xff] }
 0x8ac   :  { %v9025_v9 = vmul.f32 -1.442695, %v6969_v22  ;;  %9381 = vtanh.f32 %v6971_v35  ;;  %v6913_v27 = vpop.f32.mrb[55].mxu0  ;;  %v6954_v47 = vpop.f32.mrb[55].mxu1  ;;  %v14250_v21 = vld [vmem:[#allocation48_spill] sm:$0xff]  ;;  %v14251_v22 = vld [vmem:[#allocation49_spill] sm:$0xff] }
 0x8ad   :  { %v9026_v13 = vmul.f32 -1.442695, %v6970_v25  ;;  %9383 = vtanh.f32 %v6972_v39  ;;  %v14252_v35 = vld [vmem:[#allocation50_spill] sm:$0xff]  ;;  %v14253_v53 = vld [vmem:[#allocation51_spill] sm:$0xff]  ;;  %v14254_v3 = vld [vmem:[#allocation52_spill] sm:$0xff] }
 0x8ae   :  { %9385 = vpow2.f32 %v9025_v9  ;;  %v14255_v25 = vld [vmem:[#allocation53_spill] sm:$0xff]  ;;  %v14256_v39 = vld [vmem:[#allocation54_spill] sm:$0xff]  ;;  %v14257_v62 = vld [vmem:[#allocation55_spill] sm:$0xff] }
 0x8af   :  { %9387 = vpow2.f32 %v9026_v13  ;;  %v14258_v28 = vld [vmem:[#allocation56_spill] sm:$0xff]  ;;  %v14259_v9 = vld [vmem:[#allocation57_spill] sm:$0xff]  ;;  %v14260_v27 = vld [vmem:[#allocation58_spill] sm:$0xff] }
 0x8b0   :  { %v14261_v47 = vld [vmem:[#allocation59_spill] sm:$0xff]  ;;  %v14262_v13 = vld [vmem:[#allocation60_spill] sm:$0xff] }
 0x8b6   :  { %v9382_v37 = vpop.eup %9381 }
 0x8b7   :  { %v9384_v58 = vpop.eup %9383  ;;  %v7013_v42 = vmul.f32 %v9382_v37, %v9374_v6  ;;  %v14263_v6 = vld [vmem:[#allocation61_spill] sm:$0xff] }
 0x8b8   :  { %v9386_v60 = vpop.eup %9385  ;;  %v7014_v31 = vmul.f32 %v9384_v58, %v9378_v17  ;;  %v14265_v17 = vld [vmem:[#allocation63_spill] sm:$0xff]  ;;  %v14267_v37 = vld [vmem:[#allocation65_spill] sm:$0xff]  ;;  %v14268_v58 = vld [vmem:[#allocation66_spill] sm:$0xff] }
 0x8b9   :  { %v9388_v51 = vpop.eup %9387  ;;  %v6995_v32 = vadd.f32 1.0, %v9386_v60  ;;  %v13269_v50 = vadd.f32 %v7013_v42, %v7011_v36  ;;  %v14269_v36 = vld [vmem:[#allocation67_spill] sm:$0xff]  ;;  %v14270_v42 = vld [vmem:[#allocation68_spill] sm:$0xff]  ;;  %v14271_v60 = vld [vmem:[#allocation69_spill] sm:$0xff] }
 0x8ba   :  { %v6996_v33 = vadd.f32 1.0, %v9388_v51  ;;  %v13271_v12 = vadd.f32 %v7014_v31, %v7012_v46  ;;  %v14272_v46 = vld [vmem:[#allocation70_spill] sm:$0xff]  ;;  %v14273_v31 = vld [vmem:[#allocation71_spill] sm:$0xff]  ;;  %v14274_v51 = vld [vmem:[#allocation72_spill] sm:$0xff] }
 0x8bb   :  { %9389 = vrcp.f32 %v6995_v32  ;;  %v14275_v32 = vld [vmem:[#allocation73_spill] sm:$0xff] }
 0x8bc   :  { %9391 = vtanh.f32 %v13269_v50 }
 0x8bd   :  { %9393 = vrcp.f32 %v6996_v33  ;;  %v14276_v33 = vld [vmem:[#allocation74_spill] sm:$0xff] }
 0x8be   :  { %9395 = vtanh.f32 %v13271_v12 }
 0x8c5   :  { %v9390_v4 = vpop.eup %9389 }
 0x8c6   :  { %v9392_v44 = vpop.eup %9391 }
 0x8c7   :  { %v9394_v11 = vpop.eup %9393  ;;  %v7019_v43 = vmul.f32 %v9392_v44, %v9390_v4  ;;  %v14277_v4 = vld [vmem:[#allocation75_spill] sm:$0xff]  ;;  %v14278_v44 = vld [vmem:[#allocation76_spill] sm:$0xff] }
 0x8c8   :  { %v9396_v54 = vpop.eup %9395 }
 0x8c9   :  { %v7020_v8 = vmul.f32 %v9396_v54, %v9394_v11  ;;  %v13275_v0 = vpack.c.bf16 %v7019_v43, %v7019_v43 }
 0x8cb   :  { %v7023_v1 = vpack.c.bf16 %v7020_v8, %v7020_v8  ;;  %9027 = vst [vmem:[%s13384_s2 + $0x30] sm:$0xf] %v13275_v0  ;;  %v9160_v8 = vld [vmem:[%s13383_s0 + $0x1d8] sm:$0xff] }
 0x8cd   :  { %9028 = vst [vmem:[%s13384_s2 + $0xc] sm:$0xf] %v7023_v1  ;;  %7825 = vmatprep.mubr.bf16.mxu0 %v7023_v1  ;;  %7866 = vmatprep.mubr.bf16.mxu1 %v7023_v1 }
 0x8ce   :  { %7826 = vmatmul.mubr.bf16.vlgmr.msra.gmra.mrb[56].mxu0 %v13275_v0  ;;  %7867 = vmatmul.mubr.bf16.vlgmr.msra.gmra.mrb[56].mxu1 %v13275_v0 }
 0x8cf   :  { %7876 = vmatpush1.bf16.msra.mxu0 %v12762_v63  ;;  %7917 = vmatpush1.bf16.msra.mxu1 %v12764_v38  ;;  %v14236_v63 = vld [vmem:[#allocation34_spill] sm:$0xff]  ;;  %v14237_v38 = vld [vmem:[#allocation35_spill] sm:$0xff] }
 0x8d0   :  { %7907 = vmatprep.mubr.bf16.mxu0 %v7023_v1  ;;  %7948 = vmatprep.mubr.bf16.mxu1 %v7023_v1 }
 0x8d1   :  { %7877 = vmatprep.subr.bf16.mxu0 %v12826_v16  ;;  %7918 = vmatprep.subr.bf16.mxu1 %v12828_v14  ;;  %v14239_v16 = vld [vmem:[#allocation37_spill] sm:$0xff]  ;;  %v14240_v14 = vld [vmem:[#allocation38_spill] sm:$0xff] }
 0x8d3   :  { %7878 = vmatpush1.bf16.msra.mxu0 %v12843_v5  ;;  %7919 = vmatpush1.bf16.msra.mxu1 %v12845_v45  ;;  %v14241_v5 = vld [vmem:[#allocation39_spill] sm:$0xff]  ;;  %v14242_v45 = vld [vmem:[#allocation40_spill] sm:$0xff] }
 0x8d4   :  { %7879 = vmatprep.subr.bf16.mxu0 %v14232_v52  ;;  %7920 = vmatprep.subr.bf16.mxu1 %v14233_v18 }
 0x8d7   :  { %7880 = vmatpush1.bf16.msra.mxu0 %v14234_v2  ;;  %7921 = vmatpush1.bf16.msra.mxu1 %v14235_v7 }
 0x8d8   :  { %7881 = vmatprep.subr.bf16.mxu0 %v14236_v63  ;;  %7922 = vmatprep.subr.bf16.mxu1 %v14237_v38 }
 0x8db   :  { %7882 = vmatpush1.bf16.msra.mxu0 %v14238_v48  ;;  %7923 = vmatpush1.bf16.msra.mxu1 %v14239_v16 }
 0x8dc   :  { %7883 = vmatprep.subr.bf16.mxu0 %v14240_v14  ;;  %7924 = vmatprep.subr.bf16.mxu1 %v14241_v5 }
 0x8df   :  { %7884 = vmatpush1.bf16.msra.mxu0 %v14242_v45  ;;  %7925 = vmatpush1.bf16.msra.mxu1 %v14243_v41 }
 0x8e0   :  { %7885 = vmatprep.subr.bf16.mxu0 %v14244_v29  ;;  %7926 = vmatprep.subr.bf16.mxu1 %v14245_v40  ;;  %v9161_v40 = vld [vmem:[%s13383_s0 + $0x1e0] sm:$0xff] }
 0x8e3   :  { %7886 = vmatpush1.bf16.msra.mxu0 %v14246_v61  ;;  %7927 = vmatpush1.bf16.msra.mxu1 %v14247_v34  ;;  %v9163_v61 = vld [vmem:[%s13383_s0 + $0x1f0] sm:$0xff]  ;;  %v9162_v34 = vld [vmem:[%s13383_s0 + $0x1e8] sm:$0xff] }
 0x8e4   :  { %7887 = vmatprep.subr.bf16.mxu0 %v14248_v56  ;;  %7928 = vmatprep.subr.bf16.mxu1 %v14249_v57  ;;  %v9164_v56 = vld [vmem:[%s13383_s0 + $0x1f8] sm:$0xff] }
 0x8e7   :  { %7888 = vmatpush1.bf16.msra.mxu0 %v14250_v21  ;;  %7929 = vmatpush1.bf16.msra.mxu1 %v14251_v22 }
 0x8e8   :  { %7889 = vmatprep.subr.bf16.mxu0 %v14252_v35  ;;  %7930 = vmatprep.subr.bf16.mxu1 %v14253_v53 }
 0x8eb   :  { %7890 = vmatpush1.bf16.msra.mxu0 %v14254_v3  ;;  %7931 = vmatpush1.bf16.msra.mxu1 %v14255_v25 }
 0x8ec   :  { %7891 = vmatprep.subr.bf16.mxu0 %v14256_v39  ;;  %7932 = vmatprep.subr.bf16.mxu1 %v14257_v62 }
 0x8ef   :  { %7892 = vmatpush1.bf16.msra.mxu0 %v14258_v28  ;;  %7933 = vmatpush1.bf16.msra.mxu1 %v14259_v9 }
 0x8f0   :  { %7893 = vmatprep.subr.bf16.mxu0 %v14260_v27  ;;  %7934 = vmatprep.subr.bf16.mxu1 %v14261_v47 }
 0x8f3   :  { %7894 = vmatpush1.bf16.msra.mxu0 %v14262_v13  ;;  %7935 = vmatpush1.bf16.msra.mxu1 %v14263_v6 }
 0x8f4   :  { %7895 = vmatprep.subr.bf16.mxu0 %v14264_v10  ;;  %7936 = vmatprep.subr.bf16.mxu1 %v14265_v17 }
 0x8f7   :  { %7896 = vmatpush1.bf16.msra.mxu0 %v14266_v24  ;;  %7937 = vmatpush1.bf16.msra.mxu1 %v14267_v37 }
 0x8f8   :  { %7897 = vmatprep.subr.bf16.mxu0 %v14268_v58  ;;  %7938 = vmatprep.subr.bf16.mxu1 %v14269_v36 }
 0x8fb   :  { %7898 = vmatpush1.bf16.msra.mxu0 %v14270_v42  ;;  %7939 = vmatpush1.bf16.msra.mxu1 %v14271_v60 }
 0x8fc   :  { %7899 = vmatprep.subr.bf16.mxu0 %v14272_v46  ;;  %7940 = vmatprep.subr.bf16.mxu1 %v14273_v31 }
 0x8ff   :  { %7900 = vmatpush1.bf16.msra.mxu0 %v14274_v51  ;;  %7941 = vmatpush1.bf16.msra.mxu1 %v14275_v32 }
 0x900   :  { %7901 = vmatprep.subr.bf16.mxu0 %v14276_v33  ;;  %7942 = vmatprep.subr.bf16.mxu1 %v14277_v4 }
 0x903   :  { %7902 = vmatpush1.bf16.msra.mxu0 %v14278_v44  ;;  %7943 = vmatpush1.bf16.msra.mxu1 %v13133_v49 }
 0x904   :  { %7903 = vmatprep.subr.bf16.mxu0 %v13137_v26  ;;  %7944 = vmatprep.subr.bf16.mxu1 %v13139_v59 }
 0x907   :  { %7904 = vmatpush1.bf16.msra.mxu0 %v13155_v23  ;;  %7945 = vmatpush1.bf16.msra.mxu1 %v13157_v55 }
 0x908   :  { %7905 = vmatprep.subr.bf16.mxu0 %v13161_v19  ;;  %7946 = vmatprep.subr.bf16.mxu1 %v13163_v15  ;;  %v9157_v19 = vld [vmem:[%s13383_s0 + $0x1c0] sm:$0xff]  ;;  %v9159_v15 = vld [vmem:[%s13383_s0 + $0x1d0] sm:$0xff] }
 0x90b   :  { %7906 = vmatpush1.bf16.msra.mxu0 %v13167_v30  ;;  %7947 = vmatpush1.bf16.msra.mxu1 %v13169_v20  ;;  %v9158_v30 = vld [vmem:[%s13383_s0 + $0x1c8] sm:$0xff] }
 0x90e   :  { %7908 = vmatmul.mubr.bf16.vlgmr.msra.gmra.mrb[60].mxu0 %v13275_v0  ;;  %7949 = vmatmul.mubr.bf16.vlgmr.msra.gmra.mrb[60].mxu1 %v13275_v0 }
 0x9a1   :  { %v7827_v49 = vpop.f32.mrb[56].mxu0  ;;  %v7868_v26 = vpop.f32.mrb[56].mxu1 }
 0x9a2   :  { %v7829_v11 = vpop.f32.mrb[57].mxu0  ;;  %v7870_v59 = vpop.f32.mrb[57].mxu1  ;;  %v7966_v20 = vadd.f32 %v9157_v19, %v7827_v49  ;;  %v7968_v0 = vadd.f32 %v9159_v15, %v7868_v26 }
 0x9a3   :  { %v7831_v43 = vpop.f32.mrb[58].mxu0  ;;  %v7872_v23 = vpop.f32.mrb[58].mxu1  ;;  %v7967_v1 = vadd.f32 %v9158_v30, %v7829_v11  ;;  %v7969_v52 = vadd.f32 %v9160_v8, %v7870_v59 }
 0x9a4   :  { %v7832_v54 = vpop.f32.mrb[59].mxu0  ;;  %v7873_v55 = vpop.f32.mrb[59].mxu1  ;;  %v9165_v18 = vmul.f32 -1.442695, %v7966_v20  ;;  %v9167_v2 = vmul.f32 -1.442695, %v7968_v0 }
 0x9a5   :  { %v9166_v7 = vmul.f32 -1.442695, %v7967_v1  ;;  %v9168_v63 = vmul.f32 -1.442695, %v7969_v52 }
 0x9a6   :  { %9397 = vpow2.f32 %v9165_v18 }
 0x9a7   :  { %9399 = vpow2.f32 %v9167_v2 }
 0x9a8   :  { %9401 = vpow2.f32 %v9166_v7 }
 0x9a9   :  { %9403 = vpow2.f32 %v9168_v63 }
 0x9b0   :  { %v9398_v38 = vpop.eup %9397 }
 0x9b1   :  { %v9400_v48 = vpop.eup %9399  ;;  %v7992_v5 = vadd.f32 1.0, %v9398_v38 }
 0x9b2   :  { %v9402_v16 = vpop.eup %9401  ;;  %v7994_v45 = vadd.f32 1.0, %v9400_v48 }
 0x9b3   :  { %v9404_v14 = vpop.eup %9403  ;;  %v7993_v41 = vadd.f32 1.0, %v9402_v16  ;;  %9405 = vrcp.f32 %v7992_v5 }
 0x9b4   :  { %v7995_v29 = vadd.f32 1.0, %v9404_v14  ;;  %9407 = vrcp.f32 %v7994_v45 }
 0x9b5   :  { %9409 = vrcp.f32 %v7993_v41 }
 0x9b6   :  { %9411 = vrcp.f32 %v7995_v29 }
 0x9bd   :  { %v9406_v6 = vpop.eup %9405 }
 0x9be   :  { %v9408_v10 = vpop.eup %9407 }
 0x9bf   :  { %v9410_v17 = vpop.eup %9409  ;;  %v8012_v36 = vmul.f32 %v9408_v10, %v13269_v50 }
 0x9c0   :  { %v9412_v24 = vpop.eup %9411 }
 0x9c1   :  { %v8013_v46 = vmul.f32 %v9412_v24, %v13271_v12 }
 0x9e1   :  { %v7909_v57 = vpop.f32.mrb[60].mxu0  ;;  %v7950_v21 = vpop.f32.mrb[60].mxu1 }
 0x9e2   :  { %v7970_v22 = vadd.f32 %v9161_v40, %v7909_v57  ;;  %v7972_v35 = vadd.f32 %v9163_v61, %v7950_v21  ;;  %v7911_v53 = vpop.f32.mrb[61].mxu0  ;;  %v7952_v3 = vpop.f32.mrb[61].mxu1 }
 0x9e3   :  { %v7971_v25 = vadd.f32 %v9162_v34, %v7911_v53  ;;  %v7973_v39 = vadd.f32 %v9164_v56, %v7952_v3  ;;  %v7913_v62 = vpop.f32.mrb[62].mxu0  ;;  %v7954_v28 = vpop.f32.mrb[62].mxu1 }
 0x9e4   :  { %v9169_v9 = vmul.f32 -1.442695, %v7970_v22  ;;  %9413 = vtanh.f32 %v7972_v35  ;;  %v7914_v27 = vpop.f32.mrb[63].mxu0  ;;  %v7955_v47 = vpop.f32.mrb[63].mxu1 }
 0x9e5   :  { %v9170_v13 = vmul.f32 -1.442695, %v7971_v25  ;;  %9415 = vtanh.f32 %v7973_v39 }
 0x9e6   :  { %9417 = vpow2.f32 %v9169_v9 }
 0x9e7   :  { %9419 = vpow2.f32 %v9170_v13 }
 0x9ee   :  { %v9414_v37 = vpop.eup %9413 }
 0x9ef   :  { %v9416_v58 = vpop.eup %9415  ;;  %v8014_v42 = vmul.f32 %v9414_v37, %v9406_v6 }
 0x9f0   :  { %v9418_v60 = vpop.eup %9417  ;;  %v8015_v31 = vmul.f32 %v9416_v58, %v9410_v17 }
 0x9f1   :  { %v9420_v51 = vpop.eup %9419  ;;  %v7996_v32 = vadd.f32 1.0, %v9418_v60  ;;  %v8016_v33 = vadd.f32 %v8014_v42, %v8012_v36 }
 0x9f2   :  { %v7997_v4 = vadd.f32 1.0, %v9420_v51  ;;  %v8017_v44 = vadd.f32 %v8015_v31, %v8013_v46 }
 0x9f3   :  { %9421 = vrcp.f32 %v7996_v32 }
 0x9f4   :  { %9423 = vtanh.f32 %v8016_v33 }
 0x9f5   :  { %9425 = vrcp.f32 %v7997_v4 }
 0x9f6   :  { %9427 = vtanh.f32 %v8017_v44 }
 0x9fd   :  { %v9422_v49 = vpop.eup %9421 }
 0x9fe   :  { %v9424_v26 = vpop.eup %9423 }
 0x9ff   :  { %v9426_v11 = vpop.eup %9425  ;;  %v8020_v59 = vmul.f32 %v9424_v26, %v9422_v49 }
 0xa00   :  { %v9428_v43 = vpop.eup %9427 }
 0xa01   :  { %v8022_v50 = vpack.c.bf16 %v8020_v59, %v8020_v59  ;;  %v8021_v23 = vmul.f32 %v9428_v43, %v9426_v11 }
 0xa03   :  { %9171 = vst [vmem:[%s13384_s2 + $0x38] sm:$0xf] %v8022_v50  ;;  %v8024_v12 = vpack.c.bf16 %v8021_v23, %v8021_v23 }
 0xa05   :  { %8025 = vst [vmem:[%s13384_s2 + $0x4] sm:$0xf] %v8024_v12 }

</bundles_post_ra>
